<compile_context>
chip_gen: v5e
topology: v5e:2x2
jax: 0.10.0
libtpu: 0.0.40
codegen_flags: <defaults>
</compile_context>

<pallas_src>
import functools

import jax
import jax.numpy as jnp
from jax import lax
from jax.experimental import pallas as pl
from jax.experimental.pallas import tpu as pltpu

F_PAD = 128          # lane-dense feature width (covers F_in, hidden, out_ch)
NEG_BIG = -1e30


def _fused_gat2_kernel(x_ref, adj_ref, w_ref, att_ref, b_ref, out_ref,
                       hsrc_scr, h_scr, asrc_scr, adst_scr,
                       *, tile, negative_slope, adj_resident):
    """grid = (2 layers, N_pad // tile dst-row tiles); layer axis is outermost."""
    layer = pl.program_id(0)
    it = pl.program_id(1)

    def project(x_in):
        # One fused MXU pass: [h_src | h_dst] = x @ [W_src | W_dst] (bf16 in, f32 acc).
        h_cat = jnp.dot(x_in.astype(jnp.bfloat16), w_ref[...],
                        preferred_element_type=jnp.float32)        # (N_pad, 2*F_PAD)
        h_src = h_cat[:, :F_PAD]
        h_dst = h_cat[:, F_PAD:]
        # Padded lane F_PAD-1 of W is zero -> h_src[:, F_PAD-1] == 0; set it to
        # 1.0 so the aggregation matmul also produces the softmax row-sum.
        lane = lax.broadcasted_iota(jnp.int32, (1, F_PAD), 1)
        ones_col = (lane == F_PAD - 1).astype(jnp.float32)
        hsrc_scr[...] = (h_src + ones_col).astype(jnp.bfloat16)     # RHS of aggregation
        # Per-node attention scalars: VPU multiply + lane reduction (no 1-wide MXU).
        a_src = jnp.sum(h_src * att_ref[0:1, :], axis=-1, keepdims=True)   # (N_pad, 1)
        a_dst = jnp.sum(h_dst * att_ref[1:2, :], axis=-1, keepdims=True)   # (N_pad, 1)
        asrc_scr[...] = a_src.T          # hoisted (N,1)->(1,N) transpose (once/layer)
        adst_scr[...] = a_dst

    # Per-layer prologue: project ALL nodes once, keep results in VMEM scratch.
    @pl.when(jnp.logical_and(layer == 0, it == 0))
    def _():
        project(x_ref[...])              # layer-1 input: padded x (resident, bf16)

    @pl.when(jnp.logical_and(layer == 1, it == 0))
    def _():
        project(h_scr[...])              # layer-2 input: VMEM-resident h (bf16)

    # ---- per dst-row-tile masked softmax + aggregation ----------------------
    row0 = pl.multiple_of(it * tile, tile)
    if adj_resident:
        adj_strip = adj_ref[pl.ds(row0, tile), :]                   # resident full adj
    else:
        adj_strip = adj_ref[...]                                    # streamed strip
    mask = adj_strip != 0                                           # int8 compare, no cast

    logits = adst_scr[pl.ds(row0, tile), :] + asrc_scr[...]         # (tile, N_pad)
    logits = jnp.maximum(logits, negative_slope * logits)           # LeakyReLU (slope<1)
    masked = jnp.where(mask, logits, jnp.float32(NEG_BIG))
    # Clamp the max to >= 0: softmax is shift-invariant, and masked lanes then
    # underflow to exactly 0 in exp (also fixes all-masked rows), so no post-exp
    # select is needed.
    row_max = jnp.maximum(jnp.max(masked, axis=-1, keepdims=True), 0.0)
    p = jnp.exp(masked - row_max)                                   # f32 numerators

    agg = jnp.dot(p.astype(jnp.bfloat16), hsrc_scr[...],
                  preferred_element_type=jnp.float32)               # (tile, F_PAD)
    denom = agg[:, F_PAD - 1:F_PAD]             # row-sum of p via the ones lane (MXU)
    inv = pl.reciprocal(jnp.where(denom > 0, denom, 1.0), approx=True)
    out = agg * inv + b_ref[...]

    @pl.when(layer == 0)
    def _():                              # conv1(...).relu() -> stays in VMEM (bf16)
        h_scr[pl.ds(row0, tile), :] = jnp.maximum(out, 0.0).astype(jnp.bfloat16)

    @pl.when(layer == 1)
    def _():                              # conv2(...) -> kernel output
        out_ref[...] = out.astype(out_ref.dtype)


def _pack_layer_params(p):
    """Pad & pack one GATConv layer's params into lane-dense 128-wide tensors."""
    in_dim, out_dim = p["w_src"].shape
    w = jnp.zeros((F_PAD, 2 * F_PAD), jnp.float32)
    w = w.at[:in_dim, :out_dim].set(p["w_src"])
    w = w.at[:in_dim, F_PAD:F_PAD + out_dim].set(p["w_dst"])
    att = jnp.zeros((2, F_PAD), jnp.float32)
    att = att.at[0, :out_dim].set(p["att_src"].reshape(-1))
    att = att.at[1, :out_dim].set(p["att_dst"].reshape(-1))
    bias = jnp.zeros((1, F_PAD), jnp.float32)
    bias = bias.at[0, :out_dim].set(p["bias"].reshape(-1))
    return w.astype(jnp.bfloat16), att, bias


def gnn_encoder2(x, edge_index, edge_attr, params1, params2, *,
                 tile=256, adj_resident=None):
    """x: (N, F_in) f32; edge_index: (2, E) int32 [src; dst]. Returns (N, out_ch)."""
    del edge_attr  # TODO(synk): GATConv(edge_dim=None) ignores edge_attr; kept for signature parity.
    n, f_in = x.shape
    hidden = params1["w_src"].shape[1]
    out_ch = params2["w_src"].shape[1]
    # Lane F_PAD-1 is reserved for the MXU row-sum trick.
    assert max(f_in, hidden, out_ch) <= F_PAD - 1
    assert tile % 128 == 0

    n_pad = ((n + tile - 1) // tile) * tile
    num_tiles = n_pad // tile

    # Per-chip VMEM budget (v7x: 64 MiB physical -> ~51 MiB; v5e/v6e: 128 MiB -> 100 MiB).
    try:
        vmem_cap = int(pltpu.get_tpu_info().vmem_capacity_bytes)
    except Exception:
        vmem_cap = 64 * 1024 * 1024
    vmem_limit = max(32 * 1024 * 1024, min(int(vmem_cap * 0.8), 100 * 1024 * 1024))

    # Estimate non-adjacency VMEM (double-buffered pipeline bufs + scratch + prologue
    # transient) to decide whether the full int8 adjacency can live in VMEM.
    fixed_vmem = (
        2 * n_pad * F_PAD * 2            # x (bf16), double-buffered
        + 2 * (F_PAD * 2 * F_PAD) * 2    # W (bf16), double-buffered
        + 2 * tile * F_PAD * 4           # out (f32), double-buffered
        + 2 * n_pad * F_PAD * 2          # hsrc + h scratch (bf16)
        + n_pad * F_PAD * 4              # adst scratch ((N,1) lane-pads to 128)
        + 8 * n_pad * 4                  # asrc scratch ((1,N) sublane-pads to 8)
        + n_pad * 2 * F_PAD * 4          # prologue transient h_cat (f32)
    )
    if adj_resident is None:
        adj_resident = fixed_vmem + 2 * n_pad * n_pad <= int(0.85 * vmem_limit)

    # Lane-dense padded inputs / params (padding sliced off at the end).
    x_p = jnp.zeros((n_pad, F_PAD), jnp.bfloat16).at[:n, :f_in].set(
        x.astype(jnp.bfloat16))
    w1, att1, b1 = _pack_layer_params(params1)
    w2, att2, b2 = _pack_layer_params(params2)
    w_all = jnp.stack([w1, w2])        # (2, 128, 256) bf16
    att_all = jnp.stack([att1, att2])  # (2, 2, 128)   f32
    b_all = jnp.stack([b1, b2])        # (2, 1, 128)   f32

    # Dense adjacency as an int8 mask: adj[i, j] = 1 iff edge j -> i.
    # TODO(synk): dense mask dedups duplicate (src, dst) edges; PyG's scatter
    # softmax counts duplicates separately (multigraph semantics diverge).
    src, dst = edge_index[0], edge_index[1]
    adj = jnp.zeros((n_pad, n_pad), jnp.int8).at[dst, src].set(1)

    kernel = functools.partial(_fused_gat2_kernel, tile=tile,
                               negative_slope=0.2, adj_resident=adj_resident)

    if adj_resident:
        # Constant block index across the whole grid -> fetched from HBM once.
        adj_spec = pl.BlockSpec((n_pad, n_pad), lambda l, i: (0, 0))
        adj_reads = n_pad * n_pad
    else:
        adj_spec = pl.BlockSpec((tile, n_pad), lambda l, i: (i, 0))
        adj_reads = 2 * n_pad * n_pad

    flops = 2 * (2 * n_pad * F_PAD * 2 * F_PAD + 2 * n_pad * n_pad * F_PAD)
    bytes_accessed = (adj_reads
                      + n_pad * F_PAD * 2 + n_pad * F_PAD * 4      # x in (bf16) + out (f32)
                      + w_all.size * 2 + att_all.size * 4 + b_all.size * 4)

    out_pad = pl.pallas_call(
        kernel,
        out_shape=jax.ShapeDtypeStruct((n_pad, F_PAD), jnp.float32),
        grid_spec=pltpu.PrefetchScalarGridSpec(
            num_scalar_prefetch=0,
            grid=(2, num_tiles),                            # (layer, dst-row tile)
            in_specs=[
                pl.BlockSpec((n_pad, F_PAD), lambda l, i: (0, 0)),              # x (resident)
                adj_spec,                                                       # adjacency
                pl.BlockSpec((None, F_PAD, 2 * F_PAD), lambda l, i: (l, 0, 0)),  # [W_src|W_dst]
                pl.BlockSpec((None, 2, F_PAD), lambda l, i: (l, 0, 0)),          # [a_src;a_dst]
                pl.BlockSpec((None, 1, F_PAD), lambda l, i: (l, 0, 0)),          # bias
            ],
            # Only layer 1 writes the output; `l*i` pins the block index to 0 for
            # the whole of layer 0 (never flushed untouched) and makes layer 1
            # the only producer of every output block.
            out_specs=pl.BlockSpec((tile, F_PAD), lambda l, i: (l * i, 0)),
            scratch_shapes=[
                pltpu.VMEM((n_pad, F_PAD), jnp.bfloat16),   # h_src (current layer, + ones lane)
                pltpu.VMEM((n_pad, F_PAD), jnp.bfloat16),   # h     (layer-1 output, relu'd)
                pltpu.VMEM((1, n_pad), jnp.float32),        # a_src (lane layout)
                pltpu.VMEM((n_pad, 1), jnp.float32),        # a_dst (sublane layout)
            ],
        ),
        compiler_params=pltpu.CompilerParams(
            # Tile axis stays sequential: layer-2's prologue reads the whole
            # layer-1 output from scratch (cross-tile dep -> no megacore split).
            dimension_semantics=("arbitrary", "arbitrary"),
            vmem_limit_bytes=vmem_limit,
        ),
        cost_estimate=pl.CostEstimate(
            flops=flops,
            transcendentals=2 * n_pad * n_pad,
            bytes_accessed=bytes_accessed,
        ),
    )(x_p, adj, w_all, att_all, b_all)
    return out_pad[:n, :out_ch]


def init_gat_params(key, in_ch, out_ch):
    k1, k2, k3, k4 = jax.random.split(key, 4)

    def glorot(k, shape):
        fan_in, fan_out = shape
        lim = jnp.sqrt(6.0 / (fan_in + fan_out))
        return jax.random.uniform(k, shape, jnp.float32, -lim, lim)

    return dict(
        w_src=glorot(k1, (in_ch, out_ch)),
        w_dst=glorot(k2, (in_ch, out_ch)),
        att_src=glorot(k3, (out_ch, 1)),
        att_dst=glorot(k4, (out_ch, 1)),
        bias=jnp.zeros((1, out_ch), jnp.float32),   # GATConv bias is zero-init
    )


# ---------------- pure-JAX reference (f32) for a loose sanity check ----------
def _gat_ref(x, adj, p):
    h_src = x @ p["w_src"]
    h_dst = x @ p["w_dst"]
    a_src = h_src @ p["att_src"]
    a_dst = h_dst @ p["att_dst"]
    logits = a_dst + a_src.T
    logits = jnp.where(logits > 0, logits, 0.2 * logits)
    masked = jnp.where(adj > 0, logits, -1e30)
    e = jnp.exp(masked - masked.max(axis=-1, keepdims=True)) * adj
    denom = e.sum(axis=-1, keepdims=True)
    alpha = e / jnp.where(denom > 0, denom, 1.0)
    return alpha @ h_src + p["bias"]


def _encoder_ref(x, edge_index, params1, params2):
    n = x.shape[0]
    src, dst = edge_index[0], edge_index[1]
    adj = jnp.zeros((n, n), jnp.float32).at[dst, src].set(1.0)
    h = jnp.maximum(_gat_ref(x, adj, params1), 0.0)
    return _gat_ref(h, adj, params2)


if __name__ == "__main__":
    N, F_IN, HIDDEN, OUT_CH, E = 300, 8, 32, 16, 900   # -> N_pad=512, 2 dst-row tiles

    key = jax.random.PRNGKey(0)
    kx, ke, kea, kp1, kp2 = jax.random.split(key, 5)

    x = jax.random.normal(kx, (N, F_IN), jnp.float32)

    # E distinct (src, dst) pairs so the dense-adjacency formulation matches
    # PyG's scatter softmax exactly (no duplicate edges).
    flat = jax.random.choice(ke, N * N, shape=(E,), replace=False)
    edge_index = jnp.stack([flat // N, flat % N]).astype(jnp.int32)   # (2, E)
    edge_attr = jax.random.normal(kea, (E, 4), jnp.float32)           # unused (edge_dim=None)

    params1 = init_gat_params(kp1, F_IN, HIDDEN)
    params2 = init_gat_params(kp2, HIDDEN, OUT_CH)

    ref = _encoder_ref(x, edge_index, params1, params2)

    # Default path (adjacency resident in VMEM for this small graph).
    out = gnn_encoder2(x, edge_index, edge_attr, params1, params2)
    out = jax.block_until_ready(out)
    assert out.shape == (N, OUT_CH) and out.dtype == jnp.float32
    assert jnp.allclose(out, ref, rtol=5e-2, atol=1e-1), float(jnp.max(jnp.abs(out - ref)))

    # Also exercise the streamed per-tile adjacency-strip path (large-graph mode).
    out_s = gnn_encoder2(x, edge_index, edge_attr, params1, params2, adj_resident=False)
    out_s = jax.block_until_ready(out_s)
    assert jnp.allclose(out_s, ref, rtol=5e-2, atol=1e-1), float(jnp.max(jnp.abs(out_s - ref)))

    print("KERNEL_OK")
</pallas_src>

<mosaic_0001>
module attributes {stable_mosaic.version = 11 : i64} {
  func.func @_fused_gat2_kernel(%arg0: i32, %arg1: i32, %arg2: memref<512x128xbf16, #tpu.memory_space<vmem>>, %arg3: memref<512x512xi8, #tpu.memory_space<vmem>>, %arg4: memref<1x128x256xbf16, #tpu.memory_space<vmem>>, %arg5: memref<1x2x128xf32, #tpu.memory_space<vmem>>, %arg6: memref<1x1x128xf32, #tpu.memory_space<vmem>>, %arg7: memref<256x128xf32, #tpu.memory_space<vmem>>, %arg8: memref<512x128xbf16, #tpu.memory_space<vmem>>, %arg9: memref<512x128xbf16, #tpu.memory_space<vmem>>, %arg10: memref<1x512xf32, #tpu.memory_space<vmem>>, %arg11: memref<512x1xf32, #tpu.memory_space<vmem>>) attributes {dimension_semantics = [#tpu.dimension_semantics<arbitrary>, #tpu.dimension_semantics<arbitrary>], iteration_bounds = array<i64: 2, 2>, scalar_prefetch = 0 : i64, scratch_operands = 4 : i64, tpu.core_type = #tpu.core_type<tc>, window_params = [{pipeline_mode = #tpu.pipeline_mode<synchronous>, transform_indices = @transform_0, window_bounds = array<i64: 512, 128>}, {pipeline_mode = #tpu.pipeline_mode<synchronous>, transform_indices = @transform_1, window_bounds = array<i64: 512, 512>}, {transform_indices = @transform_2, window_bounds = array<i64: 1, 128, 256>}, {transform_indices = @transform_3, window_bounds = array<i64: 1, 2, 128>}, {transform_indices = @transform_4, window_bounds = array<i64: 1, 1, 128>}, {transform_indices = @transform_5, window_bounds = array<i64: 256, 128>}]} {
    %c0_i32 = arith.constant 0 : i32
    %0 = arith.cmpi eq, %arg0, %c0_i32 : i32
    %c0_i32_0 = arith.constant 0 : i32
    %1 = arith.cmpi eq, %arg1, %c0_i32_0 : i32
    %2 = arith.andi %0, %1 : i1
    %3 = arith.extui %2 : i1 to i32
    %c0_i32_1 = arith.constant 0 : i32
    %4 = arith.cmpi ne, %3, %c0_i32_1 : i32
    scf.if %4 {
      %c0_22 = arith.constant 0 : index
      %c0_23 = arith.constant 0 : index
      %55 = vector.load %arg2[%c0_22, %c0_23] : memref<512x128xbf16, #tpu.memory_space<vmem>>, vector<512x128xbf16>
      %c0_24 = arith.constant 0 : index
      %c0_25 = arith.constant 0 : index
      %c0_26 = arith.constant 0 : index
      %56 = vector.load %arg4[%c0_24, %c0_25, %c0_26] : memref<1x128x256xbf16, #tpu.memory_space<vmem>>, vector<1x128x256xbf16>
      %57 = vector.shape_cast %56 : vector<1x128x256xbf16> to vector<128x256xbf16>
      %cst_27 = arith.constant dense<0.000000e+00> : vector<512x256xf32>
      %58 = tpu.matmul %55, %57, %cst_27 {dimension_numbers = #tpu.dot_dimension_numbers<[1], [0], [0], [1], [0, 0, 1, 1], [], []>} : vector<512x128xbf16>, vector<128x256xbf16>, vector<512x256xf32> -> vector<512x256xf32>
      %59 = vector.extract_strided_slice %58 {offsets = [0, 0], sizes = [512, 128], strides = [1, 1]} : vector<512x256xf32> to vector<512x128xf32>
      %60 = vector.extract_strided_slice %58 {offsets = [0, 128], sizes = [512, 128], strides = [1, 1]} : vector<512x256xf32> to vector<512x128xf32>
      %61 = tpu.iota {dimensions = array<i32: 1>} : vector<1x128xi32>
      %c127_i32 = arith.constant 127 : i32
      %62 = vector.broadcast %c127_i32 : i32 to vector<1x128xi32>
      %63 = arith.cmpi eq, %61, %62 : vector<1x128xi32>
      %64 = arith.extui %63 : vector<1x128xi1> to vector<1x128xi32>
      %65 = arith.sitofp %64 : vector<1x128xi32> to vector<1x128xf32>
      %66 = vector.broadcast %65 : vector<1x128xf32> to vector<512x128xf32>
      %67 = arith.addf %59, %66 : vector<512x128xf32>
      %68 = arith.truncf %67 : vector<512x128xf32> to vector<512x128xbf16>
      %c0_28 = arith.constant 0 : index
      %c0_29 = arith.constant 0 : index
      %69 = vector.load %arg8[%c0_28, %c0_29] : memref<512x128xbf16, #tpu.memory_space<vmem>>, vector<512x128xbf16>
      tpu.vector_store %arg8[%c0_28, %c0_29], %68 {strides = array<i32>} : memref<512x128xbf16, #tpu.memory_space<vmem>>, vector<512x128xbf16>,
      %c0_30 = arith.constant 0 : index
      %c0_31 = arith.constant 0 : index
      %c0_32 = arith.constant 0 : index
      %70 = vector.load %arg5[%c0_30, %c0_31, %c0_32] : memref<1x2x128xf32, #tpu.memory_space<vmem>>, vector<1x1x128xf32>
      %71 = vector.shape_cast %70 : vector<1x1x128xf32> to vector<1x128xf32>
      %72 = vector.broadcast %71 : vector<1x128xf32> to vector<512x128xf32>
      %73 = arith.mulf %59, %72 : vector<512x128xf32>
      %cst_33 = arith.constant dense<0.000000e+00> : vector<512xf32>
      %74 = vector.multi_reduction <add>, %73, %cst_33 [1] : vector<512x128xf32> to vector<512xf32>
      %75 = vector.shape_cast %74 : vector<512xf32> to vector<512x1xf32>
      %c0_34 = arith.constant 0 : index
      %c1 = arith.constant 1 : index
      %c0_35 = arith.constant 0 : index
      %76 = vector.load %arg5[%c0_34, %c1, %c0_35] : memref<1x2x128xf32, #tpu.memory_space<vmem>>, vector<1x1x128xf32>
      %77 = vector.shape_cast %76 : vector<1x1x128xf32> to vector<1x128xf32>
      %78 = vector.broadcast %77 : vector<1x128xf32> to vector<512x128xf32>
      %79 = arith.mulf %60, %78 : vector<512x128xf32>
      %cst_36 = arith.constant dense<0.000000e+00> : vector<512xf32>
      %80 = vector.multi_reduction <add>, %79, %cst_36 [1] : vector<512x128xf32> to vector<512xf32>
      %81 = vector.shape_cast %80 : vector<512xf32> to vector<512x1xf32>
      %82 = tpu.transpose %75, [1, 0] : vector<512x1xf32> -> vector<1x512xf32>
      %c0_37 = arith.constant 0 : index
      %c0_38 = arith.constant 0 : index
      %83 = vector.load %arg10[%c0_37, %c0_38] : memref<1x512xf32, #tpu.memory_space<vmem>>, vector<1x512xf32>
      tpu.vector_store %arg10[%c0_37, %c0_38], %82 {strides = array<i32>} : memref<1x512xf32, #tpu.memory_space<vmem>>, vector<1x512xf32>,
      %c0_39 = arith.constant 0 : index
      %c0_40 = arith.constant 0 : index
      %84 = vector.load %arg11[%c0_39, %c0_40] : memref<512x1xf32, #tpu.memory_space<vmem>>, vector<512x1xf32>
      tpu.vector_store %arg11[%c0_39, %c0_40], %81 {strides = array<i32>} : memref<512x1xf32, #tpu.memory_space<vmem>>, vector<512x1xf32>,
    } else {
    }
    %c1_i32 = arith.constant 1 : i32
    %5 = arith.cmpi eq, %arg0, %c1_i32 : i32
    %c0_i32_2 = arith.constant 0 : i32
    %6 = arith.cmpi eq, %arg1, %c0_i32_2 : i32
    %7 = arith.andi %5, %6 : i1
    %8 = arith.extui %7 : i1 to i32
    %c0_i32_3 = arith.constant 0 : i32
    %9 = arith.cmpi ne, %8, %c0_i32_3 : i32
    scf.if %9 {
      %c0_22 = arith.constant 0 : index
      %c0_23 = arith.constant 0 : index
      %55 = vector.load %arg9[%c0_22, %c0_23] : memref<512x128xbf16, #tpu.memory_space<vmem>>, vector<512x128xbf16>
      %c0_24 = arith.constant 0 : index
      %c0_25 = arith.constant 0 : index
      %c0_26 = arith.constant 0 : index
      %56 = vector.load %arg4[%c0_24, %c0_25, %c0_26] : memref<1x128x256xbf16, #tpu.memory_space<vmem>>, vector<1x128x256xbf16>
      %57 = vector.shape_cast %56 : vector<1x128x256xbf16> to vector<128x256xbf16>
      %cst_27 = arith.constant dense<0.000000e+00> : vector<512x256xf32>
      %58 = tpu.matmul %55, %57, %cst_27 {dimension_numbers = #tpu.dot_dimension_numbers<[1], [0], [0], [1], [0, 0, 1, 1], [], []>} : vector<512x128xbf16>, vector<128x256xbf16>, vector<512x256xf32> -> vector<512x256xf32>
      %59 = vector.extract_strided_slice %58 {offsets = [0, 0], sizes = [512, 128], strides = [1, 1]} : vector<512x256xf32> to vector<512x128xf32>
      %60 = vector.extract_strided_slice %58 {offsets = [0, 128], sizes = [512, 128], strides = [1, 1]} : vector<512x256xf32> to vector<512x128xf32>
      %61 = tpu.iota {dimensions = array<i32: 1>} : vector<1x128xi32>
      %c127_i32 = arith.constant 127 : i32
      %62 = vector.broadcast %c127_i32 : i32 to vector<1x128xi32>
      %63 = arith.cmpi eq, %61, %62 : vector<1x128xi32>
      %64 = arith.extui %63 : vector<1x128xi1> to vector<1x128xi32>
      %65 = arith.sitofp %64 : vector<1x128xi32> to vector<1x128xf32>
      %66 = vector.broadcast %65 : vector<1x128xf32> to vector<512x128xf32>
      %67 = arith.addf %59, %66 : vector<512x128xf32>
      %68 = arith.truncf %67 : vector<512x128xf32> to vector<512x128xbf16>
      %c0_28 = arith.constant 0 : index
      %c0_29 = arith.constant 0 : index
      %69 = vector.load %arg8[%c0_28, %c0_29] : memref<512x128xbf16, #tpu.memory_space<vmem>>, vector<512x128xbf16>
      tpu.vector_store %arg8[%c0_28, %c0_29], %68 {strides = array<i32>} : memref<512x128xbf16, #tpu.memory_space<vmem>>, vector<512x128xbf16>,
      %c0_30 = arith.constant 0 : index
      %c0_31 = arith.constant 0 : index
      %c0_32 = arith.constant 0 : index
      %70 = vector.load %arg5[%c0_30, %c0_31, %c0_32] : memref<1x2x128xf32, #tpu.memory_space<vmem>>, vector<1x1x128xf32>
      %71 = vector.shape_cast %70 : vector<1x1x128xf32> to vector<1x128xf32>
      %72 = vector.broadcast %71 : vector<1x128xf32> to vector<512x128xf32>
      %73 = arith.mulf %59, %72 : vector<512x128xf32>
      %cst_33 = arith.constant dense<0.000000e+00> : vector<512xf32>
      %74 = vector.multi_reduction <add>, %73, %cst_33 [1] : vector<512x128xf32> to vector<512xf32>
      %75 = vector.shape_cast %74 : vector<512xf32> to vector<512x1xf32>
      %c0_34 = arith.constant 0 : index
      %c1 = arith.constant 1 : index
      %c0_35 = arith.constant 0 : index
      %76 = vector.load %arg5[%c0_34, %c1, %c0_35] : memref<1x2x128xf32, #tpu.memory_space<vmem>>, vector<1x1x128xf32>
      %77 = vector.shape_cast %76 : vector<1x1x128xf32> to vector<1x128xf32>
      %78 = vector.broadcast %77 : vector<1x128xf32> to vector<512x128xf32>
      %79 = arith.mulf %60, %78 : vector<512x128xf32>
      %cst_36 = arith.constant dense<0.000000e+00> : vector<512xf32>
      %80 = vector.multi_reduction <add>, %79, %cst_36 [1] : vector<512x128xf32> to vector<512xf32>
      %81 = vector.shape_cast %80 : vector<512xf32> to vector<512x1xf32>
      %82 = tpu.transpose %75, [1, 0] : vector<512x1xf32> -> vector<1x512xf32>
      %c0_37 = arith.constant 0 : index
      %c0_38 = arith.constant 0 : index
      %83 = vector.load %arg10[%c0_37, %c0_38] : memref<1x512xf32, #tpu.memory_space<vmem>>, vector<1x512xf32>
      tpu.vector_store %arg10[%c0_37, %c0_38], %82 {strides = array<i32>} : memref<1x512xf32, #tpu.memory_space<vmem>>, vector<1x512xf32>,
      %c0_39 = arith.constant 0 : index
      %c0_40 = arith.constant 0 : index
      %84 = vector.load %arg11[%c0_39, %c0_40] : memref<512x1xf32, #tpu.memory_space<vmem>>, vector<512x1xf32>
      tpu.vector_store %arg11[%c0_39, %c0_40], %81 {strides = array<i32>} : memref<512x1xf32, #tpu.memory_space<vmem>>, vector<512x1xf32>,
    } else {
    }
    %c256_i32 = arith.constant 256 : i32
    %10 = arith.muli %arg1, %c256_i32 : i32
    %11 = tpu.assume_multiple %10, 256 : i32
    %12 = arith.index_cast %11 : i32 to index
    %c0 = arith.constant 0 : index
    %13 = vector.load %arg3[%12, %c0] : memref<512x512xi8, #tpu.memory_space<vmem>>, vector<256x512xi8>
    %c0_i8 = arith.constant 0 : i8
    %14 = vector.broadcast %c0_i8 : i8 to vector<256x512xi8>
    %15 = arith.cmpi ne, %13, %14 : vector<256x512xi8>
    %16 = arith.index_cast %11 : i32 to index
    %c0_4 = arith.constant 0 : index
    %17 = vector.load %arg11[%16, %c0_4] : memref<512x1xf32, #tpu.memory_space<vmem>>, vector<256x1xf32>
    %c0_5 = arith.constant 0 : index
    %c0_6 = arith.constant 0 : index
    %18 = vector.load %arg10[%c0_5, %c0_6] : memref<1x512xf32, #tpu.memory_space<vmem>>, vector<1x512xf32>
    %19 = vector.broadcast %17 : vector<256x1xf32> to vector<256x512xf32>
    %20 = vector.broadcast %18 : vector<1x512xf32> to vector<256x512xf32>
    %21 = arith.addf %19, %20 : vector<256x512xf32>
    %cst = arith.constant 2.000000e-01 : f32
    %22 = vector.broadcast %cst : f32 to vector<256x512xf32>
    %23 = arith.mulf %22, %21 : vector<256x512xf32>
    %24 = arith.maximumf %21, %23 : vector<256x512xf32>
    %cst_7 = arith.constant -1.000000e+30 : f32
    %25 = vector.broadcast %cst_7 : f32 to vector<256x512xf32>
    %26 = arith.select %15, %24, %25 : vector<256x512xi1>, vector<256x512xf32>
    %cst_8 = arith.constant dense<0xFF800000> : vector<256xf32>
    %27 = vector.multi_reduction <maximumf>, %26, %cst_8 [1] : vector<256x512xf32> to vector<256xf32>
    %28 = vector.shape_cast %27 : vector<256xf32> to vector<256x1xf32>
    %cst_9 = arith.constant 0.000000e+00 : f32
    %29 = vector.broadcast %cst_9 : f32 to vector<256x1xf32>
    %30 = arith.maximumf %28, %29 : vector<256x1xf32>
    %31 = vector.broadcast %30 : vector<256x1xf32> to vector<256x512xf32>
    %32 = arith.subf %26, %31 : vector<256x512xf32>
    %33 = math.exp %32 : vector<256x512xf32>
    %34 = arith.truncf %33 : vector<256x512xf32> to vector<256x512xbf16>
    %c0_10 = arith.constant 0 : index
    %c0_11 = arith.constant 0 : index
    %35 = vector.load %arg8[%c0_10, %c0_11] : memref<512x128xbf16, #tpu.memory_space<vmem>>, vector<512x128xbf16>
    %cst_12 = arith.constant dense<0.000000e+00> : vector<256x128xf32>
    %36 = tpu.matmul %34, %35, %cst_12 {dimension_numbers = #tpu.dot_dimension_numbers<[1], [0], [0], [1], [0, 0, 1, 1], [], []>} : vector<256x512xbf16>, vector<512x128xbf16>, vector<256x128xf32> -> vector<256x128xf32>
    %37 = vector.extract_strided_slice %36 {offsets = [0, 127], sizes = [256, 1], strides = [1, 1]} : vector<256x128xf32> to vector<256x1xf32>
    %cst_13 = arith.constant 0.000000e+00 : f32
    %38 = vector.broadcast %cst_13 : f32 to vector<256x1xf32>
    %39 = arith.cmpf ogt, %37, %38 : vector<256x1xf32>
    %cst_14 = arith.constant 1.000000e+00 : f32
    %40 = vector.broadcast %cst_14 : f32 to vector<256x1xf32>
    %41 = arith.select %39, %37, %40 : vector<256x1xi1>, vector<256x1xf32>
    %42 = tpu.reciprocal %41 {approx = true} : vector<256x1xf32> -> vector<256x1xf32>
    %43 = vector.broadcast %42 : vector<256x1xf32> to vector<256x128xf32>
    %44 = arith.mulf %36, %43 : vector<256x128xf32>
    %c0_15 = arith.constant 0 : index
    %c0_16 = arith.constant 0 : index
    %c0_17 = arith.constant 0 : index
    %45 = vector.load %arg6[%c0_15, %c0_16, %c0_17] : memref<1x1x128xf32, #tpu.memory_space<vmem>>, vector<1x1x128xf32>
    %46 = vector.shape_cast %45 : vector<1x1x128xf32> to vector<1x128xf32>
    %47 = vector.broadcast %46 : vector<1x128xf32> to vector<256x128xf32>
    %48 = arith.addf %44, %47 : vector<256x128xf32>
    %c0_i32_18 = arith.constant 0 : i32
    %49 = arith.cmpi eq, %arg0, %c0_i32_18 : i32
    %50 = arith.extui %49 : i1 to i32
    %c0_i32_19 = arith.constant 0 : i32
    %51 = arith.cmpi ne, %50, %c0_i32_19 : i32
    scf.if %51 {
      %cst_22 = arith.constant 0.000000e+00 : f32
      %55 = vector.broadcast %cst_22 : f32 to vector<256x128xf32>
      %56 = arith.maximumf %48, %55 : vector<256x128xf32>
      %57 = arith.truncf %56 : vector<256x128xf32> to vector<256x128xbf16>
      %58 = arith.index_cast %11 : i32 to index
      %c0_23 = arith.constant 0 : index
      %59 = vector.load %arg9[%58, %c0_23] : memref<512x128xbf16, #tpu.memory_space<vmem>>, vector<256x128xbf16>
      tpu.vector_store %arg9[%58, %c0_23], %57 {strides = array<i32>} : memref<512x128xbf16, #tpu.memory_space<vmem>>, vector<256x128xbf16>,
    } else {
    }
    %c1_i32_20 = arith.constant 1 : i32
    %52 = arith.cmpi eq, %arg0, %c1_i32_20 : i32
    %53 = arith.extui %52 : i1 to i32
    %c0_i32_21 = arith.constant 0 : i32
    %54 = arith.cmpi ne, %53, %c0_i32_21 : i32
    scf.if %54 {
      %c0_22 = arith.constant 0 : index
      %c0_23 = arith.constant 0 : index
      %55 = vector.load %arg7[%c0_22, %c0_23] : memref<256x128xf32, #tpu.memory_space<vmem>>, vector<256x128xf32>
      tpu.vector_store %arg7[%c0_22, %c0_23], %48 {strides = array<i32>} : memref<256x128xf32, #tpu.memory_space<vmem>>, vector<256x128xf32>,
    } else {
    }
    return
  }
  func.func @transform_0(%arg0: i32, %arg1: i32) -> (i32, i32) {
    %c0_i32 = arith.constant 0 : i32
    %c0_i32_0 = arith.constant 0 : i32
    %c0_i32_1 = arith.constant 0 : i32
    return %c0_i32, %c0_i32_0 : i32, i32
  }
  func.func @transform_1(%arg0: i32, %arg1: i32) -> (i32, i32) {
    %c0_i32 = arith.constant 0 : i32
    %c0_i32_0 = arith.constant 0 : i32
    %c0_i32_1 = arith.constant 0 : i32
    return %c0_i32, %c0_i32_0 : i32, i32
  }
  func.func @transform_2(%arg0: i32, %arg1: i32) -> (i32, i32, i32) {
    %c0_i32 = arith.constant 0 : i32
    %c0_i32_0 = arith.constant 0 : i32
    %c0_i32_1 = arith.constant 0 : i32
    return %arg0, %c0_i32, %c0_i32_0 : i32, i32, i32
  }
  func.func @transform_3(%arg0: i32, %arg1: i32) -> (i32, i32, i32) {
    %c0_i32 = arith.constant 0 : i32
    %c0_i32_0 = arith.constant 0 : i32
    %c0_i32_1 = arith.constant 0 : i32
    return %arg0, %c0_i32, %c0_i32_0 : i32, i32, i32
  }
  func.func @transform_4(%arg0: i32, %arg1: i32) -> (i32, i32, i32) {
    %c0_i32 = arith.constant 0 : i32
    %c0_i32_0 = arith.constant 0 : i32
    %c0_i32_1 = arith.constant 0 : i32
    return %arg0, %c0_i32, %c0_i32_0 : i32, i32, i32
  }
  func.func @transform_5(%arg0: i32, %arg1: i32) -> (i32, i32) {
    %0 = arith.muli %arg0, %arg1 : i32
    %c0_i32 = arith.constant 0 : i32
    %c0_i32_0 = arith.constant 0 : i32
    return %0, %c0_i32 : i32, i32
  }
}

</mosaic_0001>

<bundles_post_ra>
// kernel: tpu_custom_call.1
= control target key start
LH: loop header
LB: loop body
LE: loop exit
PB: predicated region body
PF: predicated region fallthrough
CT: control target
= control target key end

     0   :  { %s12270_s0 = inlined_call_operand.hbm [shape: bf16[512,128], index: 0, kind: input, shape index: {}]   ;;  %s12271_s1 = inlined_call_operand.hbm [shape: s8[512,512], index: 1, kind: input, shape index: {}]   ;;  %s12272_s2 = inlined_call_operand.hbm [shape: bf16[2,128,256], index: 2, kind: input, shape index: {}]   ;;  %s12273_s3 = inlined_call_operand.hbm [shape: f32[2,2,128], index: 3, kind: input, shape index: {}]   ;;  %s12274_s4 = inlined_call_operand.vmem [shape: f32[2,1,128], index: 4, kind: input, shape index: {}]   ;;  %s12275_s5 = inlined_call_operand.hbm [shape: f32[512,128], index: 5, kind: output, shape index: {}]  }
   0x1   :  { %12367 = sst [smem:[#allocation88_spill]] %s12270_s0 }
   0x2   :  { %12368 = sst [smem:[#allocation89_spill]] %s12271_s1 }
   0x3   :  { %12369 = sst [smem:[#allocation90_spill]] %s12272_s2 }
   0x4   :  { %12370 = sst [smem:[#allocation91_spill]] %s12274_s4 }
   0x5   :  { %12371 = sst [smem:[#allocation92_spill]] %s12275_s5 }
   0x6   :  { %10 = vsyncpa [#allocation7], 0 }
   0x7   :  { %11 = vsyncpa [#allocation10], 0 }
   0x8   :  { %12 = vsyncpa [#allocation8], 0 }
   0x9   :  { %14 = vsyncpa [#allocation8 + $0x1], 0  ;;  %s8513_s18 = smov 0   ;;  %s8515_s19 = smov 0  }
   0xa   :  { %s8517_s20 = smov 0   ;;  %s8519_s21 = smov 0  }
   0xb   :  { %s8521_s22 = smov 0   ;;  %s8523_s23 = smov 0  }
   0xc   :  { %s8525_s24 = smov 0   ;;  %s8527_s25 = smov 0  }
   0xd   :  { %s8529_s26 = smov 0   ;;  %s8531_s27 = smov 0  }
   0xe   :  { %s8533_s28 = smov 0  }
   0xf LB: > { %12372 = sst [smem:[#allocation18_spill]] %s8427_s18  ;;  %s8567_s29 = sadd.s32 4294967295, %s8467_s28   ;;  %s8467_s28 = sphi %s8533_s28, %s20_s28   ;;  %s8463_s27 = sphi %s8531_s27, %s12707_s27   ;;  %s8459_s26 = sphi %s8529_s26, %s12706_s26   ;;  %s8455_s25 = sphi %s8527_s25, %s12705_s25   ;;  %s8451_s24 = sphi %s8525_s24, %s12699_s24   ;;  %s8447_s23 = sphi %s8523_s23, %s12704_s23   ;;  %s8443_s22 = sphi %s8521_s22, %s12703_s22   ;;  %s8439_s21 = sphi %s8519_s21, %s12698_s21   ;;  %s8435_s20 = sphi %s8517_s20, %s12702_s20   ;;  %s8431_s19 = sphi %s8515_s19, %s12701_s19   ;;  %s8427_s18 = sphi %s8513_s18, %s12697_s18  }
  0x10   : > { %12373 = sst [smem:[#allocation19_spill]] %s8431_s19  ;;  %s6560_s30 = sadd.s32 4294967294, %s8467_s28  }
  0x11   : > { %12374 = sst [smem:[#allocation20_spill]] %s8443_s22  ;;  %p94_p0 = scmp.ne.s32.totalorder %s8443_s22, %s8439_s21 }
  0x12   : > { %12375 = sst [smem:[#allocation21_spill]] %s8451_s24  ;;  %p95_p1 = scmp.eq.s32.totalorder %s8567_s29, 0 }
  0x13   : > { %12376 = sst [smem:[#allocation22_spill]] %s8455_s25  ;;  %p171_p2 = scmp.ne.s32.totalorder %s8435_s20, %s8431_s19 }
  0x14   : > { %12377 = sst [smem:[#allocation23_spill]] %s8459_s26  ;;  %p8577_p3 = por %p95_p1, %p94_p0 }
  0x15   : > { %p172_p4 = scmp.eq.s32.totalorder %s8567_s29, 3  ;;  %p177_p5 = scmp.ne.s32.totalorder %s8431_s19, %s8427_s18 }
  0x16   : > { %s12378_s7 = scalar_select %p8577_p3, 1, 0 }
  0x17   : > { %p178_p6 = scmp.eq.s32.totalorder %s6560_s30, 3  ;;  %p8584_p7 = por %p172_p4, %p171_p2 }
  0x18   : > { %12379 = sst [smem:[#allocation24_spill]] %s12378_s7  ;;  %p6561_p8 = scmp.ge.s32.totalorder %s8467_s28, 1 }
  0x19   : > { %s12380_s8 = scalar_select %p8584_p7, 1, 0 }
  0x1a   : > { %p8589_p9 = por %p178_p6, %p177_p5  ;;  %p185_p10 = scmp.lt.s32.totalorder %s8467_s28, 5 }
  0x1b   : > { %12381 = sst [smem:[#allocation25_spill]] %s12380_s8  ;;  %s8469_s14 = smov [#allocation6]  }
  0x1c   : > { %s12382_s9 = scalar_select %p8589_p9, 1, 0 }
  0x1d   : > { %s12384_s0 = sld [smem:[#allocation88_spill]]  ;;  %p8597_p11 = pnand %p6561_p8, %p185_p10 }
  0x1e   : > { %12383 = sst [smem:[#allocation26_spill]] %s12382_s9  ;;  %s198_s15 = sshll.u32 %s8469_s14, 4  ;;  %s199_s15 = int_to_ptr.vmem [resolvable:$true] %s198_s15 }
  0x1f   : > { %p7755_p12 = pneg %p8597_p11  ;;  %s8470_s17 = smov 64  }
  0x20   : > { %s8471_s21 = smov 4   ;;  %s29_s30 = sadd.s32 1, %s8459_s26 }
  0x21   : > { %p8605_p13 = pnand %p7755_p12, %p95_p1  ;;  %p30_p0 = scmp.ge.s32.totalorder %s29_s30, 2 }
  0x22   : > { %s32_s10 = sadd.s32 1, %s8463_s27  ;;  %s81_s11 = sadd.s32 1, %s8447_s23 }
  0x23   : > { %s196_s12 = sshll.u32 %s12384_s0, 4  ;;  %p88_p2 = scmp.ne.s32.totalorder %s8447_s23, %s8443_s22  ;;  %s197_s12 = int_to_ptr.hbm [resolvable:$true] %s196_s12 }
  0x24   : > { %7758 = dma.hbm_to_vmem [thread:$0]  (!%p8605_p13), %s197_s12, 4096, %s199_s15, [#allocation7], %s8470_s17, %s8470_s17, %s8471_s21  }
  0x25   : > { %s12709_s30 = smov (%p30_p0, %s29_s30), 0  ;;  %s12711_s10 = smov (!%p30_p0, %s32_s10), %s8463_s27 }
  0x26   : > { %p89_p4 = scmp.eq.s32.totalorder %s8467_s28, 0  ;;  %s156_s14 = smul.u32 %s8459_s26, %s8463_s27 }
  0x27   : > { %p34_p5 = scmp.ge.s32.totalorder %s12711_s10, 2  ;;  %p7775_p6 = scmp.lt.s32.totalorder %s8467_s28, 4 }
  0x28   : > { %p8623_p8 = por %p89_p4, %p88_p2  ;;  %s226_s15 = sand.u32 1, %s8467_s28  }
  0x29   : > { %s12713_s10 = smov (%p34_p5, %s12711_s10), 0  ;;  %s228_s17 = sand.u32 1, %s8447_s23  }
  0x2a   : > { %12388 = sst [smem:[#allocation27_spill]] %s12713_s10  ;;  %s78_s21 = ssub.s32 %s8463_s27, %s12713_s10 }
  0x2b   : > { %s157_s6 = smul.u32 %s12713_s10, %s12709_s30  ;;  %p79_p10 = scmp.eq.s32.totalorder %s78_s21, 0 }
  0x2c   : > { %s6565_s0 = sshll.u32 %s228_s17, 7  ;;  %s7101_s18 = sshll.u32 %s8463_s27, 7 }
  0x2d   : > { %s158_s26 = ssub.s32 %s156_s14, %s157_s6  ;;  %s12389_s2 = sld [smem:[#allocation90_spill]] }
  0x2e   : > { %s8638_s9 = scalar_select %p79_p10, %s8447_s23, %s81_s11  }
  0x2f   : > { %p159_p12 = scmp.eq.s32.totalorder %s158_s26, 0  ;;  %s230_s24 = scalar_lea.vmem [#allocation11], %s6565_s0 }
  0x30   : > { %s238_s25 = sshll.u32 %s230_s24, 4  ;;  %s12390_s19 = sadd.s32 1, %s8435_s20  ;;  %s239_s25 = int_to_ptr.vmem [resolvable:$true] %s238_s25 }
  0x31   : > { %s8647_s7 = scalar_select %p159_p12, %s8435_s20, %s12390_s19  }
  0x32   : > { %p8653_p0 = pnand %p7775_p6, %p8623_p8  ;;  %s12392_s1 = sld [smem:[#allocation89_spill]] }
  0x33   : > { %s235_s4 = scalar_lea.hbm %s12389_s2, %s7101_s18  ;;  %s227_s18 = scalar_lea.sflag [#allocation7], %s226_s15 }
  0x34   : > { %s236_s22 = sshll.u32 %s235_s4, 4  ;;  %s8472_s19 = smov 128   ;;  %s237_s22 = int_to_ptr.hbm [resolvable:$true] %s236_s22 }
  0x35   : > { %s8473_s24 = smov 8   ;;  %s8474_s4 = smov [#allocation9]  }
  0x36   : > { %7765 = dma.hbm_to_vmem [thread:$0]  (!%p8653_p0), %s237_s22, 2048, %s239_s25, %s227_s18, %s8472_s19, %s8472_s19, %s8473_s24  }
  0x37   : > { %s212_s8 = sshll.u32 %s8474_s4, 4  ;;  %s8475_s11 = smov 512   ;;  %s213_s8 = int_to_ptr.vmem [resolvable:$true] %s212_s8 }
  0x38   : > { %s210_s0 = sshll.u32 %s12392_s1, 4  ;;  %s8476_s14 = smov 32   ;;  %s211_s0 = int_to_ptr.hbm [resolvable:$true] %s210_s0 }
  0x39   : > { %7761 = dma.hbm_to_vmem [thread:$0]  (!%p8605_p13), %s211_s0, 8192, %s213_s8, [#allocation10], %s8475_s11, %s8475_s11, %s8476_s14  }
  0x3a   : > { %s6568_s12 = sshll.u32 %s228_s17, 1  ;;  %s6569_s21 = sshll.u32 %s8463_s27, 1 }
  0x3b   : > { %s256_s15 = scalar_lea.hbm %s12273_s3, %s6569_s21  ;;  %s252_s2 = scalar_lea.vmem [#allocation12], %s6568_s12 }
  0x3c   : > { %s258_s1 = sshll.u32 %s256_s15, 4  ;;  %s260_s10 = sshll.u32 %s252_s2, 4  ;;  %s259_s1 = int_to_ptr.hbm [resolvable:$true] %s258_s1  ;;  %s261_s10 = int_to_ptr.vmem [resolvable:$true] %s260_s10 }
  0x3d   : > { %7768 = dma.hbm_to_vmem [thread:$0]  (!%p8653_p0), %s259_s1, 32, %s261_s10, %s227_s18  }
  0x3e   : > { %275 = sbr.rel (%p8597_p11) target bundleno = 3120 (0xc30), region = 40 }
  0x43   : > { %8410 = dma.done.wait (%p95_p1), [#allocation7], 4096  }
  0x44   : > { %8412 = vsyncadd (%p95_p1), [#allocation7], 4294963200 }
  0x45   : > { %8414 = dma.done.wait (%p95_p1), [#allocation10], 8192  }
  0x46   : > { %8416 = vsyncadd (%p95_p1), [#allocation10], 4294959104  ;;  %s12393_s2 = sld [smem:[#allocation20_spill]]  ;;  %s287_s25 = sand.u32 1, %s8567_s29  }
  0x47   : > { %s288_s13 = scalar_lea.sflag [#allocation7], %s287_s25 }
  0x4c   : > { %s289_s1 = sand.u32 1, %s12393_s2  }
  0x4d   : > { %s6573_s16 = sshll.u32 %s289_s1, 7 }
  0x4e   : > { %s8684_s10 = scalar_lea.vmem [#allocation11], %s6573_s16 }
  0x4f   : > { %8418 = dma.done.wait (%p8577_p3), %s288_s13, 2080  }
  0x50   : > { %8420 = vsyncadd (%p8577_p3), %s288_s13, 4294965216  ;;  %s12395_s17 = sld [smem:[#allocation19_spill]]  ;;  %s6574_s18 = sshll.u32 %s289_s1, 1 }
  0x51   : > { %s12396_s26 = sld [smem:[#allocation22_spill]]  ;;  %s8704_s14 = scalar_lea.vmem [#allocation12], %s6574_s18 }
  0x52   : > { %s12397_s0 = sld [smem:[#allocation21_spill]] }
  0x53   : > { %s12398_s8 = sld [smem:[#allocation91_spill]] }
  0x56   : > { %s334_s19 = sand.u32 1, %s12395_s17  }
  0x57   : > { %s6575_s29 = sshll.u32 %s334_s19, 8  ;;  %p337_p1 = scmp.lt.s32.totalorder %s12396_s26, 1 }
  0x58   : > { %p344_p11 = scmp.eq.s32.totalorder %s12396_s26, 0  ;;  %p345_p13 = scmp.eq.s32.totalorder %s12397_s0, 0 }
  0x59   : > { %s12715_s26 = smov (!%p337_p1, %s12396_s26), 1  ;;  %s8706_s12 = scalar_lea.vmem [#allocation13], %s6575_s29 }
  0x5a   : > { %p346_p2 = pnand %p345_p13, %p344_p11  ;;  %s8702_s11 = scalar_lea.vmem %s12398_s8, %s12715_s26 }
  0x5c   : > { %349 = sbr.rel (%p346_p2) target bundleno = 922 (0x39a), region = 60 }
  0x61   : > { %v6762_v0 = vld [vmem:[%s8684_s10 + $0x70] sm:$0xf]  ;;  %v7149_v1 = vld [vmem:[%s8684_s10 + $0x74] sm:$0xf0]  ;;  %v7148_v2 = vld [vmem:[%s8684_s10 + $0x74] sm:$0xf] }
  0x62   : > { %v6763_v3 = vor.u32 %v7149_v1, %v6762_v0  ;;  %v6764_v4 = vld [vmem:[%s8684_s10 + $0x78] sm:$0xf0]  ;;  %v6754_v5 = vld [vmem:[%s8684_s10 + $0x60] sm:$0xf]  ;;  %v7147_v6 = vld [vmem:[%s8684_s10 + $0x64] sm:$0xf0]  ;;  %v1040_v0 = vlaneseq }
  0x63   : > { %v6767_v7 = vor.u32 %v7148_v2, %v6764_v4  ;;  %v7146_v8 = vld [vmem:[%s8684_s10 + $0x64] sm:$0xf]  ;;  %v6756_v9 = vld [vmem:[%s8684_s10 + $0x68] sm:$0xf0]  ;;  %v6755_v10 = vor.u32 %v7147_v6, %v6754_v5  ;;  %v6746_v12 = vld [vmem:[%s8684_s10 + $0x50] sm:$0xf] }
  0x64   : > { %702 = vmatpush.bf16.msra.mxu0 %v6763_v3  ;;  %7709 = vmatpush.bf16.msra.mxu2 %v6763_v3  ;;  %v6759_v11 = vor.u32 %v7146_v8, %v6756_v9  ;;  %v7145_v13 = vld [vmem:[%s8684_s10 + $0x54] sm:$0xf0]  ;;  %v7144_v14 = vld [vmem:[%s8684_s10 + $0x54] sm:$0xf]  ;;  %v6748_v15 = vld [vmem:[%s8684_s10 + $0x58] sm:$0xf0] }
  0x65   : > { %871 = vmatpush.bf16.msra.mxu1 %v6767_v7  ;;  %7717 = vmatpush.bf16.msra.mxu3 %v6767_v7  ;;  %v6747_v16 = vor.u32 %v7145_v13, %v6746_v12  ;;  %v6751_v17 = vor.u32 %v7144_v14, %v6748_v15  ;;  %v6738_v18 = vld [vmem:[%s8684_s10 + $0x40] sm:$0xf]  ;;  %v7143_v19 = vld [vmem:[%s8684_s10 + $0x44] sm:$0xf0]  ;;  %v7142_v20 = vld [vmem:[%s8684_s10 + $0x44] sm:$0xf] }
  0x66   : > { %v6740_v21 = vld [vmem:[%s8684_s10 + $0x48] sm:$0xf0]  ;;  %v6739_v22 = vor.u32 %v7143_v19, %v6738_v18  ;;  %v6730_v24 = vld [vmem:[%s8684_s10 + $0x30] sm:$0xf]  ;;  %v7141_v25 = vld [vmem:[%s8684_s10 + $0x34] sm:$0xf0] }
  0x67   : > { %v6743_v23 = vor.u32 %v7142_v20, %v6740_v21  ;;  %v7140_v26 = vld [vmem:[%s8684_s10 + $0x34] sm:$0xf]  ;;  %v6732_v27 = vld [vmem:[%s8684_s10 + $0x38] sm:$0xf0]  ;;  %v6731_v28 = vor.u32 %v7141_v25, %v6730_v24  ;;  %v6722_v30 = vld [vmem:[%s8684_s10 + $0x20] sm:$0xf] }
  0x68   : > { %703 = vmatpush.bf16.msra.mxu0 %v6755_v10  ;;  %7710 = vmatpush.bf16.msra.mxu2 %v6755_v10  ;;  %v6735_v29 = vor.u32 %v7140_v26, %v6732_v27  ;;  %v7139_v31 = vld [vmem:[%s8684_s10 + $0x24] sm:$0xf0]  ;;  %v7138_v32 = vld [vmem:[%s8684_s10 + $0x24] sm:$0xf]  ;;  %v6724_v33 = vld [vmem:[%s8684_s10 + $0x28] sm:$0xf0] }
  0x69   : > { %872 = vmatpush.bf16.msra.mxu1 %v6759_v11  ;;  %7718 = vmatpush.bf16.msra.mxu3 %v6759_v11  ;;  %v6723_v34 = vor.u32 %v7139_v31, %v6722_v30  ;;  %v6727_v35 = vor.u32 %v7138_v32, %v6724_v33  ;;  %v6714_v36 = vld [vmem:[%s8684_s10 + $0x10] sm:$0xf]  ;;  %v7137_v37 = vld [vmem:[%s8684_s10 + $0x14] sm:$0xf0]  ;;  %v7136_v38 = vld [vmem:[%s8684_s10 + $0x14] sm:$0xf] }
  0x6a   : > { %v6716_v39 = vld [vmem:[%s8684_s10 + $0x18] sm:$0xf0]  ;;  %v6715_v40 = vor.u32 %v7137_v37, %v6714_v36  ;;  %v6706_v42 = vld [vmem:[%s8684_s10] sm:$0xf]  ;;  %v7135_v43 = vld [vmem:[%s8684_s10 + $0x4] sm:$0xf0] }
  0x6b   : > { %v6719_v41 = vor.u32 %v7136_v38, %v6716_v39  ;;  %v7134_v44 = vld [vmem:[%s8684_s10 + $0x4] sm:$0xf]  ;;  %v6708_v45 = vld [vmem:[%s8684_s10 + $0x8] sm:$0xf0]  ;;  %v6707_v46 = vor.u32 %v7135_v43, %v6706_v42  ;;  %v7104_v52 = vld [vmem:[#allocation6 + $0x10] sm:$0xff]  ;;  %v1041_v3 = vand.u32 127, %v1040_v0 }
  0x6c   : > { %704 = vmatpush.bf16.msra.mxu0 %v6747_v16  ;;  %7711 = vmatpush.bf16.msra.mxu2 %v6747_v16  ;;  %v6711_v47 = vor.u32 %v7134_v44, %v6708_v45  ;;  %v7102_v48 = vld [vmem:[#allocation6] sm:$0xff]  ;;  %v7103_v50 = vld [vmem:[#allocation6 + $0x8] sm:$0xff]  ;;  %v7120_v53 = vld [vmem:[#allocation6 + $0x90] sm:$0xff]  ;;  %v8477_v8 = vmov 0.0   ;;  %vm1772_vm1 = vcmask 7168   ;;  %vm1760_vm2 = vcmask 1040384  }
  0x6d   : > { %873 = vmatpush.bf16.msra.mxu1 %v6751_v17  ;;  %7719 = vmatpush.bf16.msra.mxu3 %v6751_v17  ;;  %v7118_v49 = vld [vmem:[#allocation6 + $0x80] sm:$0xff]  ;;  %v7119_v51 = vld [vmem:[#allocation6 + $0x88] sm:$0xff]  ;;  %v7121_v54 = vld [vmem:[#allocation6 + $0x98] sm:$0xff]  ;;  %vm1042_vm0 = vcmp.eq.s32.totalorder %v1041_v3, 127  ;;  %vm1762_vm3 = vcmask 1042434   ;;  %vm1764_vm4 = vcmask 1041408  }
  0x6e   : > { %v7105_v55 = vld [vmem:[#allocation6 + $0x18] sm:$0xff]  ;;  %v7106_v56 = vld [vmem:[#allocation6 + $0x20] sm:$0xff]  ;;  %v7107_v58 = vld [vmem:[#allocation6 + $0x28] sm:$0xff]  ;;  %v8749_v9 = vsel %vm1042_vm0, 1.0, %v8477_v8  ;;  %vm1769_vm5 = vcmp.lt.s32.totalorder %v1040_v0, 512 }
  0x6f   : > { %v7122_v57 = vld [vmem:[#allocation6 + $0xa0] sm:$0xff]  ;;  %v7123_v59 = vld [vmem:[#allocation6 + $0xa8] sm:$0xff]  ;;  %v7124_v60 = vld [vmem:[#allocation6 + $0xb0] sm:$0xff] }
  0x70   : > { %705 = vmatpush.bf16.msra.mxu0 %v6739_v22  ;;  %7712 = vmatpush.bf16.msra.mxu2 %v6739_v22  ;;  %v7108_v61 = vld [vmem:[#allocation6 + $0x30] sm:$0xff]  ;;  %v7109_v62 = vld [vmem:[#allocation6 + $0x38] sm:$0xff]  ;;  %v8741_v1 = vld [vmem:[%s8704_s14] ss:$0 sm:$0xff] }
  0x71   : > { %874 = vmatpush.bf16.msra.mxu1 %v6743_v23  ;;  %7720 = vmatpush.bf16.msra.mxu3 %v6743_v23  ;;  %v7125_v63 = vld [vmem:[#allocation6 + $0xb8] sm:$0xff]  ;;  %v8744_v2 = vld [vmem:[%s8704_s14 + $0x1] ss:$0 sm:$0xff]  ;;  %v7127_v39 = vld [vmem:[#allocation6 + $0xc8] sm:$0xff] }
  0x72   : > { %v7110_v14 = vld [vmem:[#allocation6 + $0x40] sm:$0xff] }
  0x73   : > { %v7126_v18 = vld [vmem:[#allocation6 + $0xc0] sm:$0xff] }
  0x74   : > { %706 = vmatpush.bf16.msra.mxu0 %v6731_v28  ;;  %7713 = vmatpush.bf16.msra.mxu2 %v6731_v28 }
  0x75   : > { %875 = vmatpush.bf16.msra.mxu1 %v6735_v29  ;;  %7721 = vmatpush.bf16.msra.mxu3 %v6735_v29 }
  0x78   : > { %707 = vmatpush.bf16.msra.mxu0 %v6723_v34  ;;  %7714 = vmatpush.bf16.msra.mxu2 %v6723_v34 }
  0x79   : > { %876 = vmatpush.bf16.msra.mxu1 %v6727_v35  ;;  %7722 = vmatpush.bf16.msra.mxu3 %v6727_v35 }
  0x7c   : > { %708 = vmatpush.bf16.msra.mxu0 %v6715_v40  ;;  %7715 = vmatpush.bf16.msra.mxu2 %v6715_v40 }
  0x7d   : > { %877 = vmatpush.bf16.msra.mxu1 %v6719_v41  ;;  %7723 = vmatpush.bf16.msra.mxu3 %v6719_v41  ;;  %v7111_v41 = vld [vmem:[#allocation6 + $0x48] sm:$0xff] }
  0x80   : > { %709 = vmatpush.bf16.msra.mxu0 %v6707_v46  ;;  %7716 = vmatpush.bf16.msra.mxu2 %v6707_v46 }
  0x81   : > { %878 = vmatpush.bf16.msra.mxu1 %v6711_v47  ;;  %7724 = vmatpush.bf16.msra.mxu3 %v6711_v47 }
  0x83   : > { %710 = vmatmul.bf16.vlgmr.msra.gmra.mxu0 %v7102_v48  ;;  %790 = vmatmul.bf16.vlgmr.msra.gmra.mxu2 %v7118_v49 }
  0x84   : > { %879 = vmatmul.bf16.vlgmr.msra.gmra.mxu1 %v7102_v48  ;;  %959 = vmatmul.bf16.vlgmr.msra.gmra.mxu3 %v7118_v49 }
  0x93   : > { %715 = vmatmul.bf16.gmra.mxu0 %v7103_v50  ;;  %795 = vmatmul.bf16.gmra.mxu2 %v7119_v51 }
  0x94   : > { %964 = vmatmul.bf16.gmra.mxu3 %v7119_v51  ;;  %884 = vmatmul.bf16.gmra.mxu1 %v7103_v50 }
  0xa3   : > { %720 = vmatmul.bf16.gmra.mxu0 %v7104_v52  ;;  %800 = vmatmul.bf16.gmra.mxu2 %v7120_v53 }
  0xa4   : > { %889 = vmatmul.bf16.gmra.mxu1 %v7104_v52  ;;  %969 = vmatmul.bf16.gmra.mxu3 %v7120_v53 }
  0xb3   : > { %805 = vmatmul.bf16.gmra.mxu2 %v7121_v54  ;;  %725 = vmatmul.bf16.gmra.mxu0 %v7105_v55 }
  0xb4   : > { %894 = vmatmul.bf16.gmra.mxu1 %v7105_v55  ;;  %974 = vmatmul.bf16.gmra.mxu3 %v7121_v54 }
  0xc3   : > { %730 = vmatmul.bf16.gmra.mxu0 %v7106_v56  ;;  %810 = vmatmul.bf16.gmra.mxu2 %v7122_v57 }
  0xc4   : > { %979 = vmatmul.bf16.gmra.mxu3 %v7122_v57  ;;  %899 = vmatmul.bf16.gmra.mxu1 %v7106_v56 }
  0xd3   : > { %735 = vmatmul.bf16.gmra.mxu0 %v7107_v58  ;;  %815 = vmatmul.bf16.gmra.mxu2 %v7123_v59 }
  0xd4   : > { %904 = vmatmul.bf16.gmra.mxu1 %v7107_v58  ;;  %984 = vmatmul.bf16.gmra.mxu3 %v7123_v59 }
  0xe3   : > { %820 = vmatmul.bf16.gmra.mxu2 %v7124_v60  ;;  %740 = vmatmul.bf16.gmra.mxu0 %v7108_v61 }
  0xe4   : > { %909 = vmatmul.bf16.gmra.mxu1 %v7108_v61  ;;  %989 = vmatmul.bf16.gmra.mxu3 %v7124_v60  ;;  %v7112_v60 = vld [vmem:[#allocation6 + $0x50] sm:$0xff] }
  0xf3   : > { %745 = vmatmul.bf16.gmra.mxu0 %v7109_v62  ;;  %825 = vmatmul.bf16.gmra.mxu2 %v7125_v63 }
  0xf4   : > { %994 = vmatmul.bf16.gmra.mxu3 %v7125_v63  ;;  %914 = vmatmul.bf16.gmra.mxu1 %v7109_v62 }
 0x100   : > { %v711_v4 = vpop.f32.mrf.mxu0 }
 0x101   : > { %v880_v5 = vpop.f32.mrf.mxu1  ;;  %v1239_v6 = vmul.f32 %v8741_v1, %v711_v4  ;;  %v1045_v15 = vadd.f32 %v8749_v9, %v711_v4 }
 0x102   : > { %v1433_v7 = vmul.f32 %v8744_v2, %v880_v5 }
 0x103   : > { %1303 = vadd.xlane.f32.xlu0 %v1239_v6  ;;  %750 = vmatmul.bf16.gmra.mxu0 %v7110_v14 }
 0x104   : > { %1497 = vadd.xlane.f32.xlu1 %v1433_v7  ;;  %919 = vmatmul.bf16.gmra.mxu1 %v7110_v14 }
 0x105   : > { %830 = vmatmul.bf16.gmra.mxu2 %v7126_v18  ;;  %999 = vmatmul.bf16.gmra.mxu3 %v7126_v18 }
 0x106   : > { %v791_v10 = vpop.f32.mrf.mxu2 }
 0x107   : > { %v960_v11 = vpop.f32.mrf.mxu3  ;;  %v1271_v12 = vmul.f32 %v8741_v1, %v791_v10  ;;  %v1077_v22 = vadd.f32 %v8749_v9, %v791_v10  ;;  %v7128_v10 = vld [vmem:[#allocation6 + $0xd0] sm:$0xff] }
 0x108   : > { %v713_v13 = vpop.f32.mrf.mxu0  ;;  %v1465_v16 = vmul.f32 %v8744_v2, %v960_v11 }
 0x109   : > { %v1046_v17 = vadd.f32 %v8749_v9, %v713_v13  ;;  %1367 = vadd.xlane.f32.xlu2 %v1271_v12  ;;  %v882_v20 = vpop.f32.mrf.mxu1  ;;  %v1240_v29 = vmul.f32 %v8741_v1, %v713_v13 }
 0x10a   : > { %v1434_v25 = vmul.f32 %v8744_v2, %v882_v20 }
 0x10b   : > { %v7235_v19 = vpack.c.bf16 %v1046_v17, %v1045_v15  ;;  %1561 = vadd.xlane.f32.xlu0 %v1465_v16 }
 0x10d   : > { %7236 = vst [vmem:[#allocation2 + $0xb0] sm:$0xff] %v7235_v19  }
 0x10e   : > { %v793_v21 = vpop.f32.mrf.mxu2 }
 0x10f   : > { %v1078_v23 = vadd.f32 %v8749_v9, %v793_v21  ;;  %v962_v24 = vpop.f32.mrf.mxu3  ;;  %v1272_v38 = vmul.f32 %v8741_v1, %v793_v21 }
 0x110   : > { %v716_v26 = vpop.f32.mrf.mxu0  ;;  %v1466_v27 = vmul.f32 %v8744_v2, %v962_v24 }
 0x111   : > { %v7315_v28 = vpack.c.bf16 %v1078_v23, %v1077_v22  ;;  %1499 = vadd.xlane.f32.xlu2 %v1434_v25  ;;  %v1241_v31 = vmul.f32 %v8741_v1, %v716_v26  ;;  %v885_v33 = vpop.f32.mrf.mxu1  ;;  %v1047_v36 = vadd.f32 %v8749_v9, %v716_v26 }
 0x112   : > { %1563 = vadd.xlane.f32.xlu1 %v1466_v27  ;;  %v1435_v48 = vmul.f32 %v8744_v2, %v885_v33 }
 0x113   : > { %7647 = vst [vmem:[#allocation2 + $0x38] sm:$0xff] %v7315_v28   ;;  %1305 = vadd.xlane.f32.xlu0 %v1240_v29  ;;  %755 = vmatmul.bf16.gmra.mxu0 %v7111_v41 }
 0x114   : > { %924 = vmatmul.bf16.gmra.mxu1 %v7111_v41 }
 0x115   : > { %835 = vmatmul.bf16.gmra.mxu2 %v7127_v39  ;;  %1004 = vmatmul.bf16.gmra.mxu3 %v7127_v39 }
 0x116   : > { %v796_v30 = vpop.f32.mrf.mxu2 }
 0x117   : > { %v965_v32 = vpop.f32.mrf.mxu3  ;;  %v1079_v43 = vadd.f32 %v8749_v9, %v796_v30  ;;  %v1273_v47 = vmul.f32 %v8741_v1, %v796_v30 }
 0x118   : > { %v1467_v34 = vmul.f32 %v8744_v2, %v965_v32  ;;  %v718_v35 = vpop.f32.mrf.mxu0 }
 0x119   : > { %v1048_v37 = vadd.f32 %v8749_v9, %v718_v35  ;;  %v887_v50 = vpop.f32.mrf.mxu1  ;;  %v1242_v55 = vmul.f32 %v8741_v1, %v718_v35 }
 0x11a   : > { %1565 = vadd.xlane.f32.xlu2 %v1467_v34  ;;  %1307 = vadd.xlane.f32.xlu1 %v1241_v31  ;;  %v1436_v6 = vmul.f32 %v8744_v2, %v887_v50  ;;  %v7113_v31 = vld [vmem:[#allocation6 + $0x58] sm:$0xff] }
 0x11b   : > { %v7240_v40 = vpack.c.bf16 %v1048_v37, %v1047_v36  ;;  %1369 = vadd.xlane.f32.xlu0 %v1272_v38 }
 0x11d   : > { %7632 = vst [vmem:[#allocation2] sm:$0xff] %v7240_v40   ;;  %v7129_v40 = vld [vmem:[#allocation6 + $0xd8] sm:$0xff] }
 0x11e   : > { %v798_v42 = vpop.f32.mrf.mxu2 }
 0x11f   : > { %v1080_v44 = vadd.f32 %v8749_v9, %v798_v42  ;;  %v1274_v45 = vmul.f32 %v8741_v1, %v798_v42  ;;  %v967_v51 = vpop.f32.mrf.mxu3 }
 0x120   : > { %v721_v46 = vpop.f32.mrf.mxu0  ;;  %v1468_v58 = vmul.f32 %v8744_v2, %v967_v51 }
 0x121   : > { %v7320_v49 = vpack.c.bf16 %v1080_v44, %v1079_v43  ;;  %v1243_v52 = vmul.f32 %v8741_v1, %v721_v46  ;;  %v1049_v56 = vadd.f32 %v8749_v9, %v721_v46  ;;  %v890_v61 = vpop.f32.mrf.mxu1 }
 0x122   : > { %1373 = vadd.xlane.f32.xlu2 %v1274_v45  ;;  %1371 = vadd.xlane.f32.xlu1 %v1273_v47  ;;  %v1437_v63 = vmul.f32 %v8744_v2, %v890_v61 }
 0x123   : > { %7648 = vst [vmem:[#allocation2 + $0x58] sm:$0xff] %v7320_v49   ;;  %1501 = vadd.xlane.f32.xlu0 %v1435_v48  ;;  %760 = vmatmul.bf16.gmra.mxu0 %v7112_v60 }
 0x124   : > { %929 = vmatmul.bf16.gmra.mxu1 %v7112_v60  ;;  %v7130_v60 = vld [vmem:[#allocation6 + $0xe0] sm:$0xff] }
 0x125   : > { %840 = vmatmul.bf16.gmra.mxu2 %v7128_v10  ;;  %1009 = vmatmul.bf16.gmra.mxu3 %v7128_v10 }
 0x126   : > { %v801_v53 = vpop.f32.mrf.mxu2 }
 0x127   : > { %v1081_v62 = vadd.f32 %v8749_v9, %v801_v53  ;;  %v1275_v4 = vmul.f32 %v8741_v1, %v801_v53  ;;  %v970_v11 = vpop.f32.mrf.mxu3 }
 0x128   : > { %v723_v54 = vpop.f32.mrf.mxu0  ;;  %v1469_v13 = vmul.f32 %v8744_v2, %v970_v11 }
 0x129   : > { %v1050_v57 = vadd.f32 %v8749_v9, %v723_v54  ;;  %v892_v12 = vpop.f32.mrf.mxu1  ;;  %v1244_v16 = vmul.f32 %v8741_v1, %v723_v54 }
 0x12a   : > { %1309 = vadd.xlane.f32.xlu1 %v1242_v55  ;;  %1311 = vadd.xlane.f32.xlu2 %v1243_v52  ;;  %v1438_v18 = vmul.f32 %v8744_v2, %v892_v12 }
 0x12b   : > { %v7245_v59 = vpack.c.bf16 %v1050_v57, %v1049_v56  ;;  %1567 = vadd.xlane.f32.xlu0 %v1468_v58 }
 0x12d   : > { %7633 = vst [vmem:[#allocation2 + $0xd8] sm:$0xff] %v7245_v59  }
 0x12e   : > { %v803_v3 = vpop.f32.mrf.mxu2 }
 0x12f   : > { %v1082_v5 = vadd.f32 %v8749_v9, %v803_v3  ;;  %v972_v21 = vpop.f32.mrf.mxu3  ;;  %v1276_v26 = vmul.f32 %v8741_v1, %v803_v3 }
 0x130   : > { %v726_v7 = vpop.f32.mrf.mxu0  ;;  %v1470_v27 = vmul.f32 %v8744_v2, %v972_v21 }
 0x131   : > { %v7325_v8 = vpack.c.bf16 %v1082_v5, %v1081_v62  ;;  %v1051_v15 = vadd.f32 %v8749_v9, %v726_v7  ;;  %v1245_v24 = vmul.f32 %v8741_v1, %v726_v7  ;;  %v895_v30 = vpop.f32.mrf.mxu1  ;;  %v7114_v7 = vld [vmem:[#allocation6 + $0x60] sm:$0xff] }
 0x132   : > { %1503 = vadd.xlane.f32.xlu1 %v1436_v6  ;;  %1505 = vadd.xlane.f32.xlu2 %v1437_v63  ;;  %v1439_v32 = vmul.f32 %v8744_v2, %v895_v30 }
 0x133   : > { %1375 = vadd.xlane.f32.xlu0 %v1275_v4  ;;  %7649 = vst [vmem:[#allocation2 + $0x40] sm:$0xff] %v7325_v8   ;;  %765 = vmatmul.bf16.gmra.mxu0 %v7113_v31 }
 0x134   : > { %934 = vmatmul.bf16.gmra.mxu1 %v7113_v31 }
 0x135   : > { %845 = vmatmul.bf16.gmra.mxu2 %v7129_v40  ;;  %1014 = vmatmul.bf16.gmra.mxu3 %v7129_v40 }
 0x136   : > { %v806_v14 = vpop.f32.mrf.mxu2 }
 0x137   : > { %v1083_v22 = vadd.f32 %v8749_v9, %v806_v14  ;;  %v975_v33 = vpop.f32.mrf.mxu3  ;;  %v1277_v34 = vmul.f32 %v8741_v1, %v806_v14 }
 0x138   : > { %v728_v17 = vpop.f32.mrf.mxu0  ;;  %v1471_v36 = vmul.f32 %v8744_v2, %v975_v33 }
 0x139   : > { %v1052_v19 = vadd.f32 %v8749_v9, %v728_v17  ;;  %v897_v42 = vpop.f32.mrf.mxu1  ;;  %v1246_v47 = vmul.f32 %v8741_v1, %v728_v17 }
 0x13a   : > { %1569 = vadd.xlane.f32.xlu1 %v1469_v13  ;;  %1313 = vadd.xlane.f32.xlu2 %v1244_v16  ;;  %v1440_v46 = vmul.f32 %v8744_v2, %v897_v42 }
 0x13b   : > { %1507 = vadd.xlane.f32.xlu0 %v1438_v18  ;;  %v7250_v20 = vpack.c.bf16 %v1052_v19, %v1051_v15 }
 0x13d   : > { %7634 = vst [vmem:[#allocation2 + $0x18] sm:$0xff] %v7250_v20  }
 0x13e   : > { %v808_v23 = vpop.f32.mrf.mxu2 }
 0x13f   : > { %v1084_v25 = vadd.f32 %v8749_v9, %v808_v23  ;;  %v1278_v49 = vmul.f32 %v8741_v1, %v808_v23  ;;  %v977_v51 = vpop.f32.mrf.mxu3 }
 0x140   : > { %v731_v28 = vpop.f32.mrf.mxu0  ;;  %v1472_v57 = vmul.f32 %v8744_v2, %v977_v51 }
 0x141   : > { %v7330_v29 = vpack.c.bf16 %v1084_v25, %v1083_v22  ;;  %v1053_v37 = vadd.f32 %v8749_v9, %v731_v28  ;;  %v900_v52 = vpop.f32.mrf.mxu1  ;;  %v1247_v53 = vmul.f32 %v8741_v1, %v731_v28 }
 0x142   : > { %1377 = vadd.xlane.f32.xlu1 %v1276_v26  ;;  %1571 = vadd.xlane.f32.xlu2 %v1470_v27  ;;  %v1441_v55 = vmul.f32 %v8744_v2, %v900_v52  ;;  %v7115_v27 = vld [vmem:[#allocation6 + $0x68] sm:$0xff] }
 0x143   : > { %1315 = vadd.xlane.f32.xlu0 %v1245_v24  ;;  %7650 = vst [vmem:[#allocation2 + $0xc8] sm:$0xff] %v7330_v29   ;;  %770 = vmatmul.bf16.gmra.mxu0 %v7114_v7 }
 0x144   : > { %939 = vmatmul.bf16.gmra.mxu1 %v7114_v7 }
 0x145   : > { %850 = vmatmul.bf16.gmra.mxu2 %v7130_v60  ;;  %1019 = vmatmul.bf16.gmra.mxu3 %v7130_v60 }
 0x146   : > { %v811_v35 = vpop.f32.mrf.mxu2 }
 0x147   : > { %v1085_v43 = vadd.f32 %v8749_v9, %v811_v35  ;;  %v980_v62 = vpop.f32.mrf.mxu3  ;;  %v1279_v4 = vmul.f32 %v8741_v1, %v811_v35 }
 0x148   : > { %v733_v38 = vpop.f32.mrf.mxu0  ;;  %v1473_v3 = vmul.f32 %v8744_v2, %v980_v62 }
 0x149   : > { %v1054_v39 = vadd.f32 %v8749_v9, %v733_v38  ;;  %v1248_v10 = vmul.f32 %v8741_v1, %v733_v38  ;;  %v902_v12 = vpop.f32.mrf.mxu1 }
 0x14a   : > { %1509 = vadd.xlane.f32.xlu1 %v1439_v32  ;;  %1379 = vadd.xlane.f32.xlu2 %v1277_v34  ;;  %v1442_v16 = vmul.f32 %v8744_v2, %v902_v12  ;;  %v7131_v32 = vld [vmem:[#allocation6 + $0xe8] sm:$0xff] }
 0x14b   : > { %1573 = vadd.xlane.f32.xlu0 %v1471_v36  ;;  %v7255_v41 = vpack.c.bf16 %v1054_v39, %v1053_v37 }
 0x14d   : > { %7635 = vst [vmem:[#allocation2 + $0x50] sm:$0xff] %v7255_v41  }
 0x14e   : > { %v813_v44 = vpop.f32.mrf.mxu2 }
 0x14f   : > { %v1086_v45 = vadd.f32 %v8749_v9, %v813_v44  ;;  %v982_v13 = vpop.f32.mrf.mxu3  ;;  %v1280_v17 = vmul.f32 %v8741_v1, %v813_v44 }
 0x150   : > { %v736_v48 = vpop.f32.mrf.mxu0  ;;  %v1474_v19 = vmul.f32 %v8744_v2, %v982_v13 }
 0x151   : > { %v7335_v50 = vpack.c.bf16 %v1086_v45, %v1085_v43  ;;  %v1055_v56 = vadd.f32 %v8749_v9, %v736_v48  ;;  %v905_v22 = vpop.f32.mrf.mxu1  ;;  %v1249_v25 = vmul.f32 %v8741_v1, %v736_v48 }
 0x152   : > { %1511 = vadd.xlane.f32.xlu2 %v1440_v46  ;;  %1317 = vadd.xlane.f32.xlu1 %v1246_v47  ;;  %v1443_v24 = vmul.f32 %v8744_v2, %v905_v22 }
 0x153   : > { %1381 = vadd.xlane.f32.xlu0 %v1278_v49  ;;  %7651 = vst [vmem:[#allocation2 + $0xe0] sm:$0xff] %v7335_v50   ;;  %775 = vmatmul.bf16.gmra.mxu0 %v7115_v27 }
 0x154   : > { %944 = vmatmul.bf16.gmra.mxu1 %v7115_v27 }
 0x155   : > { %855 = vmatmul.bf16.gmra.mxu2 %v7131_v32  ;;  %1024 = vmatmul.bf16.gmra.mxu3 %v7131_v32 }
 0x156   : > { %v816_v54 = vpop.f32.mrf.mxu2 }
 0x157   : > { %v1087_v63 = vadd.f32 %v8749_v9, %v816_v54  ;;  %v1281_v28 = vmul.f32 %v8741_v1, %v816_v54  ;;  %v985_v33 = vpop.f32.mrf.mxu3 }
 0x158   : > { %v8804_v58 = vpop.f32.mrf.mxu0  ;;  %v1475_v35 = vmul.f32 %v8744_v2, %v985_v33 }
 0x159   : > { %v1056_v59 = vadd.f32 %v8749_v9, %v8804_v58  ;;  %v907_v34 = vpop.f32.mrf.mxu1  ;;  %v1250_v40 = vmul.f32 %v8741_v1, %v8804_v58 }
 0x15a   : > { %1575 = vadd.xlane.f32.xlu1 %v1472_v57  ;;  %1319 = vadd.xlane.f32.xlu2 %v1247_v53  ;;  %v1444_v42 = vmul.f32 %v8744_v2, %v907_v34 }
 0x15b   : > { %1513 = vadd.xlane.f32.xlu0 %v1441_v55  ;;  %v7260_v61 = vpack.c.bf16 %v1056_v59, %v1055_v56 }
 0x15d   : > { %7636 = vst [vmem:[#allocation2 + $0x68] sm:$0xff] %v7260_v61  }
 0x15e   : > { %v8811_v5 = vpop.f32.mrf.mxu2 }
 0x15f   : > { %v1088_v6 = vadd.f32 %v8749_v9, %v8811_v5  ;;  %v987_v46 = vpop.f32.mrf.mxu3  ;;  %v1282_v52 = vmul.f32 %v8741_v1, %v8811_v5 }
 0x160   : > { %v8815_v8 = vpop.f32.mrf.mxu0  ;;  %v1476_v51 = vmul.f32 %v8744_v2, %v987_v46 }
 0x161   : > { %v7340_v11 = vpack.c.bf16 %v1088_v6, %v1087_v63  ;;  %v1057_v15 = vadd.f32 %v8749_v9, %v8815_v8  ;;  %v1251_v49 = vmul.f32 %v8741_v1, %v8815_v8  ;;  %v910_v54 = vpop.f32.mrf.mxu1 }
 0x162   : > { %1383 = vadd.xlane.f32.xlu1 %v1279_v4  ;;  %1577 = vadd.xlane.f32.xlu2 %v1473_v3  ;;  %v1445_v58 = vmul.f32 %v8744_v2, %v910_v54  ;;  %v7116_v3 = vld [vmem:[#allocation6 + $0x70] sm:$0xff] }
 0x163   : > { %1321 = vadd.xlane.f32.xlu0 %v1248_v10  ;;  %7652 = vst [vmem:[#allocation2 + $0x90] sm:$0xff] %v7340_v11   ;;  %780 = vmatmul.bf16.gmra.mxu0 %v7116_v3  ;;  %v7132_v4 = vld [vmem:[#allocation6 + $0xf0] sm:$0xff] }
 0x164   : > { %949 = vmatmul.bf16.gmra.mxu1 %v7116_v3 }
 0x165   : > { %860 = vmatmul.bf16.gmra.mxu2 %v7132_v4  ;;  %1029 = vmatmul.bf16.gmra.mxu3 %v7132_v4 }
 0x166   : > { %v8818_v14 = vpop.f32.mrf.mxu2 }
 0x167   : > { %v1089_v23 = vadd.f32 %v8749_v9, %v8818_v14  ;;  %v990_v59 = vpop.f32.mrf.mxu3  ;;  %v1283_v61 = vmul.f32 %v8741_v1, %v8818_v14 }
 0x168   : > { %v8824_v18 = vpop.f32.mrf.mxu0  ;;  %v1477_v62 = vmul.f32 %v8744_v2, %v990_v59 }
 0x169   : > { %v1058_v20 = vadd.f32 %v8749_v9, %v8824_v18  ;;  %v912_v5 = vpop.f32.mrf.mxu1  ;;  %v1252_v13 = vmul.f32 %v8741_v1, %v8824_v18 }
 0x16a   : > { %1515 = vadd.xlane.f32.xlu1 %v1442_v16  ;;  %1385 = vadd.xlane.f32.xlu2 %v1280_v17  ;;  %v1446_v12 = vmul.f32 %v8744_v2, %v912_v5 }
 0x16b   : > { %1579 = vadd.xlane.f32.xlu0 %v1474_v19  ;;  %v7265_v21 = vpack.c.bf16 %v1058_v20, %v1057_v15 }
 0x16d   : > { %7637 = vst [vmem:[#allocation2 + $0x30] sm:$0xff] %v7265_v21  }
 0x16e   : > { %v8833_v26 = vpop.f32.mrf.mxu2 }
 0x16f   : > { %v1090_v29 = vadd.f32 %v8749_v9, %v8833_v26  ;;  %v1284_v15 = vmul.f32 %v8741_v1, %v8833_v26  ;;  %v992_v17 = vpop.f32.mrf.mxu3 }
 0x170   : > { %v8838_v30 = vpop.f32.mrf.mxu0  ;;  %v1478_v27 = vmul.f32 %v8744_v2, %v992_v17 }
 0x171   : > { %v7345_v31 = vpack.c.bf16 %v1090_v29, %v1089_v23  ;;  %v1059_v38 = vadd.f32 %v8749_v9, %v8838_v30  ;;  %v915_v22 = vpop.f32.mrf.mxu1  ;;  %v1253_v23 = vmul.f32 %v8741_v1, %v8838_v30 }
 0x172   : > { %1517 = vadd.xlane.f32.xlu2 %v1443_v24  ;;  %1323 = vadd.xlane.f32.xlu1 %v1249_v25  ;;  %v1447_v25 = vmul.f32 %v8744_v2, %v915_v22 }
 0x173   : > { %1387 = vadd.xlane.f32.xlu0 %v1281_v28  ;;  %7653 = vst [vmem:[#allocation2 + $0x70] sm:$0xff] %v7345_v31   ;;  %v7133_v31 = vld [vmem:[#allocation6 + $0xf8] sm:$0xff] }
 0x175   : > { %865 = vmatmul.bf16.gmra.mxu2 %v7133_v31  ;;  %1034 = vmatmul.bf16.gmra.mxu3 %v7133_v31 }
 0x176   : > { %v8841_v36 = vpop.xlane.xlu0 %1303  ;;  %v8845_v39 = vpop.f32.mrf.mxu2 }
 0x177   : > { %v1498_v37 = vpop.xlane.xlu1 %1497  ;;  %v1091_v48 = vadd.f32 %v8749_v9, %v8845_v39  ;;  %v995_v30 = vpop.f32.mrf.mxu3 }
 0x178   : > { %1773 = vst.msk [vmem:[#allocation5] sm:$0xff] %vm1772_vm1, %v1498_v37  ;;  %v8850_v41 = vpop.f32.mrf.mxu0  ;;  %v1479_v34 = vmul.f32 %v8744_v2, %v995_v30  ;;  %v1285_v37 = vmul.f32 %v8741_v1, %v8845_v39 }
 0x179   : > { %v1060_v43 = vadd.f32 %v8749_v9, %v8850_v41 }
 0x17a   : > { %1581 = vadd.xlane.f32.xlu1 %v1475_v35  ;;  %1325 = vadd.xlane.f32.xlu2 %v1250_v40 }
 0x17b   : > { %1519 = vadd.xlane.f32.xlu0 %v1444_v42  ;;  %v7270_v44 = vpack.c.bf16 %v1060_v43, %v1059_v38  ;;  %v7117_v42 = vld [vmem:[#allocation6 + $0x78] sm:$0xff]  ;;  %v1254_v43 = vmul.f32 %v8741_v1, %v8850_v41 }
 0x17c   : > { %v8855_v45 = vpop.xlane.xlu2 %1367  ;;  %954 = vmatmul.bf16.gmra.mxu1 %v7117_v42  ;;  %785 = vmatmul.bf16.gmra.mxu0 %v7117_v42 }
 0x17d   : > { %7638 = vst [vmem:[#allocation2 + $0x48] sm:$0xff] %v7270_v44   ;;  %v917_v44 = vpop.f32.mrf.mxu1 }
 0x17e   : > { %v1562_v47 = vpop.xlane.xlu0 %1561  ;;  %v8862_v50 = vpop.f32.mrf.mxu2 }
 0x17f   : > { %1805 = vst.msk [vmem:[#allocation5 + $0x100] sm:$0xff] %vm1772_vm1, %v1562_v47  ;;  %v1092_v53 = vadd.f32 %v8749_v9, %v8862_v50 }
 0x180   : > { %v8877_v63 = vpop.f32.mrf.mxu0 }
 0x181   : > { %v7350_v55 = vpack.c.bf16 %v1092_v53, %v1091_v48  ;;  %v1061_v10 = vadd.f32 %v8749_v9, %v8877_v63  ;;  %v997_v48 = vpop.f32.mrf.mxu3  ;;  %v1286_v53 = vmul.f32 %v8741_v1, %v8862_v50  ;;  %v1255_v5 = vmul.f32 %v8741_v1, %v8877_v63 }
 0x182   : > { %1389 = vadd.xlane.f32.xlu1 %v1282_v52  ;;  %1583 = vadd.xlane.f32.xlu2 %v1476_v51  ;;  %v1448_v52 = vmul.f32 %v8744_v2, %v917_v44 }
 0x183   : > { %1327 = vadd.xlane.f32.xlu0 %v1251_v49  ;;  %7654 = vst [vmem:[#allocation2 + $0xc0] sm:$0xff] %v7350_v55  }
 0x184   : > { %v1500_v56 = vpop.xlane.xlu2 %1499 }
 0x185   : > { %v1564_v57 = vpop.xlane.xlu1 %1563  ;;  %1774 = vst.msk [vmem:[#allocation5 + $0x8] sm:$0xff] %vm1772_vm1, %v1500_v56  ;;  %v1480_v56 = vmul.f32 %v8744_v2, %v997_v48 }
 0x186   : > { %1806 = vst.msk [vmem:[#allocation5 + $0x108] sm:$0xff] %vm1772_vm1, %v1564_v57  ;;  %v8872_v60 = vpop.xlane.xlu0 %1305 }
 0x188   : > { %v8886_v11 = vpop.f32.mrf.mxu2  ;;  %v8891_v14 = vpop.f32.mrf.mxu0 }
 0x189   : > { %v1062_v16 = vadd.f32 %v8749_v9, %v8891_v14  ;;  %v1093_v24 = vadd.f32 %v8749_v9, %v8886_v11  ;;  %v1256_v22 = vmul.f32 %v8741_v1, %v8891_v14 }
 0x18a   : > { %1521 = vadd.xlane.f32.xlu1 %v1445_v58  ;;  %1391 = vadd.xlane.f32.xlu2 %v1283_v61  ;;  %v920_v61 = vpop.f32.mrf.mxu1 }
 0x18b   : > { %1585 = vadd.xlane.f32.xlu0 %v1477_v62  ;;  %v7275_v19 = vpack.c.bf16 %v1062_v16, %v1061_v10  ;;  %v1449_v50 = vmul.f32 %v8744_v2, %v920_v61 }
 0x18d   : > { %v1566_v6 = vpop.xlane.xlu2 %1565  ;;  %v8879_v7 = vpop.xlane.xlu1 %1307  ;;  %7639 = vst [vmem:[#allocation2 + $0x80] sm:$0xff] %v7275_v19  }
 0x18e   : > { %1807 = vst.msk [vmem:[#allocation5 + $0x110] sm:$0xff] %vm1772_vm1, %v1566_v6  ;;  %v8882_v8 = vpop.xlane.xlu0 %1369  ;;  %v1287_v6 = vmul.f32 %v8741_v1, %v8886_v11 }
 0x190   : > { %v8907_v26 = vpop.f32.mrf.mxu2  ;;  %v8922_v40 = vpop.f32.mrf.mxu0 }
 0x191   : > { %v1094_v28 = vadd.f32 %v8749_v9, %v8907_v26  ;;  %v1063_v41 = vadd.f32 %v8749_v9, %v8922_v40  ;;  %v1257_v30 = vmul.f32 %v8741_v1, %v8922_v40 }
 0x192   : > { %1523 = vadd.xlane.f32.xlu2 %v1446_v12  ;;  %1329 = vadd.xlane.f32.xlu1 %v1252_v13  ;;  %v1000_v12 = vpop.f32.mrf.mxu3  ;;  %v922_v16 = vpop.f32.mrf.mxu1 }
 0x193   : > { %1393 = vadd.xlane.f32.xlu0 %v1284_v15  ;;  %v7355_v29 = vpack.c.bf16 %v1094_v28, %v1093_v24  ;;  %v1481_v17 = vmul.f32 %v8744_v2, %v1000_v12 }
 0x195   : > { %v8897_v20 = vpop.xlane.xlu2 %1373  ;;  %v8899_v21 = vpop.xlane.xlu1 %1371  ;;  %7655 = vst [vmem:[#allocation2 + $0xa8] sm:$0xff] %v7355_v29  }
 0x196   : > { %v1502_v18 = vpop.xlane.xlu0 %1501 }
 0x197   : > { %1775 = vst.msk [vmem:[#allocation5 + $0x10] sm:$0xff] %vm1772_vm1, %v1502_v18 }
 0x198   : > { %v8920_v38 = vpop.f32.mrf.mxu2  ;;  %v8941_v55 = vpop.f32.mrf.mxu0 }
 0x199   : > { %v1095_v49 = vadd.f32 %v8749_v9, %v8920_v38  ;;  %v1064_v57 = vadd.f32 %v8749_v9, %v8941_v55  ;;  %v1258_v61 = vmul.f32 %v8741_v1, %v8941_v55 }
 0x19a   : > { %1587 = vadd.xlane.f32.xlu1 %v1478_v27  ;;  %1331 = vadd.xlane.f32.xlu2 %v1253_v23  ;;  %v1450_v23 = vmul.f32 %v8744_v2, %v922_v16  ;;  %v1002_v27 = vpop.f32.mrf.mxu3 }
 0x19b   : > { %1525 = vadd.xlane.f32.xlu0 %v1447_v25  ;;  %v7280_v59 = vpack.c.bf16 %v1064_v57, %v1063_v41 }
 0x19d   : > { %v8912_v32 = vpop.xlane.xlu1 %1309  ;;  %v8914_v33 = vpop.xlane.xlu2 %1311  ;;  %7640 = vst [vmem:[#allocation2 + $0x88] sm:$0xff] %v7280_v59  }
 0x19e   : > { %v1568_v35 = vpop.xlane.xlu0 %1567 }
 0x19f   : > { %1808 = vst.msk [vmem:[#allocation5 + $0x118] sm:$0xff] %vm1772_vm1, %v1568_v35  ;;  %v1482_v35 = vmul.f32 %v8744_v2, %v1002_v27 }
 0x1a0   : > { %v8934_v51 = vpop.f32.mrf.mxu2  ;;  %v8955_v10 = vpop.f32.mrf.mxu0 }
 0x1a1   : > { %v1096_v54 = vadd.f32 %v8749_v9, %v8934_v51  ;;  %v1065_v19 = vadd.f32 %v8749_v9, %v8955_v10 }
 0x1a2   : > { %1395 = vadd.xlane.f32.xlu1 %v1285_v37  ;;  %1589 = vadd.xlane.f32.xlu2 %v1479_v34  ;;  %v1288_v37 = vmul.f32 %v8741_v1, %v8907_v26  ;;  %v1005_v48 = vpop.f32.mrf.mxu3  ;;  %v1289_v26 = vmul.f32 %v8741_v1, %v8920_v38 }
 0x1a3   : > { %1333 = vadd.xlane.f32.xlu0 %v1254_v43  ;;  %v7360_v58 = vpack.c.bf16 %v1096_v54, %v1095_v49  ;;  %v925_v43 = vpop.f32.mrf.mxu1  ;;  %v1483_v41 = vmul.f32 %v8744_v2, %v1005_v48 }
 0x1a4   : > { %v1451_v40 = vmul.f32 %v8744_v2, %v925_v43 }
 0x1a5   : > { %v1504_v46 = vpop.xlane.xlu1 %1503  ;;  %v1506_v47 = vpop.xlane.xlu2 %1505  ;;  %7656 = vst [vmem:[#allocation2 + $0xd0] sm:$0xff] %v7360_v58  }
 0x1a6   : > { %1776 = vst.msk [vmem:[#allocation5 + $0x18] sm:$0xff] %vm1772_vm1, %v1504_v46  ;;  %v8927_v39 = vpop.xlane.xlu0 %1375 }
 0x1a7   : > { %1777 = vst.msk [vmem:[#allocation5 + $0x20] sm:$0xff] %vm1772_vm1, %v1506_v47 }
 0x1a8   : > { %v8965_v11 = vpop.f32.mrf.mxu2  ;;  %v8969_v18 = vpop.f32.mrf.mxu0 }
 0x1a9   : > { %v1066_v24 = vadd.f32 %v8749_v9, %v8969_v18  ;;  %v1097_v14 = vadd.f32 %v8749_v9, %v8965_v11 }
 0x1aa   : > { %1527 = vadd.xlane.f32.xlu1 %v1448_v52  ;;  %1397 = vadd.xlane.f32.xlu2 %v1286_v53 }
 0x1ab   : > { %1591 = vadd.xlane.f32.xlu0 %v1480_v56  ;;  %v7285_v25 = vpack.c.bf16 %v1066_v24, %v1065_v19  ;;  %v927_v53 = vpop.f32.mrf.mxu1 }
 0x1ac   : > { %v1452_v59 = vmul.f32 %v8744_v2, %v927_v53 }
 0x1ad   : > { %v1570_v62 = vpop.xlane.xlu1 %1569  ;;  %v8946_v3 = vpop.xlane.xlu2 %1313  ;;  %7641 = vst [vmem:[#allocation2 + $0xe8] sm:$0xff] %v7285_v25  }
 0x1ae   : > { %1809 = vst.msk [vmem:[#allocation5 + $0x120] sm:$0xff] %vm1772_vm1, %v1570_v62  ;;  %v1508_v4 = vpop.xlane.xlu0 %1507 }
 0x1af   : > { %1778 = vst.msk [vmem:[#allocation5 + $0x28] sm:$0xff] %vm1772_vm1, %v1508_v4 }
 0x1b0   : > { %v8982_v34 = vpop.f32.mrf.mxu2  ;;  %v8998_v52 = vpop.f32.mrf.mxu0 }
 0x1b1   : > { %v1098_v42 = vadd.f32 %v8749_v9, %v8982_v34  ;;  %v1067_v58 = vadd.f32 %v8749_v9, %v8998_v52  ;;  %v1292_v53 = vmul.f32 %v8741_v1, %v8982_v34 }
 0x1b2   : > { %1529 = vadd.xlane.f32.xlu2 %v1449_v50  ;;  %1335 = vadd.xlane.f32.xlu1 %v1255_v5  ;;  %v1290_v50 = vmul.f32 %v8741_v1, %v8934_v51  ;;  %v1007_v5 = vpop.f32.mrf.mxu3  ;;  %v1259_v51 = vmul.f32 %v8741_v1, %v8955_v10 }
 0x1b3   : > { %1399 = vadd.xlane.f32.xlu0 %v1287_v6  ;;  %v7365_v44 = vpack.c.bf16 %v1098_v42, %v1097_v14  ;;  %v930_v55 = vpop.f32.mrf.mxu1  ;;  %v1260_v42 = vmul.f32 %v8741_v1, %v8969_v18 }
 0x1b4   : > { %v1453_v19 = vmul.f32 %v8744_v2, %v930_v55  ;;  %v1261_v55 = vmul.f32 %v8741_v1, %v8998_v52 }
 0x1b5   : > { %v8957_v13 = vpop.xlane.xlu1 %1377  ;;  %v1572_v15 = vpop.xlane.xlu2 %1571  ;;  %7657 = vst [vmem:[#allocation2 + $0x10] sm:$0xff] %v7365_v44  }
 0x1b6   : > { %1810 = vst.msk [vmem:[#allocation5 + $0x128] sm:$0xff] %vm1772_vm1, %v1572_v15  ;;  %v8961_v63 = vpop.xlane.xlu0 %1315 }
 0x1b8   : > { %v9006_v38 = vpop.f32.mrf.mxu2  ;;  %v9011_v62 = vpop.f32.mrf.mxu0 }
 0x1b9   : > { %v1068_v4 = vadd.f32 %v8749_v9, %v9011_v62 }
 0x1ba   : > { %1593 = vadd.xlane.f32.xlu1 %v1481_v17  ;;  %1337 = vadd.xlane.f32.xlu2 %v1256_v22  ;;  %v1099_v17 = vadd.f32 %v8749_v9, %v9006_v38  ;;  %v1010_v27 = vpop.f32.mrf.mxu3 }
 0x1bb   : > { %1531 = vadd.xlane.f32.xlu0 %v1450_v23  ;;  %v7290_v6 = vpack.c.bf16 %v1068_v4, %v1067_v58  ;;  %v1484_v23 = vmul.f32 %v8744_v2, %v1007_v5  ;;  %v932_v43 = vpop.f32.mrf.mxu1 }
 0x1bc   : > { %v1454_v18 = vmul.f32 %v8744_v2, %v932_v43 }
 0x1bd   : > { %v1510_v28 = vpop.xlane.xlu1 %1509  ;;  %v8974_v29 = vpop.xlane.xlu2 %1379  ;;  %7642 = vst [vmem:[#allocation2 + $0xb8] sm:$0xff] %v7290_v6  }
 0x1be   : > { %1779 = vst.msk [vmem:[#allocation5 + $0x30] sm:$0xff] %vm1772_vm1, %v1510_v28  ;;  %v1574_v31 = vpop.xlane.xlu0 %1573 }
 0x1bf   : > { %1811 = vst.msk [vmem:[#allocation5 + $0x130] sm:$0xff] %vm1772_vm1, %v1574_v31  ;;  %v1485_v31 = vmul.f32 %v8744_v2, %v1010_v27 }
 0x1c0   : > { %v9027_v22 = vpop.f32.mrf.mxu2 }
 0x1c1   : > { %v1100_v24 = vadd.f32 %v8749_v9, %v9027_v22 }
 0x1c2   : > { %1401 = vadd.xlane.f32.xlu1 %v1288_v37  ;;  %1595 = vadd.xlane.f32.xlu2 %v1482_v35  ;;  %v9041_v37 = vpop.f32.mrf.mxu0 }
 0x1c3   : > { %1339 = vadd.xlane.f32.xlu0 %v1257_v30  ;;  %v7370_v25 = vpack.c.bf16 %v1100_v24, %v1099_v17  ;;  %v1291_v30 = vmul.f32 %v8741_v1, %v8965_v11  ;;  %v935_v4 = vpop.f32.mrf.mxu1 }
 0x1c4   : > { %v1455_v34 = vmul.f32 %v8744_v2, %v935_v4 }
 0x1c5   : > { %v1512_v46 = vpop.xlane.xlu2 %1511  ;;  %v8989_v47 = vpop.xlane.xlu1 %1317  ;;  %7658 = vst [vmem:[#allocation2 + $0x28] sm:$0xff] %v7370_v25  }
 0x1c6   : > { %1780 = vst.msk [vmem:[#allocation5 + $0x38] sm:$0xff] %vm1772_vm1, %v1512_v46  ;;  %v8993_v49 = vpop.xlane.xlu0 %1381 }
 0x1c8   : > { %v9039_v35 = vpop.f32.mrf.mxu2 }
 0x1c9   : > { %v1101_v48 = vadd.f32 %v8749_v9, %v9039_v35 }
 0x1ca   : > { %1533 = vadd.xlane.f32.xlu1 %v1451_v40  ;;  %1403 = vadd.xlane.f32.xlu2 %v1289_v26  ;;  %v1012_v40 = vpop.f32.mrf.mxu3  ;;  %v1069_v26 = vadd.f32 %v8749_v9, %v9041_v37 }
 0x1cb   : > { %1597 = vadd.xlane.f32.xlu0 %v1483_v41  ;;  %v1486_v58 = vmul.f32 %v8744_v2, %v1012_v40  ;;  %v937_v25 = vpop.f32.mrf.mxu1 }
 0x1cd   : > { %v1576_v54 = vpop.xlane.xlu1 %1575  ;;  %v9000_v56 = vpop.xlane.xlu2 %1319 }
 0x1ce   : > { %1812 = vst.msk [vmem:[#allocation5 + $0x138] sm:$0xff] %vm1772_vm1, %v1576_v54  ;;  %v1514_v57 = vpop.xlane.xlu0 %1513 }
 0x1cf   : > { %1781 = vst.msk [vmem:[#allocation5 + $0x40] sm:$0xff] %vm1772_vm1, %v1514_v57  ;;  %v9061_v57 = vpop.f32.mrf.mxu0 }
 0x1d0   : > { %v9054_v41 = vpop.f32.mrf.mxu2 }
 0x1d1   : > { %v1102_v54 = vadd.f32 %v8749_v9, %v9054_v41 }
 0x1d2   : > { %1535 = vadd.xlane.f32.xlu2 %v1452_v59  ;;  %1341 = vadd.xlane.f32.xlu1 %v1258_v61  ;;  %v1070_v59 = vadd.f32 %v8749_v9, %v9061_v57 }
 0x1d3   : > { %1405 = vadd.xlane.f32.xlu0 %v1290_v50  ;;  %v7375_v61 = vpack.c.bf16 %v1102_v54, %v1101_v48 }
 0x1d4   : > { %v7295_v50 = vpack.c.bf16 %v1070_v59, %v1069_v26 }
 0x1d5   : > { %v9017_v12 = vpop.xlane.xlu1 %1383  ;;  %v1578_v15 = vpop.xlane.xlu2 %1577  ;;  %7659 = vst [vmem:[#allocation2 + $0xa0] sm:$0xff] %v7375_v61  }
 0x1d6   : > { %1813 = vst.msk [vmem:[#allocation5 + $0x140] sm:$0xff] %vm1772_vm1, %v1578_v15  ;;  %v9020_v16 = vpop.xlane.xlu0 %1321  ;;  %v940_v61 = vpop.f32.mrf.mxu1 }
 0x1d7   : > { %7643 = vst [vmem:[#allocation2 + $0x60] sm:$0xff] %v7295_v50   ;;  %v9075_v17 = vpop.f32.mrf.mxu0 }
 0x1da   : > { %1599 = vadd.xlane.f32.xlu1 %v1484_v23  ;;  %1343 = vadd.xlane.f32.xlu2 %v1259_v51  ;;  %v1293_v51 = vmul.f32 %v8741_v1, %v9006_v38  ;;  %v1071_v1 = vadd.f32 %v8749_v9, %v9075_v17  ;;  %v9085_v38 = vpop.f32.mrf.mxu2 }
 0x1db   : > { %1537 = vadd.xlane.f32.xlu0 %v1453_v19  ;;  %v1015_v19 = vpop.f32.mrf.mxu3  ;;  %v1103_v26 = vadd.f32 %v8749_v9, %v9085_v38 }
 0x1dc   : > { %v1487_v27 = vmul.f32 %v8744_v2, %v1015_v19 }
 0x1dd   : > { %v1516_v28 = vpop.xlane.xlu1 %1515  ;;  %v9032_v10 = vpop.xlane.xlu2 %1385 }
 0x1de   : > { %1782 = vst.msk [vmem:[#allocation5 + $0x48] sm:$0xff] %vm1772_vm1, %v1516_v28  ;;  %v1580_v14 = vpop.xlane.xlu0 %1579  ;;  %v9088_v28 = vld [vmem:[%s8704_s14] ss:$0 sm:$0xff]  ;;  %v942_v19 = vpop.f32.mrf.mxu1 }
 0x1df   : > { %1814 = vst.msk [vmem:[#allocation5 + $0x148] sm:$0xff] %vm1772_vm1, %v1580_v14  ;;  %v9092_v14 = vpop.f32.mrf.mxu0 }
 0x1e2   : > { %1407 = vadd.xlane.f32.xlu1 %v1291_v30  ;;  %1601 = vadd.xlane.f32.xlu2 %v1485_v31  ;;  %v1262_v31 = vmul.f32 %v9088_v28, %v9011_v62  ;;  %v9095_v30 = vld [vmem:[%s8704_s14 + $0x1] ss:$0 sm:$0xff] }
 0x1e3   : > { %1345 = vadd.xlane.f32.xlu0 %v1260_v42  ;;  %v1456_v2 = vmul.f32 %v9095_v30, %v937_v25  ;;  %v1072_v42 = vadd.f32 %v8749_v9, %v9092_v14 }
 0x1e5   : > { %v1518_v44 = vpop.xlane.xlu2 %1517  ;;  %v9045_v46 = vpop.xlane.xlu1 %1323  ;;  %v7300_v43 = vpack.c.bf16 %v1072_v42, %v1071_v1 }
 0x1e6   : > { %1783 = vst.msk [vmem:[#allocation5 + $0x50] sm:$0xff] %vm1772_vm1, %v1518_v44  ;;  %v9048_v11 = vpop.xlane.xlu0 %1387  ;;  %v1017_v44 = vpop.f32.mrf.mxu3 }
 0x1e7   : > { %7644 = vst [vmem:[#allocation2 + $0xf0] sm:$0xff] %v7300_v43   ;;  %v1488_v54 = vmul.f32 %v9095_v30, %v1017_v44  ;;  %v1296_v43 = vmul.f32 %v9088_v28, %v9054_v41  ;;  %v1265_v41 = vmul.f32 %v9088_v28, %v9075_v17 }
 0x1ea   : > { %1539 = vadd.xlane.f32.xlu1 %v1454_v18  ;;  %1409 = vadd.xlane.f32.xlu2 %v1292_v53  ;;  %v1263_v18 = vmul.f32 %v9088_v28, %v9041_v37  ;;  %v9108_v53 = vpop.f32.mrf.mxu2  ;;  %v1457_v37 = vmul.f32 %v9095_v30, %v940_v61 }
 0x1eb   : > { %1603 = vadd.xlane.f32.xlu0 %v1486_v58  ;;  %v1294_v58 = vmul.f32 %v9088_v28, %v9027_v22  ;;  %v1104_v59 = vadd.f32 %v8749_v9, %v9108_v53  ;;  %v1295_v22 = vmul.f32 %v9088_v28, %v9039_v35 }
 0x1ed   : > { %v1582_v5 = vpop.xlane.xlu1 %1581  ;;  %v9066_v6 = vpop.xlane.xlu2 %1325  ;;  %v7380_v50 = vpack.c.bf16 %v1104_v59, %v1103_v26 }
 0x1ee   : > { %1815 = vst.msk [vmem:[#allocation5 + $0x150] sm:$0xff] %vm1772_vm1, %v1582_v5  ;;  %v1520_v15 = vpop.xlane.xlu0 %1519 }
 0x1ef   : > { %1784 = vst.msk [vmem:[#allocation5 + $0x58] sm:$0xff] %vm1772_vm1, %v1520_v15 }
 0x1f0   : > { %7660 = vst [vmem:[#allocation2 + $0xf8] sm:$0xff] %v7380_v50  }
 0x1f2   : > { %1541 = vadd.xlane.f32.xlu2 %v1455_v34  ;;  %1347 = vadd.xlane.f32.xlu1 %v1261_v55  ;;  %v1020_v34 = vpop.f32.mrf.mxu3  ;;  %v9132_v35 = vpop.f32.mrf.mxu2 }
 0x1f3   : > { %1411 = vadd.xlane.f32.xlu0 %v1293_v51  ;;  %v1489_v55 = vmul.f32 %v9095_v30, %v1020_v34  ;;  %v9124_v51 = vpop.f32.mrf.mxu0 }
 0x1f4   : > { %v1073_v1 = vadd.f32 %v8749_v9, %v9124_v51 }
 0x1f5   : > { %v9077_v23 = vpop.xlane.xlu1 %1389  ;;  %v1584_v24 = vpop.xlane.xlu2 %1583 }
 0x1f6   : > { %1816 = vst.msk [vmem:[#allocation5 + $0x158] sm:$0xff] %vm1772_vm1, %v1584_v24  ;;  %v9081_v52 = vpop.xlane.xlu0 %1327 }
 0x1fa   : > { %1605 = vadd.xlane.f32.xlu1 %v1487_v27  ;;  %1349 = vadd.xlane.f32.xlu2 %v1262_v31  ;;  %v1458_v31 = vmul.f32 %v9095_v30, %v942_v19  ;;  %v9153_v61 = vpop.f32.mrf.mxu2 }
 0x1fb   : > { %1543 = vadd.xlane.f32.xlu0 %v1456_v2  ;;  %v1264_v2 = vmul.f32 %v9088_v28, %v9061_v57  ;;  %v9137_v42 = vpop.f32.mrf.mxu0  ;;  %v945_v57 = vpop.f32.mrf.mxu1 }
 0x1fc   : > { %v1074_v44 = vadd.f32 %v8749_v9, %v9137_v42  ;;  %v1459_v59 = vmul.f32 %v9095_v30, %v945_v57  ;;  %v1298_v57 = vmul.f32 %v9088_v28, %v9108_v53  ;;  %v1267_v53 = vmul.f32 %v9088_v28, %v9124_v51 }
 0x1fd   : > { %v1522_v40 = vpop.xlane.xlu1 %1521  ;;  %v9100_v48 = vpop.xlane.xlu2 %1391 }
 0x1fe   : > { %1785 = vst.msk [vmem:[#allocation5 + $0x60] sm:$0xff] %vm1772_vm1, %v1522_v40  ;;  %v1586_v62 = vpop.xlane.xlu0 %1585  ;;  %v1022_v40 = vpop.f32.mrf.mxu3 }
 0x1ff   : > { %1817 = vst.msk [vmem:[#allocation5 + $0x160] sm:$0xff] %vm1772_vm1, %v1586_v62  ;;  %v7305_v62 = vpack.c.bf16 %v1074_v44, %v1073_v1  ;;  %v1490_v50 = vmul.f32 %v9095_v30, %v1022_v40  ;;  %v1266_v1 = vmul.f32 %v9088_v28, %v9092_v14 }
 0x201   : > { %7645 = vst [vmem:[#allocation2 + $0x8] sm:$0xff] %v7305_v62  }
 0x202   : > { %1413 = vadd.xlane.f32.xlu1 %v1294_v58  ;;  %1607 = vadd.xlane.f32.xlu2 %v1488_v54  ;;  %v1105_v58 = vadd.f32 %v8749_v9, %v9132_v35 }
 0x203   : > { %1351 = vadd.xlane.f32.xlu0 %v1263_v18  ;;  %v786_v62 = vpop.f32.mrf.mxu0 }
 0x205   : > { %v1524_v4 = vpop.xlane.xlu2 %1523  ;;  %v9115_v5 = vpop.xlane.xlu1 %1329 }
 0x206   : > { %1786 = vst.msk [vmem:[#allocation5 + $0x68] sm:$0xff] %vm1772_vm1, %v1524_v4  ;;  %v9119_v15 = vpop.xlane.xlu0 %1393  ;;  %v1106_v4 = vadd.f32 %v8749_v9, %v9153_v61  ;;  %v1025_v34 = vpop.f32.mrf.mxu3 }
 0x20a   : > { %1545 = vadd.xlane.f32.xlu1 %v1457_v37  ;;  %1415 = vadd.xlane.f32.xlu2 %v1295_v22  ;;  %v7385_v37 = vpack.c.bf16 %v1106_v4, %v1105_v58 }
 0x20b   : > { %1609 = vadd.xlane.f32.xlu0 %v1489_v55  ;;  %v1491_v55 = vmul.f32 %v9095_v30, %v1025_v34 }
 0x20c   : > { %7661 = vst [vmem:[#allocation2 + $0x20] sm:$0xff] %v7385_v37  }
 0x20d   : > { %v1588_v24 = vpop.xlane.xlu1 %1587  ;;  %v9126_v25 = vpop.xlane.xlu2 %1331 }
 0x20e   : > { %1818 = vst.msk [vmem:[#allocation5 + $0x168] sm:$0xff] %vm1772_vm1, %v1588_v24  ;;  %v1526_v27 = vpop.xlane.xlu0 %1525  ;;  %v1297_v24 = vmul.f32 %v9088_v28, %v9085_v38  ;;  %v1027_v44 = vpop.f32.mrf.mxu3 }
 0x20f   : > { %1787 = vst.msk [vmem:[#allocation5 + $0x70] sm:$0xff] %vm1772_vm1, %v1526_v27  ;;  %v9165_v27 = vpop.f32.mrf.mxu2  ;;  %v1492_v58 = vmul.f32 %v9095_v30, %v1027_v44 }
 0x210   : > { %v1107_v38 = vadd.f32 %v8749_v9, %v9165_v27 }
 0x212   : > { %1547 = vadd.xlane.f32.xlu2 %v1458_v31  ;;  %1353 = vadd.xlane.f32.xlu1 %v1264_v2  ;;  %v947_v31 = vpop.f32.mrf.mxu1 }
 0x213   : > { %1417 = vadd.xlane.f32.xlu0 %v1296_v43  ;;  %v1460_v14 = vmul.f32 %v9095_v30, %v947_v31 }
 0x215   : > { %v9143_v26 = vpop.xlane.xlu1 %1395  ;;  %v1590_v18 = vpop.xlane.xlu2 %1589 }
 0x216   : > { %1819 = vst.msk [vmem:[#allocation5 + $0x170] sm:$0xff] %vm1772_vm1, %v1590_v18  ;;  %v9146_v54 = vpop.xlane.xlu0 %1333  ;;  %v1030_v31 = vpop.f32.mrf.mxu3 }
 0x217   : > { %v9176_v18 = vpop.f32.mrf.mxu2 }
 0x21a   : > { %1611 = vadd.xlane.f32.xlu1 %v1490_v50  ;;  %1355 = vadd.xlane.f32.xlu2 %v1265_v41  ;;  %v1108_v41 = vadd.f32 %v8749_v9, %v9176_v18  ;;  %v950_v50 = vpop.f32.mrf.mxu1 }
 0x21b   : > { %1549 = vadd.xlane.f32.xlu0 %v1459_v59  ;;  %v1461_v34 = vmul.f32 %v9095_v30, %v950_v50 }
 0x21c   : > { %v7390_v59 = vpack.c.bf16 %v1108_v41, %v1107_v38 }
 0x21d   : > { %v1528_v22 = vpop.xlane.xlu1 %1527  ;;  %v9158_v17 = vpop.xlane.xlu2 %1397 }
 0x21e   : > { %1788 = vst.msk [vmem:[#allocation5 + $0x78] sm:$0xff] %vm1772_vm1, %v1528_v22  ;;  %v1592_v19 = vpop.xlane.xlu0 %1591  ;;  %v1032_v41 = vpop.f32.mrf.mxu3 }
 0x21f   : > { %1820 = vst.msk [vmem:[#allocation5 + $0x178] sm:$0xff] %vm1772_vm1, %v1592_v19  ;;  %v1299_v19 = vmul.f32 %v9088_v28, %v9132_v35  ;;  %v1268_v35 = vmul.f32 %v9088_v28, %v9137_v42  ;;  %v1300_v42 = vmul.f32 %v9088_v28, %v9153_v61 }
 0x220   : > { %7662 = vst [vmem:[#allocation2 + $0x98] sm:$0xff] %v7390_v59  }
 0x222   : > { %1419 = vadd.xlane.f32.xlu1 %v1297_v24  ;;  %1613 = vadd.xlane.f32.xlu2 %v1491_v55  ;;  %v1075_v55 = vadd.f32 %v8749_v9, %v786_v62  ;;  %v788_v24 = vpop.f32.mrf.mxu0  ;;  %v952_v51 = vpop.f32.mrf.mxu1 }
 0x223   : > { %1357 = vadd.xlane.f32.xlu0 %v1266_v1  ;;  %v1076_v1 = vadd.f32 %v8749_v9, %v788_v24  ;;  %v1462_v9 = vmul.f32 %v9095_v30, %v952_v51 }
 0x225   : > { %v1530_v2 = vpop.xlane.xlu2 %1529  ;;  %v9169_v43 = vpop.xlane.xlu1 %1335 }
 0x226   : > { %1789 = vst.msk [vmem:[#allocation5 + $0x80] sm:$0xff] %vm1772_vm1, %v1530_v2  ;;  %v9172_v40 = vpop.xlane.xlu0 %1399  ;;  %v7310_v2 = vpack.c.bf16 %v1076_v1, %v1075_v55 }
 0x228   : > { %7646 = vst [vmem:[#allocation2 + $0x78] sm:$0xff] %v7310_v2  }
 0x22a   : > { %1551 = vadd.xlane.f32.xlu1 %v1460_v14  ;;  %1421 = vadd.xlane.f32.xlu2 %v1298_v57  ;;  %v1493_v14 = vmul.f32 %v9095_v30, %v1030_v31 }
 0x22b   : > { %1615 = vadd.xlane.f32.xlu0 %v1492_v58 }
 0x22d   : > { %v1594_v4 = vpop.xlane.xlu1 %1593  ;;  %v9184_v37 = vpop.xlane.xlu2 %1337 }
 0x22e   : > { %1821 = vst.msk [vmem:[#allocation5 + $0x180] sm:$0xff] %vm1772_vm1, %v1594_v4  ;;  %v1532_v22 = vpop.xlane.xlu0 %1531  ;;  %v1269_v4 = vmul.f32 %v9088_v28, %v786_v62  ;;  %v1301_v62 = vmul.f32 %v9088_v28, %v9165_v27  ;;  %v1302_v27 = vmul.f32 %v9088_v28, %v9176_v18 }
 0x22f   : > { %1790 = vst.msk [vmem:[#allocation5 + $0x88] sm:$0xff] %vm1772_vm1, %v1532_v22  ;;  %v955_v22 = vpop.f32.mrf.mxu1 }
 0x230   : > { %v1463_v1 = vmul.f32 %v9095_v30, %v955_v22 }
 0x232   : > { %1553 = vadd.xlane.f32.xlu2 %v1461_v34  ;;  %1359 = vadd.xlane.f32.xlu1 %v1267_v53  ;;  %v1494_v34 = vmul.f32 %v9095_v30, %v1032_v41  ;;  %v1035_v53 = vpop.f32.mrf.mxu3 }
 0x233   : > { %1423 = vadd.xlane.f32.xlu0 %v1299_v19  ;;  %v1495_v2 = vmul.f32 %v9095_v30, %v1035_v53 }
 0x235   : > { %v9195_v44 = vpop.xlane.xlu1 %1401  ;;  %v1596_v38 = vpop.xlane.xlu2 %1595 }
 0x236   : > { %1822 = vst.msk [vmem:[#allocation5 + $0x188] sm:$0xff] %vm1772_vm1, %v1596_v38  ;;  %v9199_v57 = vpop.xlane.xlu0 %1339 }
 0x237   : > { %v957_v61 = vpop.f32.mrf.mxu1 }
 0x23a   : > { %1617 = vadd.xlane.f32.xlu1 %v1493_v14  ;;  %1361 = vadd.xlane.f32.xlu2 %v1268_v35  ;;  %v1270_v35 = vmul.f32 %v9088_v28, %v788_v24  ;;  %v1037_v41 = vpop.f32.mrf.mxu3 }
 0x23b   : > { %1555 = vadd.xlane.f32.xlu0 %v1462_v9  ;;  %v1464_v9 = vmul.f32 %v9095_v30, %v957_v61 }
 0x23d   : > { %v1534_v58 = vpop.xlane.xlu1 %1533  ;;  %v9204_v59 = vpop.xlane.xlu2 %1403 }
 0x23e   : > { %1791 = vst.msk [vmem:[#allocation5 + $0x90] sm:$0xff] %vm1772_vm1, %v1534_v58  ;;  %v1598_v50 = vpop.xlane.xlu0 %1597 }
 0x23f   : > { %1823 = vst.msk [vmem:[#allocation5 + $0x190] sm:$0xff] %vm1772_vm1, %v1598_v50 }
 0x242   : > { %1425 = vadd.xlane.f32.xlu1 %v1300_v42  ;;  %1619 = vadd.xlane.f32.xlu2 %v1494_v34 }
 0x243   : > { %1363 = vadd.xlane.f32.xlu0 %v1269_v4  ;;  %v1496_v4 = vmul.f32 %v9095_v30, %v1037_v41 }
 0x245   : > { %v1536_v55 = vpop.xlane.xlu2 %1535  ;;  %v9212_v19 = vpop.xlane.xlu1 %1341 }
 0x246   : > { %1792 = vst.msk [vmem:[#allocation5 + $0x98] sm:$0xff] %vm1772_vm1, %v1536_v55  ;;  %v9216_v31 = vpop.xlane.xlu0 %1405 }
 0x24a   : > { %1557 = vadd.xlane.f32.xlu1 %v1463_v1  ;;  %1427 = vadd.xlane.f32.xlu2 %v1301_v62 }
 0x24b   : > { %1621 = vadd.xlane.f32.xlu0 %v1495_v2 }
 0x24d   : > { %v1600_v38 = vpop.xlane.xlu1 %1599  ;;  %v9221_v51 = vpop.xlane.xlu2 %1343 }
 0x24e   : > { %1824 = vst.msk [vmem:[#allocation5 + $0x198] sm:$0xff] %vm1772_vm1, %v1600_v38  ;;  %v1538_v14 = vpop.xlane.xlu0 %1537 }
 0x24f   : > { %1793 = vst.msk [vmem:[#allocation5 + $0xa0] sm:$0xff] %vm1772_vm1, %v1538_v14 }
 0x252   : > { %1559 = vadd.xlane.f32.xlu2 %v1464_v9  ;;  %1365 = vadd.xlane.f32.xlu1 %v1270_v35 }
 0x253   : > { %1429 = vadd.xlane.f32.xlu0 %v1302_v27 }
 0x255   : > { %v9229_v58 = vpop.xlane.xlu1 %1407  ;;  %v1602_v50 = vpop.xlane.xlu2 %1601 }
 0x256   : > { %1825 = vst.msk [vmem:[#allocation5 + $0x1a0] sm:$0xff] %vm1772_vm1, %v1602_v50  ;;  %v1346_v34 = vpop.xlane.xlu0 %1345 }
 0x25a   : > { %1623 = vadd.xlane.f32.xlu1 %v1496_v4 }
 0x25d   : > { %v1540_v24 = vpop.xlane.xlu1 %1539  ;;  %v9233_v42 = vpop.xlane.xlu2 %1409 }
 0x25e   : > { %1794 = vst.msk [vmem:[#allocation5 + $0xa8] sm:$0xff] %vm1772_vm1, %v1540_v24  ;;  %v1604_v22 = vpop.xlane.xlu0 %1603 }
 0x25f   : > { %1826 = vst.msk [vmem:[#allocation5 + $0x1a8] sm:$0xff] %vm1772_vm1, %v1604_v22 }
 0x265   : > { %v1542_v28 = vpop.xlane.xlu2 %1541  ;;  %v1348_v18 = vpop.xlane.xlu1 %1347 }
 0x266   : > { %1795 = vst.msk [vmem:[#allocation5 + $0xb0] sm:$0xff] %vm1772_vm1, %v1542_v28  ;;  %v9238_v53 = vpop.xlane.xlu0 %1411 }
 0x26d   : > { %v1606_v55 = vpop.xlane.xlu1 %1605  ;;  %v1350_v1 = vpop.xlane.xlu2 %1349 }
 0x26e   : > { %1827 = vst.msk [vmem:[#allocation5 + $0x1b0] sm:$0xff] %vm1772_vm1, %v1606_v55  ;;  %v1544_v30 = vpop.xlane.xlu0 %1543 }
 0x26f   : > { %1796 = vst.msk [vmem:[#allocation5 + $0xb8] sm:$0xff] %vm1772_vm1, %v1544_v30 }
 0x275   : > { %v9242_v62 = vpop.xlane.xlu1 %1413  ;;  %v1608_v2 = vpop.xlane.xlu2 %1607 }
 0x276   : > { %1828 = vst.msk [vmem:[#allocation5 + $0x1b8] sm:$0xff] %vm1772_vm1, %v1608_v2  ;;  %v1352_v61 = vpop.xlane.xlu0 %1351 }
 0x27b   : > { %1625 = vxpose.xlu2.b32.start [1/16] (narrow) %v8841_v36, 8 }
 0x27c   : > { %1657 = vxpose.xlu0.b32.start [1/16] (narrow) %v9169_v43, 8 }
 0x27d   : > { %v1546_v38 = vpop.xlane.xlu1 %1545  ;;  %v9247_v14 = vpop.xlane.xlu2 %1415 }
 0x27e   : > { %1797 = vst.msk [vmem:[#allocation5 + $0xc0] sm:$0xff] %vm1772_vm1, %v1546_v38  ;;  %v1610_v35 = vpop.xlane.xlu0 %1609 }
 0x27f   : > { %1829 = vst.msk [vmem:[#allocation5 + $0x1c0] sm:$0xff] %vm1772_vm1, %v1610_v35 }
 0x283   : > { %1626 = vxpose.xlu2.b32.cont [2/16] (narrow) %v8872_v60, 8 }
 0x284   : > { %1658 = vxpose.xlu0.b32.cont [2/16] (narrow) %v9184_v37, 8 }
 0x285   : > { %v1548_v9 = vpop.xlane.xlu2 %1547  ;;  %v1354_v27 = vpop.xlane.xlu1 %1353 }
 0x286   : > { %1798 = vst.msk [vmem:[#allocation5 + $0xc8] sm:$0xff] %vm1772_vm1, %v1548_v9  ;;  %v9254_v41 = vpop.xlane.xlu0 %1417 }
 0x28b   : > { %1627 = vxpose.xlu2.b32.cont [3/16] (narrow) %v8879_v7, 8 }
 0x28c   : > { %1659 = vxpose.xlu0.b32.cont [3/16] (narrow) %v9199_v57, 8 }
 0x28d   : > { %v1612_v36 = vpop.xlane.xlu1 %1611  ;;  %v1356_v43 = vpop.xlane.xlu2 %1355 }
 0x28e   : > { %1830 = vst.msk [vmem:[#allocation5 + $0x1c8] sm:$0xff] %vm1772_vm1, %v1612_v36  ;;  %v1550_v50 = vpop.xlane.xlu0 %1549 }
 0x28f   : > { %1799 = vst.msk [vmem:[#allocation5 + $0xd0] sm:$0xff] %vm1772_vm1, %v1550_v50 }
 0x293   : > { %1628 = vxpose.xlu2.b32.cont [4/16] (narrow) %v8912_v32, 8 }
 0x294   : > { %1689 = vxpose.xlu1.b32.start [1/16] (narrow) %v8855_v45, 8  ;;  %1660 = vxpose.xlu0.b32.cont [4/16] (narrow) %v9212_v19, 8 }
 0x295   : > { %v9263_v60 = vpop.xlane.xlu1 %1419  ;;  %v1614_v37 = vpop.xlane.xlu2 %1613 }
 0x296   : > { %1831 = vst.msk [vmem:[#allocation5 + $0x1d0] sm:$0xff] %vm1772_vm1, %v1614_v37  ;;  %v1358_v7 = vpop.xlane.xlu0 %1357 }
 0x29b   : > { %1629 = vxpose.xlu2.b32.cont [5/16] (narrow) %v8914_v33, 8 }
 0x29c   : > { %1690 = vxpose.xlu1.b32.cont [2/16] (narrow) %v8882_v8, 8  ;;  %1661 = vxpose.xlu0.b32.cont [5/16] (narrow) %v9221_v51, 8 }
 0x29d   : > { %v1552_v57 = vpop.xlane.xlu1 %1551  ;;  %v9269_v4 = vpop.xlane.xlu2 %1421 }
 0x29e   : > { %1800 = vst.msk [vmem:[#allocation5 + $0xd8] sm:$0xff] %vm1772_vm1, %v1552_v57  ;;  %v1616_v45 = vpop.xlane.xlu0 %1615 }
 0x29f   : > { %1832 = vst.msk [vmem:[#allocation5 + $0x1d8] sm:$0xff] %vm1772_vm1, %v1616_v45 }
 0x2a3   : > { %1630 = vxpose.xlu2.b32.cont [6/16] (narrow) %v8946_v3, 8 }
 0x2a4   : > { %1691 = vxpose.xlu1.b32.cont [3/16] (narrow) %v8899_v21, 8  ;;  %1662 = vxpose.xlu0.b32.cont [6/16] (narrow) %v1346_v34, 8 }
 0x2a5   : > { %v1554_v32 = vpop.xlane.xlu2 %1553  ;;  %v1360_v19 = vpop.xlane.xlu1 %1359 }
 0x2a6   : > { %1801 = vst.msk [vmem:[#allocation5 + $0xe0] sm:$0xff] %vm1772_vm1, %v1554_v32  ;;  %v9276_v8 = vpop.xlane.xlu0 %1423 }
 0x2ab   : > { %1631 = vxpose.xlu2.b32.cont [7/16] (narrow) %v8961_v63, 8 }
 0x2ac   : > { %1692 = vxpose.xlu1.b32.cont [4/16] (narrow) %v8897_v20, 8  ;;  %1663 = vxpose.xlu0.b32.cont [7/16] (narrow) %v1348_v18, 8 }
 0x2ad   : > { %v1618_v33 = vpop.xlane.xlu1 %1617  ;;  %v1362_v51 = vpop.xlane.xlu2 %1361 }
 0x2ae   : > { %1833 = vst.msk [vmem:[#allocation5 + $0x1e0] sm:$0xff] %vm1772_vm1, %v1618_v33  ;;  %v1556_v24 = vpop.xlane.xlu0 %1555 }
 0x2af   : > { %1802 = vst.msk [vmem:[#allocation5 + $0xe8] sm:$0xff] %vm1772_vm1, %v1556_v24 }
 0x2b3   : > { %1632 = vxpose.xlu2.b32.cont [8/16] (narrow) %v8989_v47, 8 }
 0x2b4   : > { %1693 = vxpose.xlu1.b32.cont [5/16] (narrow) %v8927_v39, 8  ;;  %1664 = vxpose.xlu0.b32.cont [8/16] (narrow) %v1350_v1, 8 }
 0x2b5   : > { %v1426_v21 = vpop.xlane.xlu1 %1425  ;;  %v1620_v3 = vpop.xlane.xlu2 %1619 }
 0x2b6   : > { %1834 = vst.msk [vmem:[#allocation5 + $0x1e8] sm:$0xff] %vm1772_vm1, %v1620_v3  ;;  %v1364_v63 = vpop.xlane.xlu0 %1363 }
 0x2bb   : > { %1633 = vxpose.xlu2.b32.cont [9/16] (narrow) %v9000_v56, 8 }
 0x2bc   : > { %1694 = vxpose.xlu1.b32.cont [6/16] (narrow) %v8957_v13, 8  ;;  %1665 = vxpose.xlu0.b32.cont [9/16] (narrow) %v1352_v61, 8 }
 0x2bd   : > { %v1558_v20 = vpop.xlane.xlu1 %1557  ;;  %v1428_v34 = vpop.xlane.xlu2 %1427 }
 0x2be   : > { %1803 = vst.msk [vmem:[#allocation5 + $0xf0] sm:$0xff] %vm1772_vm1, %v1558_v20  ;;  %v1622_v22 = vpop.xlane.xlu0 %1621 }
 0x2bf   : > { %1835 = vst.msk [vmem:[#allocation5 + $0x1f0] sm:$0xff] %vm1772_vm1, %v1622_v22 }
 0x2c3   : > { %1634 = vxpose.xlu2.b32.cont [10/16] (narrow) %v9020_v16, 8 }
 0x2c4   : > { %1695 = vxpose.xlu1.b32.cont [7/16] (narrow) %v8974_v29, 8  ;;  %1666 = vxpose.xlu0.b32.cont [10/16] (narrow) %v1354_v27, 8 }
 0x2c5   : > { %v1560_v39 = vpop.xlane.xlu2 %1559  ;;  %v1366_v13 = vpop.xlane.xlu1 %1365 }
 0x2c6   : > { %1804 = vst.msk [vmem:[#allocation5 + $0xf8] sm:$0xff] %vm1772_vm1, %v1560_v39  ;;  %v1430_v47 = vpop.xlane.xlu0 %1429 }
 0x2cb   : > { %1635 = vxpose.xlu2.b32.cont [11/16] (narrow) %v9045_v46, 8 }
 0x2cc   : > { %1696 = vxpose.xlu1.b32.cont [8/16] (narrow) %v8993_v49, 8  ;;  %1667 = vxpose.xlu0.b32.cont [11/16] (narrow) %v1356_v43, 8 }
 0x2cd   : > { %v1624_v29 = vpop.xlane.xlu1 %1623 }
 0x2ce   : > { %1836 = vst.msk [vmem:[#allocation5 + $0x1f8] sm:$0xff] %vm1772_vm1, %v1624_v29 }
 0x2d3   : > { %1636 = vxpose.xlu2.b32.cont [12/16] (narrow) %v9066_v6, 8 }
 0x2d4   : > { %1697 = vxpose.xlu1.b32.cont [9/16] (narrow) %v9017_v12, 8  ;;  %1668 = vxpose.xlu0.b32.cont [12/16] (narrow) %v1358_v7, 8 }
 0x2db   : > { %1637 = vxpose.xlu2.b32.cont [13/16] (narrow) %v9081_v52, 8 }
 0x2dc   : > { %1698 = vxpose.xlu1.b32.cont [10/16] (narrow) %v9032_v10, 8  ;;  %1669 = vxpose.xlu0.b32.cont [13/16] (narrow) %v1360_v19, 8 }
 0x2e3   : > { %1638 = vxpose.xlu2.b32.cont [14/16] (narrow) %v9115_v5, 8 }
 0x2e4   : > { %1699 = vxpose.xlu1.b32.cont [11/16] (narrow) %v9048_v11, 8  ;;  %1670 = vxpose.xlu0.b32.cont [14/16] (narrow) %v1362_v51, 8 }
 0x2eb   : > { %1639 = vxpose.xlu2.b32.cont [15/16] (narrow) %v9126_v25, 8 }
 0x2ec   : > { %1700 = vxpose.xlu1.b32.cont [12/16] (narrow) %v9077_v23, 8  ;;  %1671 = vxpose.xlu0.b32.cont [15/16] (narrow) %v1364_v63, 8 }
 0x2f3   : > { %1640 = vxpose.xlu2.b32.end [16/16] (narrow) %v9146_v54, 8 }
 0x2f4   : > { %1701 = vxpose.xlu1.b32.cont [13/16] (narrow) %v9100_v48, 8  ;;  %1672 = vxpose.xlu0.b32.end [16/16] (narrow) %v1366_v13, 8 }
 0x2fb   : > { %1721 = vxpose.xlu2.b32.start [1/16] (narrow) %v9172_v40, 8 }
 0x2fc   : > { %1702 = vxpose.xlu1.b32.cont [14/16] (narrow) %v9119_v15, 8 }
 0x303   : > { %1722 = vxpose.xlu2.b32.cont [2/16] (narrow) %v9195_v44, 8 }
 0x304   : > { %1703 = vxpose.xlu1.b32.cont [15/16] (narrow) %v9143_v26, 8 }
 0x30b   : > { %1723 = vxpose.xlu2.b32.cont [3/16] (narrow) %v9204_v59, 8 }
 0x30c   : > { %1704 = vxpose.xlu1.b32.end [16/16] (narrow) %v9158_v17, 8 }
 0x313   : > { %1724 = vxpose.xlu2.b32.cont [4/16] (narrow) %v9216_v31, 8 }
 0x314   : > { %v1641_v49 = vpop.trf.xlu2 }
 0x31b   : > { %1725 = vxpose.xlu2.b32.cont [5/16] (narrow) %v9229_v58, 8 }
 0x320   : > { %v1673_v56 = vpop.trf.xlu0 }
 0x321   : > { %v1757_v16 = vrot.slane %v1673_v56, 7 }
 0x323   : > { %1726 = vxpose.xlu2.b32.cont [6/16] (narrow) %v9233_v42, 8  ;;  %v1761_v6 = vsel %vm1760_vm2, %v1641_v49, %v1757_v16 }
 0x32b   : > { %1727 = vxpose.xlu2.b32.cont [7/16] (narrow) %v9238_v53, 8 }
 0x333   : > { %1728 = vxpose.xlu2.b32.cont [8/16] (narrow) %v9242_v62, 8 }
 0x338   : > { %v1705_v12 = vpop.trf.xlu1 }
 0x339   : > { %v1758_v10 = vrot.slane %v1705_v12, 6 }
 0x33b   : > { %1729 = vxpose.xlu2.b32.cont [9/16] (narrow) %v9247_v14, 8 }
 0x343   : > { %1730 = vxpose.xlu2.b32.cont [10/16] (narrow) %v9254_v41, 8 }
 0x34b   : > { %1731 = vxpose.xlu2.b32.cont [11/16] (narrow) %v9263_v60, 8 }
 0x353   : > { %1732 = vxpose.xlu2.b32.cont [12/16] (narrow) %v9269_v4, 8 }
 0x35b   : > { %1733 = vxpose.xlu2.b32.cont [13/16] (narrow) %v9276_v8, 8 }
 0x363   : > { %1734 = vxpose.xlu2.b32.cont [14/16] (narrow) %v1426_v21, 8 }
 0x36b   : > { %1735 = vxpose.xlu2.b32.cont [15/16] (narrow) %v1428_v34, 8 }
 0x373   : > { %1736 = vxpose.xlu2.b32.end [16/16] (narrow) %v1430_v47, 8 }
 0x394   : > { %v1737_v46 = vpop.trf.xlu2 }
 0x395   : > { %v1759_v11 = vrot.slane %v1737_v46, 5 }
 0x397   : > { %v1763_v23 = vsel %vm1762_vm3, %v1758_v10, %v1759_v11 }
 0x398   : > { %v1765_v52 = vsel %vm1764_vm4, %v1761_v6, %v1763_v23 }
 0x399   : > { %1771 = vst.msk [vmem:[#allocation4] sm:$0xf] %vm1769_vm5, %v1765_v52 }
 0x39a PF: > { %s12399_s21 = sld [smem:[#allocation22_spill]] }
 0x3a0   : > { %p1837_p3 = scmp.eq.s32.totalorder %s12399_s21, 1 }
 0x3a2   : > { %p1838_p4 = pnand %p1837_p3, %p345_p13 }
 0x3a4   : > { %1841 = sbr.rel (%p1838_p4) target bundleno = 1762 (0x6e2), region = 64 }
 0x3a9   : > { %v6955_v0 = vld [vmem:[%s8684_s10 + $0x70] sm:$0xf]  ;;  %v7197_v48 = vld [vmem:[%s8684_s10 + $0x74] sm:$0xf0]  ;;  %v7196_v5 = vld [vmem:[%s8684_s10 + $0x74] sm:$0xf] }
 0x3aa   : > { %v6956_v15 = vor.u32 %v7197_v48, %v6955_v0  ;;  %v6957_v25 = vld [vmem:[%s8684_s10 + $0x78] sm:$0xf0]  ;;  %v6947_v26 = vld [vmem:[%s8684_s10 + $0x60] sm:$0xf]  ;;  %v7195_v54 = vld [vmem:[%s8684_s10 + $0x64] sm:$0xf0]  ;;  %v2532_v0 = vlaneseq }
 0x3ab   : > { %v6960_v17 = vor.u32 %v7196_v5, %v6957_v25  ;;  %v7194_v40 = vld [vmem:[%s8684_s10 + $0x64] sm:$0xf]  ;;  %v6949_v44 = vld [vmem:[%s8684_s10 + $0x68] sm:$0xf0]  ;;  %v6948_v59 = vor.u32 %v7195_v54, %v6947_v26  ;;  %v6939_v58 = vld [vmem:[%s8684_s10 + $0x50] sm:$0xf] }
 0x3ac   : > { %2194 = vmatpush.bf16.msra.mxu0 %v6956_v15  ;;  %7725 = vmatpush.bf16.msra.mxu2 %v6956_v15  ;;  %v6952_v31 = vor.u32 %v7194_v40, %v6949_v44  ;;  %v7193_v42 = vld [vmem:[%s8684_s10 + $0x54] sm:$0xf0]  ;;  %v7192_v28 = vld [vmem:[%s8684_s10 + $0x54] sm:$0xf]  ;;  %v6941_v18 = vld [vmem:[%s8684_s10 + $0x58] sm:$0xf0] }
 0x3ad   : > { %2363 = vmatpush.bf16.msra.mxu1 %v6960_v17  ;;  %7733 = vmatpush.bf16.msra.mxu3 %v6960_v17  ;;  %v6940_v53 = vor.u32 %v7193_v42, %v6939_v58  ;;  %v6944_v55 = vor.u32 %v7192_v28, %v6941_v18  ;;  %v6931_v1 = vld [vmem:[%s8684_s10 + $0x40] sm:$0xf]  ;;  %v7191_v30 = vld [vmem:[%s8684_s10 + $0x44] sm:$0xf0]  ;;  %v7190_v62 = vld [vmem:[%s8684_s10 + $0x44] sm:$0xf] }
 0x3ae   : > { %v6933_v2 = vld [vmem:[%s8684_s10 + $0x48] sm:$0xf0]  ;;  %v6932_v61 = vor.u32 %v7191_v30, %v6931_v1  ;;  %v6923_v14 = vld [vmem:[%s8684_s10 + $0x30] sm:$0xf]  ;;  %v7189_v35 = vld [vmem:[%s8684_s10 + $0x34] sm:$0xf0] }
 0x3af   : > { %v6936_v38 = vor.u32 %v7190_v62, %v6933_v2  ;;  %v7188_v9 = vld [vmem:[%s8684_s10 + $0x34] sm:$0xf]  ;;  %v6925_v27 = vld [vmem:[%s8684_s10 + $0x38] sm:$0xf0]  ;;  %v6924_v41 = vor.u32 %v7189_v35, %v6923_v14  ;;  %v6915_v43 = vld [vmem:[%s8684_s10 + $0x20] sm:$0xf] }
 0x3b0   : > { %2195 = vmatpush.bf16.msra.mxu0 %v6948_v59  ;;  %7726 = vmatpush.bf16.msra.mxu2 %v6948_v59  ;;  %v6928_v36 = vor.u32 %v7188_v9, %v6925_v27  ;;  %v7187_v50 = vld [vmem:[%s8684_s10 + $0x24] sm:$0xf0]  ;;  %v7186_v60 = vld [vmem:[%s8684_s10 + $0x24] sm:$0xf]  ;;  %v6917_v37 = vld [vmem:[%s8684_s10 + $0x28] sm:$0xf0] }
 0x3b1   : > { %2364 = vmatpush.bf16.msra.mxu1 %v6952_v31  ;;  %7734 = vmatpush.bf16.msra.mxu3 %v6952_v31  ;;  %v6916_v7 = vor.u32 %v7187_v50, %v6915_v43  ;;  %v6920_v57 = vor.u32 %v7186_v60, %v6917_v37  ;;  %v6907_v4 = vld [vmem:[%s8684_s10 + $0x10] sm:$0xf]  ;;  %v7185_v45 = vld [vmem:[%s8684_s10 + $0x14] sm:$0xf0]  ;;  %v7184_v32 = vld [vmem:[%s8684_s10 + $0x14] sm:$0xf] }
 0x3b2   : > { %v6909_v19 = vld [vmem:[%s8684_s10 + $0x18] sm:$0xf0]  ;;  %v6908_v8 = vor.u32 %v7185_v45, %v6907_v4  ;;  %v6899_v51 = vld [vmem:[%s8684_s10] sm:$0xf]  ;;  %v7183_v24 = vld [vmem:[%s8684_s10 + $0x4] sm:$0xf0] }
 0x3b3   : > { %v6912_v33 = vor.u32 %v7184_v32, %v6909_v19  ;;  %v7182_v21 = vld [vmem:[%s8684_s10 + $0x4] sm:$0xf]  ;;  %v6901_v3 = vld [vmem:[%s8684_s10 + $0x8] sm:$0xf0]  ;;  %v6900_v63 = vor.u32 %v7183_v24, %v6899_v51  ;;  %v7150_v34 = vld [vmem:[#allocation3] sm:$0xff]  ;;  %v2533_v15 = vand.u32 127, %v2532_v0 }
 0x3b4   : > { %2196 = vmatpush.bf16.msra.mxu0 %v6940_v53  ;;  %7727 = vmatpush.bf16.msra.mxu2 %v6940_v53  ;;  %v6904_v20 = vor.u32 %v7182_v21, %v6901_v3  ;;  %v7166_v22 = vld [vmem:[#allocation3 + $0x80] sm:$0xff]  ;;  %v7151_v39 = vld [vmem:[#allocation3 + $0x8] sm:$0xff]  ;;  %v7152_v29 = vld [vmem:[#allocation3 + $0x10] sm:$0xff]  ;;  %v8478_v40 = vmov 0.0   ;;  %vm3264_vm7 = vcmask 7168   ;;  %vm3252_vm8 = vcmask 1040384  }
 0x3b5   : > { %2365 = vmatpush.bf16.msra.mxu1 %v6944_v55  ;;  %7735 = vmatpush.bf16.msra.mxu3 %v6944_v55  ;;  %v7167_v13 = vld [vmem:[#allocation3 + $0x88] sm:$0xff]  ;;  %v7168_v47 = vld [vmem:[#allocation3 + $0x90] sm:$0xff]  ;;  %v7169_v49 = vld [vmem:[#allocation3 + $0x98] sm:$0xff]  ;;  %vm2534_vm6 = vcmp.eq.s32.totalorder %v2533_v15, 127  ;;  %vm3254_vm9 = vcmask 1042434   ;;  %vm3256_vm10 = vcmask 1041408  }
 0x3b6   : > { %v7153_v56 = vld [vmem:[#allocation3 + $0x18] sm:$0xff]  ;;  %v7154_v12 = vld [vmem:[#allocation3 + $0x20] sm:$0xff]  ;;  %v7155_v10 = vld [vmem:[#allocation3 + $0x28] sm:$0xff]  ;;  %v9366_v44 = vsel %vm2534_vm6, 1.0, %v8478_v40  ;;  %vm3261_vm11 = vcmp.lt.s32.totalorder %v2532_v0, 512 }
 0x3b7   : > { %v7170_v16 = vld [vmem:[#allocation3 + $0xa0] sm:$0xff]  ;;  %v7171_v46 = vld [vmem:[#allocation3 + $0xa8] sm:$0xff]  ;;  %v7172_v11 = vld [vmem:[#allocation3 + $0xb0] sm:$0xff] }
 0x3b8   : > { %2197 = vmatpush.bf16.msra.mxu0 %v6932_v61  ;;  %7728 = vmatpush.bf16.msra.mxu2 %v6932_v61  ;;  %v7156_v6 = vld [vmem:[#allocation3 + $0x30] sm:$0xff]  ;;  %v7157_v23 = vld [vmem:[#allocation3 + $0x38] sm:$0xff]  ;;  %v9358_v48 = vld [vmem:[%s8704_s14] ss:$0 sm:$0xff] }
 0x3b9   : > { %2366 = vmatpush.bf16.msra.mxu1 %v6936_v38  ;;  %7736 = vmatpush.bf16.msra.mxu3 %v6936_v38  ;;  %v7173_v52 = vld [vmem:[#allocation3 + $0xb8] sm:$0xff]  ;;  %v9361_v5 = vld [vmem:[%s8704_s14 + $0x1] ss:$0 sm:$0xff]  ;;  %v7175_v19 = vld [vmem:[#allocation3 + $0xc8] sm:$0xff] }
 0x3ba   : > { %v7158_v28 = vld [vmem:[#allocation3 + $0x40] sm:$0xff] }
 0x3bb   : > { %v7174_v1 = vld [vmem:[#allocation3 + $0xc0] sm:$0xff] }
 0x3bc   : > { %2198 = vmatpush.bf16.msra.mxu0 %v6924_v41  ;;  %7729 = vmatpush.bf16.msra.mxu2 %v6924_v41 }
 0x3bd   : > { %2367 = vmatpush.bf16.msra.mxu1 %v6928_v36  ;;  %7737 = vmatpush.bf16.msra.mxu3 %v6928_v36 }
 0x3c0   : > { %2199 = vmatpush.bf16.msra.mxu0 %v6916_v7  ;;  %7730 = vmatpush.bf16.msra.mxu2 %v6916_v7 }
 0x3c1   : > { %2368 = vmatpush.bf16.msra.mxu1 %v6920_v57  ;;  %7738 = vmatpush.bf16.msra.mxu3 %v6920_v57 }
 0x3c4   : > { %2200 = vmatpush.bf16.msra.mxu0 %v6908_v8  ;;  %7731 = vmatpush.bf16.msra.mxu2 %v6908_v8 }
 0x3c5   : > { %2369 = vmatpush.bf16.msra.mxu1 %v6912_v33  ;;  %7739 = vmatpush.bf16.msra.mxu3 %v6912_v33  ;;  %v7159_v33 = vld [vmem:[#allocation3 + $0x48] sm:$0xff] }
 0x3c8   : > { %2201 = vmatpush.bf16.msra.mxu0 %v6900_v63  ;;  %7732 = vmatpush.bf16.msra.mxu2 %v6900_v63 }
 0x3c9   : > { %2370 = vmatpush.bf16.msra.mxu1 %v6904_v20  ;;  %7740 = vmatpush.bf16.msra.mxu3 %v6904_v20 }
 0x3cb   : > { %2202 = vmatmul.bf16.vlgmr.msra.gmra.mxu0 %v7150_v34  ;;  %2282 = vmatmul.bf16.vlgmr.msra.gmra.mxu2 %v7166_v22 }
 0x3cc   : > { %2371 = vmatmul.bf16.vlgmr.msra.gmra.mxu1 %v7150_v34  ;;  %2451 = vmatmul.bf16.vlgmr.msra.gmra.mxu3 %v7166_v22 }
 0x3db   : > { %2207 = vmatmul.bf16.gmra.mxu0 %v7151_v39  ;;  %2287 = vmatmul.bf16.gmra.mxu2 %v7167_v13 }
 0x3dc   : > { %2456 = vmatmul.bf16.gmra.mxu3 %v7167_v13  ;;  %2376 = vmatmul.bf16.gmra.mxu1 %v7151_v39 }
 0x3eb   : > { %2212 = vmatmul.bf16.gmra.mxu0 %v7152_v29  ;;  %2292 = vmatmul.bf16.gmra.mxu2 %v7168_v47 }
 0x3ec   : > { %2381 = vmatmul.bf16.gmra.mxu1 %v7152_v29  ;;  %2461 = vmatmul.bf16.gmra.mxu3 %v7168_v47 }
 0x3fb   : > { %2297 = vmatmul.bf16.gmra.mxu2 %v7169_v49  ;;  %2217 = vmatmul.bf16.gmra.mxu0 %v7153_v56 }
 0x3fc   : > { %2386 = vmatmul.bf16.gmra.mxu1 %v7153_v56  ;;  %2466 = vmatmul.bf16.gmra.mxu3 %v7169_v49 }
 0x40b   : > { %2222 = vmatmul.bf16.gmra.mxu0 %v7154_v12  ;;  %2302 = vmatmul.bf16.gmra.mxu2 %v7170_v16 }
 0x40c   : > { %2471 = vmatmul.bf16.gmra.mxu3 %v7170_v16  ;;  %2391 = vmatmul.bf16.gmra.mxu1 %v7154_v12 }
 0x41b   : > { %2227 = vmatmul.bf16.gmra.mxu0 %v7155_v10  ;;  %2307 = vmatmul.bf16.gmra.mxu2 %v7171_v46 }
 0x41c   : > { %2396 = vmatmul.bf16.gmra.mxu1 %v7155_v10  ;;  %2476 = vmatmul.bf16.gmra.mxu3 %v7171_v46 }
 0x42b   : > { %2312 = vmatmul.bf16.gmra.mxu2 %v7172_v11  ;;  %2232 = vmatmul.bf16.gmra.mxu0 %v7156_v6 }
 0x42c   : > { %2401 = vmatmul.bf16.gmra.mxu1 %v7156_v6  ;;  %2481 = vmatmul.bf16.gmra.mxu3 %v7172_v11  ;;  %v7160_v11 = vld [vmem:[#allocation3 + $0x50] sm:$0xff] }
 0x43b   : > { %2237 = vmatmul.bf16.gmra.mxu0 %v7157_v23  ;;  %2317 = vmatmul.bf16.gmra.mxu2 %v7173_v52 }
 0x43c   : > { %2486 = vmatmul.bf16.gmra.mxu3 %v7173_v52  ;;  %2406 = vmatmul.bf16.gmra.mxu1 %v7157_v23 }
 0x448   : > { %v2203_v25 = vpop.f32.mrf.mxu0 }
 0x449   : > { %v2372_v26 = vpop.f32.mrf.mxu1  ;;  %v2731_v54 = vmul.f32 %v9358_v48, %v2203_v25  ;;  %v2537_v18 = vadd.f32 %v9366_v44, %v2203_v25 }
 0x44a   : > { %v2925_v17 = vmul.f32 %v9361_v5, %v2372_v26 }
 0x44b   : > { %2795 = vadd.xlane.f32.xlu0 %v2731_v54  ;;  %2242 = vmatmul.bf16.gmra.mxu0 %v7158_v28 }
 0x44c   : > { %2989 = vadd.xlane.f32.xlu1 %v2925_v17  ;;  %2411 = vmatmul.bf16.gmra.mxu1 %v7158_v28 }
 0x44d   : > { %2322 = vmatmul.bf16.gmra.mxu2 %v7174_v1  ;;  %2491 = vmatmul.bf16.gmra.mxu3 %v7174_v1 }
 0x44e   : > { %v2283_v59 = vpop.f32.mrf.mxu2 }
 0x44f   : > { %v2452_v31 = vpop.f32.mrf.mxu3  ;;  %v2763_v58 = vmul.f32 %v9358_v48, %v2283_v59  ;;  %v2569_v61 = vadd.f32 %v9366_v44, %v2283_v59  ;;  %v7176_v59 = vld [vmem:[#allocation3 + $0xd0] sm:$0xff] }
 0x450   : > { %v2205_v42 = vpop.f32.mrf.mxu0  ;;  %v2957_v53 = vmul.f32 %v9361_v5, %v2452_v31 }
 0x451   : > { %v2538_v55 = vadd.f32 %v9366_v44, %v2205_v42  ;;  %2859 = vadd.xlane.f32.xlu2 %v2763_v58  ;;  %v2374_v62 = vpop.f32.mrf.mxu1  ;;  %v2732_v36 = vmul.f32 %v9358_v48, %v2205_v42 }
 0x452   : > { %v2926_v35 = vmul.f32 %v9361_v5, %v2374_v62 }
 0x453   : > { %v7395_v30 = vpack.c.bf16 %v2538_v55, %v2537_v18  ;;  %3053 = vadd.xlane.f32.xlu0 %v2957_v53 }
 0x455   : > { %7396 = vst [vmem:[#allocation2 + $0xb0] sm:$0xff] %v7395_v30  }
 0x456   : > { %v2285_v2 = vpop.f32.mrf.mxu2 }
 0x457   : > { %v2570_v38 = vadd.f32 %v9366_v44, %v2285_v2  ;;  %v2454_v14 = vpop.f32.mrf.mxu3  ;;  %v2764_v32 = vmul.f32 %v9358_v48, %v2285_v2 }
 0x458   : > { %v2208_v9 = vpop.f32.mrf.mxu0  ;;  %v2958_v27 = vmul.f32 %v9361_v5, %v2454_v14 }
 0x459   : > { %v7475_v41 = vpack.c.bf16 %v2570_v38, %v2569_v61  ;;  %2991 = vadd.xlane.f32.xlu2 %v2926_v35  ;;  %v2733_v50 = vmul.f32 %v9358_v48, %v2208_v9  ;;  %v2377_v37 = vpop.f32.mrf.mxu1  ;;  %v2539_v4 = vadd.f32 %v9366_v44, %v2208_v9 }
 0x45a   : > { %3055 = vadd.xlane.f32.xlu1 %v2958_v27  ;;  %v2927_v34 = vmul.f32 %v9361_v5, %v2377_v37 }
 0x45b   : > { %7678 = vst [vmem:[#allocation2 + $0x38] sm:$0xff] %v7475_v41   ;;  %2797 = vadd.xlane.f32.xlu0 %v2732_v36  ;;  %2247 = vmatmul.bf16.gmra.mxu0 %v7159_v33 }
 0x45c   : > { %2416 = vmatmul.bf16.gmra.mxu1 %v7159_v33 }
 0x45d   : > { %2327 = vmatmul.bf16.gmra.mxu2 %v7175_v19  ;;  %2496 = vmatmul.bf16.gmra.mxu3 %v7175_v19 }
 0x45e   : > { %v2288_v43 = vpop.f32.mrf.mxu2 }
 0x45f   : > { %v2457_v60 = vpop.f32.mrf.mxu3  ;;  %v2571_v24 = vadd.f32 %v9366_v44, %v2288_v43  ;;  %v2765_v20 = vmul.f32 %v9358_v48, %v2288_v43 }
 0x460   : > { %v2959_v7 = vmul.f32 %v9361_v5, %v2457_v60  ;;  %v2210_v57 = vpop.f32.mrf.mxu0 }
 0x461   : > { %v2540_v45 = vadd.f32 %v9366_v44, %v2210_v57  ;;  %v2379_v39 = vpop.f32.mrf.mxu1  ;;  %v2734_v56 = vmul.f32 %v9358_v48, %v2210_v57 }
 0x462   : > { %3057 = vadd.xlane.f32.xlu2 %v2959_v7  ;;  %2799 = vadd.xlane.f32.xlu1 %v2733_v50  ;;  %v2928_v54 = vmul.f32 %v9361_v5, %v2379_v39  ;;  %v7161_v50 = vld [vmem:[#allocation3 + $0x58] sm:$0xff] }
 0x463   : > { %v7400_v8 = vpack.c.bf16 %v2540_v45, %v2539_v4  ;;  %2861 = vadd.xlane.f32.xlu0 %v2764_v32 }
 0x465   : > { %7663 = vst [vmem:[#allocation2] sm:$0xff] %v7400_v8   ;;  %v7177_v8 = vld [vmem:[#allocation3 + $0xd8] sm:$0xff] }
 0x466   : > { %v2290_v51 = vpop.f32.mrf.mxu2 }
 0x467   : > { %v2572_v21 = vadd.f32 %v9366_v44, %v2290_v51  ;;  %v2766_v3 = vmul.f32 %v9358_v48, %v2290_v51  ;;  %v2459_v13 = vpop.f32.mrf.mxu3 }
 0x468   : > { %v2213_v63 = vpop.f32.mrf.mxu0  ;;  %v2960_v10 = vmul.f32 %v9361_v5, %v2459_v13 }
 0x469   : > { %v7480_v22 = vpack.c.bf16 %v2572_v21, %v2571_v24  ;;  %v2735_v29 = vmul.f32 %v9358_v48, %v2213_v63  ;;  %v2541_v12 = vadd.f32 %v9366_v44, %v2213_v63  ;;  %v2382_v6 = vpop.f32.mrf.mxu1 }
 0x46a   : > { %2865 = vadd.xlane.f32.xlu2 %v2766_v3  ;;  %2863 = vadd.xlane.f32.xlu1 %v2765_v20  ;;  %v2929_v52 = vmul.f32 %v9361_v5, %v2382_v6 }
 0x46b   : > { %7679 = vst [vmem:[#allocation2 + $0x58] sm:$0xff] %v7480_v22   ;;  %2993 = vadd.xlane.f32.xlu0 %v2927_v34  ;;  %2252 = vmatmul.bf16.gmra.mxu0 %v7160_v11 }
 0x46c   : > { %2421 = vmatmul.bf16.gmra.mxu1 %v7160_v11  ;;  %v7178_v11 = vld [vmem:[#allocation3 + $0xe0] sm:$0xff] }
 0x46d   : > { %2332 = vmatmul.bf16.gmra.mxu2 %v7176_v59  ;;  %2501 = vmatmul.bf16.gmra.mxu3 %v7176_v59 }
 0x46e   : > { %v2293_v47 = vpop.f32.mrf.mxu2 }
 0x46f   : > { %v2573_v23 = vadd.f32 %v9366_v44, %v2293_v47  ;;  %v2767_v25 = vmul.f32 %v9358_v48, %v2293_v47  ;;  %v2462_v31 = vpop.f32.mrf.mxu3 }
 0x470   : > { %v2215_v49 = vpop.f32.mrf.mxu0  ;;  %v2961_v42 = vmul.f32 %v9361_v5, %v2462_v31 }
 0x471   : > { %v2542_v16 = vadd.f32 %v9366_v44, %v2215_v49  ;;  %v2384_v58 = vpop.f32.mrf.mxu1  ;;  %v2736_v53 = vmul.f32 %v9358_v48, %v2215_v49 }
 0x472   : > { %2801 = vadd.xlane.f32.xlu1 %v2734_v56  ;;  %2803 = vadd.xlane.f32.xlu2 %v2735_v29  ;;  %v2930_v1 = vmul.f32 %v9361_v5, %v2384_v58 }
 0x473   : > { %v7405_v46 = vpack.c.bf16 %v2542_v16, %v2541_v12  ;;  %3059 = vadd.xlane.f32.xlu0 %v2960_v10 }
 0x475   : > { %7664 = vst [vmem:[#allocation2 + $0xd8] sm:$0xff] %v7405_v46  }
 0x476   : > { %v2295_v15 = vpop.f32.mrf.mxu2 }
 0x477   : > { %v2574_v26 = vadd.f32 %v9366_v44, %v2295_v15  ;;  %v2464_v2 = vpop.f32.mrf.mxu3  ;;  %v2768_v9 = vmul.f32 %v9358_v48, %v2295_v15 }
 0x478   : > { %v2218_v17 = vpop.f32.mrf.mxu0  ;;  %v2962_v27 = vmul.f32 %v9361_v5, %v2464_v2 }
 0x479   : > { %v7485_v40 = vpack.c.bf16 %v2574_v26, %v2573_v23  ;;  %v2543_v18 = vadd.f32 %v9366_v44, %v2218_v17  ;;  %v2737_v14 = vmul.f32 %v9358_v48, %v2218_v17  ;;  %v2387_v43 = vpop.f32.mrf.mxu1  ;;  %v7162_v17 = vld [vmem:[#allocation3 + $0x60] sm:$0xff] }
 0x47a   : > { %2995 = vadd.xlane.f32.xlu1 %v2928_v54  ;;  %2997 = vadd.xlane.f32.xlu2 %v2929_v52  ;;  %v2931_v60 = vmul.f32 %v9361_v5, %v2387_v43 }
 0x47b   : > { %2867 = vadd.xlane.f32.xlu0 %v2767_v25  ;;  %7680 = vst [vmem:[#allocation2 + $0x40] sm:$0xff] %v7485_v40   ;;  %2257 = vmatmul.bf16.gmra.mxu0 %v7161_v50 }
 0x47c   : > { %2426 = vmatmul.bf16.gmra.mxu1 %v7161_v50 }
 0x47d   : > { %2337 = vmatmul.bf16.gmra.mxu2 %v7177_v8  ;;  %2506 = vmatmul.bf16.gmra.mxu3 %v7177_v8 }
 0x47e   : > { %v2298_v28 = vpop.f32.mrf.mxu2 }
 0x47f   : > { %v2575_v61 = vadd.f32 %v9366_v44, %v2298_v28  ;;  %v2467_v37 = vpop.f32.mrf.mxu3  ;;  %v2769_v7 = vmul.f32 %v9358_v48, %v2298_v28 }
 0x480   : > { %v2220_v55 = vpop.f32.mrf.mxu0  ;;  %v2963_v4 = vmul.f32 %v9361_v5, %v2467_v37 }
 0x481   : > { %v2544_v30 = vadd.f32 %v9366_v44, %v2220_v55  ;;  %v2389_v51 = vpop.f32.mrf.mxu1  ;;  %v2738_v20 = vmul.f32 %v9358_v48, %v2220_v55 }
 0x482   : > { %3061 = vadd.xlane.f32.xlu1 %v2961_v42  ;;  %2805 = vadd.xlane.f32.xlu2 %v2736_v53  ;;  %v2932_v63 = vmul.f32 %v9361_v5, %v2389_v51 }
 0x483   : > { %2999 = vadd.xlane.f32.xlu0 %v2930_v1  ;;  %v7410_v62 = vpack.c.bf16 %v2544_v30, %v2543_v18 }
 0x485   : > { %7665 = vst [vmem:[#allocation2 + $0x18] sm:$0xff] %v7410_v62  }
 0x486   : > { %v2300_v38 = vpop.f32.mrf.mxu2 }
 0x487   : > { %v2576_v35 = vadd.f32 %v9366_v44, %v2300_v38  ;;  %v2770_v22 = vmul.f32 %v9358_v48, %v2300_v38  ;;  %v2469_v13 = vpop.f32.mrf.mxu3 }
 0x488   : > { %v2223_v41 = vpop.f32.mrf.mxu0  ;;  %v2964_v16 = vmul.f32 %v9361_v5, %v2469_v13 }
 0x489   : > { %v7490_v36 = vpack.c.bf16 %v2576_v35, %v2575_v61  ;;  %v2545_v45 = vadd.f32 %v9366_v44, %v2223_v41  ;;  %v2392_v29 = vpop.f32.mrf.mxu1  ;;  %v2739_v47 = vmul.f32 %v9358_v48, %v2223_v41 }
 0x48a   : > { %2869 = vadd.xlane.f32.xlu1 %v2768_v9  ;;  %3063 = vadd.xlane.f32.xlu2 %v2962_v27  ;;  %v2933_v56 = vmul.f32 %v9361_v5, %v2392_v29  ;;  %v7163_v27 = vld [vmem:[#allocation3 + $0x68] sm:$0xff] }
 0x48b   : > { %2807 = vadd.xlane.f32.xlu0 %v2737_v14  ;;  %7681 = vst [vmem:[#allocation2 + $0xc8] sm:$0xff] %v7490_v36   ;;  %2262 = vmatmul.bf16.gmra.mxu0 %v7162_v17 }
 0x48c   : > { %2431 = vmatmul.bf16.gmra.mxu1 %v7162_v17 }
 0x48d   : > { %2342 = vmatmul.bf16.gmra.mxu2 %v7178_v11  ;;  %2511 = vmatmul.bf16.gmra.mxu3 %v7178_v11 }
 0x48e   : > { %v2303_v57 = vpop.f32.mrf.mxu2 }
 0x48f   : > { %v2577_v24 = vadd.f32 %v9366_v44, %v2303_v57  ;;  %v2472_v23 = vpop.f32.mrf.mxu3  ;;  %v2771_v25 = vmul.f32 %v9358_v48, %v2303_v57 }
 0x490   : > { %v2225_v32 = vpop.f32.mrf.mxu0  ;;  %v2965_v15 = vmul.f32 %v9361_v5, %v2472_v23 }
 0x491   : > { %v2546_v19 = vadd.f32 %v9366_v44, %v2225_v32  ;;  %v2740_v59 = vmul.f32 %v9358_v48, %v2225_v32  ;;  %v2394_v58 = vpop.f32.mrf.mxu1 }
 0x492   : > { %3001 = vadd.xlane.f32.xlu1 %v2931_v60  ;;  %2871 = vadd.xlane.f32.xlu2 %v2769_v7  ;;  %v2934_v53 = vmul.f32 %v9361_v5, %v2394_v58  ;;  %v7179_v60 = vld [vmem:[#allocation3 + $0xe8] sm:$0xff] }
 0x493   : > { %3065 = vadd.xlane.f32.xlu0 %v2963_v4  ;;  %v7415_v33 = vpack.c.bf16 %v2546_v19, %v2545_v45 }
 0x495   : > { %7666 = vst [vmem:[#allocation2 + $0x50] sm:$0xff] %v7415_v33  }
 0x496   : > { %v2305_v21 = vpop.f32.mrf.mxu2 }
 0x497   : > { %v2578_v3 = vadd.f32 %v9366_v44, %v2305_v21  ;;  %v2474_v42 = vpop.f32.mrf.mxu3  ;;  %v2772_v55 = vmul.f32 %v9358_v48, %v2305_v21 }
 0x498   : > { %v2228_v34 = vpop.f32.mrf.mxu0  ;;  %v2966_v30 = vmul.f32 %v9361_v5, %v2474_v42 }
 0x499   : > { %v7495_v39 = vpack.c.bf16 %v2578_v3, %v2577_v24  ;;  %v2547_v12 = vadd.f32 %v9366_v44, %v2228_v34  ;;  %v2397_v61 = vpop.f32.mrf.mxu1  ;;  %v2741_v35 = vmul.f32 %v9358_v48, %v2228_v34 }
 0x49a   : > { %3003 = vadd.xlane.f32.xlu2 %v2932_v63  ;;  %2809 = vadd.xlane.f32.xlu1 %v2738_v20  ;;  %v2935_v14 = vmul.f32 %v9361_v5, %v2397_v61 }
 0x49b   : > { %2873 = vadd.xlane.f32.xlu0 %v2770_v22  ;;  %7682 = vst [vmem:[#allocation2 + $0xe0] sm:$0xff] %v7495_v39   ;;  %2267 = vmatmul.bf16.gmra.mxu0 %v7163_v27 }
 0x49c   : > { %2436 = vmatmul.bf16.gmra.mxu1 %v7163_v27 }
 0x49d   : > { %2347 = vmatmul.bf16.gmra.mxu2 %v7179_v60  ;;  %2516 = vmatmul.bf16.gmra.mxu3 %v7179_v60 }
 0x49e   : > { %v2308_v49 = vpop.f32.mrf.mxu2 }
 0x49f   : > { %v2579_v52 = vadd.f32 %v9366_v44, %v2308_v49  ;;  %v2773_v41 = vmul.f32 %v9358_v48, %v2308_v49  ;;  %v2477_v37 = vpop.f32.mrf.mxu3 }
 0x4a0   : > { %v9421_v10 = vpop.f32.mrf.mxu0  ;;  %v2967_v57 = vmul.f32 %v9361_v5, %v2477_v37 }
 0x4a1   : > { %v2548_v46 = vadd.f32 %v9366_v44, %v9421_v10  ;;  %v2399_v7 = vpop.f32.mrf.mxu1  ;;  %v2742_v8 = vmul.f32 %v9358_v48, %v9421_v10 }
 0x4a2   : > { %3067 = vadd.xlane.f32.xlu1 %v2964_v16  ;;  %2811 = vadd.xlane.f32.xlu2 %v2739_v47  ;;  %v2936_v51 = vmul.f32 %v9361_v5, %v2399_v7 }
 0x4a3   : > { %3005 = vadd.xlane.f32.xlu0 %v2933_v56  ;;  %v7420_v6 = vpack.c.bf16 %v2548_v46, %v2547_v12 }
 0x4a5   : > { %7667 = vst [vmem:[#allocation2 + $0x68] sm:$0xff] %v7420_v6  }
 0x4a6   : > { %v9428_v26 = vpop.f32.mrf.mxu2 }
 0x4a7   : > { %v2580_v54 = vadd.f32 %v9366_v44, %v9428_v26  ;;  %v2479_v63 = vpop.f32.mrf.mxu3  ;;  %v2774_v29 = vmul.f32 %v9358_v48, %v9428_v26 }
 0x4a8   : > { %v9432_v40 = vpop.f32.mrf.mxu0  ;;  %v2968_v13 = vmul.f32 %v9361_v5, %v2479_v63 }
 0x4a9   : > { %v7500_v31 = vpack.c.bf16 %v2580_v54, %v2579_v52  ;;  %v2549_v18 = vadd.f32 %v9366_v44, %v9432_v40  ;;  %v2743_v22 = vmul.f32 %v9358_v48, %v9432_v40  ;;  %v2402_v49 = vpop.f32.mrf.mxu1 }
 0x4aa   : > { %2875 = vadd.xlane.f32.xlu1 %v2771_v25  ;;  %3069 = vadd.xlane.f32.xlu2 %v2965_v15  ;;  %v2937_v10 = vmul.f32 %v9361_v5, %v2402_v49  ;;  %v7164_v15 = vld [vmem:[#allocation3 + $0x70] sm:$0xff] }
 0x4ab   : > { %2813 = vadd.xlane.f32.xlu0 %v2740_v59  ;;  %7683 = vst [vmem:[#allocation2 + $0x90] sm:$0xff] %v7500_v31   ;;  %2272 = vmatmul.bf16.gmra.mxu0 %v7164_v15  ;;  %v7180_v25 = vld [vmem:[#allocation3 + $0xf0] sm:$0xff] }
 0x4ac   : > { %2441 = vmatmul.bf16.gmra.mxu1 %v7164_v15 }
 0x4ad   : > { %2352 = vmatmul.bf16.gmra.mxu2 %v7180_v25  ;;  %2521 = vmatmul.bf16.gmra.mxu3 %v7180_v25 }
 0x4ae   : > { %v9435_v28 = vpop.f32.mrf.mxu2 }
 0x4af   : > { %v2581_v38 = vadd.f32 %v9366_v44, %v9435_v28  ;;  %v2482_v46 = vpop.f32.mrf.mxu3  ;;  %v2775_v6 = vmul.f32 %v9358_v48, %v9435_v28 }
 0x4b0   : > { %v9441_v1 = vpop.f32.mrf.mxu0  ;;  %v2969_v23 = vmul.f32 %v9361_v5, %v2482_v46 }
 0x4b1   : > { %v2550_v62 = vadd.f32 %v9366_v44, %v9441_v1  ;;  %v2404_v26 = vpop.f32.mrf.mxu1  ;;  %v2744_v42 = vmul.f32 %v9358_v48, %v9441_v1 }
 0x4b2   : > { %3007 = vadd.xlane.f32.xlu1 %v2934_v53  ;;  %2877 = vadd.xlane.f32.xlu2 %v2772_v55  ;;  %v2938_v58 = vmul.f32 %v9361_v5, %v2404_v26 }
 0x4b3   : > { %3071 = vadd.xlane.f32.xlu0 %v2966_v30  ;;  %v7425_v2 = vpack.c.bf16 %v2550_v62, %v2549_v18 }
 0x4b5   : > { %7668 = vst [vmem:[#allocation2 + $0x30] sm:$0xff] %v7425_v2  }
 0x4b6   : > { %v9450_v9 = vpop.f32.mrf.mxu2 }
 0x4b7   : > { %v2582_v36 = vadd.f32 %v9366_v44, %v9450_v9  ;;  %v2776_v18 = vmul.f32 %v9358_v48, %v9450_v9  ;;  %v2484_v55 = vpop.f32.mrf.mxu3 }
 0x4b8   : > { %v9455_v43 = vpop.f32.mrf.mxu0  ;;  %v2970_v27 = vmul.f32 %v9361_v5, %v2484_v55 }
 0x4b9   : > { %v7505_v50 = vpack.c.bf16 %v2582_v36, %v2581_v38  ;;  %v2551_v32 = vadd.f32 %v9366_v44, %v9455_v43  ;;  %v2407_v61 = vpop.f32.mrf.mxu1  ;;  %v2745_v38 = vmul.f32 %v9358_v48, %v9455_v43 }
 0x4ba   : > { %3009 = vadd.xlane.f32.xlu2 %v2935_v14  ;;  %2815 = vadd.xlane.f32.xlu1 %v2741_v35  ;;  %v2939_v35 = vmul.f32 %v9361_v5, %v2407_v61 }
 0x4bb   : > { %2879 = vadd.xlane.f32.xlu0 %v2773_v41  ;;  %7684 = vst [vmem:[#allocation2 + $0x70] sm:$0xff] %v7505_v50   ;;  %v7181_v50 = vld [vmem:[#allocation3 + $0xf8] sm:$0xff] }
 0x4bd   : > { %2357 = vmatmul.bf16.gmra.mxu2 %v7181_v50  ;;  %2526 = vmatmul.bf16.gmra.mxu3 %v7181_v50 }
 0x4be   : > { %v9458_v4 = vpop.xlane.xlu0 %2795  ;;  %v9462_v19 = vpop.f32.mrf.mxu2 }
 0x4bf   : > { %v2990_v45 = vpop.xlane.xlu1 %2989  ;;  %v2583_v34 = vadd.f32 %v9366_v44, %v9462_v19  ;;  %v2487_v43 = vpop.f32.mrf.mxu3 }
 0x4c0   : > { %3265 = vst.msk [vmem:[#allocation5] sm:$0xff] %vm3264_vm7, %v2990_v45  ;;  %v9467_v33 = vpop.f32.mrf.mxu0  ;;  %v2971_v7 = vmul.f32 %v9361_v5, %v2487_v43  ;;  %v2777_v45 = vmul.f32 %v9358_v48, %v9462_v19 }
 0x4c1   : > { %v2552_v24 = vadd.f32 %v9366_v44, %v9467_v33 }
 0x4c2   : > { %3073 = vadd.xlane.f32.xlu1 %v2967_v57  ;;  %2817 = vadd.xlane.f32.xlu2 %v2742_v8 }
 0x4c3   : > { %3011 = vadd.xlane.f32.xlu0 %v2936_v51  ;;  %v7430_v21 = vpack.c.bf16 %v2552_v24, %v2551_v32  ;;  %v7165_v51 = vld [vmem:[#allocation3 + $0x78] sm:$0xff]  ;;  %v2746_v24 = vmul.f32 %v9358_v48, %v9467_v33 }
 0x4c4   : > { %v9472_v3 = vpop.xlane.xlu2 %2859  ;;  %2446 = vmatmul.bf16.gmra.mxu1 %v7165_v51  ;;  %2277 = vmatmul.bf16.gmra.mxu0 %v7165_v51 }
 0x4c5   : > { %7669 = vst [vmem:[#allocation2 + $0x48] sm:$0xff] %v7430_v21   ;;  %v2409_v21 = vpop.f32.mrf.mxu1 }
 0x4c6   : > { %v3054_v20 = vpop.xlane.xlu0 %3053  ;;  %v9479_v39 = vpop.f32.mrf.mxu2 }
 0x4c7   : > { %3297 = vst.msk [vmem:[#allocation5 + $0x100] sm:$0xff] %vm3264_vm7, %v3054_v20  ;;  %v2584_v47 = vadd.f32 %v9366_v44, %v9479_v39 }
 0x4c8   : > { %v9494_v52 = vpop.f32.mrf.mxu0 }
 0x4c9   : > { %v7510_v56 = vpack.c.bf16 %v2584_v47, %v2583_v34  ;;  %v2553_v59 = vadd.f32 %v9366_v44, %v9494_v52  ;;  %v2489_v34 = vpop.f32.mrf.mxu3  ;;  %v2778_v47 = vmul.f32 %v9358_v48, %v9479_v39  ;;  %v2747_v26 = vmul.f32 %v9358_v48, %v9494_v52 }
 0x4ca   : > { %2881 = vadd.xlane.f32.xlu1 %v2774_v29  ;;  %3075 = vadd.xlane.f32.xlu2 %v2968_v13  ;;  %v2940_v29 = vmul.f32 %v9361_v5, %v2409_v21 }
 0x4cb   : > { %2819 = vadd.xlane.f32.xlu0 %v2743_v22  ;;  %7685 = vst [vmem:[#allocation2 + $0xc0] sm:$0xff] %v7510_v56  }
 0x4cc   : > { %v2992_v12 = vpop.xlane.xlu2 %2991 }
 0x4cd   : > { %v3056_v16 = vpop.xlane.xlu1 %3055  ;;  %3266 = vst.msk [vmem:[#allocation5 + $0x8] sm:$0xff] %vm3264_vm7, %v2992_v12  ;;  %v2972_v12 = vmul.f32 %v9361_v5, %v2489_v34 }
 0x4ce   : > { %3298 = vst.msk [vmem:[#allocation5 + $0x108] sm:$0xff] %vm3264_vm7, %v3056_v16  ;;  %v9489_v11 = vpop.xlane.xlu0 %2797 }
 0x4d0   : > { %v9503_v31 = vpop.f32.mrf.mxu2  ;;  %v9508_v28 = vpop.f32.mrf.mxu0 }
 0x4d1   : > { %v2554_v53 = vadd.f32 %v9366_v44, %v9508_v28  ;;  %v2585_v14 = vadd.f32 %v9366_v44, %v9503_v31  ;;  %v2748_v61 = vmul.f32 %v9358_v48, %v9508_v28 }
 0x4d2   : > { %3013 = vadd.xlane.f32.xlu1 %v2937_v10  ;;  %2883 = vadd.xlane.f32.xlu2 %v2775_v6  ;;  %v2412_v6 = vpop.f32.mrf.mxu1 }
 0x4d3   : > { %3077 = vadd.xlane.f32.xlu0 %v2969_v23  ;;  %v7435_v30 = vpack.c.bf16 %v2554_v53, %v2553_v59  ;;  %v2941_v39 = vmul.f32 %v9361_v5, %v2412_v6 }
 0x4d5   : > { %v3058_v54 = vpop.xlane.xlu2 %3057  ;;  %v9496_v17 = vpop.xlane.xlu1 %2799  ;;  %7670 = vst [vmem:[#allocation2 + $0x80] sm:$0xff] %v7435_v30  }
 0x4d6   : > { %3299 = vst.msk [vmem:[#allocation5 + $0x110] sm:$0xff] %vm3264_vm7, %v3058_v54  ;;  %v9499_v40 = vpop.xlane.xlu0 %2861  ;;  %v2779_v54 = vmul.f32 %v9358_v48, %v9503_v31 }
 0x4d8   : > { %v9524_v9 = vpop.f32.mrf.mxu2  ;;  %v9539_v8 = vpop.f32.mrf.mxu0 }
 0x4d9   : > { %v2586_v41 = vadd.f32 %v9366_v44, %v9524_v9  ;;  %v2555_v33 = vadd.f32 %v9366_v44, %v9539_v8  ;;  %v2749_v43 = vmul.f32 %v9358_v48, %v9539_v8 }
 0x4da   : > { %3015 = vadd.xlane.f32.xlu2 %v2938_v58  ;;  %2821 = vadd.xlane.f32.xlu1 %v2744_v42  ;;  %v2492_v58 = vpop.f32.mrf.mxu3  ;;  %v2414_v53 = vpop.f32.mrf.mxu1 }
 0x4db   : > { %2885 = vadd.xlane.f32.xlu0 %v2776_v18  ;;  %v7515_v36 = vpack.c.bf16 %v2586_v41, %v2585_v14  ;;  %v2973_v55 = vmul.f32 %v9361_v5, %v2492_v58 }
 0x4dd   : > { %v9514_v62 = vpop.xlane.xlu2 %2865  ;;  %v9516_v2 = vpop.xlane.xlu1 %2863  ;;  %7686 = vst [vmem:[#allocation2 + $0xa8] sm:$0xff] %v7515_v36  }
 0x4de   : > { %v2994_v1 = vpop.xlane.xlu0 %2993 }
 0x4df   : > { %3267 = vst.msk [vmem:[#allocation5 + $0x10] sm:$0xff] %vm3264_vm7, %v2994_v1 }
 0x4e0   : > { %v9537_v32 = vpop.f32.mrf.mxu2  ;;  %v9558_v56 = vpop.f32.mrf.mxu0 }
 0x4e1   : > { %v2587_v22 = vadd.f32 %v9366_v44, %v9537_v32  ;;  %v2556_v16 = vadd.f32 %v9366_v44, %v9558_v56  ;;  %v2750_v6 = vmul.f32 %v9358_v48, %v9558_v56 }
 0x4e2   : > { %3079 = vadd.xlane.f32.xlu1 %v2970_v27  ;;  %2823 = vadd.xlane.f32.xlu2 %v2745_v38  ;;  %v2942_v38 = vmul.f32 %v9361_v5, %v2414_v53  ;;  %v2494_v27 = vpop.f32.mrf.mxu3 }
 0x4e3   : > { %3017 = vadd.xlane.f32.xlu0 %v2939_v35  ;;  %v7440_v46 = vpack.c.bf16 %v2556_v16, %v2555_v33 }
 0x4e5   : > { %v9529_v60 = vpop.xlane.xlu1 %2801  ;;  %v9531_v37 = vpop.xlane.xlu2 %2803  ;;  %7671 = vst [vmem:[#allocation2 + $0x88] sm:$0xff] %v7440_v46  }
 0x4e6   : > { %v3060_v57 = vpop.xlane.xlu0 %3059 }
 0x4e7   : > { %3300 = vst.msk [vmem:[#allocation5 + $0x118] sm:$0xff] %vm3264_vm7, %v3060_v57  ;;  %v2974_v57 = vmul.f32 %v9361_v5, %v2494_v27 }
 0x4e8   : > { %v9551_v13 = vpop.f32.mrf.mxu2  ;;  %v9572_v59 = vpop.f32.mrf.mxu0 }
 0x4e9   : > { %v2588_v49 = vadd.f32 %v9366_v44, %v9551_v13  ;;  %v2557_v30 = vadd.f32 %v9366_v44, %v9572_v59 }
 0x4ea   : > { %2887 = vadd.xlane.f32.xlu1 %v2777_v45  ;;  %3081 = vadd.xlane.f32.xlu2 %v2971_v7  ;;  %v2780_v45 = vmul.f32 %v9358_v48, %v9524_v9  ;;  %v2497_v34 = vpop.f32.mrf.mxu3  ;;  %v2781_v9 = vmul.f32 %v9358_v48, %v9537_v32 }
 0x4eb   : > { %2825 = vadd.xlane.f32.xlu0 %v2746_v24  ;;  %v7520_v10 = vpack.c.bf16 %v2588_v49, %v2587_v22  ;;  %v2417_v24 = vpop.f32.mrf.mxu1  ;;  %v2975_v33 = vmul.f32 %v9361_v5, %v2497_v34 }
 0x4ec   : > { %v2943_v8 = vmul.f32 %v9361_v5, %v2417_v24 }
 0x4ed   : > { %v2996_v63 = vpop.xlane.xlu1 %2995  ;;  %v2998_v20 = vpop.xlane.xlu2 %2997  ;;  %7687 = vst [vmem:[#allocation2 + $0xd0] sm:$0xff] %v7520_v10  }
 0x4ee   : > { %3268 = vst.msk [vmem:[#allocation5 + $0x18] sm:$0xff] %vm3264_vm7, %v2996_v63  ;;  %v9544_v19 = vpop.xlane.xlu0 %2867 }
 0x4ef   : > { %3269 = vst.msk [vmem:[#allocation5 + $0x20] sm:$0xff] %vm3264_vm7, %v2998_v20 }
 0x4f0   : > { %v9582_v31 = vpop.f32.mrf.mxu2  ;;  %v9586_v1 = vpop.f32.mrf.mxu0 }
 0x4f1   : > { %v2558_v14 = vadd.f32 %v9366_v44, %v9586_v1  ;;  %v2589_v28 = vadd.f32 %v9366_v44, %v9582_v31 }
 0x4f2   : > { %3019 = vadd.xlane.f32.xlu1 %v2940_v29  ;;  %2889 = vadd.xlane.f32.xlu2 %v2778_v47 }
 0x4f3   : > { %3083 = vadd.xlane.f32.xlu0 %v2972_v12  ;;  %v7445_v35 = vpack.c.bf16 %v2558_v14, %v2557_v30  ;;  %v2419_v47 = vpop.f32.mrf.mxu1 }
 0x4f4   : > { %v2944_v46 = vmul.f32 %v9361_v5, %v2419_v47 }
 0x4f5   : > { %v3062_v23 = vpop.xlane.xlu1 %3061  ;;  %v9563_v15 = vpop.xlane.xlu2 %2805  ;;  %7672 = vst [vmem:[#allocation2 + $0xe8] sm:$0xff] %v7445_v35  }
 0x4f6   : > { %3301 = vst.msk [vmem:[#allocation5 + $0x120] sm:$0xff] %vm3264_vm7, %v3062_v23  ;;  %v3000_v25 = vpop.xlane.xlu0 %2999 }
 0x4f7   : > { %3270 = vst.msk [vmem:[#allocation5 + $0x28] sm:$0xff] %vm3264_vm7, %v3000_v25 }
 0x4f8   : > { %v9599_v7 = vpop.f32.mrf.mxu2  ;;  %v9615_v29 = vpop.f32.mrf.mxu0 }
 0x4f9   : > { %v2590_v51 = vadd.f32 %v9366_v44, %v9599_v7  ;;  %v2559_v10 = vadd.f32 %v9366_v44, %v9615_v29  ;;  %v2784_v47 = vmul.f32 %v9358_v48, %v9599_v7 }
 0x4fa   : > { %3021 = vadd.xlane.f32.xlu2 %v2941_v39  ;;  %2827 = vadd.xlane.f32.xlu1 %v2747_v26  ;;  %v2782_v39 = vmul.f32 %v9358_v48, %v9551_v13  ;;  %v2499_v26 = vpop.f32.mrf.mxu3  ;;  %v2751_v13 = vmul.f32 %v9358_v48, %v9572_v59 }
 0x4fb   : > { %2891 = vadd.xlane.f32.xlu0 %v2779_v54  ;;  %v7525_v21 = vpack.c.bf16 %v2590_v51, %v2589_v28  ;;  %v2422_v56 = vpop.f32.mrf.mxu1  ;;  %v2752_v51 = vmul.f32 %v9358_v48, %v9586_v1 }
 0x4fc   : > { %v2945_v30 = vmul.f32 %v9361_v5, %v2422_v56  ;;  %v2753_v56 = vmul.f32 %v9358_v48, %v9615_v29 }
 0x4fd   : > { %v9574_v42 = vpop.xlane.xlu1 %2869  ;;  %v3064_v18 = vpop.xlane.xlu2 %3063  ;;  %7688 = vst [vmem:[#allocation2 + $0x10] sm:$0xff] %v7525_v21  }
 0x4fe   : > { %3302 = vst.msk [vmem:[#allocation5 + $0x128] sm:$0xff] %vm3264_vm7, %v3064_v18  ;;  %v9578_v52 = vpop.xlane.xlu0 %2807 }
 0x500   : > { %v9623_v32 = vpop.f32.mrf.mxu2  ;;  %v9628_v23 = vpop.f32.mrf.mxu0 }
 0x501   : > { %v2560_v25 = vadd.f32 %v9366_v44, %v9628_v23 }
 0x502   : > { %3085 = vadd.xlane.f32.xlu1 %v2973_v55  ;;  %2829 = vadd.xlane.f32.xlu2 %v2748_v61  ;;  %v2591_v55 = vadd.f32 %v9366_v44, %v9623_v32  ;;  %v2502_v27 = vpop.f32.mrf.mxu3 }
 0x503   : > { %3023 = vadd.xlane.f32.xlu0 %v2942_v38  ;;  %v7450_v54 = vpack.c.bf16 %v2560_v25, %v2559_v10  ;;  %v2976_v38 = vmul.f32 %v9361_v5, %v2499_v26  ;;  %v2424_v24 = vpop.f32.mrf.mxu1 }
 0x504   : > { %v2946_v1 = vmul.f32 %v9361_v5, %v2424_v24 }
 0x505   : > { %v3002_v41 = vpop.xlane.xlu1 %3001  ;;  %v9591_v36 = vpop.xlane.xlu2 %2871  ;;  %7673 = vst [vmem:[#allocation2 + $0xb8] sm:$0xff] %v7450_v54  }
 0x506   : > { %3271 = vst.msk [vmem:[#allocation5 + $0x30] sm:$0xff] %vm3264_vm7, %v3002_v41  ;;  %v3066_v50 = vpop.xlane.xlu0 %3065 }
 0x507   : > { %3303 = vst.msk [vmem:[#allocation5 + $0x130] sm:$0xff] %vm3264_vm7, %v3066_v50  ;;  %v2977_v50 = vmul.f32 %v9361_v5, %v2502_v27 }
 0x508   : > { %v9644_v61 = vpop.f32.mrf.mxu2 }
 0x509   : > { %v2592_v14 = vadd.f32 %v9366_v44, %v9644_v61 }
 0x50a   : > { %2893 = vadd.xlane.f32.xlu1 %v2780_v45  ;;  %3087 = vadd.xlane.f32.xlu2 %v2974_v57  ;;  %v9658_v45 = vpop.f32.mrf.mxu0 }
 0x50b   : > { %2831 = vadd.xlane.f32.xlu0 %v2749_v43  ;;  %v7530_v35 = vpack.c.bf16 %v2592_v14, %v2591_v55  ;;  %v2783_v43 = vmul.f32 %v9358_v48, %v9582_v31  ;;  %v2427_v25 = vpop.f32.mrf.mxu1 }
 0x50c   : > { %v2947_v7 = vmul.f32 %v9361_v5, %v2427_v25 }
 0x50d   : > { %v3004_v63 = vpop.xlane.xlu2 %3003  ;;  %v9606_v20 = vpop.xlane.xlu1 %2809  ;;  %7689 = vst [vmem:[#allocation2 + $0x28] sm:$0xff] %v7530_v35  }
 0x50e   : > { %3272 = vst.msk [vmem:[#allocation5 + $0x38] sm:$0xff] %vm3264_vm7, %v3004_v63  ;;  %v9610_v22 = vpop.xlane.xlu0 %2873 }
 0x510   : > { %v9656_v57 = vpop.f32.mrf.mxu2 }
 0x511   : > { %v2593_v34 = vadd.f32 %v9366_v44, %v9656_v57 }
 0x512   : > { %3025 = vadd.xlane.f32.xlu1 %v2943_v8  ;;  %2895 = vadd.xlane.f32.xlu2 %v2781_v9  ;;  %v2504_v8 = vpop.f32.mrf.mxu3  ;;  %v2561_v9 = vadd.f32 %v9366_v44, %v9658_v45 }
 0x513   : > { %3089 = vadd.xlane.f32.xlu0 %v2975_v33  ;;  %v2978_v10 = vmul.f32 %v9361_v5, %v2504_v8  ;;  %v2429_v35 = vpop.f32.mrf.mxu1 }
 0x515   : > { %v3068_v49 = vpop.xlane.xlu1 %3067  ;;  %v9617_v12 = vpop.xlane.xlu2 %2811 }
 0x516   : > { %3304 = vst.msk [vmem:[#allocation5 + $0x138] sm:$0xff] %vm3264_vm7, %v3068_v49  ;;  %v3006_v16 = vpop.xlane.xlu0 %3005 }
 0x517   : > { %3273 = vst.msk [vmem:[#allocation5 + $0x40] sm:$0xff] %vm3264_vm7, %v3006_v16  ;;  %v9678_v16 = vpop.f32.mrf.mxu0 }
 0x518   : > { %v9671_v33 = vpop.f32.mrf.mxu2 }
 0x519   : > { %v2594_v49 = vadd.f32 %v9366_v44, %v9671_v33 }
 0x51a   : > { %3027 = vadd.xlane.f32.xlu2 %v2944_v46  ;;  %2833 = vadd.xlane.f32.xlu1 %v2750_v6  ;;  %v2562_v46 = vadd.f32 %v9366_v44, %v9678_v16 }
 0x51b   : > { %2897 = vadd.xlane.f32.xlu0 %v2782_v39  ;;  %v7535_v6 = vpack.c.bf16 %v2594_v49, %v2593_v34 }
 0x51c   : > { %v7455_v39 = vpack.c.bf16 %v2562_v46, %v2561_v9 }
 0x51d   : > { %v9634_v58 = vpop.xlane.xlu1 %2875  ;;  %v3070_v18 = vpop.xlane.xlu2 %3069  ;;  %7690 = vst [vmem:[#allocation2 + $0xa0] sm:$0xff] %v7535_v6  }
 0x51e   : > { %3305 = vst.msk [vmem:[#allocation5 + $0x140] sm:$0xff] %vm3264_vm7, %v3070_v18  ;;  %v9637_v53 = vpop.xlane.xlu0 %2813  ;;  %v2432_v6 = vpop.f32.mrf.mxu1 }
 0x51f   : > { %7674 = vst [vmem:[#allocation2 + $0x60] sm:$0xff] %v7455_v39   ;;  %v9692_v55 = vpop.f32.mrf.mxu0 }
 0x522   : > { %3091 = vadd.xlane.f32.xlu1 %v2976_v38  ;;  %2835 = vadd.xlane.f32.xlu2 %v2751_v13  ;;  %v2785_v13 = vmul.f32 %v9358_v48, %v9623_v32  ;;  %v2563_v48 = vadd.f32 %v9366_v44, %v9692_v55  ;;  %v9702_v32 = vpop.f32.mrf.mxu2 }
 0x523   : > { %3029 = vadd.xlane.f32.xlu0 %v2945_v30  ;;  %v2507_v30 = vpop.f32.mrf.mxu3  ;;  %v2595_v9 = vadd.f32 %v9366_v44, %v9702_v32 }
 0x524   : > { %v2979_v27 = vmul.f32 %v9361_v5, %v2507_v30 }
 0x525   : > { %v3008_v41 = vpop.xlane.xlu1 %3007  ;;  %v9649_v59 = vpop.xlane.xlu2 %2877 }
 0x526   : > { %3274 = vst.msk [vmem:[#allocation5 + $0x48] sm:$0xff] %vm3264_vm7, %v3008_v41  ;;  %v3072_v28 = vpop.xlane.xlu0 %3071  ;;  %v9705_v41 = vld [vmem:[%s8704_s14] ss:$0 sm:$0xff]  ;;  %v2434_v30 = vpop.f32.mrf.mxu1 }
 0x527   : > { %3306 = vst.msk [vmem:[#allocation5 + $0x148] sm:$0xff] %vm3264_vm7, %v3072_v28  ;;  %v9709_v28 = vpop.f32.mrf.mxu0 }
 0x52a   : > { %2899 = vadd.xlane.f32.xlu1 %v2783_v43  ;;  %3093 = vadd.xlane.f32.xlu2 %v2977_v50  ;;  %v2754_v50 = vmul.f32 %v9705_v41, %v9628_v23  ;;  %v9712_v43 = vld [vmem:[%s8704_s14 + $0x1] ss:$0 sm:$0xff] }
 0x52b   : > { %2837 = vadd.xlane.f32.xlu0 %v2752_v51  ;;  %v2948_v5 = vmul.f32 %v9712_v43, %v2429_v35  ;;  %v2564_v51 = vadd.f32 %v9366_v44, %v9709_v28 }
 0x52d   : > { %v3010_v21 = vpop.xlane.xlu2 %3009  ;;  %v9662_v63 = vpop.xlane.xlu1 %2815  ;;  %v7460_v24 = vpack.c.bf16 %v2564_v51, %v2563_v48 }
 0x52e   : > { %3275 = vst.msk [vmem:[#allocation5 + $0x50] sm:$0xff] %vm3264_vm7, %v3010_v21  ;;  %v9665_v31 = vpop.xlane.xlu0 %2879  ;;  %v2509_v21 = vpop.f32.mrf.mxu3 }
 0x52f   : > { %7675 = vst [vmem:[#allocation2 + $0xf0] sm:$0xff] %v7460_v24   ;;  %v2980_v49 = vmul.f32 %v9712_v43, %v2509_v21  ;;  %v2788_v24 = vmul.f32 %v9705_v41, %v9671_v33  ;;  %v2757_v33 = vmul.f32 %v9705_v41, %v9692_v55 }
 0x532   : > { %3031 = vadd.xlane.f32.xlu1 %v2946_v1  ;;  %2901 = vadd.xlane.f32.xlu2 %v2784_v47  ;;  %v2755_v1 = vmul.f32 %v9705_v41, %v9658_v45  ;;  %v9725_v47 = vpop.f32.mrf.mxu2  ;;  %v2949_v45 = vmul.f32 %v9712_v43, %v2432_v6 }
 0x533   : > { %3095 = vadd.xlane.f32.xlu0 %v2978_v10  ;;  %v2786_v10 = vmul.f32 %v9705_v41, %v9644_v61  ;;  %v2596_v46 = vadd.f32 %v9366_v44, %v9725_v47  ;;  %v2787_v61 = vmul.f32 %v9705_v41, %v9656_v57 }
 0x535   : > { %v3074_v26 = vpop.xlane.xlu1 %3073  ;;  %v9683_v54 = vpop.xlane.xlu2 %2817  ;;  %v7540_v39 = vpack.c.bf16 %v2596_v46, %v2595_v9 }
 0x536   : > { %3307 = vst.msk [vmem:[#allocation5 + $0x150] sm:$0xff] %vm3264_vm7, %v3074_v26  ;;  %v3012_v18 = vpop.xlane.xlu0 %3011 }
 0x537   : > { %3276 = vst.msk [vmem:[#allocation5 + $0x58] sm:$0xff] %vm3264_vm7, %v3012_v18 }
 0x538   : > { %7691 = vst [vmem:[#allocation2 + $0xf8] sm:$0xff] %v7540_v39  }
 0x53a   : > { %3033 = vadd.xlane.f32.xlu2 %v2947_v7  ;;  %2839 = vadd.xlane.f32.xlu1 %v2753_v56  ;;  %v2512_v7 = vpop.f32.mrf.mxu3  ;;  %v9749_v57 = vpop.f32.mrf.mxu2 }
 0x53b   : > { %2903 = vadd.xlane.f32.xlu0 %v2785_v13  ;;  %v2981_v56 = vmul.f32 %v9712_v43, %v2512_v7  ;;  %v9741_v13 = vpop.f32.mrf.mxu0 }
 0x53c   : > { %v2565_v48 = vadd.f32 %v9366_v44, %v9741_v13 }
 0x53d   : > { %v9694_v38 = vpop.xlane.xlu1 %2881  ;;  %v3076_v14 = vpop.xlane.xlu2 %3075 }
 0x53e   : > { %3308 = vst.msk [vmem:[#allocation5 + $0x158] sm:$0xff] %vm3264_vm7, %v3076_v14  ;;  %v9698_v29 = vpop.xlane.xlu0 %2819 }
 0x542   : > { %3097 = vadd.xlane.f32.xlu1 %v2979_v27  ;;  %2841 = vadd.xlane.f32.xlu2 %v2754_v50  ;;  %v2950_v50 = vmul.f32 %v9712_v43, %v2434_v30  ;;  %v9770_v6 = vpop.f32.mrf.mxu2 }
 0x543   : > { %3035 = vadd.xlane.f32.xlu0 %v2948_v5  ;;  %v2756_v5 = vmul.f32 %v9705_v41, %v9678_v16  ;;  %v9754_v51 = vpop.f32.mrf.mxu0  ;;  %v2437_v16 = vpop.f32.mrf.mxu1 }
 0x544   : > { %v2566_v21 = vadd.f32 %v9366_v44, %v9754_v51  ;;  %v2951_v46 = vmul.f32 %v9712_v43, %v2437_v16  ;;  %v2790_v16 = vmul.f32 %v9705_v41, %v9725_v47  ;;  %v2759_v47 = vmul.f32 %v9705_v41, %v9741_v13 }
 0x545   : > { %v3014_v8 = vpop.xlane.xlu1 %3013  ;;  %v9717_v34 = vpop.xlane.xlu2 %2883 }
 0x546   : > { %3277 = vst.msk [vmem:[#allocation5 + $0x60] sm:$0xff] %vm3264_vm7, %v3014_v8  ;;  %v3078_v23 = vpop.xlane.xlu0 %3077  ;;  %v2514_v8 = vpop.f32.mrf.mxu3 }
 0x547   : > { %3309 = vst.msk [vmem:[#allocation5 + $0x160] sm:$0xff] %vm3264_vm7, %v3078_v23  ;;  %v7465_v23 = vpack.c.bf16 %v2566_v21, %v2565_v48  ;;  %v2982_v39 = vmul.f32 %v9712_v43, %v2514_v8  ;;  %v2758_v48 = vmul.f32 %v9705_v41, %v9709_v28 }
 0x549   : > { %7676 = vst [vmem:[#allocation2 + $0x8] sm:$0xff] %v7465_v23  }
 0x54a   : > { %2905 = vadd.xlane.f32.xlu1 %v2786_v10  ;;  %3099 = vadd.xlane.f32.xlu2 %v2980_v49  ;;  %v2597_v10 = vadd.f32 %v9366_v44, %v9749_v57 }
 0x54b   : > { %2843 = vadd.xlane.f32.xlu0 %v2755_v1  ;;  %v2278_v23 = vpop.f32.mrf.mxu0 }
 0x54d   : > { %v3016_v25 = vpop.xlane.xlu2 %3015  ;;  %v9732_v26 = vpop.xlane.xlu1 %2821 }
 0x54e   : > { %3278 = vst.msk [vmem:[#allocation5 + $0x68] sm:$0xff] %vm3264_vm7, %v3016_v25  ;;  %v9736_v18 = vpop.xlane.xlu0 %2885  ;;  %v2598_v25 = vadd.f32 %v9366_v44, %v9770_v6  ;;  %v2517_v7 = vpop.f32.mrf.mxu3 }
 0x552   : > { %3037 = vadd.xlane.f32.xlu1 %v2949_v45  ;;  %2907 = vadd.xlane.f32.xlu2 %v2787_v61  ;;  %v7545_v45 = vpack.c.bf16 %v2598_v25, %v2597_v10 }
 0x553   : > { %3101 = vadd.xlane.f32.xlu0 %v2981_v56  ;;  %v2983_v56 = vmul.f32 %v9712_v43, %v2517_v7 }
 0x554   : > { %7692 = vst [vmem:[#allocation2 + $0x20] sm:$0xff] %v7545_v45  }
 0x555   : > { %v3080_v14 = vpop.xlane.xlu1 %3079  ;;  %v9743_v35 = vpop.xlane.xlu2 %2823 }
 0x556   : > { %3310 = vst.msk [vmem:[#allocation5 + $0x168] sm:$0xff] %vm3264_vm7, %v3080_v14  ;;  %v3018_v27 = vpop.xlane.xlu0 %3017  ;;  %v2789_v14 = vmul.f32 %v9705_v41, %v9702_v32  ;;  %v2519_v21 = vpop.f32.mrf.mxu3 }
 0x557   : > { %3279 = vst.msk [vmem:[#allocation5 + $0x70] sm:$0xff] %vm3264_vm7, %v3018_v27  ;;  %v9782_v27 = vpop.f32.mrf.mxu2  ;;  %v2984_v10 = vmul.f32 %v9712_v43, %v2519_v21 }
 0x558   : > { %v2599_v32 = vadd.f32 %v9366_v44, %v9782_v27 }
 0x55a   : > { %3039 = vadd.xlane.f32.xlu2 %v2950_v50  ;;  %2845 = vadd.xlane.f32.xlu1 %v2756_v5  ;;  %v2439_v50 = vpop.f32.mrf.mxu1 }
 0x55b   : > { %2909 = vadd.xlane.f32.xlu0 %v2788_v24  ;;  %v2952_v28 = vmul.f32 %v9712_v43, %v2439_v50 }
 0x55d   : > { %v9760_v9 = vpop.xlane.xlu1 %2887  ;;  %v3082_v1 = vpop.xlane.xlu2 %3081 }
 0x55e   : > { %3311 = vst.msk [vmem:[#allocation5 + $0x170] sm:$0xff] %vm3264_vm7, %v3082_v1  ;;  %v9763_v49 = vpop.xlane.xlu0 %2825  ;;  %v2522_v50 = vpop.f32.mrf.mxu3 }
 0x55f   : > { %v9793_v1 = vpop.f32.mrf.mxu2 }
 0x562   : > { %3103 = vadd.xlane.f32.xlu1 %v2982_v39  ;;  %2847 = vadd.xlane.f32.xlu2 %v2757_v33  ;;  %v2600_v33 = vadd.f32 %v9366_v44, %v9793_v1  ;;  %v2442_v39 = vpop.f32.mrf.mxu1 }
 0x563   : > { %3041 = vadd.xlane.f32.xlu0 %v2951_v46  ;;  %v2953_v7 = vmul.f32 %v9712_v43, %v2442_v39 }
 0x564   : > { %v7550_v46 = vpack.c.bf16 %v2600_v33, %v2599_v32 }
 0x565   : > { %v3020_v61 = vpop.xlane.xlu1 %3019  ;;  %v9775_v55 = vpop.xlane.xlu2 %2889 }
 0x566   : > { %3280 = vst.msk [vmem:[#allocation5 + $0x78] sm:$0xff] %vm3264_vm7, %v3020_v61  ;;  %v3084_v30 = vpop.xlane.xlu0 %3083  ;;  %v2524_v33 = vpop.f32.mrf.mxu3 }
 0x567   : > { %3312 = vst.msk [vmem:[#allocation5 + $0x178] sm:$0xff] %vm3264_vm7, %v3084_v30  ;;  %v2791_v30 = vmul.f32 %v9705_v41, %v9749_v57  ;;  %v2760_v57 = vmul.f32 %v9705_v41, %v9754_v51  ;;  %v2792_v51 = vmul.f32 %v9705_v41, %v9770_v6 }
 0x568   : > { %7693 = vst [vmem:[#allocation2 + $0x98] sm:$0xff] %v7550_v46  }
 0x56a   : > { %2911 = vadd.xlane.f32.xlu1 %v2789_v14  ;;  %3105 = vadd.xlane.f32.xlu2 %v2983_v56  ;;  %v2567_v56 = vadd.f32 %v9366_v44, %v2278_v23  ;;  %v2280_v14 = vpop.f32.mrf.mxu0  ;;  %v2444_v13 = vpop.f32.mrf.mxu1 }
 0x56b   : > { %2849 = vadd.xlane.f32.xlu0 %v2758_v48  ;;  %v2568_v48 = vadd.f32 %v9366_v44, %v2280_v14  ;;  %v2954_v44 = vmul.f32 %v9712_v43, %v2444_v13 }
 0x56d   : > { %v3022_v5 = vpop.xlane.xlu2 %3021  ;;  %v9786_v24 = vpop.xlane.xlu1 %2827 }
 0x56e   : > { %3281 = vst.msk [vmem:[#allocation5 + $0x80] sm:$0xff] %vm3264_vm7, %v3022_v5  ;;  %v9789_v8 = vpop.xlane.xlu0 %2891  ;;  %v7470_v5 = vpack.c.bf16 %v2568_v48, %v2567_v56 }
 0x570   : > { %7677 = vst [vmem:[#allocation2 + $0x78] sm:$0xff] %v7470_v5  }
 0x572   : > { %3043 = vadd.xlane.f32.xlu1 %v2952_v28  ;;  %2913 = vadd.xlane.f32.xlu2 %v2790_v16  ;;  %v2985_v28 = vmul.f32 %v9712_v43, %v2522_v50 }
 0x573   : > { %3107 = vadd.xlane.f32.xlu0 %v2984_v10 }
 0x575   : > { %v3086_v25 = vpop.xlane.xlu1 %3085  ;;  %v9801_v45 = vpop.xlane.xlu2 %2829 }
 0x576   : > { %3313 = vst.msk [vmem:[#allocation5 + $0x180] sm:$0xff] %vm3264_vm7, %v3086_v25  ;;  %v3024_v61 = vpop.xlane.xlu0 %3023  ;;  %v2761_v25 = vmul.f32 %v9705_v41, %v2278_v23  ;;  %v2793_v23 = vmul.f32 %v9705_v41, %v9782_v27  ;;  %v2794_v27 = vmul.f32 %v9705_v41, %v9793_v1 }
 0x577   : > { %3282 = vst.msk [vmem:[#allocation5 + $0x88] sm:$0xff] %vm3264_vm7, %v3024_v61  ;;  %v2447_v61 = vpop.f32.mrf.mxu1 }
 0x578   : > { %v2955_v48 = vmul.f32 %v9712_v43, %v2447_v61 }
 0x57a   : > { %3045 = vadd.xlane.f32.xlu2 %v2953_v7  ;;  %2851 = vadd.xlane.f32.xlu1 %v2759_v47  ;;  %v2986_v7 = vmul.f32 %v9712_v43, %v2524_v33  ;;  %v2527_v47 = vpop.f32.mrf.mxu3 }
 0x57b   : > { %2915 = vadd.xlane.f32.xlu0 %v2791_v30  ;;  %v2987_v5 = vmul.f32 %v9712_v43, %v2527_v47 }
 0x57d   : > { %v9812_v21 = vpop.xlane.xlu1 %2893  ;;  %v3088_v32 = vpop.xlane.xlu2 %3087 }
 0x57e   : > { %3314 = vst.msk [vmem:[#allocation5 + $0x188] sm:$0xff] %vm3264_vm7, %v3088_v32  ;;  %v9816_v16 = vpop.xlane.xlu0 %2831 }
 0x57f   : > { %v2449_v6 = vpop.f32.mrf.mxu1 }
 0x582   : > { %3109 = vadd.xlane.f32.xlu1 %v2985_v28  ;;  %2853 = vadd.xlane.f32.xlu2 %v2760_v57  ;;  %v2762_v57 = vmul.f32 %v9705_v41, %v2280_v14  ;;  %v2529_v33 = vpop.f32.mrf.mxu3 }
 0x583   : > { %3047 = vadd.xlane.f32.xlu0 %v2954_v44  ;;  %v2956_v44 = vmul.f32 %v9712_v43, %v2449_v6 }
 0x585   : > { %v3026_v10 = vpop.xlane.xlu1 %3025  ;;  %v9821_v46 = vpop.xlane.xlu2 %2895 }
 0x586   : > { %3283 = vst.msk [vmem:[#allocation5 + $0x90] sm:$0xff] %vm3264_vm7, %v3026_v10  ;;  %v3090_v39 = vpop.xlane.xlu0 %3089 }
 0x587   : > { %3315 = vst.msk [vmem:[#allocation5 + $0x190] sm:$0xff] %vm3264_vm7, %v3090_v39 }
 0x58a   : > { %2917 = vadd.xlane.f32.xlu1 %v2792_v51  ;;  %3111 = vadd.xlane.f32.xlu2 %v2986_v7 }
 0x58b   : > { %2855 = vadd.xlane.f32.xlu0 %v2761_v25  ;;  %v2988_v25 = vmul.f32 %v9712_v43, %v2529_v33 }
 0x58d   : > { %v3028_v56 = vpop.xlane.xlu2 %3027  ;;  %v9829_v30 = vpop.xlane.xlu1 %2833 }
 0x58e   : > { %3284 = vst.msk [vmem:[#allocation5 + $0x98] sm:$0xff] %vm3264_vm7, %v3028_v56  ;;  %v9833_v50 = vpop.xlane.xlu0 %2897 }
 0x592   : > { %3049 = vadd.xlane.f32.xlu1 %v2955_v48  ;;  %2919 = vadd.xlane.f32.xlu2 %v2793_v23 }
 0x593   : > { %3113 = vadd.xlane.f32.xlu0 %v2987_v5 }
 0x595   : > { %v3092_v32 = vpop.xlane.xlu1 %3091  ;;  %v9838_v13 = vpop.xlane.xlu2 %2835 }
 0x596   : > { %3316 = vst.msk [vmem:[#allocation5 + $0x198] sm:$0xff] %vm3264_vm7, %v3092_v32  ;;  %v3030_v28 = vpop.xlane.xlu0 %3029 }
 0x597   : > { %3285 = vst.msk [vmem:[#allocation5 + $0xa0] sm:$0xff] %vm3264_vm7, %v3030_v28 }
 0x59a   : > { %3051 = vadd.xlane.f32.xlu2 %v2956_v44  ;;  %2857 = vadd.xlane.f32.xlu1 %v2762_v57 }
 0x59b   : > { %2921 = vadd.xlane.f32.xlu0 %v2794_v27 }
 0x59d   : > { %v9846_v10 = vpop.xlane.xlu1 %2899  ;;  %v3094_v39 = vpop.xlane.xlu2 %3093 }
 0x59e   : > { %3317 = vst.msk [vmem:[#allocation5 + $0x1a0] sm:$0xff] %vm3264_vm7, %v3094_v39  ;;  %v2838_v7 = vpop.xlane.xlu0 %2837 }
 0x5a2   : > { %3115 = vadd.xlane.f32.xlu1 %v2988_v25 }
 0x5a5   : > { %v3032_v14 = vpop.xlane.xlu1 %3031  ;;  %v9850_v51 = vpop.xlane.xlu2 %2901 }
 0x5a6   : > { %3286 = vst.msk [vmem:[#allocation5 + $0xa8] sm:$0xff] %vm3264_vm7, %v3032_v14  ;;  %v3096_v61 = vpop.xlane.xlu0 %3095 }
 0x5a7   : > { %3318 = vst.msk [vmem:[#allocation5 + $0x1a8] sm:$0xff] %vm3264_vm7, %v3096_v61 }
 0x5ad   : > { %v3034_v41 = vpop.xlane.xlu2 %3033  ;;  %v2840_v1 = vpop.xlane.xlu1 %2839 }
 0x5ae   : > { %3287 = vst.msk [vmem:[#allocation5 + $0xb0] sm:$0xff] %vm3264_vm7, %v3034_v41  ;;  %v9855_v47 = vpop.xlane.xlu0 %2903 }
 0x5b5   : > { %v3098_v56 = vpop.xlane.xlu1 %3097  ;;  %v2842_v48 = vpop.xlane.xlu2 %2841 }
 0x5b6   : > { %3319 = vst.msk [vmem:[#allocation5 + $0x1b0] sm:$0xff] %vm3264_vm7, %v3098_v56  ;;  %v3036_v43 = vpop.xlane.xlu0 %3035 }
 0x5b7   : > { %3288 = vst.msk [vmem:[#allocation5 + $0xb8] sm:$0xff] %vm3264_vm7, %v3036_v43 }
 0x5bd   : > { %v9859_v23 = vpop.xlane.xlu1 %2905  ;;  %v3100_v5 = vpop.xlane.xlu2 %3099 }
 0x5be   : > { %3320 = vst.msk [vmem:[#allocation5 + $0x1b8] sm:$0xff] %vm3264_vm7, %v3100_v5  ;;  %v2844_v6 = vpop.xlane.xlu0 %2843 }
 0x5c3   : > { %3117 = vxpose.xlu2.b32.start [1/16] (narrow) %v9458_v4, 8 }
 0x5c4   : > { %3149 = vxpose.xlu0.b32.start [1/16] (narrow) %v9786_v24, 8 }
 0x5c5   : > { %v3038_v32 = vpop.xlane.xlu1 %3037  ;;  %v9864_v28 = vpop.xlane.xlu2 %2907 }
 0x5c6   : > { %3289 = vst.msk [vmem:[#allocation5 + $0xc0] sm:$0xff] %vm3264_vm7, %v3038_v32  ;;  %v3102_v57 = vpop.xlane.xlu0 %3101 }
 0x5c7   : > { %3321 = vst.msk [vmem:[#allocation5 + $0x1c0] sm:$0xff] %vm3264_vm7, %v3102_v57 }
 0x5cb   : > { %3118 = vxpose.xlu2.b32.cont [2/16] (narrow) %v9489_v11, 8 }
 0x5cc   : > { %3150 = vxpose.xlu0.b32.cont [2/16] (narrow) %v9801_v45, 8 }
 0x5cd   : > { %v3040_v44 = vpop.xlane.xlu2 %3039  ;;  %v2846_v27 = vpop.xlane.xlu1 %2845 }
 0x5ce   : > { %3290 = vst.msk [vmem:[#allocation5 + $0xc8] sm:$0xff] %vm3264_vm7, %v3040_v44  ;;  %v9871_v33 = vpop.xlane.xlu0 %2909 }
 0x5d3   : > { %3119 = vxpose.xlu2.b32.cont [3/16] (narrow) %v9496_v17, 8 }
 0x5d4   : > { %3151 = vxpose.xlu0.b32.cont [3/16] (narrow) %v9816_v16, 8 }
 0x5d5   : > { %v3104_v4 = vpop.xlane.xlu1 %3103  ;;  %v2848_v24 = vpop.xlane.xlu2 %2847 }
 0x5d6   : > { %3322 = vst.msk [vmem:[#allocation5 + $0x1c8] sm:$0xff] %vm3264_vm7, %v3104_v4  ;;  %v3042_v39 = vpop.xlane.xlu0 %3041 }
 0x5d7   : > { %3291 = vst.msk [vmem:[#allocation5 + $0xd0] sm:$0xff] %vm3264_vm7, %v3042_v39 }
 0x5db   : > { %3120 = vxpose.xlu2.b32.cont [4/16] (narrow) %v9529_v60, 8 }
 0x5dc   : > { %3181 = vxpose.xlu1.b32.start [1/16] (narrow) %v9472_v3, 8  ;;  %3152 = vxpose.xlu0.b32.cont [4/16] (narrow) %v9829_v30, 8 }
 0x5dd   : > { %v9880_v11 = vpop.xlane.xlu1 %2911  ;;  %v3106_v45 = vpop.xlane.xlu2 %3105 }
 0x5de   : > { %3323 = vst.msk [vmem:[#allocation5 + $0x1d0] sm:$0xff] %vm3264_vm7, %v3106_v45  ;;  %v2850_v17 = vpop.xlane.xlu0 %2849 }
 0x5e3   : > { %3121 = vxpose.xlu2.b32.cont [5/16] (narrow) %v9531_v37, 8 }
 0x5e4   : > { %3182 = vxpose.xlu1.b32.cont [2/16] (narrow) %v9499_v40, 8  ;;  %3153 = vxpose.xlu0.b32.cont [5/16] (narrow) %v9838_v13, 8 }
 0x5e5   : > { %v3044_v16 = vpop.xlane.xlu1 %3043  ;;  %v9886_v25 = vpop.xlane.xlu2 %2913 }
 0x5e6   : > { %3292 = vst.msk [vmem:[#allocation5 + $0xd8] sm:$0xff] %vm3264_vm7, %v3044_v16  ;;  %v3108_v3 = vpop.xlane.xlu0 %3107 }
 0x5e7   : > { %3324 = vst.msk [vmem:[#allocation5 + $0x1d8] sm:$0xff] %vm3264_vm7, %v3108_v3 }
 0x5eb   : > { %3122 = vxpose.xlu2.b32.cont [6/16] (narrow) %v9563_v15, 8 }
 0x5ec   : > { %3183 = vxpose.xlu1.b32.cont [3/16] (narrow) %v9516_v2, 8  ;;  %3154 = vxpose.xlu0.b32.cont [6/16] (narrow) %v2838_v7, 8 }
 0x5ed   : > { %v3046_v60 = vpop.xlane.xlu2 %3045  ;;  %v2852_v30 = vpop.xlane.xlu1 %2851 }
 0x5ee   : > { %3293 = vst.msk [vmem:[#allocation5 + $0xe0] sm:$0xff] %vm3264_vm7, %v3046_v60  ;;  %v9893_v40 = vpop.xlane.xlu0 %2915 }
 0x5f3   : > { %3123 = vxpose.xlu2.b32.cont [7/16] (narrow) %v9578_v52, 8 }
 0x5f4   : > { %3184 = vxpose.xlu1.b32.cont [4/16] (narrow) %v9514_v62, 8  ;;  %3155 = vxpose.xlu0.b32.cont [7/16] (narrow) %v2840_v1, 8 }
 0x5f5   : > { %v3110_v37 = vpop.xlane.xlu1 %3109  ;;  %v2854_v13 = vpop.xlane.xlu2 %2853 }
 0x5f6   : > { %3325 = vst.msk [vmem:[#allocation5 + $0x1e0] sm:$0xff] %vm3264_vm7, %v3110_v37  ;;  %v3048_v14 = vpop.xlane.xlu0 %3047 }
 0x5f7   : > { %3294 = vst.msk [vmem:[#allocation5 + $0xe8] sm:$0xff] %vm3264_vm7, %v3048_v14 }
 0x5fb   : > { %3124 = vxpose.xlu2.b32.cont [8/16] (narrow) %v9606_v20, 8 }
 0x5fc   : > { %3185 = vxpose.xlu1.b32.cont [5/16] (narrow) %v9544_v19, 8  ;;  %3156 = vxpose.xlu0.b32.cont [8/16] (narrow) %v2842_v48, 8 }
 0x5fd   : > { %v2918_v2 = vpop.xlane.xlu1 %2917  ;;  %v3112_v15 = vpop.xlane.xlu2 %3111 }
 0x5fe   : > { %3326 = vst.msk [vmem:[#allocation5 + $0x1e8] sm:$0xff] %vm3264_vm7, %v3112_v15  ;;  %v2856_v52 = vpop.xlane.xlu0 %2855 }
 0x603   : > { %3125 = vxpose.xlu2.b32.cont [9/16] (narrow) %v9617_v12, 8 }
 0x604   : > { %3186 = vxpose.xlu1.b32.cont [6/16] (narrow) %v9574_v42, 8  ;;  %3157 = vxpose.xlu0.b32.cont [9/16] (narrow) %v2844_v6, 8 }
 0x605   : > { %v3050_v62 = vpop.xlane.xlu1 %3049  ;;  %v2920_v7 = vpop.xlane.xlu2 %2919 }
 0x606   : > { %3295 = vst.msk [vmem:[#allocation5 + $0xf0] sm:$0xff] %vm3264_vm7, %v3050_v62  ;;  %v3114_v61 = vpop.xlane.xlu0 %3113 }
 0x607   : > { %3327 = vst.msk [vmem:[#allocation5 + $0x1f0] sm:$0xff] %vm3264_vm7, %v3114_v61 }
 0x60b   : > { %3126 = vxpose.xlu2.b32.cont [10/16] (narrow) %v9637_v53, 8 }
 0x60c   : > { %3187 = vxpose.xlu1.b32.cont [7/16] (narrow) %v9591_v36, 8  ;;  %3158 = vxpose.xlu0.b32.cont [10/16] (narrow) %v2846_v27, 8 }
 0x60d   : > { %v3052_v19 = vpop.xlane.xlu2 %3051  ;;  %v2858_v42 = vpop.xlane.xlu1 %2857 }
 0x60e   : > { %3296 = vst.msk [vmem:[#allocation5 + $0xf8] sm:$0xff] %vm3264_vm7, %v3052_v19  ;;  %v2922_v20 = vpop.xlane.xlu0 %2921 }
 0x613   : > { %3127 = vxpose.xlu2.b32.cont [11/16] (narrow) %v9662_v63, 8 }
 0x614   : > { %3188 = vxpose.xlu1.b32.cont [8/16] (narrow) %v9610_v22, 8  ;;  %3159 = vxpose.xlu0.b32.cont [11/16] (narrow) %v2848_v24, 8 }
 0x615   : > { %v3116_v36 = vpop.xlane.xlu1 %3115 }
 0x616   : > { %3328 = vst.msk [vmem:[#allocation5 + $0x1f8] sm:$0xff] %vm3264_vm7, %v3116_v36 }
 0x61b   : > { %3128 = vxpose.xlu2.b32.cont [12/16] (narrow) %v9683_v54, 8 }
 0x61c   : > { %3189 = vxpose.xlu1.b32.cont [9/16] (narrow) %v9634_v58, 8  ;;  %3160 = vxpose.xlu0.b32.cont [12/16] (narrow) %v2850_v17, 8 }
 0x623   : > { %3129 = vxpose.xlu2.b32.cont [13/16] (narrow) %v9698_v29, 8 }
 0x624   : > { %3190 = vxpose.xlu1.b32.cont [10/16] (narrow) %v9649_v59, 8  ;;  %3161 = vxpose.xlu0.b32.cont [13/16] (narrow) %v2852_v30, 8 }
 0x62b   : > { %3130 = vxpose.xlu2.b32.cont [14/16] (narrow) %v9732_v26, 8 }
 0x62c   : > { %3191 = vxpose.xlu1.b32.cont [11/16] (narrow) %v9665_v31, 8  ;;  %3162 = vxpose.xlu0.b32.cont [14/16] (narrow) %v2854_v13, 8 }
 0x633   : > { %3131 = vxpose.xlu2.b32.cont [15/16] (narrow) %v9743_v35, 8 }
 0x634   : > { %3192 = vxpose.xlu1.b32.cont [12/16] (narrow) %v9694_v38, 8  ;;  %3163 = vxpose.xlu0.b32.cont [15/16] (narrow) %v2856_v52, 8 }
 0x63b   : > { %3132 = vxpose.xlu2.b32.end [16/16] (narrow) %v9763_v49, 8 }
 0x63c   : > { %3193 = vxpose.xlu1.b32.cont [13/16] (narrow) %v9717_v34, 8  ;;  %3164 = vxpose.xlu0.b32.end [16/16] (narrow) %v2858_v42, 8 }
 0x643   : > { %3213 = vxpose.xlu2.b32.start [1/16] (narrow) %v9789_v8, 8 }
 0x644   : > { %3194 = vxpose.xlu1.b32.cont [14/16] (narrow) %v9736_v18, 8 }
 0x64b   : > { %3214 = vxpose.xlu2.b32.cont [2/16] (narrow) %v9812_v21, 8 }
 0x64c   : > { %3195 = vxpose.xlu1.b32.cont [15/16] (narrow) %v9760_v9, 8 }
 0x653   : > { %3215 = vxpose.xlu2.b32.cont [3/16] (narrow) %v9821_v46, 8 }
 0x654   : > { %3196 = vxpose.xlu1.b32.end [16/16] (narrow) %v9775_v55, 8 }
 0x65b   : > { %3216 = vxpose.xlu2.b32.cont [4/16] (narrow) %v9833_v50, 8 }
 0x65c   : > { %v3133_v22 = vpop.trf.xlu2 }
 0x663   : > { %3217 = vxpose.xlu2.b32.cont [5/16] (narrow) %v9846_v10, 8 }
 0x668   : > { %v3165_v12 = vpop.trf.xlu0 }
 0x669   : > { %v3249_v53 = vrot.slane %v3165_v12, 7 }
 0x66b   : > { %3218 = vxpose.xlu2.b32.cont [6/16] (narrow) %v9850_v51, 8  ;;  %v3253_v54 = vsel %vm3252_vm8, %v3133_v22, %v3249_v53 }
 0x673   : > { %3219 = vxpose.xlu2.b32.cont [7/16] (narrow) %v9855_v47, 8 }
 0x67b   : > { %3220 = vxpose.xlu2.b32.cont [8/16] (narrow) %v9859_v23, 8 }
 0x680   : > { %v3197_v58 = vpop.trf.xlu1 }
 0x681   : > { %v3250_v59 = vrot.slane %v3197_v58, 6 }
 0x683   : > { %3221 = vxpose.xlu2.b32.cont [9/16] (narrow) %v9864_v28, 8 }
 0x68b   : > { %3222 = vxpose.xlu2.b32.cont [10/16] (narrow) %v9871_v33, 8 }
 0x693   : > { %3223 = vxpose.xlu2.b32.cont [11/16] (narrow) %v9880_v11, 8 }
 0x69b   : > { %3224 = vxpose.xlu2.b32.cont [12/16] (narrow) %v9886_v25, 8 }
 0x6a3   : > { %3225 = vxpose.xlu2.b32.cont [13/16] (narrow) %v9893_v40, 8 }
 0x6ab   : > { %3226 = vxpose.xlu2.b32.cont [14/16] (narrow) %v2918_v2, 8 }
 0x6b3   : > { %3227 = vxpose.xlu2.b32.cont [15/16] (narrow) %v2920_v7, 8 }
 0x6bb   : > { %3228 = vxpose.xlu2.b32.end [16/16] (narrow) %v2922_v20, 8 }
 0x6dc   : > { %v3229_v63 = vpop.trf.xlu2 }
 0x6dd   : > { %v3251_v31 = vrot.slane %v3229_v63, 5 }
 0x6df   : > { %v3255_v38 = vsel %vm3254_vm9, %v3250_v59, %v3251_v31 }
 0x6e0   : > { %v3257_v29 = vsel %vm3256_vm10, %v3253_v54, %v3255_v38 }
 0x6e1   : > { %3263 = vst.msk [vmem:[#allocation4] sm:$0xf] %vm3261_vm11, %v3257_v29 }
 0x6e2 PF: > { %s12401_s5 = sld [smem:[#allocation21_spill]]  ;;  %v12290_v34 = vmov 0  }
 0x6e3   : > { %7890 = vset.pattern.permute.xlu1 %v12290_v34  ;;  %7889 = vset.pattern.permute.xlu0 %v12290_v34  ;;  %s12688_s25 = sld [smem:[#allocation22_spill]] }
 0x6e8   : > { %s9940_s15 = sshll.u32 %s12401_s5, 8  ;;  %v3432_v25 = vld [vmem:[#allocation4] sm:$0xf] }
 0x6e9   : > { %s9945_s2 = scalar_lea.vmem [#allocation5], %s9940_s15  ;;  %s9963_s22 = scalar_lea.vmem [#allocation9], %s9940_s15  ;;  %v9993_v13 = vperm.slane %v3432_v25, 0  ;;  %v9995_v14 = vperm.slane %v3432_v25, 1  ;;  %v10000_v52 = vperm.slane %v3432_v25, 2  ;;  %v10031_v54 = vperm.slane %v3432_v25, 3 }
 0x6ea   : > { %v3402_v0 = vld [vmem:[%s9945_s2 + $0x10] sm:$0xff]  ;;  %v3400_v26 = vld [vmem:[%s9945_s2] sm:$0xff]  ;;  %v3403_v35 = vld [vmem:[%s9945_s2 + $0x18] sm:$0xff]  ;;  %p7093_p5 = scmp.ne.s32.totalorder %s12688_s25, 0 }
 0x6eb   : > { %3445 = vperm.xlu1 %7890, %v3402_v0   ;;  %3435 = vperm.xlu0 %7889, %v3400_v26   ;;  %v3404_v18 = vld [vmem:[%s9945_s2 + $0x20] sm:$0xff]  ;;  %v3401_v9 = vld [vmem:[%s9945_s2 + $0x8] sm:$0xff]  ;;  %v3407_v55 = vld [vmem:[%s9945_s2 + $0x38] sm:$0xff]  ;;  %s6333_s1 = sshra.s32 (!%p7093_p5), %s9940_s15, 3 }
 0x6ec   : > { %v3405_v49 = vld [vmem:[%s9945_s2 + $0x28] sm:$0xff]  ;;  %v3406_v8 = vld [vmem:[%s9945_s2 + $0x30] sm:$0xff]  ;;  %v3408_v46 = vld [vmem:[%s9945_s2 + $0x40] sm:$0xff]  ;;  %s7094_s16 = sshll.u32 (!%p7093_p5), %s6333_s1, 2 }
 0x6ed   : > { %v3410_v21 = vld [vmem:[%s9945_s2 + $0x50] sm:$0xff]  ;;  %v3411_v50 = vld [vmem:[%s9945_s2 + $0x58] sm:$0xff]  ;;  %v3412_v10 = vld [vmem:[%s9945_s2 + $0x60] sm:$0xff]  ;;  %s12112_s13 = scalar_lea.vmem (!%p7093_p5), [#allocation3], %s7094_s16 }
 0x6ee   : > { %v3409_v51 = vld [vmem:[%s9945_s2 + $0x48] sm:$0xff]  ;;  %v3335_v1 = vld [vmem:[%s9963_s22] sm:$0xff]  ;;  %v3337_v56 = vld [vmem:[%s9963_s22 + $0x10] sm:$0xff] }
 0x6ef   : > { %v3413_v41 = vld [vmem:[%s9945_s2 + $0x68] sm:$0xff]  ;;  %v3338_v48 = vld [vmem:[%s9963_s22 + $0x18] sm:$0xff]  ;;  %vm3367_vm12 = vnez %v3335_v1  ;;  %vm3369_vm14 = vnez %v3337_v56  ;;  %v3339_v45 = vld [vmem:[%s9963_s22 + $0x20] sm:$0xff] }
 0x6f0   : > { %v3336_v47 = vld [vmem:[%s9963_s22 + $0x8] sm:$0xff]  ;;  %vm3370_vm15 = vnez %v3338_v48  ;;  %v9970_v43 = vsel %vm3367_vm12, 16843009, %v12290_v34  ;;  %v9976_v5 = vsel %vm3369_vm14, 16843009, %v12290_v34  ;;  %v3341_v30 = vld [vmem:[%s9963_s22 + $0x30] sm:$0xff]  ;;  %vm3371_vm0 = vnez %v3339_v45 }
 0x6f1   : > { %vm3368_vm13 = vnez %v3336_v47  ;;  %v9979_v6 = vsel %vm3370_vm15, 16843009, %v12290_v34  ;;  %v4026_v32 = vunpack.c.2.s8 %v9970_v43  ;;  %v4028_v57 = vunpack.c.2.s8 %v9976_v5  ;;  %v3340_v16 = vld [vmem:[%s9963_s22 + $0x28] sm:$0xff]  ;;  %v3342_v40 = vld [vmem:[%s9963_s22 + $0x38] sm:$0xff] }
 0x6f2   : > { %v9973_v23 = vsel %vm3368_vm13, 16843009, %v12290_v34  ;;  %v4029_v44 = vunpack.c.2.s8 %v9979_v6  ;;  %v4018_v27 = vunpack.c.0.s8 %v9970_v43  ;;  %v4020_v4 = vunpack.c.0.s8 %v9976_v5 }
 0x6f3   : > { %3450 = vperm.xlu1 %7890, %v3403_v35   ;;  %3440 = vperm.xlu0 %7889, %v3401_v9   ;;  %v4027_v28 = vunpack.c.2.s8 %v9973_v23  ;;  %v4019_v33 = vunpack.c.0.s8 %v9973_v23  ;;  %v4021_v24 = vunpack.c.0.s8 %v9979_v6  ;;  %vm3372_vm1 = vnez %v3340_v16 }
 0x6f4   : > { %v4153_v11 = vpack.c.b16 %v4029_v44, %v4028_v57  ;;  %vm3373_vm2 = vnez %v3341_v30  ;;  %vm3374_vm3 = vnez %v3342_v40  ;;  %v9998_v15 = vsel %vm3371_vm0, 16843009, %v12290_v34 }
 0x6f5   : > { %v4152_v39 = vpack.c.b16 %v4027_v28, %v4026_v32  ;;  %v4146_v3 = vpack.c.b16 %v4019_v33, %v4018_v27  ;;  %v4147_v60 = vpack.c.b16 %v4021_v24, %v4020_v4  ;;  %v10009_v61 = vsel %vm3372_vm1, 16843009, %v12290_v34 }
 0x6f6   : > { %v10012_v19 = vsel %vm3373_vm2, 16843009, %v12290_v34  ;;  %v10015_v42 = vsel %vm3374_vm3, 16843009, %v12290_v34  ;;  %v4034_v20 = vunpack.c.0.s8 %v9998_v15  ;;  %v4035_v22 = vunpack.c.0.s8 %v10009_v61 }
 0x6f7   : > { %v4154_v37 = vpack.c.b8 %v4153_v11, %v4152_v39  ;;  %v4148_v2 = vpack.c.b8 %v4147_v60, %v4146_v3  ;;  %v4036_v12 = vunpack.c.0.s8 %v10012_v19  ;;  %v4037_v58 = vunpack.c.0.s8 %v10015_v42 }
 0x6f8   : > { %v4158_v26 = vpack.c.b16 %v4035_v22, %v4034_v20  ;;  %v4022_v48 = vunpack.c.1.s8 %v9970_v43  ;;  %v4023_v32 = vunpack.c.1.s8 %v9973_v23  ;;  %v4024_v44 = vunpack.c.1.s8 %v9976_v5 }
 0x6f9   : > { %vm4244_vm4 = vnez %v4154_v37  ;;  %vm4242_vm5 = vnez %v4148_v2  ;;  %v4025_v27 = vunpack.c.1.s8 %v9979_v6  ;;  %v4030_v24 = vunpack.c.3.s8 %v9970_v43 }
 0x6fa   : > { %v4276_v31 = vsel %vm4244_vm4, 16843009, %v12290_v34  ;;  %v10040_v0 = vsel %vm4242_vm5, 16843009, %v12290_v34  ;;  %v4031_v39 = vunpack.c.3.s8 %v9973_v23  ;;  %v4032_v11 = vunpack.c.3.s8 %v9976_v5 }
 0x6fb   : > { %3470 = vperm.xlu1 %7890, %v3407_v55   ;;  %3465 = vperm.xlu0 %7889, %v3406_v8   ;;  %v4315_v55 = vunpack.c.1.s8 %v4276_v31  ;;  %v4306_v1 = vunpack.c.0.s8 %v10040_v0  ;;  %v4307_v47 = vunpack.c.1.s8 %v10040_v0  ;;  %v4308_v28 = vunpack.c.2.s8 %v10040_v0 }
 0x6fc   : > { %v4309_v57 = vunpack.c.3.s8 %v10040_v0  ;;  %v4033_v45 = vunpack.c.3.s8 %v9979_v6  ;;  %v4149_v30 = vpack.c.b16 %v4023_v32, %v4022_v48  ;;  %v4150_v22 = vpack.c.b16 %v4025_v27, %v4024_v44 }
 0x6fd   : > { %vm10073_vm7 = vcmp.ne.s32.totalorder %v4315_v55, 0  ;;  %vm10123_vm11 = vcmp.ne.s32.totalorder %v4306_v1, 0  ;;  %vm10127_vm12 = vcmp.ne.s32.totalorder %v4307_v47, 0  ;;  %vm10138_vm13 = vcmp.ne.s32.totalorder %v4308_v28, 0 }
 0x6fe   : > { %v4156_v0 = vpack.c.b16 %v4033_v45, %v4032_v11  ;;  %v4151_v45 = vpack.c.b8 %v4150_v22, %v4149_v30  ;;  %vm10149_vm14 = vcmp.ne.s32.totalorder %v4309_v57, 0 }
 0x700   : > { %vm4243_vm15 = vnez %v4151_v45 }
 0x703   : > { %3475 = vperm.xlu1 %7890, %v3408_v46   ;;  %3490 = vperm.xlu0 %7889, %v3411_v50   ;;  %v4316_v46 = vunpack.c.2.s8 %v4276_v31  ;;  %v4317_v50 = vunpack.c.3.s8 %v4276_v31 }
 0x705   : > { %vm10107_vm9 = vcmp.ne.s32.totalorder %v4316_v46, 0  ;;  %vm10119_vm10 = vcmp.ne.s32.totalorder %v4317_v50, 0 }
 0x70b   : > { %3480 = vperm.xlu1 %7890, %v3409_v51  }
 0x713   : > { %3500 = vperm.xlu1 %7890, %v3413_v41  }
 0x71d   : > { %7891 = vset.pattern.permute.xlu2 %v12290_v34 }
 0x724   : > { %3455 = vperm.xlu2 %7891, %v3404_v18   ;;  %v4159_v18 = vpack.c.b16 %v4037_v58, %v4036_v12 }
 0x726   : > { %v4160_v56 = vpack.c.b8 %v4159_v18, %v4158_v26 }
 0x728   : > { %vm10096_vm8 = vnez %v4160_v56 }
 0x72c   : > { %3460 = vperm.xlu2 %7891, %v3405_v49   ;;  %v4314_v49 = vunpack.c.0.s8 %v4276_v31  ;;  %v4155_v31 = vpack.c.b16 %v4031_v39, %v4030_v24  ;;  %v10136_v24 = vsel %vm10096_vm8, 16843009, %v12290_v34 }
 0x72d   : > { %v4324_v5 = vunpack.c.2.s8 %v10136_v24 }
 0x72e   : > { %vm10069_vm6 = vcmp.ne.s32.totalorder %v4314_v49, 0  ;;  %v4157_v25 = vpack.c.b8 %v4156_v0, %v4155_v31 }
 0x72f   : > { %vm4452_vm3 = vcmp.ne.s32.totalorder %v4324_v5, 0 }
 0x730   : > { %vm4245_vm0 = vnez %v4157_v25 }
 0x734   : > { %3485 = vperm.xlu2 %7891, %v3410_v21   ;;  %v4325_v21 = vunpack.c.3.s8 %v10136_v24 }
 0x736   : > { %vm4453_vm4 = vcmp.ne.s32.totalorder %v4325_v21, 0 }
 0x73c   : > { %3495 = vperm.xlu2 %7891, %v3412_v10  }
 0x75d   : > { %v3446_v60 = vpop.permute.xlu1 %3445  ;;  %v3436_v43 = vpop.permute.xlu0 %3435 }
 0x75e   : > { %v3610_v40 = vadd.f32 %v9993_v13, %v3446_v60  ;;  %v3611_v37 = vadd.f32 %v9995_v14, %v3446_v60  ;;  %v3612_v2 = vadd.f32 %v10000_v52, %v3446_v60  ;;  %v3613_v12 = vadd.f32 %v10031_v54, %v3446_v60 }
 0x75f   : > { %v3602_v49 = vadd.f32 %v9993_v13, %v3436_v43  ;;  %v3603_v55 = vadd.f32 %v9995_v14, %v3436_v43  ;;  %v3604_v47 = vadd.f32 %v10000_v52, %v3436_v43 }
 0x760   : > { %v3738_v26 = vmul.f32 0.2, %v3610_v40  ;;  %v3739_v18 = vmul.f32 0.2, %v3611_v37  ;;  %v3740_v50 = vmul.f32 0.2, %v3612_v2 }
 0x761   : > { %v3730_v28 = vmul.f32 0.2, %v3602_v49  ;;  %v3732_v31 = vmul.f32 0.2, %v3604_v47 }
 0x762   : > { %v3866_v39 = vmax.f32 %v3610_v40, %v3738_v26  ;;  %v3867_v11 = vmax.f32 %v3611_v37, %v3739_v18  ;;  %v3605_v40 = vadd.f32 %v10031_v54, %v3436_v43  ;;  %v3731_v37 = vmul.f32 0.2, %v3603_v55 }
 0x763   : > { %v3741_v26 = vmul.f32 0.2, %v3613_v12  ;;  %v4323_v18 = vunpack.c.1.s8 %v10136_v24  ;;  %v3868_v57 = vmax.f32 %v3612_v2, %v3740_v50  ;;  %v3858_v8 = vmax.f32 %v3602_v49, %v3730_v28 }
 0x764   : > { %v10164_v27 = vsel %vm10069_vm6, %v3866_v39, -1e+30  ;;  %v10168_v43 = vsel %vm10073_vm7, %v3867_v11, -1e+30  ;;  %v3859_v34 = vmax.f32 %v3603_v55, %v3731_v37  ;;  %v3733_v50 = vmul.f32 0.2, %v3605_v40 }
 0x765   : > { %12421 = vst [vmem:[#allocation29_spill] sm:$0xff] %v10164_v27  ;;  %v3451_v0 = vpop.permute.xlu1 %3450  ;;  %v3869_v2 = vmax.f32 %v3613_v12, %v3741_v26  ;;  %v4700_v33 = vmax.f32 %v10164_v27, %v10168_v43  ;;  %vm10178_vm2 = vcmp.ne.s32.totalorder %v4323_v18, 0  ;;  %v12427_v11 = vmov 0  }
 0x766   : > { %12422 = vst [vmem:[#allocation30_spill] sm:$0xff] %v10168_v43  ;;  %v10183_v45 = vsel %vm4243_vm15, 16843009, %v12427_v11  ;;  %v10186_v25 = vadd.f32 %v9993_v13, %v3451_v0  ;;  %v10189_v12 = vadd.f32 %v9995_v14, %v3451_v0  ;;  %v10195_v55 = vsel %vm10107_vm9, %v3868_v57, -1e+30 }
 0x767   : > { %12428 = vst [vmem:[#allocation31_spill] sm:$0xff] %v10195_v55  ;;  %v4701_v26 = vmax.f32 %v4700_v33, %v10195_v55  ;;  %v10205_v18 = vsel %vm10119_vm10, %v3869_v2, -1e+30  ;;  %v3861_v43 = vmax.f32 %v3605_v40, %v3733_v50  ;;  %v10213_v57 = vsel %vm10127_vm12, %v3859_v34, -1e+30 }
 0x768   : > { %12429 = vst [vmem:[#allocation32_spill] sm:$0xff] %v10205_v18  ;;  %v10230_v46 = vmul.f32 0.2, %v10186_v25  ;;  %v10238_v40 = vmul.f32 0.2, %v10189_v12  ;;  %v10251_v6 = vadd.f32 %v10031_v54, %v3451_v0  ;;  %v4312_v39 = vunpack.c.2.s8 %v10183_v45 }
 0x769   : > { %v4702_v33 = vmax.f32 %v4701_v26, %v10205_v18  ;;  %v10235_v44 = vsel %vm10149_vm14, %v3861_v43, -1e+30 }
 0x76a   : > { %vm4440_vm7 = vcmp.ne.s32.totalorder %v4312_v39, 0 }
 0x76b   : > { %4703 = vmax.xlane.f32.xlu1 %v4702_v33 }
 0x77e   : > { %v3456_v17 = vpop.permute.xlu2 %3455 }
 0x77f   : > { %v10003_v62 = vadd.f32 %v9993_v13, %v3456_v17  ;;  %v10006_v7 = vadd.f32 %v9995_v14, %v3456_v17  ;;  %v10018_v36 = vadd.f32 %v10000_v52, %v3456_v17  ;;  %v10043_v35 = vadd.f32 %v10031_v54, %v3456_v17 }
 0x781   : > { %v10025_v53 = vmul.f32 0.2, %v10003_v62  ;;  %v10028_v59 = vmul.f32 0.2, %v10006_v7  ;;  %v10046_v9 = vmul.f32 0.2, %v10018_v36 }
 0x782   : > { %v10092_v23 = vmul.f32 0.2, %v10043_v35 }
 0x783   : > { %v12431_v55 = vmax.f32 %v10003_v62, %v10025_v53  ;;  %v12433_v21 = vmax.f32 %v10006_v7, %v10028_v59  ;;  %v12435_v62 = vmax.f32 %v10018_v36, %v10046_v9  ;;  %v4310_v7 = vunpack.c.0.s8 %v10183_v45 }
 0x784   : > { %v4311_v59 = vunpack.c.1.s8 %v10183_v45  ;;  %v4313_v36 = vunpack.c.3.s8 %v10183_v45 }
 0x785   : > { %v10279_v53 = vsel %vm4452_vm3, %v12435_v62, -1e+30  ;;  %vm4438_vm5 = vcmp.ne.s32.totalorder %v4310_v7, 0 }
 0x786   : > { %v3461_v63 = vpop.permute.xlu2 %3460  ;;  %12436 = vst [vmem:[#allocation36_spill] sm:$0xff] %v10279_v53  ;;  %vm4439_vm6 = vcmp.ne.s32.totalorder %v4311_v59, 0  ;;  %vm4441_vm8 = vcmp.ne.s32.totalorder %v4313_v36, 0 }
 0x787   : > { %v10034_v38 = vadd.f32 %v9993_v13, %v3461_v63  ;;  %v10037_v29 = vadd.f32 %v9995_v14, %v3461_v63  ;;  %v10053_v10 = vadd.f32 %v10000_v52, %v3461_v63  ;;  %v10082_v17 = vadd.f32 %v10031_v54, %v3461_v63 }
 0x788   : > { %v10209_v63 = vsel %vm10123_vm11, %v3858_v8, -1e+30  ;;  %v10227_v8 = vadd.f32 %v10000_v52, %v3451_v0  ;;  %v3871_v0 = vmax.f32 %v10189_v12, %v10238_v40 }
 0x789   : > { %v10056_v51 = vmul.f32 0.2, %v10034_v38  ;;  %v10059_v41 = vmul.f32 0.2, %v10037_v29  ;;  %v10085_v16 = vmul.f32 0.2, %v10053_v10 }
 0x78a   : > { %v3744_v33 = vmul.f32 0.2, %v10227_v8 }
 0x78e   : > { %v3486_v20 = vpop.permute.xlu2 %3485 }
 0x78f   : > { %v10105_v58 = vadd.f32 %v9993_v13, %v3486_v20  ;;  %v10114_v56 = vadd.f32 %v9995_v14, %v3486_v20  ;;  %v10117_v48 = vadd.f32 %v10000_v52, %v3486_v20  ;;  %v10144_v60 = vadd.f32 %v10031_v54, %v3486_v20 }
 0x790   : > { %v4322_v20 = vunpack.c.0.s8 %v10136_v24  ;;  %v10198_v24 = vsel %vm4245_vm0, 16843009, %v12427_v11 }
 0x791   : > { %12410 = vst [vmem:[#allocation28_spill] sm:$0xff] %v10117_v48  ;;  %v10147_v3 = vmul.f32 0.2, %v10105_v58  ;;  %v10155_v30 = vmul.f32 0.2, %v10114_v56  ;;  %v4320_v7 = vunpack.c.2.s8 %v10198_v24 }
 0x792   : > { %v10158_v22 = vmul.f32 0.2, %v10117_v48  ;;  %v3441_v48 = vpop.permute.xlu0 %3440  ;;  %vm10174_vm1 = vcmp.ne.s32.totalorder %v4322_v20, 0  ;;  %v3860_v20 = vmax.f32 %v3604_v47, %v3732_v31  ;;  %v4690_v47 = vmax.f32 %v10209_v63, %v10213_v57 }
 0x793   : > { %v3606_v28 = vadd.f32 %v9993_v13, %v3441_v48  ;;  %v3607_v37 = vadd.f32 %v9995_v14, %v3441_v48  ;;  %v3608_v34 = vadd.f32 %v10000_v52, %v3441_v48  ;;  %v3609_v50 = vadd.f32 %v10031_v54, %v3441_v48 }
 0x794   : > { %v10222_v32 = vsel %vm10138_vm13, %v3860_v20, -1e+30  ;;  %v3870_v48 = vmax.f32 %v10186_v25, %v10230_v46  ;;  %v10265_v5 = vsel %vm10174_vm1, %v12431_v55, -1e+30  ;;  %v10274_v25 = vsel %vm10178_vm2, %v12433_v21, -1e+30 }
 0x795   : > { %12430 = vst [vmem:[#allocation33_spill] sm:$0xff] %v10222_v32  ;;  %v3734_v1 = vmul.f32 0.2, %v3606_v28  ;;  %v4691_v2 = vmax.f32 %v4690_v47, %v10222_v32  ;;  %v3735_v26 = vmul.f32 0.2, %v3607_v37  ;;  %v12437_v55 = vmax.f32 %v10043_v35, %v10092_v23 }
 0x796   : > { %v10191_v49 = vpop.permute.xlu2 %3495  ;;  %v3736_v47 = vmul.f32 0.2, %v3608_v34  ;;  %12432 = vst [vmem:[#allocation34_spill] sm:$0xff] %v10265_v5  ;;  %vm4448_vm11 = vcmp.ne.s32.totalorder %v4320_v7, 0 }
 0x797   : > { %v10217_v27 = vadd.f32 %v9993_v13, %v10191_v49  ;;  %v10242_v31 = vadd.f32 %v9995_v14, %v10191_v49  ;;  %v10248_v20 = vadd.f32 %v10000_v52, %v10191_v49  ;;  %v4692_v18 = vmax.f32 %v4691_v2, %v10235_v44  ;;  %v3471_v2 = vpop.permute.xlu1 %3470  ;;  %12434 = vst [vmem:[#allocation35_spill] sm:$0xff] %v10274_v25 }
 0x798   : > { %v3862_v32 = vmax.f32 %v3606_v28, %v3734_v1  ;;  %v3863_v4 = vmax.f32 %v3607_v37, %v3735_v26  ;;  %v10284_v12 = vsel %vm4453_vm4, %v12437_v55, -1e+30  ;;  %v4710_v28 = vmax.f32 %v10265_v5, %v10274_v25 }
 0x799   : > { %v10254_v43 = vmul.f32 0.2, %v10217_v27  ;;  %4693 = vmax.xlane.f32.xlu2 %v4692_v18  ;;  %12438 = vst [vmem:[#allocation37_spill] sm:$0xff] %v10284_v12  ;;  %v3737_v18 = vmul.f32 0.2, %v3609_v50  ;;  %v10293_v9 = vadd.f32 %v9993_v13, %v3471_v2  ;;  %v10296_v37 = vadd.f32 %v9995_v14, %v3471_v2 }
 0x79a   : > { %v4711_v35 = vmax.f32 %v4710_v28, %v10279_v53  ;;  %v3864_v23 = vmax.f32 %v3608_v34, %v3736_v47  ;;  %v10300_v46 = vadd.f32 %v10000_v52, %v3471_v2  ;;  %v3466_v40 = vpop.permute.xlu0 %3465  ;;  %v10303_v45 = vsel %vm4438_vm5, %v3862_v32, -1e+30 }
 0x79b   : > { %v3865_v26 = vmax.f32 %v3609_v50, %v3737_v18  ;;  %v10305_v21 = vsel %vm4439_vm6, %v3863_v4, -1e+30  ;;  %v3745_v34 = vmul.f32 0.2, %v10251_v6  ;;  %v4318_v47 = vunpack.c.0.s8 %v10198_v24 }
 0x79c   : > { %v4712_v1 = vmax.f32 %v4711_v35, %v10284_v12  ;;  %12439 = vst [vmem:[#allocation38_spill] sm:$0xff] %v10305_v21  ;;  %v4695_v62 = vmax.f32 %v10303_v45, %v10305_v21  ;;  %v10311_v55 = vsel %vm4440_vm7, %v3864_v23, -1e+30  ;;  %v4319_v28 = vunpack.c.1.s8 %v10198_v24 }
 0x79d   : > { %12440 = vst [vmem:[#allocation39_spill] sm:$0xff] %v10311_v55  ;;  %v4321_v32 = vunpack.c.3.s8 %v10198_v24  ;;  %v10317_v50 = vadd.f32 %v9993_v13, %v3466_v40  ;;  %v3872_v18 = vmax.f32 %v10227_v8, %v3744_v33  ;;  %vm4446_vm9 = vcmp.ne.s32.totalorder %v4318_v47, 0 }
 0x79e   : > { %4713 = vmax.xlane.f32.xlu1 %v4712_v1  ;;  %v4696_v4 = vmax.f32 %v4695_v62, %v10311_v55  ;;  %v10321_v59 = vsel %vm4441_vm8, %v3865_v26, -1e+30  ;;  %vm4447_vm10 = vcmp.ne.s32.totalorder %v4319_v28, 0  ;;  %v10323_v39 = vsel %vm4446_vm9, %v3870_v48, -1e+30 }
 0x79f   : > { %12441 = vst [vmem:[#allocation40_spill] sm:$0xff] %v10321_v59  ;;  %v10326_v36 = vadd.f32 %v9995_v14, %v3466_v40  ;;  %v3873_v24 = vmax.f32 %v10251_v6, %v3745_v34  ;;  %v10330_v23 = vsel %vm4447_vm10, %v3871_v0, -1e+30  ;;  %v10333_v1 = vmul.f32 0.2, %v10242_v31  ;;  %v10350_v62 = vpop.permute.xlu1 %3475 }
 0x7a0   : > { %12442 = vst [vmem:[#allocation41_spill] sm:$0xff] %v10323_v39  ;;  %v4697_v35 = vmax.f32 %v4696_v4, %v10321_v59  ;;  %v10336_v8 = vadd.f32 %v10031_v54, %v3471_v2  ;;  %vm4449_vm12 = vcmp.ne.s32.totalorder %v4321_v32, 0  ;;  %v4705_v33 = vmax.f32 %v10323_v39, %v10330_v23 }
 0x7a1   : > { %12443 = vst [vmem:[#allocation42_spill] sm:$0xff] %v10330_v23  ;;  %v10343_v26 = vmul.f32 0.2, %v10293_v9  ;;  %v10346_v6 = vmul.f32 0.2, %v10296_v37  ;;  %v10356_v34 = vadd.f32 %v10000_v52, %v3466_v40  ;;  %v10364_v32 = vadd.f32 %v10031_v54, %v3466_v40 }
 0x7a2   : > { %4698 = vmax.xlane.f32.xlu0 %v4697_v35  ;;  %v10348_v0 = vsel %vm4448_vm11, %v3872_v18, -1e+30  ;;  %v10353_v2 = vmul.f32 0.2, %v10248_v20  ;;  %v10359_v47 = vmul.f32 0.2, %v10317_v50  ;;  %v4046_v12 = vunpack.c.3.s8 %v9998_v15 }
 0x7a3   : > { %12444 = vst [vmem:[#allocation43_spill] sm:$0xff] %v10348_v0  ;;  %v4706_v28 = vmax.f32 %v4705_v33, %v10348_v0  ;;  %v3760_v7 = vmul.f32 0.2, %v10300_v46  ;;  %v10367_v4 = vmul.f32 0.2, %v10326_v36  ;;  %v4047_v53 = vunpack.c.3.s8 %v10009_v61 }
 0x7a4   : > { %v10369_v18 = vsel %vm4449_vm12, %v3873_v24, -1e+30  ;;  %v3761_v48 = vmul.f32 0.2, %v10336_v8  ;;  %v3886_v33 = vmax.f32 %v10293_v9, %v10343_v26  ;;  %v3887_v40 = vmax.f32 %v10296_v37, %v10346_v6 }
 0x7a5   : > { %12445 = vst [vmem:[#allocation44_spill] sm:$0xff] %v10369_v18  ;;  %v4707_v35 = vmax.f32 %v4706_v28, %v10369_v18  ;;  %v4048_v25 = vunpack.c.3.s8 %v10012_v19  ;;  %v4049_v5 = vunpack.c.3.s8 %v10015_v42  ;;  %v10382_v24 = vmul.f32 0.2, %v10356_v34 }
 0x7a6   : > { %v4167_v18 = vpack.c.b16 %v4047_v53, %v4046_v12  ;;  %v10387_v0 = vmul.f32 0.2, %v10082_v17  ;;  %v4038_v9 = vunpack.c.1.s8 %v9998_v15  ;;  %v4039_v37 = vunpack.c.1.s8 %v10009_v61 }
 0x7a7   : > { %4708 = vmax.xlane.f32.xlu2 %v4707_v35  ;;  %v4168_v23 = vpack.c.b16 %v4049_v5, %v4048_v25  ;;  %v4040_v26 = vunpack.c.1.s8 %v10012_v19  ;;  %v3888_v39 = vmax.f32 %v10300_v46, %v3760_v7  ;;  %v3889_v59 = vmax.f32 %v10336_v8, %v3761_v48  ;;  %v10408_v48 = vpop.permute.xlu1 %3480 }
 0x7a8   : > { %v4041_v35 = vunpack.c.1.s8 %v10015_v42  ;;  %v4161_v12 = vpack.c.b16 %v4039_v37, %v4038_v9  ;;  %v4042_v28 = vunpack.c.2.s8 %v9998_v15  ;;  %v4043_v5 = vunpack.c.2.s8 %v10009_v61 }
 0x7a9   : > { %v4169_v53 = vpack.c.b8 %v4168_v23, %v4167_v18  ;;  %v3880_v25 = vmax.f32 %v10053_v10, %v10085_v16  ;;  %v4044_v21 = vunpack.c.2.s8 %v10012_v19  ;;  %v4045_v6 = vunpack.c.2.s8 %v10015_v42 }
 0x7aa   : > { %v4162_v55 = vpack.c.b16 %v4041_v35, %v4040_v26  ;;  %v3881_v46 = vmax.f32 %v10082_v17, %v10387_v0  ;;  %v10406_v8 = vmul.f32 0.2, %v10364_v32  ;;  %v4164_v23 = vpack.c.b16 %v4043_v5, %v4042_v28 }
 0x7ab   : > { %vm4249_vm13 = vnez %v4169_v53  ;;  %v3884_v10 = vmax.f32 %v10356_v34, %v10382_v24  ;;  %v4165_v16 = vpack.c.b16 %v4045_v6, %v4044_v21  ;;  %v10415_v17 = vadd.f32 %v9993_v13, %v10408_v48 }
 0x7ac   : > { %v4281_v15 = vsel %vm4249_vm13, 16843009, %v12427_v11  ;;  %v4163_v61 = vpack.c.b8 %v4162_v55, %v4161_v12  ;;  %v10419_v0 = vadd.f32 %v9995_v14, %v10408_v48 }
 0x7ad   : > { %v4334_v19 = vunpack.c.0.s8 %v4281_v15  ;;  %v4335_v7 = vunpack.c.1.s8 %v4281_v15  ;;  %v4336_v42 = vunpack.c.2.s8 %v4281_v15  ;;  %v4337_v18 = vunpack.c.3.s8 %v4281_v15 }
 0x7ae   : > { %vm4247_vm14 = vnez %v4163_v61  ;;  %v4166_v9 = vpack.c.b8 %v4165_v16, %v4164_v23  ;;  %v12449_v23 = vmax.f32 %v10034_v38, %v10056_v51  ;;  %v12450_v61 = vmax.f32 %v10037_v29, %v10059_v41  ;;  %v3343_v38 = vld [vmem:[%s9963_s22 + $0x40] sm:$0xff]  ;;  %v3344_v51 = vld [vmem:[%s9963_s22 + $0x48] sm:$0xff] }
 0x7af   : > { %vm4462_vm15 = vcmp.ne.s32.totalorder %v4334_v19, 0  ;;  %vm4463_vm0 = vcmp.ne.s32.totalorder %v4335_v7, 0  ;;  %vm4464_vm1 = vcmp.ne.s32.totalorder %v4336_v42, 0  ;;  %vm4465_vm2 = vcmp.ne.s32.totalorder %v4337_v18, 0 }
 0x7b0   : > { %v10421_v55 = vsel %vm4462_vm15, %v3886_v33, -1e+30  ;;  %v10423_v21 = vsel %vm4463_vm0, %v3887_v40, -1e+30  ;;  %v10425_v34 = vsel %vm4464_vm1, %v3888_v39, -1e+30  ;;  %vm4248_vm3 = vnez %v4166_v9 }
 0x7b1   : > { %12446 = vst [vmem:[#allocation45_spill] sm:$0xff] %v10423_v21  ;;  %v10427_v24 = vsel %vm4465_vm2, %v3889_v59, -1e+30  ;;  %v4725_v28 = vmax.f32 %v10421_v55, %v10423_v21  ;;  %v4279_v37 = vsel %vm4247_vm14, 16843009, %v12427_v11  ;;  %v3885_v42 = vmax.f32 %v10364_v32, %v10406_v8 }
 0x7b2   : > { %12447 = vst [vmem:[#allocation46_spill] sm:$0xff] %v10425_v34  ;;  %v4280_v26 = vsel %vm4248_vm3, 16843009, %v12427_v11  ;;  %v4326_v6 = vunpack.c.0.s8 %v4279_v37  ;;  %v4327_v35 = vunpack.c.1.s8 %v4279_v37  ;;  %v4328_v53 = vunpack.c.2.s8 %v4279_v37 }
 0x7b3   : > { %12448 = vst [vmem:[#allocation47_spill] sm:$0xff] %v10427_v24  ;;  %v4329_v12 = vunpack.c.3.s8 %v4279_v37  ;;  %v4726_v33 = vmax.f32 %v4725_v28, %v10425_v34  ;;  %v4330_v40 = vunpack.c.0.s8 %v4280_v26  ;;  %v4331_v39 = vunpack.c.1.s8 %v4280_v26  ;;  %v3346_v37 = vld [vmem:[%s9963_s22 + $0x58] sm:$0xff] }
 0x7b4   : > { %v4332_v5 = vunpack.c.2.s8 %v4280_v26  ;;  %vm4454_vm4 = vcmp.ne.s32.totalorder %v4326_v6, 0  ;;  %vm4455_vm5 = vcmp.ne.s32.totalorder %v4327_v35, 0  ;;  %vm4456_vm6 = vcmp.ne.s32.totalorder %v4328_v53, 0 }
 0x7b5   : > { %vm4457_vm7 = vcmp.ne.s32.totalorder %v4329_v12, 0  ;;  %v4727_v59 = vmax.f32 %v4726_v33, %v10427_v24  ;;  %v10438_v15 = vsel %vm4454_vm4, %v12449_v23, -1e+30  ;;  %v10443_v16 = vsel %vm4455_vm5, %v12450_v61, -1e+30  ;;  %v3347_v61 = vld [vmem:[%s9963_s22 + $0x60] sm:$0xff] }
 0x7b6   : > { %v10445_v19 = vsel %vm4456_vm6, %v3880_v25, -1e+30  ;;  %v4715_v7 = vmax.f32 %v10438_v15, %v10443_v16  ;;  %v4333_v18 = vunpack.c.3.s8 %v4280_v26  ;;  %vm4458_vm8 = vcmp.ne.s32.totalorder %v4330_v40, 0  ;;  %v3348_v25 = vld [vmem:[%s9963_s22 + $0x68] sm:$0xff] }
 0x7b7   : > { %4728 = vmax.xlane.f32.xlu1 %v4727_v59  ;;  %v10453_v9 = vsel %vm4457_vm7, %v3881_v46, -1e+30  ;;  %vm4459_vm9 = vcmp.ne.s32.totalorder %v4331_v39, 0  ;;  %vm4460_vm10 = vcmp.ne.s32.totalorder %v4332_v5, 0  ;;  %v12451_v29 = vmax.f32 %v10317_v50, %v10359_v47  ;;  %v3345_v46 = vld [vmem:[%s9963_s22 + $0x50] sm:$0xff]  ;;  %v3501_v39 = vpop.permute.xlu1 %3500 }
 0x7b8   : > { %v4716_v28 = vmax.f32 %v4715_v7, %v10445_v19  ;;  %vm4461_vm11 = vcmp.ne.s32.totalorder %v4333_v18, 0  ;;  %v12453_v32 = vmax.f32 %v10326_v36, %v10367_v4  ;;  %v10474_v50 = vadd.f32 %v10000_v52, %v10408_v48 }
 0x7b9   : > { %v10458_v41 = vsel %vm4458_vm8, %v12451_v29, -1e+30  ;;  %v10477_v47 = vmul.f32 0.2, %v10415_v17  ;;  %v10480_v6 = vmul.f32 0.2, %v10419_v0  ;;  %vm3375_vm12 = vnez %v3343_v38 }
 0x7ba   : > { %12452 = vst [vmem:[#allocation48_spill] sm:$0xff] %v10458_v41  ;;  %v10466_v8 = vsel %vm4459_vm9, %v12453_v32, -1e+30  ;;  %v4717_v35 = vmax.f32 %v4716_v28, %v10453_v9  ;;  %v10483_v36 = vsel %vm4460_vm10, %v3884_v10, -1e+30  ;;  %vm3376_vm13 = vnez %v3344_v51 }
 0x7bb   : > { %12454 = vst [vmem:[#allocation49_spill] sm:$0xff] %v10466_v8  ;;  %v4720_v26 = vmax.f32 %v10458_v41, %v10466_v8  ;;  %v10485_v4 = vsel %vm4461_vm11, %v3885_v42, -1e+30  ;;  %vm3377_vm14 = vnez %v3345_v46  ;;  %vm3378_vm15 = vnez %v3346_v37 }
 0x7bc   : > { %12455 = vst [vmem:[#allocation50_spill] sm:$0xff] %v10483_v36  ;;  %v10490_v12 = vadd.f32 %v10031_v54, %v10191_v49  ;;  %4718 = vmax.xlane.f32.xlu0 %v4717_v35  ;;  %v10493_v33 = vsel %vm3375_vm12, 16843009, %v12427_v11  ;;  %v10496_v40 = vsel %vm3376_vm13, 16843009, %v12427_v11  ;;  %v10516_v51 = vadd.f32 %v10031_v54, %v10408_v48  ;;  %v12457_v35 = vld [vmem:[#allocation28_spill] sm:$0xff] }
 0x7bd   : > { %12456 = vst [vmem:[#allocation51_spill] sm:$0xff] %v10485_v4  ;;  %v4721_v53 = vmax.f32 %v4720_v26, %v10483_v36  ;;  %v10499_v10 = vsel %vm3377_vm14, 16843009, %v12427_v11  ;;  %v3773_v59 = vmul.f32 0.2, %v10144_v60  ;;  %v4058_v49 = vunpack.c.2.s8 %v10493_v33 }
 0x7be   : > { %v10504_v23 = vsel %vm3378_vm15, 16843009, %v12427_v11  ;;  %v4059_v7 = vunpack.c.2.s8 %v10496_v40  ;;  %v4060_v42 = vunpack.c.2.s8 %v10499_v10  ;;  %v10519_v29 = vmul.f32 0.2, %v10474_v50 }
 0x7bf   : > { %v4722_v5 = vmax.f32 %v4721_v53, %v10485_v4  ;;  %v4061_v18 = vunpack.c.2.s8 %v10504_v23  ;;  %v10522_v28 = vadd.f32 %v9993_v13, %v3501_v39  ;;  %v3900_v53 = vmax.f32 %v12457_v35, %v10158_v22 }
 0x7c0   : > { %v4176_v37 = vpack.c.b16 %v4059_v7, %v4058_v49  ;;  %v3901_v48 = vmax.f32 %v10144_v60, %v3773_v59  ;;  %v4054_v38 = vunpack.c.1.s8 %v10493_v33  ;;  %v10538_v32 = vadd.f32 %v10000_v52, %v3501_v39 }
 0x7c1   : > { %4723 = vmax.xlane.f32.xlu2 %v4722_v5  ;;  %v4177_v26 = vpack.c.b16 %v4061_v18, %v4060_v42  ;;  %v10532_v5 = vadd.f32 %v9995_v14, %v3501_v39  ;;  %v4055_v49 = vunpack.c.1.s8 %v10496_v40  ;;  %v4056_v7 = vunpack.c.1.s8 %v10499_v10  ;;  %v3349_v42 = vld [vmem:[%s9963_s22 + $0x70] sm:$0xff] }
 0x7c2   : > { %v10544_v22 = vadd.f32 %v10031_v54, %v3501_v39  ;;  %v10547_v60 = vmul.f32 0.2, %v10522_v28  ;;  %v10550_v59 = vmul.f32 0.2, %v10516_v51  ;;  %v4057_v18 = vunpack.c.1.s8 %v10504_v23 }
 0x7c3   : > { %v4178_v24 = vpack.c.b8 %v4177_v26, %v4176_v37  ;;  %v4173_v37 = vpack.c.b16 %v4055_v49, %v4054_v38  ;;  %v3350_v26 = vld [vmem:[%s9963_s22 + $0x78] sm:$0xff]  ;;  %vm3379_vm1 = vnez %v3347_v61  ;;  %vm3380_vm2 = vnez %v3348_v25 }
 0x7c4   : > { %v3896_v46 = vmax.f32 %v10474_v50, %v10519_v29  ;;  %v4174_v39 = vpack.c.b16 %v4057_v18, %v4056_v7  ;;  %vm3381_vm3 = vnez %v3349_v42  ;;  %vm3382_vm4 = vnez %v3350_v26  ;;  %v3414_v42 = vld [vmem:[%s9945_s2 + $0x70] sm:$0xff] }
 0x7c5   : > { %vm4252_vm0 = vnez %v4178_v24  ;;  %v10558_v41 = vsel %vm3379_vm1, 16843009, %v12427_v11  ;;  %v10561_v24 = vsel %vm3380_vm2, 16843009, %v12427_v11  ;;  %v12458_v25 = vmax.f32 %v10105_v58, %v10147_v3 }
 0x7c6   : > { %v4284_v35 = vsel %vm4252_vm0, 16843009, %v12427_v11  ;;  %v4175_v21 = vpack.c.b8 %v4174_v39, %v4173_v37  ;;  %v12459_v61 = vmax.f32 %v10114_v56, %v10155_v30  ;;  %v10582_v3 = vsel %vm3381_vm3, 16843009, %v12427_v11 }
 0x7c7   : > { %v4346_v4 = vunpack.c.0.s8 %v4284_v35  ;;  %v4347_v36 = vunpack.c.1.s8 %v4284_v35  ;;  %v4348_v8 = vunpack.c.2.s8 %v4284_v35  ;;  %v4349_v34 = vunpack.c.3.s8 %v4284_v35 }
 0x7c8   : > { %vm4251_vm9 = vnez %v4175_v21  ;;  %v10587_v21 = vsel %vm3382_vm4, 16843009, %v12427_v11  ;;  %v10592_v7 = vmul.f32 0.2, %v10532_v5  ;;  %v3897_v37 = vmax.f32 %v10516_v51, %v10550_v59 }
 0x7c9   : > { %vm4474_vm5 = vcmp.ne.s32.totalorder %v4346_v4, 0  ;;  %vm4475_vm6 = vcmp.ne.s32.totalorder %v4347_v36, 0  ;;  %vm4476_vm7 = vcmp.ne.s32.totalorder %v4348_v8, 0  ;;  %vm4477_vm8 = vcmp.ne.s32.totalorder %v4349_v34, 0 }
 0x7ca   : > { %v10566_v50 = vsel %vm4474_vm5, %v12458_v25, -1e+30  ;;  %v10571_v38 = vsel %vm4475_vm6, %v12459_v61, -1e+30  ;;  %v10573_v29 = vsel %vm4476_vm7, %v3900_v53, -1e+30  ;;  %v4066_v53 = vunpack.c.0.s8 %v10558_v41 }
 0x7cb   : > { %v10575_v49 = vsel %vm4477_vm8, %v3901_v48, -1e+30  ;;  %v4740_v8 = vmax.f32 %v10566_v50, %v10571_v38  ;;  %v4283_v34 = vsel %vm4251_vm9, 16843009, %v12427_v11  ;;  %v4067_v48 = vunpack.c.0.s8 %v10561_v24 }
 0x7cc   : > { %v4342_v58 = vunpack.c.0.s8 %v4283_v34  ;;  %v4343_v36 = vunpack.c.1.s8 %v4283_v34  ;;  %v4344_v56 = vunpack.c.2.s8 %v4283_v34  ;;  %v4345_v30 = vunpack.c.3.s8 %v4283_v34 }
 0x7cd   : > { %v4741_v4 = vmax.f32 %v4740_v8, %v10573_v29  ;;  %v12460_v26 = vmax.f32 %v10415_v17, %v10477_v47  ;;  %v12461_v39 = vmax.f32 %v10419_v0, %v10480_v6  ;;  %v4068_v34 = vunpack.c.0.s8 %v10582_v3 }
 0x7ce   : > { %vm4470_vm10 = vcmp.ne.s32.totalorder %v4342_v58, 0  ;;  %vm4471_vm11 = vcmp.ne.s32.totalorder %v4343_v36, 0  ;;  %vm4472_vm12 = vcmp.ne.s32.totalorder %v4344_v56, 0  ;;  %vm10608_vm13 = vcmp.ne.s32.totalorder %v4345_v30, 0 }
 0x7cf   : > { %v4742_v18 = vmax.f32 %v4741_v4, %v10575_v49  ;;  %v10601_v35 = vsel %vm4470_vm10, %v12460_v26, -1e+30  ;;  %v10606_v25 = vsel %vm4471_vm11, %v12461_v39, -1e+30  ;;  %v4069_v51 = vunpack.c.0.s8 %v10587_v21 }
 0x7d0   : > { %v4735_v8 = vmax.f32 %v10601_v35, %v10606_v25  ;;  %v10616_v17 = vsel %vm4472_vm12, %v3896_v46, -1e+30  ;;  %3505 = vperm.xlu0 %7889, %v3414_v42   ;;  %v3781_v47 = vmul.f32 0.2, %v10490_v12  ;;  %v4182_v0 = vpack.c.b16 %v4067_v48, %v4066_v53 }
 0x7d1   : > { %4743 = vmax.xlane.f32.xlu2 %v4742_v18  ;;  %v4070_v6 = vunpack.c.1.s8 %v10558_v41  ;;  %v4183_v58 = vpack.c.b16 %v4069_v51, %v4068_v34  ;;  %v4071_v36 = vunpack.c.1.s8 %v10561_v24  ;;  %v4072_v56 = vunpack.c.1.s8 %v10582_v3 }
 0x7d2   : > { %v4736_v59 = vmax.f32 %v4735_v8, %v10616_v17  ;;  %v10624_v30 = vmul.f32 0.2, %v10538_v32  ;;  %v3910_v46 = vmax.f32 %v10522_v28, %v10547_v60  ;;  %v10630_v4 = vsel %vm10608_vm13, %v3897_v37, -1e+30 }
 0x7d3   : > { %v4073_v53 = vunpack.c.1.s8 %v10587_v21  ;;  %v4184_v42 = vpack.c.b8 %v4183_v58, %v4182_v0  ;;  %v4185_v18 = vpack.c.b16 %v4071_v36, %v4070_v6  ;;  %v4050_v26 = vunpack.c.0.s8 %v10493_v33 }
 0x7d4   : > { %v4737_v48 = vmax.f32 %v4736_v59, %v10630_v4  ;;  %v3911_v39 = vmax.f32 %v10532_v5, %v10592_v7  ;;  %v4051_v34 = vunpack.c.0.s8 %v10496_v40  ;;  %v4052_v28 = vunpack.c.0.s8 %v10499_v10 }
 0x7d5   : > { %v4186_v8 = vpack.c.b16 %v4073_v53, %v4072_v56  ;;  %v3908_v60 = vmax.f32 %v10248_v20, %v10353_v2  ;;  %v3909_v37 = vmax.f32 %v10490_v12, %v3781_v47  ;;  %vm4254_vm14 = vnez %v4184_v42 }
 0x7d6   : > { %4738 = vmax.xlane.f32.xlu1 %v4737_v48  ;;  %v4053_v61 = vunpack.c.0.s8 %v10504_v23  ;;  %v4286_v51 = vsel %vm4254_vm14, 16843009, %v12427_v11  ;;  %v3785_v0 = vmul.f32 0.2, %v10544_v22  ;;  %v4170_v5 = vpack.c.b16 %v4051_v34, %v4050_v26 }
 0x7d7   : > { %v4187_v6 = vpack.c.b8 %v4186_v8, %v4185_v18  ;;  %v4354_v7 = vunpack.c.0.s8 %v4286_v51  ;;  %v4355_v59 = vunpack.c.1.s8 %v4286_v51  ;;  %v4356_v58 = vunpack.c.2.s8 %v4286_v51 }
 0x7d8   : > { %v4357_v36 = vunpack.c.3.s8 %v4286_v51  ;;  %v4171_v56 = vpack.c.b16 %v4053_v61, %v4052_v28  ;;  %v4062_v53 = vunpack.c.3.s8 %v10493_v33  ;;  %v4063_v20 = vunpack.c.3.s8 %v10496_v40 }
 0x7d9   : > { %vm4255_vm15 = vnez %v4187_v6  ;;  %vm4482_vm0 = vcmp.ne.s32.totalorder %v4354_v7, 0  ;;  %vm4483_vm1 = vcmp.ne.s32.totalorder %v4355_v59, 0  ;;  %vm4484_vm2 = vcmp.ne.s32.totalorder %v4356_v58, 0 }
 0x7da   : > { %vm4485_vm3 = vcmp.ne.s32.totalorder %v4357_v36, 0  ;;  %v12464_v2 = vmax.f32 %v10217_v27, %v10254_v43  ;;  %v12465_v47 = vmax.f32 %v10242_v31, %v10333_v1  ;;  %v10657_v42 = vsel %vm4484_vm2, %v3908_v60, -1e+30 }
 0x7db   : > { %12466 = vst [vmem:[#allocation28_spill] sm:$0xff] %v10657_v42  ;;  %v4172_v18 = vpack.c.b8 %v4171_v56, %v4170_v5  ;;  %v10659_v33 = vsel %vm4485_vm3, %v3909_v37, -1e+30  ;;  %v4287_v26 = vsel %vm4255_vm15, 16843009, %v12427_v11  ;;  %v4064_v8 = vunpack.c.3.s8 %v10499_v10  ;;  %v3491_v56 = vpop.permute.xlu0 %3490 }
 0x7dc   : > { %v10650_v12 = vsel %vm4482_vm0, %v12464_v2, -1e+30  ;;  %v10655_v48 = vsel %vm4483_vm1, %v12465_v47, -1e+30  ;;  %12467 = vst [vmem:[#allocation52_spill] sm:$0xff] %v10659_v33  ;;  %v4358_v27 = vunpack.c.0.s8 %v4287_v26  ;;  %v4359_v43 = vunpack.c.1.s8 %v4287_v26 }
 0x7dd   : > { %v4750_v40 = vmax.f32 %v10650_v12, %v10655_v48  ;;  %v4360_v34 = vunpack.c.2.s8 %v4287_v26  ;;  %v4361_v28 = vunpack.c.3.s8 %v4287_v26  ;;  %v3912_v1 = vmax.f32 %v10538_v32, %v10624_v30 }
 0x7de   : > { %v4065_v60 = vunpack.c.3.s8 %v10504_v23  ;;  %v3913_v37 = vmax.f32 %v10544_v22, %v3785_v0  ;;  %vm4486_vm4 = vcmp.ne.s32.totalorder %v4358_v27, 0  ;;  %vm4487_vm5 = vcmp.ne.s32.totalorder %v4359_v43, 0 }
 0x7df   : > { %v4751_v31 = vmax.f32 %v4750_v40, %v10657_v42  ;;  %vm4488_vm6 = vcmp.ne.s32.totalorder %v4360_v34, 0  ;;  %v10671_v51 = vsel %vm4486_vm4, %v3910_v46, -1e+30  ;;  %v10673_v10 = vsel %vm4487_vm5, %v3911_v39, -1e+30 }
 0x7e0   : > { %vm4250_vm7 = vnez %v4172_v18  ;;  %vm4489_vm8 = vcmp.ne.s32.totalorder %v4361_v28, 0  ;;  %v4755_v6 = vmax.f32 %v10671_v51, %v10673_v10  ;;  %v4179_v5 = vpack.c.b16 %v4063_v20, %v4062_v53 }
 0x7e1   : > { %v4752_v61 = vmax.f32 %v4751_v31, %v10659_v33  ;;  %v4180_v32 = vpack.c.b16 %v4065_v60, %v4064_v8  ;;  %v3634_v23 = vadd.f32 %v9993_v13, %v10350_v62  ;;  %v3635_v22 = vadd.f32 %v9995_v14, %v10350_v62 }
 0x7e2   : > { %v10681_v30 = vsel %vm4488_vm6, %v3912_v1, -1e+30  ;;  %v10684_v39 = vsel %vm4489_vm8, %v3913_v37, -1e+30  ;;  %v4282_v0 = vsel %vm4250_vm7, 16843009, %v12427_v11  ;;  %v3636_v2 = vadd.f32 %v10000_v52, %v10350_v62 }
 0x7e3   : > { %4753 = vmax.xlane.f32.xlu1 %v4752_v61  ;;  %12468 = vst [vmem:[#allocation53_spill] sm:$0xff] %v10681_v30  ;;  %v4756_v46 = vmax.f32 %v4755_v6, %v10681_v30  ;;  %v4181_v59 = vpack.c.b8 %v4180_v32, %v4179_v5  ;;  %v3762_v58 = vmul.f32 0.2, %v3634_v23  ;;  %v3763_v36 = vmul.f32 0.2, %v3635_v22 }
 0x7e4   : > { %12469 = vst [vmem:[#allocation54_spill] sm:$0xff] %v10684_v39  ;;  %v4338_v53 = vunpack.c.0.s8 %v4282_v0  ;;  %v4339_v20 = vunpack.c.1.s8 %v4282_v0  ;;  %v3646_v47 = vadd.f32 %v9993_v13, %v3491_v56  ;;  %v3647_v26 = vadd.f32 %v9995_v14, %v3491_v56 }
 0x7e5   : > { %v4757_v7 = vmax.f32 %v4756_v46, %v10684_v39  ;;  %vm4253_vm9 = vnez %v4181_v59  ;;  %v3890_v18 = vmax.f32 %v3634_v23, %v3762_v58  ;;  %v3891_v40 = vmax.f32 %v3635_v22, %v3763_v36 }
 0x7e6   : > { %vm4466_vm10 = vcmp.ne.s32.totalorder %v4338_v53, 0  ;;  %vm4467_vm11 = vcmp.ne.s32.totalorder %v4339_v20, 0  ;;  %v3637_v8 = vadd.f32 %v10031_v54, %v10350_v62  ;;  %v3764_v27 = vmul.f32 0.2, %v3636_v2 }
 0x7e7   : > { %4758 = vmax.xlane.f32.xlu2 %v4757_v7  ;;  %v4285_v43 = vsel %vm4253_vm9, 16843009, %v12427_v11  ;;  %v3774_v34 = vmul.f32 0.2, %v3646_v47  ;;  %v4340_v28 = vunpack.c.2.s8 %v4282_v0  ;;  %v3775_v31 = vmul.f32 0.2, %v3647_v26 }
 0x7e8   : > { %v10695_v1 = vsel %vm4466_vm10, %v3890_v18, -1e+30  ;;  %v10697_v60 = vsel %vm4467_vm11, %v3891_v40, -1e+30  ;;  %v4350_v37 = vunpack.c.0.s8 %v4285_v43  ;;  %v4351_v61 = vunpack.c.1.s8 %v4285_v43  ;;  %v7206_v18 = vld [vmem:[#allocation2 + $0x48] sm:$0xff]  ;;  %v7214_v40 = vld [vmem:[#allocation2 + $0x78] sm:$0xff] }
 0x7e9   : > { %v3648_v6 = vadd.f32 %v10000_v52, %v3491_v56  ;;  %v3765_v5 = vmul.f32 0.2, %v3637_v8  ;;  %v3892_v32 = vmax.f32 %v3636_v2, %v3764_v27  ;;  %v4341_v23 = vunpack.c.3.s8 %v4282_v0  ;;  %5586 = vmatpush.bf16.msra.mxu0 %v7206_v18  ;;  %5675 = vmatpush.bf16.msra.mxu1 %v7214_v40  ;;  %v7211_v18 = vld [vmem:[#allocation2 + $0x60] sm:$0xff] }
 0x7ea   : > { %vm4468_vm12 = vcmp.ne.s32.totalorder %v4340_v28, 0  ;;  %v4730_v62 = vmax.f32 %v10695_v1, %v10697_v60  ;;  %v3902_v22 = vmax.f32 %v3646_v47, %v3774_v34  ;;  %v3903_v46 = vmax.f32 %v3647_v26, %v3775_v31  ;;  %v7222_v47 = vld [vmem:[#allocation2 + $0xc0] sm:$0xff]  ;;  %v7230_v34 = vld [vmem:[#allocation2 + $0x98] sm:$0xff] }
 0x7eb   : > { %vm4478_vm13 = vcmp.ne.s32.totalorder %v4350_v37, 0  ;;  %vm4479_vm14 = vcmp.ne.s32.totalorder %v4351_v61, 0  ;;  %v3649_v7 = vadd.f32 %v10031_v54, %v3491_v56  ;;  %v3776_v59 = vmul.f32 0.2, %v3648_v6  ;;  %v7205_v37 = vld [vmem:[#allocation2 + $0x30] sm:$0xff]  ;;  %v7213_v61 = vld [vmem:[#allocation2 + $0x8] sm:$0xff]  ;;  %5764 = vmatpush.bf16.msra.mxu2 %v7222_v47  ;;  %5853 = vmatpush.bf16.msra.mxu3 %v7230_v34 }
 0x7ec   : > { %v3893_v58 = vmax.f32 %v3637_v8, %v3765_v5  ;;  %v10703_v36 = vsel %vm4468_vm12, %v3892_v32, -1e+30  ;;  %vm4469_vm15 = vcmp.ne.s32.totalorder %v4341_v23, 0  ;;  %v4352_v20 = vunpack.c.2.s8 %v4285_v43  ;;  %v7221_v5 = vld [vmem:[#allocation2 + $0x70] sm:$0xff]  ;;  %v7229_v32 = vld [vmem:[#allocation2 + $0x20] sm:$0xff]  ;;  %v3415_v23 = vld [vmem:[%s9945_s2 + $0x78] sm:$0xff] }
 0x7ed   : > { %v4731_v53 = vmax.f32 %v4730_v62, %v10703_v36  ;;  %v10706_v2 = vsel %vm4478_vm13, %v3902_v22, -1e+30  ;;  %v10708_v0 = vsel %vm4479_vm14, %v3903_v46, -1e+30  ;;  %v3777_v27 = vmul.f32 0.2, %v3649_v7  ;;  %5587 = vmatpush.bf16.msra.mxu0 %v7205_v37  ;;  %5676 = vmatpush.bf16.msra.mxu1 %v7213_v61 }
 0x7ee   : > { %v10710_v26 = vsel %vm4469_vm15, %v3893_v58, -1e+30  ;;  %v3904_v56 = vmax.f32 %v3648_v6, %v3776_v59  ;;  %v4353_v28 = vunpack.c.3.s8 %v4285_v43  ;;  %vm4480_vm0 = vcmp.ne.s32.totalorder %v4352_v20, 0  ;;  %v7204_v22 = vld [vmem:[#allocation2 + $0x68] sm:$0xff]  ;;  %v7212_v46 = vld [vmem:[#allocation2 + $0xf0] sm:$0xff]  ;;  %v7228_v58 = vld [vmem:[#allocation2 + $0xf8] sm:$0xff] }
 0x7ef   : > { %v4732_v8 = vmax.f32 %v4731_v53, %v10710_v26  ;;  %v4745_v31 = vmax.f32 %v10706_v2, %v10708_v0  ;;  %v3905_v62 = vmax.f32 %v3649_v7, %v3777_v27  ;;  %5765 = vmatpush.bf16.msra.mxu2 %v7221_v5  ;;  %5854 = vmatpush.bf16.msra.mxu3 %v7229_v32  ;;  %v7220_v59 = vld [vmem:[#allocation2 + $0x90] sm:$0xff]  ;;  %v7219_v40 = vld [vmem:[#allocation2 + $0xe0] sm:$0xff]  ;;  %v7210_v34 = vld [vmem:[#allocation2 + $0xb8] sm:$0xff] }
 0x7f0   : > { %v10716_v6 = vsel %vm4480_vm0, %v3904_v56, -1e+30  ;;  %vm4481_vm1 = vcmp.ne.s32.totalorder %v4353_v28, 0  ;;  %v7203_v7 = vld [vmem:[#allocation2 + $0x50] sm:$0xff]  ;;  %v7227_v47 = vld [vmem:[#allocation2 + $0xa0] sm:$0xff]  ;;  %v7202_v56 = vld [vmem:[#allocation2 + $0x18] sm:$0xff] }
 0x7f1   : > { %v4746_v43 = vmax.f32 %v4745_v31, %v10716_v6  ;;  %v10719_v53 = vsel %vm4481_vm1, %v3905_v62, -1e+30  ;;  %5588 = vmatpush.bf16.msra.mxu0 %v7204_v22  ;;  %5677 = vmatpush.bf16.msra.mxu1 %v7212_v46  ;;  %v3416_v27 = vld [vmem:[%s9945_s2 + $0x80] sm:$0xff]  ;;  %v7226_v28 = vld [vmem:[#allocation2 + $0x28] sm:$0xff]  ;;  %v7201_v31 = vld [vmem:[#allocation2 + $0xd8] sm:$0xff] }
 0x7f2   : > { %v7209_v37 = vld [vmem:[#allocation2 + $0xe8] sm:$0xff]  ;;  %v7217_v61 = vld [vmem:[#allocation2 + $0x40] sm:$0xff]  ;;  %v7225_v5 = vld [vmem:[#allocation2 + $0x10] sm:$0xff] }
 0x7f3   : > { %v4747_v20 = vmax.f32 %v4746_v43, %v10719_v53  ;;  %5766 = vmatpush.bf16.msra.mxu2 %v7220_v59  ;;  %5855 = vmatpush.bf16.msra.mxu3 %v7228_v58  ;;  %v3422_v46 = vld [vmem:[%s9945_s2 + $0xb0] sm:$0xff] }
 0x7f4   : > { %v12470_v59 = vld [vmem:[#allocation33_spill] sm:$0xff] }
 0x7f5   : > { %5589 = vmatpush.bf16.msra.mxu0 %v7203_v7  ;;  %5678 = vmatpush.bf16.msra.mxu1 %v7211_v18  ;;  %v7200_v18 = vld [vmem:[#allocation2] sm:$0xff] }
 0x7f7   : > { %5767 = vmatpush.bf16.msra.mxu2 %v7219_v40  ;;  %5856 = vmatpush.bf16.msra.mxu3 %v7227_v47  ;;  %v7208_v40 = vld [vmem:[#allocation2 + $0x88] sm:$0xff]  ;;  %v7216_v47 = vld [vmem:[#allocation2 + $0x58] sm:$0xff] }
 0x7f9   : > { %5590 = vmatpush.bf16.msra.mxu0 %v7202_v56  ;;  %5679 = vmatpush.bf16.msra.mxu1 %v7210_v34  ;;  %v7224_v56 = vld [vmem:[#allocation2 + $0xd0] sm:$0xff] }
 0x7fa   : > { %4733 = vmax.xlane.f32.xlu0 %v4732_v8  ;;  %v7218_v8 = vld [vmem:[#allocation2 + $0xc8] sm:$0xff] }
 0x7fb   : > { %5768 = vmatpush.bf16.msra.mxu2 %v7218_v8  ;;  %5857 = vmatpush.bf16.msra.mxu3 %v7226_v28 }
 0x7fd   : > { %5591 = vmatpush.bf16.msra.mxu0 %v7201_v31  ;;  %5680 = vmatpush.bf16.msra.mxu1 %v7209_v37  ;;  %v12471_v31 = vld [vmem:[#allocation38_spill] sm:$0xff]  ;;  %v12472_v37 = vld [vmem:[#allocation39_spill] sm:$0xff] }
 0x7ff   : > { %3510 = vperm.xlu2 %7891, %v3415_v23   ;;  %v3421_v23 = vld [vmem:[%s9945_s2 + $0xa8] sm:$0xff]  ;;  %5769 = vmatpush.bf16.msra.mxu2 %v7217_v61  ;;  %v7199_v61 = vld [vmem:[#allocation2 + $0xb0] sm:$0xff] }
 0x800   : > { %5858 = vmatpush.bf16.msra.mxu3 %v7225_v5  ;;  %v12473_v5 = vld [vmem:[#allocation40_spill] sm:$0xff] }
 0x801   : > { %5592 = vmatpush.bf16.msra.mxu0 %v7200_v18  ;;  %5681 = vmatpush.bf16.msra.mxu1 %v7208_v40 }
 0x802   : > { %4748 = vmax.xlane.f32.xlu0 %v4747_v20 }
 0x803   : > { %5770 = vmatpush.bf16.msra.mxu2 %v7216_v47 }
 0x804   : > { %5859 = vmatpush.bf16.msra.mxu3 %v7224_v56 }
 0x805   : > { %5593 = vmatpush.bf16.msra.mxu0 %v7199_v61 }
 0x807   : > { %3515 = vperm.xlu2 %7891, %v3416_v27  }
 0x80c   : > { %v4694_v32 = vpop.xlane.xlu2 %4693 }
 0x80d   : > { %v4850_v62 = vmax.f32 %v4694_v32, 0.0 }
 0x80f   : > { %3540 = vperm.xlu2 %7891, %v3421_v23   ;;  %v4882_v43 = vsub.f32 %v10209_v63, %v4850_v62  ;;  %v4883_v22 = vsub.f32 %v10213_v57, %v4850_v62  ;;  %v4884_v58 = vsub.f32 %v12470_v59, %v4850_v62  ;;  %v4885_v8 = vsub.f32 %v10235_v44, %v4850_v62  ;;  %v7207_v23 = vld [vmem:[#allocation2 + $0x80] sm:$0xff] }
 0x810   : > { %5682 = vmatpush.bf16.msra.mxu1 %v7207_v23 }
 0x811   : > { %v5010_v27 = vmul.f32 1.442695, %v4882_v43  ;;  %v5012_v34 = vmul.f32 1.442695, %v4883_v22  ;;  %v5014_v59 = vmul.f32 1.442695, %v4884_v58 }
 0x812   : > { %v7215_v43 = vld [vmem:[#allocation2 + $0x38] sm:$0xff]  ;;  %v5016_v62 = vmul.f32 1.442695, %v4885_v8 }
 0x813   : > { %7896 = vpow2.f32 %v5010_v27  ;;  %5771 = vmatpush.bf16.msra.mxu2 %v7215_v43 }
 0x814   : > { %7898 = vpow2.f32 %v5012_v34 }
 0x815   : > { %v4699_v20 = vpop.xlane.xlu0 %4698 }
 0x816   : > { %v4851_v7 = vmax.f32 %v4699_v20, 0.0 }
 0x817   : > { %3545 = vperm.xlu2 %7891, %v3422_v46   ;;  %v7223_v46 = vld [vmem:[#allocation2 + $0xa8] sm:$0xff] }
 0x818   : > { %v4886_v28 = vsub.f32 %v10303_v45, %v4851_v7  ;;  %v4887_v63 = vsub.f32 %v12471_v31, %v4851_v7  ;;  %v4888_v57 = vsub.f32 %v12472_v37, %v4851_v7  ;;  %v4889_v32 = vsub.f32 %v12473_v5, %v4851_v7  ;;  %5860 = vmatpush.bf16.msra.mxu3 %v7223_v46  ;;  %v4704_v37 = vpop.xlane.xlu1 %4703  ;;  %v12476_v46 = vld [vmem:[#allocation31_spill] sm:$0xff] }
 0x819   : > { %v7897_v7 = vpop.eup %7896 }
 0x81a   : > { %v5018_v22 = vmul.f32 1.442695, %v4886_v28  ;;  %v5020_v44 = vmul.f32 1.442695, %v4887_v63  ;;  %v5022_v45 = vmul.f32 1.442695, %v4888_v57  ;;  %v7899_v58 = vpop.eup %7898  ;;  %v4709_v61 = vpop.xlane.xlu2 %4708 }
 0x81b   : > { %v5024_v20 = vmul.f32 1.442695, %v4889_v32  ;;  %v4852_v57 = vmax.f32 %v4704_v37, 0.0  ;;  %v4853_v5 = vmax.f32 %v4709_v61, 0.0  ;;  %v12474_v32 = vld [vmem:[#allocation29_spill] sm:$0xff] }
 0x81c   : > { %7900 = vpow2.f32 %v5018_v22 }
 0x81d   : > { %7902 = vpow2.f32 %v5014_v59  ;;  %v4890_v23 = vsub.f32 %v12474_v32, %v4852_v57  ;;  %v12475_v59 = vld [vmem:[#allocation30_spill] sm:$0xff]  ;;  %v4892_v22 = vsub.f32 %v12476_v46, %v4852_v57 }
 0x81e   : > { %7904 = vpow2.f32 %v5020_v44  ;;  %v4891_v43 = vsub.f32 %v12475_v59, %v4852_v57  ;;  %v12477_v44 = vld [vmem:[#allocation41_spill] sm:$0xff] }
 0x81f   : > { %7906 = vpow2.f32 %v5022_v45  ;;  %v4894_v45 = vsub.f32 %v12477_v44, %v4853_v5 }
 0x820   : > { %7908 = vpow2.f32 %v5016_v62  ;;  %v4714_v62 = vpop.xlane.xlu1 %4713 }
 0x821   : > { %7910 = vpow2.f32 %v5024_v20  ;;  %v12478_v20 = vld [vmem:[#allocation42_spill] sm:$0xff]  ;;  %v4854_v59 = vmax.f32 %v4714_v62, 0.0 }
 0x822   : > { %v7901_v18 = vpop.eup %7900 }
 0x823   : > { %v7903_v40 = vpop.eup %7902  ;;  %v5266_v47 = vpack.c.bf16 %v7901_v18, %v7897_v7  ;;  %v4895_v7 = vsub.f32 %v12478_v20, %v4853_v5 }
 0x824   : > { %v7905_v27 = vpop.eup %7904 }
 0x825   : > { %v7907_v56 = vpop.eup %7906  ;;  %5594 = vmatmul.bf16.vlgmr.msra.gmra.mxu0 %v5266_v47  ;;  %v5267_v34 = vpack.c.bf16 %v7905_v27, %v7899_v58  ;;  %v12479_v58 = vld [vmem:[#allocation43_spill] sm:$0xff]  ;;  %v5028_v47 = vmul.f32 1.442695, %v4891_v43  ;;  %v12480_v27 = vld [vmem:[#allocation32_spill] sm:$0xff]  ;;  %v5036_v37 = vmul.f32 1.442695, %v4895_v7 }
 0x826   : > { %v7909_v28 = vpop.eup %7908  ;;  %v5268_v8 = vpack.c.bf16 %v7907_v56, %v7903_v40  ;;  %v4896_v18 = vsub.f32 %v12479_v58, %v4853_v5  ;;  %v5026_v40 = vmul.f32 1.442695, %v4890_v23  ;;  %v4893_v56 = vsub.f32 %v12480_v27, %v4852_v57  ;;  %v12482_v43 = vld [vmem:[#allocation34_spill] sm:$0xff]  ;;  %v12484_v27 = vld [vmem:[#allocation36_spill] sm:$0xff] }
 0x827   : > { %v7911_v31 = vpop.eup %7910  ;;  %5683 = vmatmul.bf16.vlgmr.msra.gmra.mxu1 %v5267_v34  ;;  %v5030_v34 = vmul.f32 1.442695, %v4892_v22  ;;  %v4898_v22 = vsub.f32 %v12482_v43, %v4854_v59 }
 0x828   : > { %5772 = vmatmul.bf16.vlgmr.msra.gmra.mxu2 %v5268_v8  ;;  %v5269_v63 = vpack.c.bf16 %v7911_v31, %v7909_v28  ;;  %v12481_v28 = vld [vmem:[#allocation44_spill] sm:$0xff]  ;;  %7912 = vpow2.f32 %v5026_v40  ;;  %v5038_v61 = vmul.f32 1.442695, %v4896_v18  ;;  %v5032_v32 = vmul.f32 1.442695, %v4893_v56  ;;  %v12483_v18 = vld [vmem:[#allocation35_spill] sm:$0xff] }
 0x829   : > { %v4897_v8 = vsub.f32 %v12481_v28, %v4853_v5  ;;  %7914 = vpow2.f32 %v5028_v47  ;;  %v4899_v62 = vsub.f32 %v12483_v18, %v4854_v59  ;;  %v4900_v56 = vsub.f32 %v12484_v27, %v4854_v59 }
 0x82a   : > { %5861 = vmatmul.bf16.vlgmr.msra.gmra.mxu3 %v5269_v63  ;;  %v5034_v63 = vmul.f32 1.442695, %v4894_v45  ;;  %7916 = vpow2.f32 %v5030_v34  ;;  %v4729_v5 = vpop.xlane.xlu1 %4728  ;;  %v4075_v27 = vunpack.c.2.s8 %v10561_v24 }
 0x82b   : > { %v5040_v46 = vmul.f32 1.442695, %v4897_v8  ;;  %v10746_v34 = vmax.f32 %v4729_v5, 0.0 }
 0x82c   : > { %7918 = vpow2.f32 %v5034_v63 }
 0x82d   : > { %7920 = vpow2.f32 %v5036_v37 }
 0x82e   : > { %7922 = vpow2.f32 %v5038_v61  ;;  %v7913_v23 = vpop.eup %7912 }
 0x82f   : > { %v4719_v31 = vpop.xlane.xlu0 %4718  ;;  %7924 = vpow2.f32 %v5032_v32  ;;  %v7915_v57 = vpop.eup %7914  ;;  %v5042_v32 = vmul.f32 1.442695, %v4898_v22 }
 0x830   : > { %v4855_v44 = vmax.f32 %v4719_v31, 0.0  ;;  %7926 = vpow2.f32 %v5040_v46  ;;  %v7917_v20 = vpop.eup %7916  ;;  %v12485_v31 = vld [vmem:[#allocation37_spill] sm:$0xff] }
 0x831   : > { %v4901_v63 = vsub.f32 %v12485_v31, %v4854_v59  ;;  %v12487_v31 = vld [vmem:[#allocation45_spill] sm:$0xff] }
 0x832   : > { %v4902_v45 = vsub.f32 %v10438_v15, %v4855_v44  ;;  %v4903_v7 = vsub.f32 %v10443_v16, %v4855_v44  ;;  %v7919_v58 = vpop.eup %7918  ;;  %v4904_v37 = vsub.f32 %v10445_v19, %v4855_v44  ;;  %v4905_v5 = vsub.f32 %v10453_v9, %v4855_v44  ;;  %v12486_v44 = vld [vmem:[#allocation48_spill] sm:$0xff] }
 0x833   : > { %v7921_v47 = vpop.eup %7920  ;;  %v5270_v28 = vpack.c.bf16 %v7919_v58, %v7913_v23  ;;  %v5044_v19 = vmul.f32 1.442695, %v4899_v62  ;;  %v5046_v58 = vmul.f32 1.442695, %v4900_v56  ;;  %v5048_v62 = vmul.f32 1.442695, %v4901_v63 }
 0x834   : > { %v4724_v40 = vpop.xlane.xlu2 %4723  ;;  %v7923_v8 = vpop.eup %7922  ;;  %v5271_v61 = vpack.c.bf16 %v7921_v47, %v7915_v57  ;;  %v5050_v18 = vmul.f32 1.442695, %v4902_v45  ;;  %v5052_v39 = vmul.f32 1.442695, %v4903_v7  ;;  %v4910_v57 = vsub.f32 %v10421_v55, %v10746_v34 }
 0x835   : > { %v7925_v15 = vpop.eup %7924  ;;  %v10750_v46 = vmax.f32 %v4724_v40, 0.0  ;;  %5599 = vmatmul.bf16.gmra.mxu0 %v5270_v28  ;;  %v5272_v43 = vpack.c.bf16 %v7923_v8, %v7917_v20  ;;  %v5054_v9 = vmul.f32 1.442695, %v4904_v37  ;;  %v5056_v40 = vmul.f32 1.442695, %v4905_v5 }
 0x836   : > { %v7927_v33 = vpop.eup %7926  ;;  %7928 = vpow2.f32 %v5050_v18  ;;  %v4074_v47 = vunpack.c.2.s8 %v10558_v41  ;;  %v4076_v28 = vunpack.c.2.s8 %v10582_v3  ;;  %v4077_v8 = vunpack.c.2.s8 %v10587_v21  ;;  %v12489_v18 = vld [vmem:[#allocation49_spill] sm:$0xff] }
 0x837   : > { %5688 = vmatmul.bf16.gmra.mxu1 %v5271_v61  ;;  %v5273_v22 = vpack.c.bf16 %v7927_v33, %v7925_v15  ;;  %7930 = vpow2.f32 %v5042_v32  ;;  %v4906_v7 = vsub.f32 %v12486_v44, %v10750_v46  ;;  %v4911_v37 = vsub.f32 %v12487_v31, %v10746_v34  ;;  %v12488_v61 = vld [vmem:[#allocation46_spill] sm:$0xff] }
 0x838   : > { %5777 = vmatmul.bf16.gmra.mxu2 %v5272_v43  ;;  %7932 = vpow2.f32 %v5052_v39  ;;  %v4912_v32 = vsub.f32 %v12488_v61, %v10746_v34  ;;  %v4188_v15 = vpack.c.b16 %v4075_v27, %v4074_v47  ;;  %v4907_v5 = vsub.f32 %v12489_v18, %v10750_v46 }
 0x839   : > { %7934 = vpow2.f32 %v5044_v19  ;;  %v12490_v19 = vld [vmem:[#allocation50_spill] sm:$0xff]  ;;  %v5058_v44 = vmul.f32 1.442695, %v4906_v7  ;;  %v4079_v7 = vunpack.c.3.s8 %v10561_v24 }
 0x83a   : > { %5866 = vmatmul.bf16.gmra.mxu3 %v5273_v22  ;;  %7936 = vpow2.f32 %v5054_v9  ;;  %v4908_v22 = vsub.f32 %v12490_v19, %v10750_v46  ;;  %v5060_v24 = vmul.f32 1.442695, %v4907_v5  ;;  %v5070_v19 = vmul.f32 1.442695, %v4912_v32 }
 0x83b   : > { %7938 = vpow2.f32 %v5046_v58 }
 0x83c   : > { %v7929_v63 = vpop.eup %7928  ;;  %7940 = vpow2.f32 %v5056_v40  ;;  %v4080_v40 = vunpack.c.3.s8 %v10582_v3  ;;  %v5062_v18 = vmul.f32 1.442695, %v4908_v22 }
 0x83d   : > { %v7931_v43 = vpop.eup %7930  ;;  %7942 = vpow2.f32 %v5048_v62  ;;  %v4081_v62 = vunpack.c.3.s8 %v10587_v21 }
 0x83e   : > { %v7933_v31 = vpop.eup %7932  ;;  %v5274_v27 = vpack.c.bf16 %v7929_v63, %v7931_v43  ;;  %7944 = vpow2.f32 %v5058_v44 }
 0x83f   : > { %v7935_v61 = vpop.eup %7934  ;;  %v4192_v63 = vpack.c.b16 %v4081_v62, %v4080_v40  ;;  %v3354_v40 = vld [vmem:[%s9963_s22 + $0x98] sm:$0xff] }
 0x840   : > { %vm3386_vm11 = vnez %v3354_v40 }
 0x842   : > { %v3506_v16 = vpop.permute.xlu0 %3505 }
 0x843   : > { %v10754_v23 = vadd.f32 %v9993_v13, %v3506_v16  ;;  %v10757_v59 = vadd.f32 %v9995_v14, %v3506_v16  ;;  %v10762_v20 = vadd.f32 %v10000_v52, %v3506_v16  ;;  %v10765_v45 = vadd.f32 %v10031_v54, %v3506_v16 }
 0x844   : > { %v4189_v16 = vpack.c.b16 %v4077_v8, %v4076_v28  ;;  %v5066_v28 = vmul.f32 1.442695, %v4910_v57  ;;  %v4078_v8 = vunpack.c.3.s8 %v10558_v41 }
 0x845   : > { %v3786_v55 = vmul.f32 0.2, %v10754_v23  ;;  %v3787_v33 = vmul.f32 0.2, %v10757_v59  ;;  %v3788_v39 = vmul.f32 0.2, %v10762_v20  ;;  %5604 = vmatmul.bf16.gmra.mxu0 %v5274_v27 }
 0x846   : > { %v10779_v56 = vmul.f32 0.2, %v10765_v45  ;;  %v4190_v42 = vpack.c.b8 %v4189_v16, %v4188_v15  ;;  %v4191_v41 = vpack.c.b16 %v4079_v7, %v4078_v8  ;;  %v5068_v15 = vmul.f32 1.442695, %v4911_v37  ;;  %v3352_v27 = vld [vmem:[%s9963_s22 + $0x88] sm:$0xff]  ;;  %v12491_v8 = vld [vmem:[#allocation51_spill] sm:$0xff] }
 0x847   : > { %v3914_v30 = vmax.f32 %v10754_v23, %v3786_v55  ;;  %v3915_v9 = vmax.f32 %v10757_v59, %v3787_v33  ;;  %v3916_v47 = vmax.f32 %v10762_v20, %v3788_v39  ;;  %v7937_v23 = vpop.eup %7936  ;;  %v5275_v55 = vpack.c.bf16 %v7933_v31, %v7935_v61  ;;  %v3351_v61 = vld [vmem:[%s9963_s22 + $0x80] sm:$0xff] }
 0x848   : > { %v3917_v58 = vmax.f32 %v10765_v45, %v10779_v56  ;;  %vm4256_vm2 = vnez %v4190_v42  ;;  %v7939_v20 = vpop.eup %7938  ;;  %v10797_v42 = vpop.xlane.xlu2 %4743  ;;  %7946 = vpow2.f32 %v5066_v28  ;;  %v3353_v28 = vld [vmem:[%s9963_s22 + $0x90] sm:$0xff]  ;;  %v4909_v7 = vsub.f32 %v12491_v8, %v10750_v46 }
 0x849   : > { %v4288_v59 = vsel %vm4256_vm2, 16843009, %v12427_v11  ;;  %v7941_v57 = vpop.eup %7940  ;;  %v5276_v16 = vpack.c.bf16 %v7937_v23, %v7939_v20  ;;  %5693 = vmatmul.bf16.gmra.mxu1 %v5275_v55  ;;  %7948 = vpow2.f32 %v5060_v24  ;;  %vm3383_vm8 = vnez %v3351_v61 }
 0x84a   : > { %v4362_v33 = vunpack.c.0.s8 %v4288_v59  ;;  %v4363_v39 = vunpack.c.1.s8 %v4288_v59  ;;  %v4364_v45 = vunpack.c.2.s8 %v4288_v59  ;;  %v4365_v56 = vunpack.c.3.s8 %v4288_v59  ;;  %v7943_v3 = vpop.eup %7942 }
 0x84b   : > { %5782 = vmatmul.bf16.gmra.mxu2 %v5276_v16  ;;  %v5277_v5 = vpack.c.bf16 %v7941_v57, %v7943_v3  ;;  %v7945_v44 = vpop.eup %7944  ;;  %7950 = vpow2.f32 %v5068_v15  ;;  %vm3384_vm9 = vnez %v3352_v27  ;;  %vm3385_vm10 = vnez %v3353_v28 }
 0x84c   : > { %vm4490_vm3 = vcmp.ne.s32.totalorder %v4362_v33, 0  ;;  %vm4491_vm4 = vcmp.ne.s32.totalorder %v4363_v39, 0  ;;  %vm4492_vm5 = vcmp.ne.s32.totalorder %v4364_v45, 0  ;;  %vm4493_vm6 = vcmp.ne.s32.totalorder %v4365_v56, 0  ;;  %v4739_v33 = vpop.xlane.xlu1 %4738 }
 0x84d   : > { %v10799_v21 = vsel %vm4490_vm3, %v3914_v30, -1e+30  ;;  %v10801_v43 = vsel %vm4491_vm4, %v3915_v9, -1e+30  ;;  %v10805_v31 = vsel %vm4492_vm5, %v3916_v47, -1e+30  ;;  %v4193_v30 = vpack.c.b8 %v4192_v63, %v4191_v41  ;;  %5871 = vmatmul.bf16.gmra.mxu3 %v5277_v5 }
 0x84e   : > { %v4760_v37 = vmax.f32 %v10799_v21, %v10801_v43  ;;  %v10810_v22 = vsel %vm4493_vm6, %v3917_v58, -1e+30  ;;  %7952 = vpow2.f32 %v5062_v18  ;;  %v7947_v47 = vpop.eup %7946  ;;  %v12492_v58 = vld [vmem:[#allocation47_spill] sm:$0xff]  ;;  %v10822_v62 = vsel %vm3383_vm8, 16843009, %v12427_v11 }
 0x84f   : > { %7954 = vpow2.f32 %v5070_v19  ;;  %vm4257_vm7 = vnez %v4193_v30  ;;  %v7949_v59 = vpop.eup %7948  ;;  %v4913_v55 = vsub.f32 %v12492_v58, %v10746_v34  ;;  %v10825_v46 = vsel %vm3384_vm9, 16843009, %v12427_v11 }
 0x850   : > { %v4761_v9 = vmax.f32 %v4760_v37, %v10805_v31  ;;  %v4289_v39 = vsel %vm4257_vm7, 16843009, %v12427_v11  ;;  %v5064_v45 = vmul.f32 1.442695, %v4909_v7  ;;  %v10829_v57 = vsel %vm3385_vm10, 16843009, %v12427_v11 }
 0x851   : > { %v7951_v20 = vpop.eup %7950  ;;  %v10832_v41 = vsel %vm3386_vm11, 16843009, %v12427_v11  ;;  %v4082_v34 = vunpack.c.0.s8 %v10822_v62  ;;  %v4083_v63 = vunpack.c.0.s8 %v10825_v46  ;;  %v4084_v15 = vunpack.c.0.s8 %v10829_v57 }
 0x852   : > { %v4762_v32 = vmax.f32 %v4761_v9, %v10810_v22  ;;  %v4085_v3 = vunpack.c.0.s8 %v10832_v41  ;;  %v10838_v16 = vmax.f32 %v4739_v33, 0.0  ;;  %v4366_v18 = vunpack.c.0.s8 %v4289_v39 }
 0x853   : > { %v4194_v37 = vpack.c.b16 %v4083_v63, %v4082_v34  ;;  %v5072_v5 = vmul.f32 1.442695, %v4913_v55  ;;  %v4367_v19 = vunpack.c.1.s8 %v4289_v39  ;;  %v5278_v9 = vpack.c.bf16 %v7947_v47, %v7945_v44 }
 0x854   : > { %4763 = vmax.xlane.f32.xlu0 %v4762_v32  ;;  %v7953_v56 = vpop.eup %7952  ;;  %v4195_v30 = vpack.c.b16 %v4085_v3, %v4084_v15  ;;  %7956 = vpow2.f32 %v5064_v45  ;;  %v4368_v27 = vunpack.c.2.s8 %v4289_v39  ;;  %v5279_v28 = vpack.c.bf16 %v7951_v20, %v7949_v59 }
 0x855   : > { %v7955_v24 = vpop.eup %7954  ;;  %7958 = vpow2.f32 %v5072_v5  ;;  %5609 = vmatmul.bf16.gmra.mxu0 %v5278_v9  ;;  %v4918_v55 = vsub.f32 %v10601_v35, %v10838_v16  ;;  %v4369_v33 = vunpack.c.3.s8 %v4289_v39  ;;  %vm10846_vm12 = vcmp.ne.s32.totalorder %v4366_v18, 0 }
 0x856   : > { %v5280_v8 = vpack.c.bf16 %v7955_v24, %v7953_v56  ;;  %v4196_v47 = vpack.c.b8 %v4195_v30, %v4194_v37  ;;  %v4919_v59 = vsub.f32 %v10606_v25, %v10838_v16  ;;  %vm4495_vm13 = vcmp.ne.s32.totalorder %v4367_v19, 0 }
 0x857   : > { %vm10852_vm14 = vcmp.ne.s32.totalorder %v4368_v27, 0  ;;  %vm4497_vm0 = vcmp.ne.s32.totalorder %v4369_v33, 0  ;;  %v5082_v25 = vmul.f32 1.442695, %v4918_v55  ;;  %v4920_v5 = vsub.f32 %v10616_v17, %v10838_v16 }
 0x858   : > { %vm4258_vm15 = vnez %v4196_v47  ;;  %v5084_v9 = vmul.f32 1.442695, %v4919_v59 }
 0x859   : > { %5698 = vmatmul.bf16.gmra.mxu1 %v5279_v28  ;;  %v4290_v3 = vsel %vm4258_vm15, 16843009, %v12427_v11  ;;  %7960 = vpow2.f32 %v5082_v25 }
 0x85a   : > { %v10817_v23 = vpop.xlane.xlu2 %4758  ;;  %v7957_v35 = vpop.eup %7956  ;;  %v4372_v44 = vunpack.c.2.s8 %v4290_v3  ;;  %7962 = vpow2.f32 %v5084_v9 }
 0x85b   : > { %5787 = vmatmul.bf16.gmra.mxu2 %v5280_v8  ;;  %v7959_v18 = vpop.eup %7958  ;;  %v4370_v8 = vunpack.c.0.s8 %v4290_v3 }
 0x85c   : > { %v5281_v47 = vpack.c.bf16 %v7959_v18, %v7957_v35  ;;  %vm4500_vm3 = vcmp.ne.s32.totalorder %v4372_v44, 0  ;;  %v5086_v35 = vmul.f32 1.442695, %v4920_v5 }
 0x85d   : > { %vm4498_vm1 = vcmp.ne.s32.totalorder %v4370_v8, 0 }
 0x85e   : > { %5876 = vmatmul.bf16.gmra.mxu3 %v5281_v47  ;;  %7964 = vpow2.f32 %v5086_v35 }
 0x85f   : > { %v7961_v47 = vpop.eup %7960 }
 0x862   : > { %v3511_v61 = vpop.permute.xlu2 %3510 }
 0x863   : > { %v3662_v7 = vadd.f32 %v9993_v13, %v3511_v61  ;;  %v3663_v32 = vadd.f32 %v9995_v14, %v3511_v61  ;;  %v3664_v40 = vadd.f32 %v10000_v52, %v3511_v61  ;;  %v3665_v58 = vadd.f32 %v10031_v54, %v3511_v61 }
 0x865   : > { %v3790_v20 = vmul.f32 0.2, %v3662_v7  ;;  %v3791_v45 = vmul.f32 0.2, %v3663_v32  ;;  %v3792_v56 = vmul.f32 0.2, %v3664_v40 }
 0x866   : > { %v3793_v34 = vmul.f32 0.2, %v3665_v58 }
 0x867   : > { %v3918_v39 = vmax.f32 %v3662_v7, %v3790_v20  ;;  %v3919_v24 = vmax.f32 %v3663_v32, %v3791_v45  ;;  %v3920_v15 = vmax.f32 %v3664_v40, %v3792_v56  ;;  %v4371_v7 = vunpack.c.1.s8 %v4290_v3 }
 0x868   : > { %v3921_v37 = vmax.f32 %v3665_v58, %v3793_v34  ;;  %v4373_v56 = vunpack.c.3.s8 %v4290_v3 }
 0x869   : > { %v10861_v19 = vsel %vm10846_vm12, %v3918_v39, -1e+30  ;;  %v10863_v30 = vsel %vm4495_vm13, %v3919_v24, -1e+30  ;;  %v10867_v27 = vsel %vm10852_vm14, %v3920_v15, -1e+30 }
 0x86a   : > { %v3516_v61 = vpop.permute.xlu2 %3515  ;;  %v4765_v28 = vmax.f32 %v10861_v19, %v10863_v30  ;;  %v10875_v55 = vsel %vm4497_vm0, %v3921_v37, -1e+30  ;;  %vm4499_vm2 = vcmp.ne.s32.totalorder %v4371_v7, 0  ;;  %vm4501_vm4 = vcmp.ne.s32.totalorder %v4373_v56, 0 }
 0x86b   : > { %v3666_v32 = vadd.f32 %v9993_v13, %v3516_v61  ;;  %v3667_v17 = vadd.f32 %v9995_v14, %v3516_v61  ;;  %v3668_v40 = vadd.f32 %v10000_v52, %v3516_v61  ;;  %v3669_v58 = vadd.f32 %v10031_v54, %v3516_v61 }
 0x86c   : > { %v4766_v33 = vmax.f32 %v4765_v28, %v10867_v27  ;;  %v4921_v28 = vsub.f32 %v10630_v4, %v10838_v16 }
 0x86d   : > { %v3794_v59 = vmul.f32 0.2, %v3666_v32  ;;  %v3795_v20 = vmul.f32 0.2, %v3667_v17  ;;  %v3796_v45 = vmul.f32 0.2, %v3668_v40  ;;  %v4734_v39 = vpop.xlane.xlu0 %4733 }
 0x86e   : > { %v4767_v34 = vmax.f32 %v4766_v33, %v10875_v55  ;;  %v3797_v63 = vmul.f32 0.2, %v3669_v58  ;;  %v4858_v37 = vmax.f32 %v4734_v39, 0.0  ;;  %v5088_v44 = vmul.f32 1.442695, %v4921_v28 }
 0x86f   : > { %v3922_v24 = vmax.f32 %v3666_v32, %v3794_v59  ;;  %v3923_v15 = vmax.f32 %v3667_v17, %v3795_v20  ;;  %v3924_v61 = vmax.f32 %v3668_v40, %v3796_v45 }
 0x870   : > { %4768 = vmax.xlane.f32.xlu1 %v4767_v34  ;;  %v3925_v18 = vmax.f32 %v3669_v58, %v3797_v63  ;;  %v4914_v8 = vsub.f32 %v10695_v1, %v4858_v37  ;;  %v4915_v32 = vsub.f32 %v10697_v60, %v4858_v37  ;;  %v4916_v17 = vsub.f32 %v10703_v36, %v4858_v37 }
 0x871   : > { %v10881_v3 = vsel %vm4498_vm1, %v3922_v24, -1e+30  ;;  %v10883_v33 = vsel %vm4499_vm2, %v3923_v15, -1e+30  ;;  %v10890_v4 = vsel %vm4500_vm3, %v3924_v61, -1e+30  ;;  %v4917_v25 = vsub.f32 %v10710_v26, %v4858_v37  ;;  %v7963_v26 = vpop.eup %7962 }
 0x872   : > { %v4770_v7 = vmax.f32 %v10881_v3, %v10883_v33  ;;  %v5074_v5 = vmul.f32 1.442695, %v4914_v8  ;;  %v5076_v40 = vmul.f32 1.442695, %v4915_v32  ;;  %v4860_v58 = vmax.f32 %v10797_v42, 0.0  ;;  %v7965_v42 = vpop.eup %7964 }
 0x873   : > { %v10895_v1 = vsel %vm4501_vm4, %v3925_v18, -1e+30  ;;  %v5078_v36 = vmul.f32 1.442695, %v4916_v17  ;;  %v5080_v20 = vmul.f32 1.442695, %v4917_v25 }
 0x874   : > { %v4771_v16 = vmax.f32 %v4770_v7, %v10890_v4  ;;  %7966 = vpow2.f32 %v5074_v5  ;;  %v4922_v45 = vsub.f32 %v10566_v50, %v4860_v58  ;;  %v4923_v56 = vsub.f32 %v10571_v38, %v4860_v58 }
 0x875   : > { %v4749_v59 = vpop.xlane.xlu0 %4748  ;;  %7968 = vpow2.f32 %v5076_v40  ;;  %v4924_v8 = vsub.f32 %v10573_v29, %v4860_v58 }
 0x876   : > { %v4772_v60 = vmax.f32 %v4771_v16, %v10895_v1  ;;  %v4861_v9 = vmax.f32 %v4749_v59, 0.0  ;;  %7970 = vpow2.f32 %v5078_v36  ;;  %v5090_v35 = vmul.f32 1.442695, %v4922_v45 }
 0x877   : > { %7972 = vpow2.f32 %v5088_v44  ;;  %v5092_v7 = vmul.f32 1.442695, %v4923_v56  ;;  %v4925_v16 = vsub.f32 %v10575_v49, %v4860_v58  ;;  %v5094_v29 = vmul.f32 1.442695, %v4924_v8  ;;  %v3417_v44 = vld [vmem:[%s9945_s2 + $0x88] sm:$0xff]  ;;  %v12500_v8 = vld [vmem:[#allocation54_spill] sm:$0xff] }
 0x878   : > { %4773 = vmax.xlane.f32.xlu2 %v4772_v60  ;;  %7974 = vpow2.f32 %v5080_v20  ;;  %v4926_v63 = vsub.f32 %v10706_v2, %v4861_v9  ;;  %v4927_v24 = vsub.f32 %v10708_v0, %v4861_v9  ;;  %v4928_v37 = vsub.f32 %v10716_v6, %v4861_v9  ;;  %v4754_v6 = vpop.xlane.xlu1 %4753 }
 0x879   : > { %v4929_v38 = vsub.f32 %v10719_v53, %v4861_v9  ;;  %7976 = vpow2.f32 %v5090_v35  ;;  %v4862_v40 = vmax.f32 %v4754_v6, 0.0  ;;  %v4863_v53 = vmax.f32 %v10817_v23, 0.0 }
 0x87a   : > { %v7967_v34 = vpop.eup %7966  ;;  %v5098_v2 = vmul.f32 1.442695, %v4926_v63  ;;  %v5100_v17 = vmul.f32 1.442695, %v4927_v24  ;;  %v5102_v25 = vmul.f32 1.442695, %v4928_v37  ;;  %7978 = vpow2.f32 %v5092_v7 }
 0x87b   : > { %v7969_v39 = vpop.eup %7968  ;;  %v5282_v15 = vpack.c.bf16 %v7961_v47, %v7967_v34  ;;  %v5104_v5 = vmul.f32 1.442695, %v4929_v38  ;;  %v5096_v47 = vmul.f32 1.442695, %v4925_v16  ;;  %v4930_v49 = vsub.f32 %v10650_v12, %v4862_v40  ;;  %v12498_v24 = vld [vmem:[#allocation53_spill] sm:$0xff] }
 0x87c   : > { %v7971_v61 = vpop.eup %7970  ;;  %v5283_v28 = vpack.c.bf16 %v7963_v26, %v7969_v39  ;;  %7980 = vpow2.f32 %v5098_v2  ;;  %v4934_v36 = vsub.f32 %v10671_v51, %v4863_v53  ;;  %v4931_v9 = vsub.f32 %v10655_v48, %v4862_v40  ;;  %v3418_v12 = vld [vmem:[%s9945_s2 + $0x90] sm:$0xff] }
 0x87d   : > { %v7973_v18 = vpop.eup %7972  ;;  %5614 = vmatmul.bf16.gmra.mxu0 %v5282_v15  ;;  %v5284_v50 = vpack.c.bf16 %v7965_v42, %v7971_v61  ;;  %7982 = vpow2.f32 %v5100_v17  ;;  %v4935_v23 = vsub.f32 %v10673_v10, %v4863_v53  ;;  %v12497_v42 = vld [vmem:[#allocation28_spill] sm:$0xff]  ;;  %v5106_v63 = vmul.f32 1.442695, %v4930_v49  ;;  %v3423_v17 = vld [vmem:[%s9945_s2 + $0xb8] sm:$0xff] }
 0x87e   : > { %v7975_v32 = vpop.eup %7974  ;;  %5703 = vmatmul.bf16.gmra.mxu1 %v5283_v28  ;;  %7984 = vpow2.f32 %v5102_v25  ;;  %v4932_v56 = vsub.f32 %v12497_v42, %v4862_v40  ;;  %v4936_v15 = vsub.f32 %v12498_v24, %v4863_v53  ;;  %v5114_v37 = vmul.f32 1.442695, %v4934_v36  ;;  %v12499_v28 = vld [vmem:[#allocation52_spill] sm:$0xff] }
 0x87f   : > { %5792 = vmatmul.bf16.gmra.mxu2 %v5284_v50  ;;  %v5285_v0 = vpack.c.bf16 %v7973_v18, %v7975_v32  ;;  %7986 = vpow2.f32 %v5094_v29  ;;  %v7977_v60 = vpop.eup %7976  ;;  %v4933_v51 = vsub.f32 %v12499_v28, %v4862_v40  ;;  %v5108_v18 = vmul.f32 1.442695, %v4931_v9 }
 0x880   : > { %7988 = vpow2.f32 %v5104_v5  ;;  %v7979_v59 = vpop.eup %7978  ;;  %v4937_v50 = vsub.f32 %v12500_v8, %v4863_v53  ;;  %v5116_v10 = vmul.f32 1.442695, %v4935_v23  ;;  %v5110_v32 = vmul.f32 1.442695, %v4932_v56 }
 0x881   : > { %5881 = vmatmul.bf16.gmra.mxu3 %v5285_v0  ;;  %7990 = vpow2.f32 %v5096_v47  ;;  %v5118_v38 = vmul.f32 1.442695, %v4936_v15  ;;  %v5112_v2 = vmul.f32 1.442695, %v4933_v51 }
 0x882   : > { %v7981_v58 = vpop.eup %7980  ;;  %7992 = vpow2.f32 %v5106_v63  ;;  %v5120_v0 = vmul.f32 1.442695, %v4937_v50 }
 0x883   : > { %v7983_v20 = vpop.eup %7982  ;;  %v5286_v34 = vpack.c.bf16 %v7981_v58, %v7977_v60  ;;  %7994 = vpow2.f32 %v5114_v37  ;;  %v3424_v60 = vld [vmem:[%s9945_s2 + $0xc0] sm:$0xff] }
 0x884   : > { %v7985_v26 = vpop.eup %7984  ;;  %v5287_v61 = vpack.c.bf16 %v7983_v20, %v7979_v59  ;;  %7996 = vpow2.f32 %v5108_v18 }
 0x885   : > { %v7987_v45 = vpop.eup %7986  ;;  %7998 = vpow2.f32 %v5116_v10 }
 0x886   : > { %v7989_v39 = vpop.eup %7988  ;;  %v5288_v35 = vpack.c.bf16 %v7985_v26, %v7987_v45  ;;  %8000 = vpow2.f32 %v5110_v32 }
 0x887   : > { %v7991_v48 = vpop.eup %7990  ;;  %8002 = vpow2.f32 %v5118_v38 }
 0x888   : > { %v5289_v7 = vpack.c.bf16 %v7989_v39, %v7991_v48  ;;  %v7993_v16 = vpop.eup %7992  ;;  %8004 = vpow2.f32 %v5112_v2 }
 0x889   : > { %3520 = vperm.xlu1 %7890, %v3417_v44   ;;  %v7995_v6 = vpop.eup %7994  ;;  %8006 = vpow2.f32 %v5120_v0 }
 0x88a   : > { %v7997_v25 = vpop.eup %7996  ;;  %v5290_v44 = vpack.c.bf16 %v7995_v6, %v7993_v16 }
 0x88b   : > { %v7999_v29 = vpop.eup %7998 }
 0x88c   : > { %v8001_v5 = vpop.eup %8000  ;;  %v5291_v59 = vpack.c.bf16 %v7999_v29, %v7997_v25 }
 0x88d   : > { %5619 = vmatmul.bf16.gmra.mxu0 %v5286_v34  ;;  %v8003_v40 = vpop.eup %8002 }
 0x88e   : > { %5708 = vmatmul.bf16.gmra.mxu1 %v5287_v61  ;;  %v8005_v53 = vpop.eup %8004  ;;  %v5292_v49 = vpack.c.bf16 %v8003_v40, %v8001_v5  ;;  %v3355_v40 = vld [vmem:[%s9963_s22 + $0xa0] sm:$0xff] }
 0x88f   : > { %5797 = vmatmul.bf16.gmra.mxu2 %v5288_v35  ;;  %v8007_v47 = vpop.eup %8006  ;;  %vm3387_vm5 = vnez %v3355_v40 }
 0x890   : > { %v5293_v58 = vpack.c.bf16 %v8007_v47, %v8005_v53 }
 0x891   : > { %3525 = vperm.xlu1 %7890, %v3418_v12   ;;  %5886 = vmatmul.bf16.gmra.mxu3 %v5289_v7 }
 0x899   : > { %3550 = vperm.xlu1 %7890, %v3423_v17  }
 0x89d   : > { %5624 = vmatmul.bf16.gmra.mxu0 %v5290_v44 }
 0x89e   : > { %5713 = vmatmul.bf16.gmra.mxu1 %v5291_v59  ;;  %v3357_v59 = vld [vmem:[%s9963_s22 + $0xb0] sm:$0xff] }
 0x89f   : > { %5802 = vmatmul.bf16.gmra.mxu2 %v5292_v49  ;;  %v3358_v49 = vld [vmem:[%s9963_s22 + $0xb8] sm:$0xff]  ;;  %vm3389_vm7 = vnez %v3357_v59  ;;  %v4090_v59 = vunpack.c.2.s8 %v10822_v62 }
 0x8a0   : > { %vm3390_vm8 = vnez %v3358_v49 }
 0x8a1   : > { %3555 = vperm.xlu1 %7890, %v3424_v60   ;;  %5891 = vmatmul.bf16.gmra.mxu3 %v5293_v58  ;;  %v3356_v60 = vld [vmem:[%s9963_s22 + $0xa8] sm:$0xff] }
 0x8a2   : > { %v5595_v36 = vpop.f32.mrf.mxu0  ;;  %vm3388_vm6 = vnez %v3356_v60 }
 0x8a4   : > { %v5684_v20 = vpop.f32.mrf.mxu1 }
 0x8a5   : > { %v5685_v9 = vadd.f32 %v5684_v20, %v5595_v36 }
 0x8aa   : > { %v10921_v56 = vpop.f32.mrf.mxu0 }
 0x8ab   : > { %v5773_v26 = vpop.f32.mrf.mxu2 }
 0x8ac   : > { %v5774_v23 = vadd.f32 %v5773_v26, %v5685_v9  ;;  %v10923_v34 = vpop.f32.mrf.mxu1 }
 0x8ad   : > { %v5862_v45 = vpop.f32.mrf.mxu3 }
 0x8ae   : > { %v10919_v42 = vadd.f32 %v5862_v45, %v5774_v23 }
 0x8b0   : > { %12501 = vst [vmem:[#allocation33_spill] sm:$0xff] %v10919_v42 }
 0x8b2   : > { %v5600_v24 = vpop.f32.mrf.mxu0 }
 0x8b3   : > { %v10925_v63 = vpop.f32.mrf.mxu2 }
 0x8b4   : > { %v5689_v15 = vpop.f32.mrf.mxu1 }
 0x8b5   : > { %v10927_v39 = vpop.f32.mrf.mxu3  ;;  %v5690_v12 = vadd.f32 %v5689_v15, %v5600_v24  ;;  %v4088_v24 = vunpack.c.1.s8 %v10829_v57  ;;  %v4089_v15 = vunpack.c.1.s8 %v10832_v41 }
 0x8ba   : > { %v10931_v35 = vpop.f32.mrf.mxu0 }
 0x8bb   : > { %v5778_v61 = vpop.f32.mrf.mxu2  ;;  %12503 = vst [vmem:[#allocation39_spill] sm:$0xff] %v10931_v35 }
 0x8bc   : > { %v5779_v37 = vadd.f32 %v5778_v61, %v5690_v12  ;;  %v10933_v18 = vpop.f32.mrf.mxu1  ;;  %v10975_v12 = vsel %vm3387_vm5, 16843009, %v12427_v11 }
 0x8bd   : > { %v5867_v28 = vpop.f32.mrf.mxu3  ;;  %12504 = vst [vmem:[#allocation40_spill] sm:$0xff] %v10933_v18 }
 0x8be   : > { %v10929_v51 = vadd.f32 %v5867_v28, %v5779_v37  ;;  %v10981_v28 = vsel %vm3388_vm6, 16843009, %v12427_v11 }
 0x8bf   : > { %v4103_v40 = vunpack.c.1.s8 %v10981_v28 }
 0x8c0   : > { %12502 = vst [vmem:[#allocation38_spill] sm:$0xff] %v10929_v51 }
 0x8c2   : > { %v10939_v10 = vpop.f32.mrf.mxu0 }
 0x8c3   : > { %v10935_v48 = vpop.f32.mrf.mxu2 }
 0x8c4   : > { %12505 = vst [vmem:[#allocation29_spill] sm:$0xff] %v10935_v48 }
 0x8c5   : > { %v10937_v50 = vpop.f32.mrf.mxu3 }
 0x8c6   : > { %12506 = vst [vmem:[#allocation30_spill] sm:$0xff] %v10937_v50  ;;  %v10941_v7 = vpop.f32.mrf.mxu1 }
 0x8c7   : > { %v4764_v8 = vpop.xlane.xlu0 %4763 }
 0x8c8   : > { %v4864_v32 = vmax.f32 %v4764_v8, 0.0  ;;  %v10985_v8 = vsel %vm3389_vm7, 16843009, %v12427_v11 }
 0x8ca   : > { %v4938_v38 = vsub.f32 %v10799_v21, %v4864_v32  ;;  %v4939_v0 = vsub.f32 %v10801_v43, %v4864_v32  ;;  %v4940_v17 = vsub.f32 %v10805_v31, %v4864_v32  ;;  %v10950_v6 = vpop.f32.mrf.mxu0  ;;  %v4941_v25 = vsub.f32 %v10810_v22, %v4864_v32 }
 0x8cb   : > { %12507 = vst [vmem:[#allocation31_spill] sm:$0xff] %v10950_v6  ;;  %v10989_v32 = vsel %vm3390_vm8, 16843009, %v12427_v11 }
 0x8cc   : > { %v5122_v5 = vmul.f32 1.442695, %v4938_v38  ;;  %v5124_v44 = vmul.f32 1.442695, %v4939_v0  ;;  %v5126_v47 = vmul.f32 1.442695, %v4940_v17  ;;  %v4198_v0 = vpack.c.b16 %v4089_v15, %v4088_v24 }
 0x8cd   : > { %v5128_v43 = vmul.f32 1.442695, %v4941_v25 }
 0x8ce   : > { %v10944_v2 = vpop.f32.mrf.mxu2  ;;  %v10953_v29 = vpop.f32.mrf.mxu1  ;;  %8008 = vpow2.f32 %v5122_v5  ;;  %v4102_v5 = vunpack.c.1.s8 %v10975_v12 }
 0x8cf   : > { %12508 = vst [vmem:[#allocation41_spill] sm:$0xff] %v10953_v29  ;;  %8010 = vpow2.f32 %v5124_v44  ;;  %v4105_v44 = vunpack.c.1.s8 %v10989_v32 }
 0x8d0   : > { %v10948_v16 = vpop.f32.mrf.mxu3  ;;  %8012 = vpow2.f32 %v5126_v47 }
 0x8d1   : > { %8014 = vpow2.f32 %v5128_v43 }
 0x8d4   : > { %v8009_v61 = vpop.eup %8008 }
 0x8d5   : > { %v8011_v17 = vpop.eup %8010 }
 0x8d6   : > { %v10963_v23 = vpop.f32.mrf.mxu2  ;;  %v10977_v37 = vpop.f32.mrf.mxu1 }
 0x8d7   : > { %12509 = vst [vmem:[#allocation42_spill] sm:$0xff] %v10963_v23  ;;  %v8013_v25 = vpop.eup %8012 }
 0x8e3   : > { %v4769_v53 = vpop.xlane.xlu1 %4768 }
 0x8e4   : > { %v4865_v21 = vmax.f32 %v4769_v53, 0.0  ;;  %v4104_v53 = vunpack.c.1.s8 %v10985_v8 }
 0x8e6   : > { %v4942_v31 = vsub.f32 %v10861_v19, %v4865_v21  ;;  %v4943_v58 = vsub.f32 %v10863_v30, %v4865_v21  ;;  %v4944_v22 = vsub.f32 %v10867_v27, %v4865_v21  ;;  %v4945_v36 = vsub.f32 %v10875_v55, %v4865_v21  ;;  %v10967_v27 = vpop.f32.mrf.mxu3  ;;  %v10969_v55 = vpop.f32.mrf.mxu0 }
 0x8e7   : > { %v4086_v19 = vunpack.c.1.s8 %v10822_v62  ;;  %v4087_v30 = vunpack.c.1.s8 %v10825_v46  ;;  %12510 = vst [vmem:[#allocation43_spill] sm:$0xff] %v10967_v27  ;;  %v8015_v21 = vpop.eup %8014 }
 0x8e8   : > { %v5130_v20 = vmul.f32 1.442695, %v4942_v31  ;;  %v5132_v9 = vmul.f32 1.442695, %v4943_v58  ;;  %v5134_v26 = vmul.f32 1.442695, %v4944_v22  ;;  %v4091_v31 = vunpack.c.2.s8 %v10825_v46 }
 0x8e9   : > { %v5136_v45 = vmul.f32 1.442695, %v4945_v36  ;;  %v4197_v38 = vpack.c.b16 %v4087_v30, %v4086_v19  ;;  %v4092_v58 = vunpack.c.2.s8 %v10829_v57  ;;  %v4093_v22 = vunpack.c.2.s8 %v10832_v41 }
 0x8ea   : > { %8016 = vpow2.f32 %v5130_v20 }
 0x8eb   : > { %8018 = vpow2.f32 %v5132_v9  ;;  %v4199_v60 = vpack.c.b8 %v4198_v0, %v4197_v38  ;;  %v10999_v9 = vpop.f32.mrf.mxu2  ;;  %v11005_v38 = vpop.f32.mrf.mxu1  ;;  %v4200_v0 = vpack.c.b16 %v4091_v31, %v4090_v59 }
 0x8ec   : > { %8020 = vpow2.f32 %v5134_v26  ;;  %v4209_v26 = vpack.c.b16 %v4103_v40, %v4102_v5  ;;  %12512 = vst [vmem:[#allocation44_spill] sm:$0xff] %v11005_v38 }
 0x8ed   : > { %8022 = vpow2.f32 %v5136_v45  ;;  %v4210_v45 = vpack.c.b16 %v4105_v44, %v4104_v53  ;;  %vm4259_vm9 = vnez %v4199_v60 }
 0x8ee   : > { %v11001_v15 = vpop.f32.mrf.mxu3  ;;  %v4291_v40 = vsel %vm4259_vm9, 16843009, %v12427_v11 }
 0x8ef   : > { %v4211_v5 = vpack.c.b8 %v4210_v45, %v4209_v26 }
 0x8f0   : > { %v8017_v47 = vpop.eup %8016 }
 0x8f1   : > { %v8019_v49 = vpop.eup %8018  ;;  %v5294_v43 = vpack.c.bf16 %v8017_v47, %v8009_v61  ;;  %v11003_v61 = vpop.f32.mrf.mxu0  ;;  %v4201_v47 = vpack.c.b16 %v4093_v22, %v4092_v58  ;;  %vm4263_vm10 = vnez %v4211_v5  ;;  %v4377_v5 = vunpack.c.3.s8 %v4291_v40 }
 0x8f2   : > { %v8021_v36 = vpop.eup %8020  ;;  %v5295_v20 = vpack.c.bf16 %v8019_v49, %v8011_v17  ;;  %12511 = vst [vmem:[#allocation32_spill] sm:$0xff] %v11003_v61  ;;  %v11007_v17 = vpop.permute.xlu2 %3540  ;;  %v4375_v49 = vunpack.c.1.s8 %v4291_v40 }
 0x8f3   : > { %v8023_v19 = vpop.eup %8022  ;;  %5629 = vmatmul.bf16.gmra.mxu0 %v5294_v43  ;;  %v5296_v30 = vpack.c.bf16 %v8021_v36, %v8013_v25  ;;  %v11012_v25 = vadd.f32 %v9993_v13, %v11007_v17  ;;  %v4202_v53 = vpack.c.b8 %v4201_v47, %v4200_v0  ;;  %v4376_v43 = vunpack.c.2.s8 %v4291_v40  ;;  %v11018_v22 = vpop.f32.mrf.mxu2 }
 0x8f4   : > { %5718 = vmatmul.bf16.gmra.mxu1 %v5295_v20  ;;  %v5297_v24 = vpack.c.bf16 %v8023_v19, %v8015_v21  ;;  %v4374_v21 = vunpack.c.0.s8 %v4291_v40  ;;  %12513 = vst [vmem:[#allocation34_spill] sm:$0xff] %v11018_v22  ;;  %v11024_v20 = vadd.f32 %v9995_v14, %v11007_v17  ;;  %v11032_v19 = vsel %vm4263_vm10, 16843009, %v12427_v11 }
 0x8f5   : > { %5807 = vmatmul.bf16.gmra.mxu2 %v5296_v30  ;;  %v11027_v26 = vmul.f32 0.2, %v11012_v25  ;;  %vm4260_vm11 = vnez %v4202_v53  ;;  %vm4503_vm13 = vcmp.ne.s32.totalorder %v4375_v49, 0  ;;  %vm4504_vm14 = vcmp.ne.s32.totalorder %v4376_v43, 0 }
 0x8f6   : > { %5896 = vmatmul.bf16.gmra.mxu3 %v5297_v24  ;;  %v11034_v47 = vpop.f32.mrf.mxu3  ;;  %vm4502_vm12 = vcmp.ne.s32.totalorder %v4374_v21, 0  ;;  %v4292_v27 = vsel %vm4260_vm11, 16843009, %v12427_v11  ;;  %v11039_v53 = vadd.f32 %v10000_v52, %v11007_v17  ;;  %v3815_v23 = vmul.f32 0.2, %v11024_v20 }
 0x8f7   : > { %12515 = vst [vmem:[#allocation36_spill] sm:$0xff] %v11034_v47  ;;  %v3942_v29 = vmax.f32 %v11012_v25, %v11027_v26  ;;  %vm4505_vm15 = vcmp.ne.s32.totalorder %v4377_v5, 0  ;;  %v4390_v49 = vunpack.c.0.s8 %v11032_v19  ;;  %v4380_v5 = vunpack.c.2.s8 %v4292_v27 }
 0x8f8   : > { %v4391_v6 = vunpack.c.1.s8 %v11032_v19  ;;  %v4381_v18 = vunpack.c.3.s8 %v4292_v27 }
 0x8f9   : > { %vm4508_vm2 = vcmp.ne.s32.totalorder %v4380_v5, 0  ;;  %vm4518_vm3 = vcmp.ne.s32.totalorder %v4390_v49, 0 }
 0x8fa   : > { %v11020_v36 = vpop.f32.mrf.mxu0  ;;  %vm4519_vm4 = vcmp.ne.s32.totalorder %v4391_v6, 0  ;;  %vm4509_vm5 = vcmp.ne.s32.totalorder %v4381_v18, 0 }
 0x8fb   : > { %v3521_v44 = vpop.permute.xlu1 %3520  ;;  %v11029_v45 = vpop.f32.mrf.mxu1 }
 0x8fc   : > { %v3670_v60 = vadd.f32 %v9993_v13, %v3521_v44  ;;  %v3671_v59 = vadd.f32 %v9995_v14, %v3521_v44  ;;  %v3672_v31 = vadd.f32 %v10000_v52, %v3521_v44  ;;  %v3673_v58 = vadd.f32 %v10031_v54, %v3521_v44  ;;  %12514 = vst [vmem:[#allocation35_spill] sm:$0xff] %v11029_v45 }
 0x8fe   : > { %v3798_v30 = vmul.f32 0.2, %v3670_v60  ;;  %v3799_v24 = vmul.f32 0.2, %v3671_v59  ;;  %v3800_v0 = vmul.f32 0.2, %v3672_v31 }
 0x8ff   : > { %v3801_v44 = vmul.f32 0.2, %v3673_v58 }
 0x900   : > { %v3926_v22 = vmax.f32 %v3670_v60, %v3798_v30  ;;  %v3927_v38 = vmax.f32 %v3671_v59, %v3799_v24  ;;  %v3928_v61 = vmax.f32 %v3672_v31, %v3800_v0  ;;  %v4378_v31 = vunpack.c.0.s8 %v4292_v27 }
 0x901   : > { %v3929_v47 = vmax.f32 %v3673_v58, %v3801_v44  ;;  %v4379_v30 = vunpack.c.1.s8 %v4292_v27  ;;  %v3816_v27 = vmul.f32 0.2, %v11039_v53 }
 0x902   : > { %v11044_v40 = vsel %vm4502_vm12, %v3926_v22, -1e+30  ;;  %v11046_v21 = vsel %vm4503_vm13, %v3927_v38, -1e+30  ;;  %v11049_v60 = vsel %vm4504_vm14, %v3928_v61, -1e+30  ;;  %v11057_v38 = vpop.f32.mrf.mxu2  ;;  %v11059_v26 = vpop.f32.mrf.mxu0 }
 0x903   : > { %v3526_v43 = vpop.permute.xlu1 %3525  ;;  %v4775_v59 = vmax.f32 %v11044_v40, %v11046_v21  ;;  %12516 = vst [vmem:[#allocation37_spill] sm:$0xff] %v11057_v38  ;;  %v11061_v0 = vsel %vm4505_vm15, %v3929_v47, -1e+30  ;;  %v11064_v44 = vpop.f32.mrf.mxu1  ;;  %vm4506_vm0 = vcmp.ne.s32.totalorder %v4378_v31, 0  ;;  %vm4507_vm1 = vcmp.ne.s32.totalorder %v4379_v30, 0 }
 0x904   : > { %v3674_v24 = vadd.f32 %v9993_v13, %v3526_v43  ;;  %v3675_v25 = vadd.f32 %v9995_v14, %v3526_v43  ;;  %v3676_v58 = vadd.f32 %v10000_v52, %v3526_v43  ;;  %v3677_v22 = vadd.f32 %v10031_v54, %v3526_v43  ;;  %12517 = vst [vmem:[#allocation48_spill] sm:$0xff] %v11059_v26  ;;  %v11067_v35 = vpop.f32.mrf.mxu3 }
 0x905   : > { %v4776_v61 = vmax.f32 %v4775_v59, %v11049_v60  ;;  %12518 = vst [vmem:[#allocation45_spill] sm:$0xff] %v11064_v44  ;;  %v3943_v47 = vmax.f32 %v11024_v20, %v3815_v23  ;;  %v3689_v44 = vadd.f32 %v10031_v54, %v11007_v17  ;;  %v11083_v23 = vsel %vm4518_vm3, %v3942_v29, -1e+30 }
 0x906   : > { %v3802_v50 = vmul.f32 0.2, %v3674_v24  ;;  %v3803_v48 = vmul.f32 0.2, %v3675_v25  ;;  %v3804_v42 = vmul.f32 0.2, %v3676_v58  ;;  %v3944_v30 = vmax.f32 %v11039_v53, %v3816_v27 }
 0x907   : > { %12519 = vst [vmem:[#allocation46_spill] sm:$0xff] %v11067_v35  ;;  %v4777_v43 = vmax.f32 %v4776_v61, %v11061_v0  ;;  %v3805_v51 = vmul.f32 0.2, %v3677_v22  ;;  %v11085_v17 = vsel %vm4519_vm4, %v3943_v47, -1e+30  ;;  %v4393_v29 = vunpack.c.3.s8 %v11032_v19  ;;  %v3420_v27 = vld [vmem:[%s9945_s2 + $0xa0] sm:$0xff] }
 0x908   : > { %v3930_v26 = vmax.f32 %v3674_v24, %v3802_v50  ;;  %v3931_v59 = vmax.f32 %v3675_v25, %v3803_v48  ;;  %v3932_v38 = vmax.f32 %v3676_v58, %v3804_v42  ;;  %v4392_v42 = vunpack.c.2.s8 %v11032_v19  ;;  %12523 = vst [vmem:[#allocation47_spill] sm:$0xff] %v11083_v23 }
 0x909   : > { %4778 = vmax.xlane.f32.xlu0 %v4777_v43  ;;  %v3933_v35 = vmax.f32 %v3677_v22, %v3805_v51  ;;  %12524 = vst [vmem:[#allocation28_spill] sm:$0xff] %v11085_v17  ;;  %v3817_v18 = vmul.f32 0.2, %v3689_v44  ;;  %v4795_v22 = vmax.f32 %v11083_v23, %v11085_v17  ;;  %vm4521_vm7 = vcmp.ne.s32.totalorder %v4393_v29, 0 }
 0x90a   : > { %v11074_v45 = vsel %vm4506_vm0, %v3930_v26, -1e+30  ;;  %v11076_v61 = vsel %vm4507_vm1, %v3931_v59, -1e+30  ;;  %v11081_v48 = vsel %vm4508_vm2, %v3932_v38, -1e+30  ;;  %v11087_v6 = vpop.f32.mrf.mxu2  ;;  %v5620_v20 = vpop.f32.mrf.mxu0 }
 0x90b   : > { %12520 = vst [vmem:[#allocation49_spill] sm:$0xff] %v11074_v45  ;;  %v4780_v50 = vmax.f32 %v11074_v45, %v11076_v61  ;;  %v5709_v49 = vpop.f32.mrf.mxu1  ;;  %v11090_v31 = vsel %vm4509_vm5, %v3933_v35, -1e+30  ;;  %vm4520_vm6 = vcmp.ne.s32.totalorder %v4392_v42, 0  ;;  %v3945_v35 = vmax.f32 %v3689_v44, %v3817_v18  ;;  %v3419_v44 = vld [vmem:[%s9945_s2 + $0x98] sm:$0xff]  ;;  %v3429_v42 = vld [vmem:[%s9945_s2 + $0xe8] sm:$0xff] }
 0x90c   : > { %12521 = vst [vmem:[#allocation50_spill] sm:$0xff] %v11076_v61  ;;  %v11093_v24 = vpop.f32.mrf.mxu3  ;;  %v5710_v25 = vadd.f32 %v5709_v49, %v5620_v20  ;;  %v11099_v38 = vsel %vm4520_vm6, %v3944_v30, -1e+30  ;;  %v3426_v20 = vld [vmem:[%s9945_s2 + $0xd0] sm:$0xff]  ;;  %v3360_v49 = vld [vmem:[%s9963_s22 + $0xc8] sm:$0xff]  ;;  %v3362_v30 = vld [vmem:[%s9963_s22 + $0xd8] sm:$0xff] }
 0x90d   : > { %12522 = vst [vmem:[#allocation51_spill] sm:$0xff] %v11081_v48  ;;  %v4781_v51 = vmax.f32 %v4780_v50, %v11081_v48  ;;  %v4796_v53 = vmax.f32 %v4795_v22, %v11099_v38  ;;  %v11102_v43 = vsel %vm4521_vm7, %v3945_v35, -1e+30  ;;  %v3425_v50 = vld [vmem:[%s9945_s2 + $0xc8] sm:$0xff]  ;;  %v3361_v18 = vld [vmem:[%s9963_s22 + $0xd0] sm:$0xff]  ;;  %vm3392_vm9 = vnez %v3360_v49 }
 0x90e   : > { %12525 = vst [vmem:[#allocation53_spill] sm:$0xff] %v11090_v31  ;;  %vm3393_vm10 = vnez %v3361_v18  ;;  %vm3394_vm11 = vnez %v3362_v30  ;;  %v11121_v29 = vsel %vm3392_vm9, 16843009, %v12427_v11 }
 0x90f   : > { %12526 = vst [vmem:[#allocation52_spill] sm:$0xff] %v11093_v24  ;;  %v4782_v58 = vmax.f32 %v4781_v51, %v11090_v31  ;;  %v4797_v47 = vmax.f32 %v4796_v53, %v11102_v43  ;;  %v3359_v51 = vld [vmem:[%s9963_s22 + $0xc0] sm:$0xff]  ;;  %v11124_v22 = vsel %vm3393_vm10, 16843009, %v12427_v11  ;;  %v11127_v35 = vsel %vm3394_vm11, 16843009, %v12427_v11  ;;  %v11129_v53 = vpop.permute.xlu1 %3550 }
 0x910   : > { %12527 = vst [vmem:[#allocation54_spill] sm:$0xff] %v11099_v38  ;;  %vm3391_vm8 = vnez %v3359_v51 }
 0x911   : > { %4783 = vmax.xlane.f32.xlu1 %v4782_v58  ;;  %12528 = vst [vmem:[#allocation55_spill] sm:$0xff] %v11102_v43  ;;  %v11118_v58 = vsel %vm3391_vm8, 16843009, %v12427_v11 }
 0x912   : > { %v5798_v26 = vpop.f32.mrf.mxu2 }
 0x913   : > { %v5799_v5 = vadd.f32 %v5798_v26, %v5710_v25  ;;  %v3431_v25 = vld [vmem:[%s9945_s2 + $0xf8] sm:$0xff]  ;;  %v4114_v26 = vunpack.c.0.s8 %v11118_v58 }
 0x914   : > { %v5887_v19 = vpop.f32.mrf.mxu3 }
 0x915   : > { %v11105_v59 = vadd.f32 %v5887_v19, %v5799_v5  ;;  %v4115_v5 = vunpack.c.0.s8 %v11121_v29  ;;  %v4116_v19 = vunpack.c.0.s8 %v11124_v22 }
 0x917   : > { %12529 = vst [vmem:[#allocation56_spill] sm:$0xff] %v11105_v59 }
 0x919   : > { %4798 = vmax.xlane.f32.xlu1 %v4797_v47  ;;  %v4117_v47 = vunpack.c.0.s8 %v11127_v35 }
 0x91d   : > { %3530 = vperm.xlu0 %7889, %v3419_v44   ;;  %v4218_v44 = vpack.c.b16 %v4115_v5, %v4114_v26 }
 0x925   : > { %3535 = vperm.xlu0 %7889, %v3420_v27   ;;  %v4219_v27 = vpack.c.b16 %v4117_v47, %v4116_v19 }
 0x92d   : > { %3560 = vperm.xlu0 %7889, %v3425_v50   ;;  %v4220_v50 = vpack.c.b8 %v4219_v27, %v4218_v44 }
 0x92f   : > { %vm4266_vm12 = vnez %v4220_v50 }
 0x930   : > { %v4298_v49 = vsel %vm4266_vm12, 16843009, %v12427_v11 }
 0x931   : > { %v4403_v59 = vunpack.c.1.s8 %v4298_v49  ;;  %v4404_v19 = vunpack.c.2.s8 %v4298_v49  ;;  %v4405_v23 = vunpack.c.3.s8 %v4298_v49 }
 0x932   : > { %3580 = vperm.xlu1 %7890, %v3429_v42   ;;  %v3556_v42 = vpop.permute.xlu1 %3555 }
 0x933   : > { %v3699_v51 = vadd.f32 %v9995_v14, %v3556_v42  ;;  %v3700_v43 = vadd.f32 %v10000_v52, %v3556_v42  ;;  %vm4531_vm14 = vcmp.ne.s32.totalorder %v4403_v59, 0  ;;  %v3701_v26 = vadd.f32 %v10031_v54, %v3556_v42 }
 0x934   : > { %vm4532_vm15 = vcmp.ne.s32.totalorder %v4404_v19, 0  ;;  %vm4533_vm0 = vcmp.ne.s32.totalorder %v4405_v23, 0  ;;  %v4095_v19 = vunpack.c.3.s8 %v10825_v46 }
 0x935   : > { %3565 = vperm.xlu0 %7889, %v3426_v20   ;;  %v3698_v20 = vadd.f32 %v9993_v13, %v3556_v42  ;;  %v3827_v30 = vmul.f32 0.2, %v3699_v51  ;;  %v3828_v5 = vmul.f32 0.2, %v3700_v43  ;;  %v3829_v27 = vmul.f32 0.2, %v3701_v26 }
 0x937   : > { %v3826_v18 = vmul.f32 0.2, %v3698_v20  ;;  %v3955_v17 = vmax.f32 %v3699_v51, %v3827_v30  ;;  %v3956_v50 = vmax.f32 %v3700_v43, %v3828_v5  ;;  %v3957_v48 = vmax.f32 %v3701_v26, %v3829_v27 }
 0x938   : > { %v4094_v5 = vunpack.c.3.s8 %v10822_v62  ;;  %v4096_v27 = vunpack.c.3.s8 %v10829_v57 }
 0x939   : > { %v3954_v38 = vmax.f32 %v3698_v20, %v3826_v18  ;;  %v11142_v44 = vsel %vm4531_vm14, %v3955_v17, -1e+30  ;;  %v11146_v20 = vsel %vm4532_vm15, %v3956_v50, -1e+30  ;;  %v11149_v42 = vsel %vm4533_vm0, %v3957_v48, -1e+30  ;;  %v11152_v17 = vpop.permute.xlu2 %3545 }
 0x93a   : > { %3590 = vperm.xlu1 %7890, %v3431_v25   ;;  %v4402_v25 = vunpack.c.0.s8 %v4298_v49  ;;  %12531 = vst [vmem:[#allocation58_spill] sm:$0xff] %v11142_v44  ;;  %v4097_v50 = vunpack.c.3.s8 %v10832_v41 }
 0x93b   : > { %12532 = vst [vmem:[#allocation59_spill] sm:$0xff] %v11146_v20 }
 0x93c   : > { %vm4530_vm13 = vcmp.ne.s32.totalorder %v4402_v25, 0  ;;  %12533 = vst [vmem:[#allocation60_spill] sm:$0xff] %v11149_v42 }
 0x93d   : > { %v11140_v47 = vsel %vm4530_vm13, %v3954_v38, -1e+30 }
 0x93e   : > { %12530 = vst [vmem:[#allocation57_spill] sm:$0xff] %v11140_v47  ;;  %v4810_v31 = vmax.f32 %v11140_v47, %v11142_v44 }
 0x940   : > { %v4811_v59 = vmax.f32 %v4810_v31, %v11146_v20 }
 0x941   : > { %v4774_v51 = vpop.xlane.xlu2 %4773 }
 0x942   : > { %v4812_v38 = vmax.f32 %v4811_v59, %v11149_v42  ;;  %v4866_v43 = vmax.f32 %v4774_v51, 0.0  ;;  %v4113_v51 = vunpack.c.3.s8 %v10989_v32 }
 0x944   : > { %v4946_v49 = vsub.f32 %v10881_v3, %v4866_v43  ;;  %v4947_v18 = vsub.f32 %v10883_v33, %v4866_v43  ;;  %v4948_v30 = vsub.f32 %v10890_v4, %v4866_v43  ;;  %v4949_v25 = vsub.f32 %v10895_v1, %v4866_v43 }
 0x945   : > { %v4110_v33 = vunpack.c.3.s8 %v10975_v12  ;;  %v4203_v4 = vpack.c.b16 %v4095_v19, %v4094_v5  ;;  %v4111_v1 = vunpack.c.3.s8 %v10981_v28  ;;  %v4204_v43 = vpack.c.b16 %v4097_v50, %v4096_v27 }
 0x946   : > { %v5138_v23 = vmul.f32 1.442695, %v4946_v49  ;;  %v5140_v26 = vmul.f32 1.442695, %v4947_v18  ;;  %v5142_v31 = vmul.f32 1.442695, %v4948_v30  ;;  %v11180_v27 = vadd.f32 %v10000_v52, %v11129_v53 }
 0x947   : > { %v5144_v3 = vmul.f32 1.442695, %v4949_v25  ;;  %v4215_v5 = vpack.c.b16 %v4111_v1, %v4110_v33  ;;  %v4100_v33 = vunpack.c.0.s8 %v10985_v8 }
 0x948   : > { %8024 = vpow2.f32 %v5138_v23 }
 0x949   : > { %8026 = vpow2.f32 %v5140_v26 }
 0x94a   : > { %8028 = vpow2.f32 %v5142_v31 }
 0x94b   : > { %8030 = vpow2.f32 %v5144_v3  ;;  %v4099_v3 = vunpack.c.0.s8 %v10981_v28 }
 0x94e   : > { %v8025_v23 = vpop.eup %8024 }
 0x964   : > { %4813 = vmax.xlane.f32.xlu1 %v4812_v38  ;;  %v4112_v38 = vunpack.c.3.s8 %v10985_v8 }
 0x966   : > { %v4216_v19 = vpack.c.b16 %v4113_v51, %v4112_v38 }
 0x968   : > { %v4217_v26 = vpack.c.b8 %v4216_v19, %v4215_v5  ;;  %v11195_v19 = vadd.f32 %v10031_v54, %v11129_v53 }
 0x96a   : > { %vm4265_vm2 = vnez %v4217_v26 }
 0x96b   : > { %v11203_v26 = vsel %vm4265_vm2, 16843009, %v12427_v11 }
 0x97c   : > { %v4779_v48 = vpop.xlane.xlu0 %4778 }
 0x97d   : > { %v4867_v59 = vmax.f32 %v4779_v48, 0.0  ;;  %v4205_v48 = vpack.c.b8 %v4204_v43, %v4203_v4  ;;  %v4101_v4 = vunpack.c.0.s8 %v10989_v32 }
 0x97f   : > { %v4950_v62 = vsub.f32 %v11044_v40, %v4867_v59  ;;  %v4951_v46 = vsub.f32 %v11046_v21, %v4867_v59  ;;  %v4952_v57 = vsub.f32 %v11049_v60, %v4867_v59  ;;  %v4953_v41 = vsub.f32 %v11061_v0, %v4867_v59  ;;  %v8027_v40 = vpop.eup %8026 }
 0x980   : > { %v11172_v21 = vadd.f32 %v9993_v13, %v11129_v53  ;;  %v11176_v60 = vadd.f32 %v9995_v14, %v11129_v53  ;;  %v8029_v0 = vpop.eup %8028  ;;  %vm4261_vm1 = vnez %v4205_v48  ;;  %v4098_v59 = vunpack.c.0.s8 %v10975_v12 }
 0x981   : > { %v5146_v49 = vmul.f32 1.442695, %v4950_v62  ;;  %v5148_v18 = vmul.f32 1.442695, %v4951_v46  ;;  %v5150_v30 = vmul.f32 1.442695, %v4952_v57  ;;  %v8031_v31 = vpop.eup %8030 }
 0x982   : > { %v5152_v25 = vmul.f32 1.442695, %v4953_v41  ;;  %v11187_v38 = vmul.f32 0.2, %v11172_v21  ;;  %v11190_v51 = vmul.f32 0.2, %v11176_v60  ;;  %v4206_v41 = vpack.c.b16 %v4099_v3, %v4098_v59 }
 0x983   : > { %8032 = vpow2.f32 %v5146_v49  ;;  %v4293_v46 = vsel %vm4261_vm1, 16843009, %v12427_v11  ;;  %v4207_v49 = vpack.c.b16 %v4101_v4, %v4100_v33 }
 0x984   : > { %8034 = vpow2.f32 %v5148_v18  ;;  %v4382_v48 = vunpack.c.0.s8 %v4293_v46  ;;  %v4384_v59 = vunpack.c.2.s8 %v4293_v46  ;;  %v4385_v3 = vunpack.c.3.s8 %v4293_v46 }
 0x985   : > { %8036 = vpow2.f32 %v5150_v30  ;;  %v4208_v5 = vpack.c.b8 %v4207_v49, %v4206_v41  ;;  %v11217_v41 = vpop.xlane.xlu1 %4783 }
 0x986   : > { %8038 = vpow2.f32 %v5152_v25  ;;  %vm11211_vm3 = vcmp.ne.s32.totalorder %v4382_v48, 0  ;;  %12536 = vst [vmem:[#allocation61_spill] sm:$0xff] %v11217_v41  ;;  %vm11220_vm6 = vcmp.ne.s32.totalorder %v4384_v59, 0  ;;  %vm4513_vm7 = vcmp.ne.s32.totalorder %v4385_v3, 0  ;;  %v3363_v59 = vld [vmem:[%s9963_s22 + $0xe0] sm:$0xff] }
 0x987   : > { %vm4262_vm4 = vnez %v4208_v5  ;;  %vm3395_vm10 = vnez %v3363_v59 }
 0x988   : > { %v4294_v5 = vsel %vm4262_vm4, 16843009, %v12427_v11  ;;  %v11273_v41 = vsel %vm3395_vm10, 16843009, %v12427_v11 }
 0x989   : > { %v8033_v50 = vpop.eup %8032  ;;  %v4386_v20 = vunpack.c.0.s8 %v4294_v5  ;;  %v4387_v44 = vunpack.c.1.s8 %v4294_v5  ;;  %v4388_v3 = vunpack.c.2.s8 %v4294_v5 }
 0x98a   : > { %v8035_v1 = vpop.eup %8034  ;;  %v5298_v62 = vpack.c.bf16 %v8033_v50, %v8025_v23  ;;  %v11198_v23 = vmul.f32 0.2, %v11180_v27  ;;  %v4383_v50 = vunpack.c.1.s8 %v4293_v46 }
 0x98b   : > { %v8037_v57 = vpop.eup %8036  ;;  %v5299_v43 = vpack.c.bf16 %v8035_v1, %v8027_v40  ;;  %vm11256_vm11 = vcmp.ne.s32.totalorder %v4386_v20, 0  ;;  %vm11260_vm12 = vcmp.ne.s32.totalorder %v4387_v44, 0  ;;  %vm11265_vm15 = vcmp.ne.s32.totalorder %v4388_v3, 0 }
 0x98c   : > { %v8039_v18 = vpop.eup %8038  ;;  %5634 = vmatmul.bf16.gmra.mxu0 %v5298_v62  ;;  %v5300_v30 = vpack.c.bf16 %v8037_v57, %v8029_v0  ;;  %v4398_v57 = vunpack.c.0.s8 %v11203_v26  ;;  %vm4511_vm5 = vcmp.ne.s32.totalorder %v4383_v50, 0  ;;  %v3952_v47 = vmax.f32 %v11180_v27, %v11198_v23 }
 0x98d   : > { %5723 = vmatmul.bf16.gmra.mxu1 %v5299_v43  ;;  %v5301_v25 = vpack.c.bf16 %v8039_v18, %v8031_v31  ;;  %v4399_v43 = vunpack.c.1.s8 %v11203_v26  ;;  %v11269_v20 = vpop.xlane.xlu1 %4798 }
 0x98e   : > { %5812 = vmatmul.bf16.gmra.mxu2 %v5300_v30  ;;  %vm11225_vm8 = vcmp.ne.s32.totalorder %v4398_v57, 0 }
 0x98f   : > { %5901 = vmatmul.bf16.gmra.mxu3 %v5301_v25  ;;  %v3531_v31 = vpop.permute.xlu0 %3530  ;;  %vm11229_vm9 = vcmp.ne.s32.totalorder %v4399_v43, 0 }
 0x990   : > { %v3678_v53 = vadd.f32 %v9993_v13, %v3531_v31  ;;  %v3679_v33 = vadd.f32 %v9995_v14, %v3531_v31  ;;  %v3680_v4 = vadd.f32 %v10000_v52, %v3531_v31  ;;  %v3681_v1 = vadd.f32 %v10031_v54, %v3531_v31 }
 0x992   : > { %v3806_v46 = vmul.f32 0.2, %v3678_v53  ;;  %v3807_v49 = vmul.f32 0.2, %v3679_v33  ;;  %v3808_v18 = vmul.f32 0.2, %v3680_v4 }
 0x993   : > { %v3809_v25 = vmul.f32 0.2, %v3681_v1 }
 0x994   : > { %v3934_v31 = vmax.f32 %v3678_v53, %v3806_v46  ;;  %v3935_v0 = vmax.f32 %v3679_v33, %v3807_v49  ;;  %v3936_v40 = vmax.f32 %v3680_v4, %v3808_v18  ;;  %v4389_v4 = vunpack.c.3.s8 %v4294_v5  ;;  %v3365_v18 = vld [vmem:[%s9963_s22 + $0xf0] sm:$0xff] }
 0x995   : > { %v3937_v42 = vmax.f32 %v3681_v1, %v3809_v25  ;;  %v3364_v1 = vld [vmem:[%s9963_s22 + $0xe8] sm:$0xff]  ;;  %vm3397_vm14 = vnez %v3365_v18 }
 0x996   : > { %v11236_v53 = vsel %vm11211_vm3, %v3934_v31, -1e+30  ;;  %v11238_v33 = vsel %vm4511_vm5, %v3935_v0, -1e+30  ;;  %v11243_v57 = vsel %vm11220_vm6, %v3936_v40, -1e+30  ;;  %vm3396_vm13 = vnez %v3364_v1 }
 0x997   : > { %12543 = vst [vmem:[#allocation62_spill] sm:$0xff] %v11236_v53  ;;  %v3536_v46 = vpop.permute.xlu0 %3535  ;;  %v11245_v43 = vsel %vm4513_vm7, %v3937_v42, -1e+30  ;;  %v4785_v49 = vmax.f32 %v11236_v53, %v11238_v33  ;;  %v3366_v31 = vld [vmem:[%s9963_s22 + $0xf8] sm:$0xff]  ;;  %v11277_v18 = vsel %vm3396_vm13, 16843009, %v12427_v11 }
 0x998   : > { %12544 = vst [vmem:[#allocation63_spill] sm:$0xff] %v11238_v33  ;;  %v3682_v62 = vadd.f32 %v9993_v13, %v3536_v46  ;;  %v3683_v0 = vadd.f32 %v9995_v14, %v3536_v46  ;;  %v3684_v25 = vadd.f32 %v10000_v52, %v3536_v46  ;;  %v3685_v5 = vadd.f32 %v10031_v54, %v3536_v46 }
 0x999   : > { %12545 = vst [vmem:[#allocation64_spill] sm:$0xff] %v11243_v57  ;;  %v4786_v48 = vmax.f32 %v4785_v49, %v11243_v57  ;;  %vm3398_vm0 = vnez %v3366_v31  ;;  %v11280_v3 = vsel %vm3397_vm14, 16843009, %v12427_v11  ;;  %v4142_v31 = vunpack.c.3.s8 %v11273_v41 }
 0x99a   : > { %v3810_v30 = vmul.f32 0.2, %v3682_v62  ;;  %v3811_v33 = vmul.f32 0.2, %v3683_v0  ;;  %v3812_v53 = vmul.f32 0.2, %v3684_v25 }
 0x99b   : > { %v4787_v61 = vmax.f32 %v4786_v48, %v11245_v43  ;;  %v3813_v45 = vmul.f32 0.2, %v3685_v5  ;;  %vm4517_vm1 = vcmp.ne.s32.totalorder %v4389_v4, 0  ;;  %v12553_v4 = vmax.f32 %v11176_v60, %v11190_v51 }
 0x99c   : > { %v3938_v49 = vmax.f32 %v3682_v62, %v3810_v30  ;;  %v3939_v44 = vmax.f32 %v3683_v0, %v3811_v33  ;;  %v3940_v57 = vmax.f32 %v3684_v25, %v3812_v53  ;;  %v4144_v33 = vunpack.c.3.s8 %v11280_v3 }
 0x99d   : > { %4788 = vmax.xlane.f32.xlu2 %v4787_v61  ;;  %v3941_v24 = vmax.f32 %v3685_v5, %v3813_v45  ;;  %v11292_v61 = vsel %vm3398_vm0, 16843009, %v12427_v11  ;;  %v4143_v45 = vunpack.c.3.s8 %v11277_v18  ;;  %v12552_v0 = vmax.f32 %v11172_v21, %v11187_v38 }
 0x99e   : > { %v11285_v30 = vsel %vm11256_vm11, %v3938_v49, -1e+30  ;;  %v11289_v59 = vsel %vm11260_vm12, %v3939_v44, -1e+30  ;;  %v4145_v1 = vunpack.c.3.s8 %v11292_v61  ;;  %v11301_v62 = vsel %vm11265_vm15, %v3940_v57, -1e+30 }
 0x99f   : > { %v4790_v53 = vmax.f32 %v11285_v30, %v11289_v59  ;;  %v11308_v25 = vsel %vm11225_vm8, %v12552_v0, -1e+30  ;;  %v11315_v5 = vsel %vm11229_vm9, %v12553_v4, -1e+30  ;;  %v4239_v40 = vpack.c.b16 %v4143_v45, %v4142_v31 }
 0x9a0   : > { %12554 = vst [vmem:[#allocation65_spill] sm:$0xff] %v11315_v5  ;;  %v4240_v42 = vpack.c.b16 %v4145_v1, %v4144_v33  ;;  %v11318_v57 = vsel %vm4517_vm1, %v3941_v24, -1e+30  ;;  %v3825_v46 = vmul.f32 0.2, %v11195_v19  ;;  %v4401_v21 = vunpack.c.3.s8 %v11203_v26 }
 0x9a1   : > { %v4791_v48 = vmax.f32 %v4790_v53, %v11301_v62  ;;  %v12338_v38 = vmov 127   ;;  %v12555_v51 = vunpack.c.2.s8 %v11203_v26  ;;  %v4805_v50 = vmax.f32 %v11308_v25, %v11315_v5 }
 0x9a2   : > { %7893 = vset.pattern.permute.xlu1 %v12338_v38  ;;  %v4241_v24 = vpack.c.b8 %v4240_v42, %v4239_v40  ;;  %v3953_v44 = vmax.f32 %v11195_v19, %v3825_v46  ;;  %vm4529_vm4 = vcmp.ne.s32.totalorder %v4401_v21, 0 }
 0x9a3   : > { %v4792_v60 = vmax.f32 %v4791_v48, %v11318_v57  ;;  %vm4528_vm2 = vcmp.ne.s32.totalorder %v12555_v51, 0 }
 0x9a4   : > { %v11330_v49 = vpop.permute.xlu1 %3580  ;;  %v11333_v27 = vsel %vm4528_vm2, %v3952_v47, -1e+30  ;;  %vm4273_vm3 = vnez %v4241_v24  ;;  %v11337_v45 = vsel %vm4529_vm4, %v3953_v44, -1e+30  ;;  %v3427_v44 = vld [vmem:[%s9945_s2 + $0xd8] sm:$0xff] }
 0x9a5   : > { %4793 = vmax.xlane.f32.xlu0 %v4792_v60  ;;  %12556 = vst [vmem:[#allocation66_spill] sm:$0xff] %v11333_v27  ;;  %v4806_v23 = vmax.f32 %v4805_v50, %v11333_v27  ;;  %v4305_v31 = vsel %vm4273_vm3, 16843009, %v12427_v11 }
 0x9a6   : > { %12557 = vst [vmem:[#allocation67_spill] sm:$0xff] %v11337_v45  ;;  %v4430_v33 = vunpack.c.0.s8 %v4305_v31  ;;  %v4431_v1 = vunpack.c.1.s8 %v4305_v31  ;;  %v4432_v40 = vunpack.c.2.s8 %v4305_v31  ;;  %v4433_v60 = vunpack.c.3.s8 %v4305_v31 }
 0x9a7   : > { %v4807_v26 = vmax.f32 %v4806_v23, %v11337_v45 }
 0x9a8   : > { %vm4558_vm5 = vcmp.ne.s32.totalorder %v4430_v33, 0  ;;  %vm4559_vm6 = vcmp.ne.s32.totalorder %v4431_v1, 0  ;;  %vm4560_vm7 = vcmp.ne.s32.totalorder %v4432_v40, 0  ;;  %vm4561_vm8 = vcmp.ne.s32.totalorder %v4433_v60, 0 }
 0x9a9   : > { %v4109_v40 = vunpack.c.2.s8 %v10989_v32  ;;  %v11373_v32 = vpop.f32.mrf.mxu1 }
 0x9ac   : > { %v3591_v53 = vpop.permute.xlu1 %3590 }
 0x9ad   : > { %v3726_v0 = vadd.f32 %v9993_v13, %v3591_v53  ;;  %v3727_v19 = vadd.f32 %v9995_v14, %v3591_v53  ;;  %v3728_v4 = vadd.f32 %v10000_v52, %v3591_v53  ;;  %v3729_v48 = vadd.f32 %v10031_v54, %v3591_v53  ;;  %4808 = vmax.xlane.f32.xlu0 %v4807_v26 }
 0x9af   : > { %v3854_v42 = vmul.f32 0.2, %v3726_v0  ;;  %v3855_v46 = vmul.f32 0.2, %v3727_v19  ;;  %v3856_v47 = vmul.f32 0.2, %v3728_v4 }
 0x9b0   : > { %v3857_v21 = vmul.f32 0.2, %v3729_v48 }
 0x9b1   : > { %v3982_v51 = vmax.f32 %v3726_v0, %v3854_v42  ;;  %v3983_v50 = vmax.f32 %v3727_v19, %v3855_v46  ;;  %v3984_v24 = vmax.f32 %v3728_v4, %v3856_v47  ;;  %v3428_v0 = vld [vmem:[%s9945_s2 + $0xe0] sm:$0xff]  ;;  %v4106_v19 = vunpack.c.2.s8 %v10975_v12  ;;  %v3430_v47 = vld [vmem:[%s9945_s2 + $0xf0] sm:$0xff] }
 0x9b2   : > { %v3985_v23 = vmax.f32 %v3729_v48, %v3857_v21  ;;  %v4107_v4 = vunpack.c.2.s8 %v10981_v28  ;;  %v4108_v48 = vunpack.c.2.s8 %v10985_v8  ;;  %v5687_v42 = vadd.f32 %v10923_v34, %v10921_v56  ;;  %v11371_v8 = vpop.f32.mrf.mxu0 }
 0x9b3   : > { %v11345_v38 = vsel %vm4558_vm5, %v3982_v51, -1e+30  ;;  %v11347_v45 = vsel %vm4559_vm6, %v3983_v50, -1e+30  ;;  %v11351_v31 = vsel %vm4560_vm7, %v3984_v24, -1e+30  ;;  %v5695_v28 = vadd.f32 %v10941_v7, %v10939_v10  ;;  %v11375_v50 = vpop.permute.xlu0 %3560 }
 0x9b4   : > { %12558 = vst [vmem:[#allocation68_spill] sm:$0xff] %v11345_v38  ;;  %v4845_v26 = vmax.f32 %v11345_v38, %v11347_v45  ;;  %v11354_v33 = vsel %vm4561_vm8, %v3985_v23, -1e+30  ;;  %v5776_v46 = vadd.f32 %v10925_v63, %v5687_v42  ;;  %v4212_v21 = vpack.c.b16 %v4107_v4, %v4106_v19  ;;  %v11388_v23 = vpop.f32.mrf.mxu2 }
 0x9b5   : > { %12559 = vst [vmem:[#allocation69_spill] sm:$0xff] %v11347_v45  ;;  %3570 = vperm.xlu2 %7891, %v3427_v44   ;;  %v4213_v60 = vpack.c.b16 %v4109_v40, %v4108_v48  ;;  %v4122_v56 = vunpack.c.2.s8 %v11118_v58  ;;  %v4123_v34 = vunpack.c.2.s8 %v11121_v29  ;;  %v4124_v63 = vunpack.c.2.s8 %v11124_v22 }
 0x9b6   : > { %12560 = vst [vmem:[#allocation70_spill] sm:$0xff] %v11351_v31  ;;  %v4846_v53 = vmax.f32 %v4845_v26, %v11351_v31  ;;  %v11367_v51 = vadd.f32 %v10927_v39, %v5776_v46  ;;  %v4125_v24 = vunpack.c.2.s8 %v11127_v35  ;;  %v12562_v39 = vmov 127  }
 0x9b7   : > { %12561 = vst [vmem:[#allocation71_spill] sm:$0xff] %v11354_v33  ;;  %v4214_v12 = vpack.c.b8 %v4213_v60, %v4212_v21  ;;  %v5784_v10 = vadd.f32 %v10944_v2, %v5695_v28  ;;  %v3690_v7 = vadd.f32 %v9993_v13, %v11152_v17  ;;  %v3691_v44 = vadd.f32 %v9995_v14, %v11152_v17 }
 0x9b8   : > { %v4847_v1 = vmax.f32 %v4846_v53, %v11354_v33  ;;  %vm5943_vm9 = vcmp.gt.f32.partialorder %v11367_v51, 0.0  ;;  %v4118_v26 = vunpack.c.1.s8 %v11118_v58  ;;  %v4119_v53 = vunpack.c.1.s8 %v11121_v29 }
 0x9b9   : > { %vm4264_vm10 = vnez %v4214_v12  ;;  %v5975_v19 = vsel %vm5943_vm9, %v11367_v51, 1.0  ;;  %v4224_v2 = vpack.c.b16 %v4123_v34, %v4122_v56  ;;  %v4225_v4 = vpack.c.b16 %v4125_v24, %v4124_v63  ;;  %v11408_v56 = vpop.f32.mrf.mxu3 }
 0x9ba   : > { %4848 = vmax.xlane.f32.xlu1 %v4847_v1  ;;  %v4120_v1 = vunpack.c.1.s8 %v11124_v22  ;;  %v11397_v48 = vadd.f32 %v10948_v16, %v5784_v10  ;;  %v4296_v40 = vsel %vm4264_vm10, 16843009, %v12427_v11  ;;  %v3692_v42 = vadd.f32 %v10000_v52, %v11152_v17 }
 0x9bb   : > { %v11404_v46 = vadd.f32 %v10031_v54, %v11152_v17  ;;  %v3819_v21 = vmul.f32 0.2, %v3691_v44  ;;  %8040 = vrcp.f32 %v5975_v19  ;;  %v5700_v60 = vadd.f32 %v10977_v37, %v10969_v55  ;;  %v11414_v17 = vpop.f32.mrf.mxu1  ;;  %v3566_v19 = vpop.permute.xlu0 %3565 }
 0x9bc   : > { %v4221_v12 = vpack.c.b16 %v4119_v53, %v4118_v26  ;;  %v4394_v16 = vunpack.c.0.s8 %v4296_v40  ;;  %v4395_v34 = vunpack.c.1.s8 %v4296_v40  ;;  %v4226_v63 = vpack.c.b8 %v4225_v4, %v4224_v2 }
 0x9bd   : > { %3575 = vperm.xlu2 %7891, %v3428_v0   ;;  %v4121_v0 = vunpack.c.1.s8 %v11127_v35  ;;  %vm5946_vm11 = vcmp.gt.f32.partialorder %v11397_v48, 0.0  ;;  %v5789_v24 = vadd.f32 %v10999_v9, %v5700_v60  ;;  %v3820_v10 = vmul.f32 0.2, %v3692_v42  ;;  %v12575_v9 = vld [vmem:[#allocation46_spill] sm:$0xff] }
 0x9be   : > { %v4396_v33 = vunpack.c.2.s8 %v4296_v40  ;;  %v3947_v55 = vmax.f32 %v3691_v44, %v3819_v21  ;;  %v11417_v37 = vmul.f32 0.2, %v11404_v46  ;;  %v5978_v53 = vsel %vm5946_vm11, %v11397_v48, 1.0  ;;  %v12567_v44 = vld [vmem:[#allocation35_spill] sm:$0xff] }
 0x9bf   : > { %v4222_v28 = vpack.c.b16 %v4121_v0, %v4120_v1  ;;  %v11420_v1 = vpop.f32.mrf.mxu2  ;;  %vm11422_vm12 = vcmp.ne.s32.totalorder %v4394_v16, 0  ;;  %vm11426_vm13 = vcmp.ne.s32.totalorder %v4395_v34, 0  ;;  %vm4268_vm14 = vnez %v4226_v63  ;;  %v12570_v16 = vld [vmem:[#allocation37_spill] sm:$0xff] }
 0x9c0   : > { %v5705_v4 = vadd.f32 %v12567_v44, %v11020_v36  ;;  %v3707_v21 = vadd.f32 %v9995_v14, %v3566_v19  ;;  %v3948_v60 = vmax.f32 %v3692_v42, %v3820_v10  ;;  %vm11437_vm15 = vcmp.ne.s32.totalorder %v4396_v33, 0 }
 0x9c1   : > { %3585 = vperm.xlu0 %7889, %v3430_v47   ;;  %v3818_v47 = vmul.f32 0.2, %v3690_v7  ;;  %v4223_v26 = vpack.c.b8 %v4222_v28, %v4221_v12  ;;  %v8041_v2 = vpop.eup %8040  ;;  %v4397_v12 = vunpack.c.3.s8 %v4296_v40  ;;  %8042 = vrcp.f32 %v5978_v53 }
 0x9c2   : > { %v5794_v34 = vadd.f32 %v12570_v16, %v5705_v4  ;;  %v3702_v36 = vadd.f32 %v9993_v13, %v11375_v50  ;;  %v3703_v63 = vadd.f32 %v9995_v14, %v11375_v50  ;;  %v11455_v33 = vsel %vm11426_vm13, %v3947_v55, -1e+30 }
 0x9c3   : > { %v3946_v31 = vmax.f32 %v3690_v7, %v3818_v47  ;;  %v11431_v7 = vadd.f32 %v11001_v15, %v5789_v24  ;;  %v3706_v47 = vadd.f32 %v9993_v13, %v3566_v19  ;;  %v11443_v15 = vsel %vm4268_vm14, 16843009, %v12427_v11  ;;  %12572 = vst [vmem:[#allocation37_spill] sm:$0xff] %v11455_v33  ;;  %v11476_v4 = vpop.f32.mrf.mxu1 }
 0x9c4   : > { %vm4267_vm0 = vnez %v4223_v26  ;;  %v3835_v24 = vmul.f32 0.2, %v3707_v21  ;;  %v3949_v10 = vmax.f32 %v11404_v46, %v11417_v37  ;;  %v11460_v26 = vpop.f32.mrf.mxu3  ;;  %vm11462_vm2 = vcmp.ne.s32.totalorder %v4397_v12, 0  ;;  %12578 = vst [vmem:[#allocation73_spill] sm:$0xff] %v11476_v4 }
 0x9c5   : > { %7892 = vset.pattern.permute.xlu2 %v12562_v39  ;;  %v11451_v40 = vsel %vm11422_vm12, %v3946_v31, -1e+30  ;;  %vm5948_vm1 = vcmp.gt.f32.partialorder %v11431_v7, 0.0  ;;  %v3834_v42 = vmul.f32 0.2, %v3706_v47  ;;  %v4410_v31 = vunpack.c.0.s8 %v11443_v15 }
 0x9c6   : > { %12571 = vst [vmem:[#allocation35_spill] sm:$0xff] %v11451_v40  ;;  %v4411_v0 = vunpack.c.1.s8 %v11443_v15  ;;  %v11469_v55 = vsel %vm4267_vm0, 16843009, %v12427_v11  ;;  %v3708_v46 = vadd.f32 %v10000_v52, %v3566_v19  ;;  %v11481_v37 = vsel %vm11437_vm15, %v3948_v60, -1e+30 }
 0x9c7   : > { %12579 = vst [vmem:[#allocation74_spill] sm:$0xff] %v11481_v37  ;;  %v4800_v12 = vmax.f32 %v11451_v40, %v11455_v33  ;;  %v5980_v16 = vsel %vm5948_vm1, %v11431_v7, 1.0  ;;  %v5712_v45 = vadd.f32 %v11373_v32, %v11371_v8  ;;  %v8043_v38 = vpop.eup %8042  ;;  %v3963_v27 = vmax.f32 %v3707_v21, %v3835_v24  ;;  %v11490_v28 = vpop.f32.mrf.mxu2 }
 0x9c8   : > { %v4406_v4 = vunpack.c.0.s8 %v11469_v55  ;;  %v4407_v5 = vunpack.c.1.s8 %v11469_v55  ;;  %12580 = vst [vmem:[#allocation75_spill] sm:$0xff] %v11490_v28  ;;  %v3704_v60 = vadd.f32 %v10000_v52, %v11375_v50  ;;  %v3709_v33 = vadd.f32 %v10031_v54, %v3566_v19 }
 0x9c9   : > { %7894 = vset.pattern.permute.xlu0 %v12562_v39  ;;  %v11412_v39 = vpop.f32.mrf.mxu0  ;;  %vm4538_vm3 = vcmp.ne.s32.totalorder %v4410_v31, 0  ;;  %vm4539_vm4 = vcmp.ne.s32.totalorder %v4411_v0, 0  ;;  %8044 = vrcp.f32 %v5980_v16  ;;  %v3836_v8 = vmul.f32 0.2, %v3708_v46 }
 0x9ca   : > { %v4801_v32 = vmax.f32 %v4800_v12, %v11481_v37  ;;  %v4412_v24 = vunpack.c.2.s8 %v11443_v15  ;;  %v11501_v40 = vsel %vm4539_vm4, %v3963_v27, -1e+30  ;;  %vm4534_vm6 = vcmp.ne.s32.totalorder %v4406_v4, 0 }
 0x9cb   : > { %12582 = vst [vmem:[#allocation77_spill] sm:$0xff] %v11501_v40  ;;  %vm4535_vm7 = vcmp.ne.s32.totalorder %v4407_v5, 0  ;;  %v3705_v19 = vadd.f32 %v10031_v54, %v11375_v50  ;;  %v3832_v31 = vmul.f32 0.2, %v3704_v60  ;;  %v3837_v0 = vmul.f32 0.2, %v3709_v33  ;;  %v5719_v16 = vpop.f32.mrf.mxu1 }
 0x9cc   : > { %v4408_v27 = vunpack.c.2.s8 %v11469_v55  ;;  %vm4540_vm8 = vcmp.ne.s32.totalorder %v4412_v24, 0 }
 0x9ce   : > { %vm4536_vm9 = vcmp.ne.s32.totalorder %v4408_v27, 0  ;;  %v12594_v27 = vld [vmem:[#allocation45_spill] sm:$0xff] }
 0x9cf   : > { %v8045_v4 = vpop.eup %8044 }
 0x9d1   : > { %v11474_v44 = vpop.f32.mrf.mxu0 }
 0x9d2   : > { %12577 = vst [vmem:[#allocation72_spill] sm:$0xff] %v11474_v44  ;;  %v3962_v44 = vmax.f32 %v3706_v47, %v3834_v42  ;;  %v5801_v47 = vadd.f32 %v11388_v23, %v5712_v45  ;;  %v11508_v45 = vsel %vm11462_vm2, %v3949_v10, -1e+30  ;;  %v3964_v23 = vmax.f32 %v3708_v46, %v3836_v8  ;;  %v5808_v46 = vpop.f32.mrf.mxu2 }
 0x9d3   : > { %6045 = vperm.xlu1 %7893, %v8041_v2   ;;  %v11472_v2 = vadd.f32 %v12575_v9, %v5794_v34  ;;  %v3830_v34 = vmul.f32 0.2, %v3702_v36  ;;  %v3831_v9 = vmul.f32 0.2, %v3703_v63  ;;  %12583 = vst [vmem:[#allocation78_spill] sm:$0xff] %v11508_v45  ;;  %v4802_v53 = vmax.f32 %v4801_v32, %v11508_v45 }
 0x9d4   : > { %v11499_v28 = vsel %vm4538_vm3, %v3962_v44, -1e+30  ;;  %v11521_v10 = vadd.f32 %v11408_v56, %v5801_v47  ;;  %v3960_v8 = vmax.f32 %v3704_v60, %v3832_v31  ;;  %v11524_v24 = vsel %vm4540_vm8, %v3964_v23, -1e+30 }
 0x9d5   : > { %12576 = vst [vmem:[#allocation46_spill] sm:$0xff] %v11472_v2  ;;  %vm5950_vm5 = vcmp.gt.f32.partialorder %v11472_v2, 0.0  ;;  %v3958_v21 = vmax.f32 %v3702_v36, %v3830_v34  ;;  %v3959_v42 = vmax.f32 %v3703_v63, %v3831_v9  ;;  %v4413_v36 = vunpack.c.3.s8 %v11443_v15  ;;  %v11512_v63 = vpop.f32.mrf.mxu3 }
 0x9d6   : > { %12581 = vst [vmem:[#allocation76_spill] sm:$0xff] %v11499_v28  ;;  %v4820_v5 = vmax.f32 %v11499_v28, %v11501_v40  ;;  %v3965_v34 = vmax.f32 %v3709_v33, %v3837_v0  ;;  %v3833_v9 = vmul.f32 0.2, %v3705_v19  ;;  %vm5953_vm11 = vcmp.gt.f32.partialorder %v11521_v10, 0.0 }
 0x9d7   : > { %12584 = vst [vmem:[#allocation79_spill] sm:$0xff] %v11512_v63  ;;  %v11516_v50 = vsel %vm4534_vm6, %v3958_v21, -1e+30  ;;  %v11518_v44 = vsel %vm4535_vm7, %v3959_v42, -1e+30  ;;  %v4409_v21 = vunpack.c.3.s8 %v11469_v55  ;;  %vm4541_vm10 = vcmp.ne.s32.totalorder %v4413_v36, 0 }
 0x9d8   : > { %12585 = vst [vmem:[#allocation80_spill] sm:$0xff] %v11516_v50  ;;  %v4815_v42 = vmax.f32 %v11516_v50, %v11518_v44  ;;  %v4821_v56 = vmax.f32 %v4820_v5, %v11524_v24  ;;  %v3961_v47 = vmax.f32 %v3705_v19, %v3833_v9  ;;  %v11533_v60 = vsel %vm4541_vm10, %v3965_v34, -1e+30  ;;  %v12593_v36 = vld [vmem:[#allocation48_spill] sm:$0xff] }
 0x9d9   : > { %v5630_v12 = vpop.f32.mrf.mxu0  ;;  %12586 = vst [vmem:[#allocation81_spill] sm:$0xff] %v11518_v44  ;;  %vm4537_vm12 = vcmp.ne.s32.totalorder %v4409_v21, 0  ;;  %v5985_v31 = vsel %vm5953_vm11, %v11521_v10, 1.0  ;;  %v5707_v5 = vadd.f32 %v12594_v27, %v12593_v36  ;;  %v5715_v9 = vadd.f32 %v11414_v17, %v11412_v39  ;;  %v5721_v21 = vpop.f32.mrf.mxu1 }
 0x9da   : > { %12587 = vst [vmem:[#allocation82_spill] sm:$0xff] %v11521_v10  ;;  %v5720_v15 = vadd.f32 %v5719_v16, %v5630_v12  ;;  %v4822_v12 = vmax.f32 %v4821_v56, %v11533_v60  ;;  %v11540_v23 = vsel %vm4537_vm12, %v3961_v47, -1e+30  ;;  %v5810_v47 = vpop.f32.mrf.mxu2  ;;  %v4135_v27 = vunpack.c.1.s8 %v11277_v18 }
 0x9db   : > { %6060 = vperm.xlu1 %7893, %v8043_v38   ;;  %v5982_v38 = vsel %vm5950_vm5, %v11472_v2, 1.0  ;;  %12588 = vst [vmem:[#allocation83_spill] sm:$0xff] %v11524_v24  ;;  %v11594_v40 = vadd.f32 %v10000_v52, %v11330_v49 }
 0x9dc   : > { %8046 = vrcp.f32 %v5982_v38  ;;  %v5809_v32 = vadd.f32 %v5808_v46, %v5720_v15  ;;  %v11531_v38 = vsel %vm4536_vm9, %v3960_v8, -1e+30  ;;  %12590 = vst [vmem:[#allocation85_spill] sm:$0xff] %v11533_v60  ;;  %v12595_v15 = vld [vmem:[#allocation38_spill] sm:$0xff]  ;;  %v5796_v46 = vadd.f32 %v11087_v6, %v5707_v5 }
 0x9dd   : > { %12589 = vst [vmem:[#allocation84_spill] sm:$0xff] %v11531_v38  ;;  %v4816_v55 = vmax.f32 %v4815_v42, %v11531_v38  ;;  %v5897_v0 = vpop.f32.mrf.mxu3  ;;  %8048 = vrcp.f32 %v5985_v31  ;;  %vm5944_vm14 = vcmp.gt.f32.partialorder %v12595_v15, 0.0  ;;  %v12596_v42 = vld [vmem:[#allocation52_spill] sm:$0xff]  ;;  %v4136_v5 = vunpack.c.1.s8 %v11280_v3  ;;  %v12607_v60 = vld [vmem:[#allocation54_spill] sm:$0xff] }
 0x9de   : > { %v11538_v16 = vadd.f32 %v5897_v0, %v5809_v32  ;;  %12592 = vst [vmem:[#allocation87_spill] sm:$0xff] %v11540_v23  ;;  %v5976_v34 = vsel %vm5944_vm14, %v12595_v15, 1.0  ;;  %v11553_v56 = vadd.f32 %v12596_v42, %v5796_v46  ;;  %v5804_v32 = vadd.f32 %v11420_v1, %v5715_v9  ;;  %v12600_v1 = vld [vmem:[#allocation61_spill] sm:$0xff] }
 0x9df   : > { %v4817_v19 = vmax.f32 %v4816_v55, %v11540_v23  ;;  %v4133_v23 = vunpack.c.0.s8 %v11292_v61 }
 0x9e0   : > { %12591 = vst [vmem:[#allocation86_spill] sm:$0xff] %v11538_v16  ;;  %vm5956_vm13 = vcmp.gt.f32.partialorder %v11538_v16, 0.0  ;;  %vm5951_vm15 = vcmp.gt.f32.partialorder %v11553_v56, 0.0  ;;  %v11558_v31 = vadd.f32 %v11460_v26, %v5804_v32  ;;  %v4134_v26 = vunpack.c.1.s8 %v11273_v41  ;;  %v12603_v32 = vld [vmem:[#allocation51_spill] sm:$0xff] }
 0x9e1   : > { %v5632_v8 = vpop.f32.mrf.mxu0  ;;  %12597 = vst [vmem:[#allocation48_spill] sm:$0xff] %v11553_v56  ;;  %v5983_v39 = vsel %vm5951_vm15, %v11553_v56, 1.0  ;;  %v4132_v56 = vunpack.c.0.s8 %v11280_v3 }
 0x9e2   : > { %v8047_v33 = vpop.eup %8046  ;;  %12598 = vst [vmem:[#allocation45_spill] sm:$0xff] %v11558_v31  ;;  %vm5954_vm0 = vcmp.gt.f32.partialorder %v11558_v31, 0.0 }
 0x9e3   : > { %6070 = vperm.xlu1 %7893, %v8045_v4   ;;  %v5988_v4 = vsel %vm5956_vm13, %v11538_v16, 1.0  ;;  %v5986_v36 = vsel %vm5954_vm0, %v11558_v31, 1.0  ;;  %v4231_v2 = vpack.c.b16 %v4133_v23, %v4132_v56 }
 0x9e4   : > { %8050 = vrcp.f32 %v5988_v4  ;;  %v4137_v4 = vunpack.c.1.s8 %v11292_v61 }
 0x9e5   : > { %8052 = vrcp.f32 %v5976_v34  ;;  %v5899_v17 = vpop.f32.mrf.mxu3  ;;  %v4871_v34 = vmax.f32 %v11269_v20, 0.0  ;;  %v4129_v20 = vunpack.c.3.s8 %v11127_v35 }
 0x9e6   : > { %4803 = vmax.xlane.f32.xlu2 %v4802_v53  ;;  %v8049_v53 = vpop.eup %8048  ;;  %8054 = vrcp.f32 %v5983_v39  ;;  %v4234_v39 = vpack.c.b16 %v4137_v4, %v4136_v5  ;;  %v12606_v5 = vld [vmem:[#allocation28_spill] sm:$0xff] }
 0x9e7   : > { %8056 = vrcp.f32 %v5986_v36  ;;  %v12605_v36 = vld [vmem:[#allocation47_spill] sm:$0xff]  ;;  %v4968_v24 = vsub.f32 %v12607_v60, %v4871_v34  ;;  %v11605_v60 = vadd.f32 %v10031_v54, %v11330_v49 }
 0x9ea   : > { %v8051_v55 = vpop.eup %8050 }
 0x9eb   : > { %4823 = vmax.xlane.f32.xlu0 %v4822_v12  ;;  %6080 = vperm.xlu1 %7893, %v8047_v33   ;;  %v5722_v33 = vadd.f32 %v5721_v21, %v5632_v8  ;;  %v8053_v0 = vpop.eup %8052  ;;  %v12602_v21 = vld [vmem:[#allocation50_spill] sm:$0xff] }
 0x9ec   : > { %v8055_v9 = vpop.eup %8054 }
 0x9ed   : > { %v5811_v6 = vadd.f32 %v5810_v47, %v5722_v33  ;;  %v12604_v33 = vld [vmem:[#allocation53_spill] sm:$0xff] }
 0x9ee   : > { %4818 = vmax.xlane.f32.xlu2 %v4817_v19  ;;  %v4868_v19 = vmax.f32 %v12600_v1, 0.0  ;;  %v4128_v1 = vunpack.c.3.s8 %v11124_v22 }
 0x9ef   : > { %v11561_v12 = vadd.f32 %v5899_v17, %v5811_v6  ;;  %v4233_v6 = vpack.c.b16 %v4135_v27, %v4134_v26  ;;  %v4126_v17 = vunpack.c.3.s8 %v11118_v58  ;;  %v4967_v58 = vsub.f32 %v12606_v5, %v4871_v34 }
 0x9f0   : > { %v4955_v42 = vsub.f32 %v12602_v21, %v4868_v19  ;;  %v4956_v47 = vsub.f32 %v12603_v32, %v4868_v19  ;;  %v11584_v21 = vadd.f32 %v9993_v13, %v11330_v49  ;;  %v4228_v22 = vpack.c.b16 %v4129_v20, %v4128_v1 }
 0x9f1   : > { %12599 = vst [vmem:[#allocation52_spill] sm:$0xff] %v11561_v12  ;;  %vm5957_vm1 = vcmp.gt.f32.partialorder %v11561_v12, 0.0 }
 0x9f2   : > { %v5989_v8 = vsel %vm5957_vm1, %v11561_v12, 1.0  ;;  %v5158_v32 = vmul.f32 1.442695, %v4956_v47 }
 0x9f3   : > { %6095 = vperm.xlu1 %7893, %v8049_v53   ;;  %v12601_v53 = vld [vmem:[#allocation49_spill] sm:$0xff]  ;;  %8058 = vrcp.f32 %v5989_v8 }
 0x9f4   : > { %v4954_v46 = vsub.f32 %v12601_v53, %v4868_v19  ;;  %v4966_v53 = vsub.f32 %v12605_v36, %v4871_v34  ;;  %v8057_v36 = vpop.eup %8056 }
 0x9f6   : > { %v5154_v27 = vmul.f32 1.442695, %v4954_v46  ;;  %v11597_v46 = vmul.f32 0.2, %v11584_v21  ;;  %v5178_v8 = vmul.f32 1.442695, %v4966_v53 }
 0x9f8   : > { %8060 = vpow2.f32 %v5154_v27 }
 0x9f9   : > { %v8059_v20 = vpop.eup %8058 }
 0x9fb   : > { %6110 = vperm.xlu1 %7893, %v8051_v55   ;;  %v4957_v55 = vsub.f32 %v12604_v33, %v4868_v19  ;;  %v11588_v19 = vadd.f32 %v9995_v14, %v11330_v49  ;;  %v4235_v33 = vpack.c.b8 %v4234_v39, %v4233_v6  ;;  %v5180_v6 = vmul.f32 1.442695, %v4967_v58 }
 0x9fc   : > { %v11612_v39 = vmul.f32 0.2, %v11594_v40 }
 0x9fd   : > { %v5160_v28 = vmul.f32 1.442695, %v4957_v55  ;;  %vm11607_vm2 = vnez %v4235_v33 }
 0x9ff   : > { %6050 = vperm.xlu0 %7894, %v8053_v0   ;;  %v4127_v0 = vunpack.c.3.s8 %v11121_v29  ;;  %v5156_v29 = vmul.f32 1.442695, %v4955_v42  ;;  %v11600_v42 = vmul.f32 0.2, %v11588_v19 }
 0xa01   : > { %8062 = vpow2.f32 %v5156_v29 }
 0xa02   : > { %8064 = vpow2.f32 %v5158_v32  ;;  %v12615_v32 = vld [vmem:[#allocation64_spill] sm:$0xff] }
 0xa03   : > { %8066 = vpow2.f32 %v5160_v28  ;;  %v11627_v28 = vsel %vm11607_vm2, 16843009, %v12427_v11 }
 0xa04   : > { %8068 = vpow2.f32 %v5178_v8 }
 0xa05   : > { %8070 = vpow2.f32 %v5180_v6  ;;  %v11644_v6 = vmul.f32 0.2, %v11605_v60 }
 0xa07   : > { %6085 = vperm.xlu0 %7894, %v8055_v9   ;;  %v4227_v9 = vpack.c.b16 %v4127_v0, %v4126_v17  ;;  %v12608_v17 = vld [vmem:[#allocation55_spill] sm:$0xff] }
 0xa08   : > { %v4969_v47 = vsub.f32 %v12608_v17, %v4871_v34  ;;  %v5182_v34 = vmul.f32 1.442695, %v4968_v24  ;;  %v11629_v24 = vpop.eup %8060 }
 0xa09   : > { %v5635_v26 = vpop.f32.mrf.mxu0  ;;  %v4229_v12 = vpack.c.b8 %v4228_v22, %v4227_v9  ;;  %v12614_v9 = vld [vmem:[#allocation63_spill] sm:$0xff] }
 0xa0a   : > { %v5724_v4 = vpop.f32.mrf.mxu1  ;;  %8072 = vpow2.f32 %v5182_v34 }
 0xa0b   : > { %v5725_v35 = vadd.f32 %v5724_v4, %v5635_v26  ;;  %vm11614_vm3 = vnez %v4229_v12  ;;  %v11622_v4 = vmul.f32 1.442695, %v4969_v47  ;;  %v12613_v12 = vld [vmem:[#allocation62_spill] sm:$0xff] }
 0xa0f   : > { %6100 = vperm.xlu0 %7894, %v8057_v36   ;;  %v11639_v36 = vpop.eup %8062 }
 0xa10   : > { %v4789_v0 = vpop.xlane.xlu2 %4788 }
 0xa11   : > { %v5813_v26 = vpop.f32.mrf.mxu2  ;;  %v4869_v27 = vmax.f32 %v4789_v0, 0.0  ;;  %v5637_v17 = vpop.f32.mrf.mxu0 }
 0xa12   : > { %v5814_v5 = vadd.f32 %v5813_v26, %v5725_v35  ;;  %v5902_v58 = vpop.f32.mrf.mxu3  ;;  %v11637_v35 = vsel %vm11614_vm3, 16843009, %v12427_v11  ;;  %v5726_v47 = vpop.f32.mrf.mxu1 }
 0xa13   : > { %v4958_v29 = vsub.f32 %v12613_v12, %v4869_v27  ;;  %v4959_v22 = vsub.f32 %v12614_v9, %v4869_v27  ;;  %v4960_v33 = vsub.f32 %v12615_v32, %v4869_v27  ;;  %v11648_v0 = vpop.eup %8064  ;;  %v4414_v34 = vunpack.c.0.s8 %v11637_v35 }
 0xa14   : > { %v11641_v8 = vadd.f32 %v5902_v58, %v5814_v5  ;;  %v11653_v5 = vpop.eup %8066  ;;  %v4415_v32 = vunpack.c.1.s8 %v11637_v35  ;;  %v4416_v53 = vunpack.c.2.s8 %v11637_v35  ;;  %v4961_v55 = vsub.f32 %v11245_v43, %v4869_v27 }
 0xa15   : > { %v5162_v26 = vmul.f32 1.442695, %v4958_v29  ;;  %v5164_v58 = vmul.f32 1.442695, %v4959_v22  ;;  %v11658_v49 = vpop.eup %8068  ;;  %v5727_v29 = vadd.f32 %v5726_v47, %v5637_v17  ;;  %v5166_v1 = vmul.f32 1.442695, %v4960_v33 }
 0xa16   : > { %12616 = vst [vmem:[#allocation61_spill] sm:$0xff] %v11641_v8  ;;  %v11661_v12 = vpop.eup %8070  ;;  %v4130_v22 = vunpack.c.0.s8 %v11273_v41  ;;  %v4131_v8 = vunpack.c.0.s8 %v11277_v18  ;;  %vm11678_vm4 = vcmp.ne.s32.totalorder %v4414_v34, 0  ;;  %vm11682_vm5 = vcmp.ne.s32.totalorder %v4415_v32, 0 }
 0xa17   : > { %6115 = vperm.xlu0 %7894, %v8059_v20   ;;  %8074 = vpow2.f32 %v5162_v26  ;;  %v11672_v33 = vpop.eup %8072  ;;  %v4417_v26 = vunpack.c.3.s8 %v11637_v35  ;;  %vm11691_vm7 = vcmp.ne.s32.totalorder %v4416_v53, 0 }
 0xa18   : > { %v4794_v9 = vpop.xlane.xlu0 %4793  ;;  %v3571_v31 = vpop.permute.xlu2 %3570  ;;  %8076 = vpow2.f32 %v5164_v58  ;;  %v4230_v45 = vpack.c.b16 %v4131_v8, %v4130_v22 }
 0xa19   : > { %v5815_v15 = vpop.f32.mrf.mxu2  ;;  %v11667_v63 = vmax.f32 %v4794_v9, 0.0  ;;  %v3710_v43 = vadd.f32 %v9993_v13, %v3571_v31  ;;  %v3711_v20 = vadd.f32 %v9995_v14, %v3571_v31  ;;  %v3712_v27 = vadd.f32 %v10000_v52, %v3571_v31 }
 0xa1a   : > { %v5816_v17 = vadd.f32 %v5815_v15, %v5727_v29  ;;  %v3713_v47 = vadd.f32 %v10031_v54, %v3571_v31  ;;  %v5904_v16 = vpop.f32.mrf.mxu3  ;;  %v5168_v9 = vmul.f32 1.442695, %v4961_v55  ;;  %8078 = vpow2.f32 %v5166_v1 }
 0xa1b   : > { %v4962_v38 = vsub.f32 %v11285_v30, %v11667_v63  ;;  %v3838_v15 = vmul.f32 0.2, %v3710_v43  ;;  %v3839_v31 = vmul.f32 0.2, %v3711_v20  ;;  %v3840_v58 = vmul.f32 0.2, %v3712_v27 }
 0xa1c   : > { %v11686_v50 = vadd.f32 %v5904_v16, %v5816_v17  ;;  %v3841_v35 = vmul.f32 0.2, %v3713_v47  ;;  %8080 = vpow2.f32 %v5168_v9  ;;  %vm11695_vm8 = vcmp.ne.s32.totalorder %v4417_v26, 0 }
 0xa1d   : > { %v8075_v29 = vpop.eup %8074  ;;  %v3966_v30 = vmax.f32 %v3710_v43, %v3838_v15  ;;  %v3967_v55 = vmax.f32 %v3711_v20, %v3839_v31  ;;  %v3968_v37 = vmax.f32 %v3712_v27, %v3840_v58  ;;  %v5170_v56 = vmul.f32 1.442695, %v4962_v38 }
 0xa1e   : > { %vm5959_vm6 = vcmp.gt.f32.partialorder %v11686_v50, 0.0  ;;  %v5302_v34 = vpack.c.bf16 %v8075_v29, %v11629_v24  ;;  %v8077_v17 = vpop.eup %8076  ;;  %v3969_v8 = vmax.f32 %v3713_v47, %v3841_v35  ;;  %v4232_v53 = vpack.c.b8 %v4231_v2, %v4230_v45 }
 0xa1f   : > { %v5991_v32 = vsel %vm5959_vm6, %v11686_v50, 1.0  ;;  %v5303_v24 = vpack.c.bf16 %v8077_v17, %v11639_v36  ;;  %v11708_v47 = vsel %vm11678_vm4, %v3966_v30, -1e+30  ;;  %v11712_v26 = vsel %vm11682_vm5, %v3967_v55, -1e+30 }
 0xa20   : > { %8082 = vrcp.f32 %v5991_v32  ;;  %5639 = vmatmul.bf16.gmra.mxu0 %v5302_v34  ;;  %v3576_v1 = vpop.permute.xlu2 %3575  ;;  %v8079_v38 = vpop.eup %8078  ;;  %v4963_v36 = vsub.f32 %v11289_v59, %v11667_v63  ;;  %v4964_v2 = vsub.f32 %v11301_v62, %v11667_v63  ;;  %v4965_v45 = vsub.f32 %v11318_v57, %v11667_v63 }
 0xa21   : > { %v3714_v22 = vadd.f32 %v9993_v13, %v3576_v1  ;;  %v3715_v43 = vadd.f32 %v9995_v14, %v3576_v1  ;;  %v3716_v20 = vadd.f32 %v10000_v52, %v3576_v1  ;;  %v11704_v27 = vadd.f32 %v10031_v54, %v3576_v1  ;;  %5728 = vmatmul.bf16.gmra.mxu1 %v5303_v24 }
 0xa22   : > { %v11722_v44 = vsel %vm11691_vm7, %v3968_v37, -1e+30  ;;  %v12625_v9 = vunpack.c.0.s8 %v11627_v28  ;;  %v5304_v15 = vpack.c.bf16 %v8079_v38, %v11648_v0  ;;  %v8081_v62 = vpop.eup %8080  ;;  %v11733_v57 = vsel %vm11695_vm8, %v3969_v8, -1e+30 }
 0xa23   : > { %v3842_v59 = vmul.f32 0.2, %v3714_v22  ;;  %v3843_v31 = vmul.f32 0.2, %v3715_v43  ;;  %v3844_v58 = vmul.f32 0.2, %v3716_v20  ;;  %v4825_v37 = vmax.f32 %v11708_v47, %v11712_v26 }
 0xa24   : > { %vm11726_vm9 = vcmp.ne.s32.totalorder %v12625_v9, 0  ;;  %vm4270_vm10 = vnez %v4232_v53  ;;  %8084 = vpow2.f32 %v5170_v56  ;;  %5817 = vmatmul.bf16.gmra.mxu2 %v5304_v15  ;;  %v5305_v29 = vpack.c.bf16 %v8081_v62, %v11653_v5 }
 0xa25   : > { %v3970_v35 = vmax.f32 %v3714_v22, %v3842_v59  ;;  %v3971_v30 = vmax.f32 %v3715_v43, %v3843_v31  ;;  %v3845_v0 = vmul.f32 0.2, %v11704_v27  ;;  %v4826_v55 = vmax.f32 %v4825_v37, %v11722_v44 }
 0xa26   : > { %v8083_v63 = vpop.eup %8082  ;;  %v3972_v34 = vmax.f32 %v3716_v20, %v3844_v58  ;;  %v4302_v32 = vsel %vm4270_vm10, 16843009, %v12427_v11  ;;  %v5172_v16 = vmul.f32 1.442695, %v4963_v36  ;;  %5906 = vmatmul.bf16.gmra.mxu3 %v5305_v29  ;;  %v5174_v5 = vmul.f32 1.442695, %v4964_v2  ;;  %v11748_v20 = vpop.xlane.xlu0 %4808 }
 0xa27   : > { %6125 = vperm.xlu1 %7893, %v8083_v63   ;;  %v4418_v17 = vunpack.c.0.s8 %v4302_v32  ;;  %v4419_v1 = vunpack.c.1.s8 %v4302_v32  ;;  %v4420_v8 = vunpack.c.2.s8 %v4302_v32  ;;  %v4421_v23 = vunpack.c.3.s8 %v4302_v32 }
 0xa28   : > { %v4827_v56 = vmax.f32 %v4826_v55, %v11733_v57  ;;  %8086 = vpow2.f32 %v5172_v16  ;;  %v5176_v24 = vmul.f32 1.442695, %v4965_v45  ;;  %v12628_v22 = vunpack.c.1.s8 %v11627_v28 }
 0xa29   : > { %vm4546_vm11 = vcmp.ne.s32.totalorder %v4418_v17, 0  ;;  %vm4547_vm12 = vcmp.ne.s32.totalorder %v4419_v1, 0  ;;  %vm4548_vm13 = vcmp.ne.s32.totalorder %v4420_v8, 0  ;;  %v3973_v38 = vmax.f32 %v11704_v27, %v3845_v0 }
 0xa2a   : > { %vm11744_vm14 = vcmp.ne.s32.totalorder %v12628_v22, 0  ;;  %v8085_v53 = vpop.eup %8084  ;;  %4828 = vmax.xlane.f32.xlu2 %v4827_v56  ;;  %v11751_v36 = vsel %vm4546_vm11, %v3970_v35, -1e+30  ;;  %v11753_v9 = vsel %vm4547_vm12, %v3971_v30, -1e+30  ;;  %8088 = vpow2.f32 %v5174_v5 }
 0xa2b   : > { %vm11755_vm15 = vcmp.ne.s32.totalorder %v4421_v23, 0  ;;  %v11759_v45 = vsel %vm4548_vm13, %v3972_v34, -1e+30  ;;  %v4830_v15 = vmax.f32 %v11751_v36, %v11753_v9  ;;  %8090 = vpow2.f32 %v5176_v24 }
 0xa2c   : > { %v4138_v59 = vunpack.c.2.s8 %v11273_v41  ;;  %v4139_v31 = vunpack.c.2.s8 %v11277_v18  ;;  %v4140_v27 = vunpack.c.2.s8 %v11280_v3  ;;  %v4141_v58 = vunpack.c.2.s8 %v11292_v61 }
 0xa2d   : > { %v4831_v62 = vmax.f32 %v4830_v15, %v11759_v45  ;;  %v5306_v37 = vpack.c.bf16 %v11658_v49, %v8085_v53  ;;  %v12633_v63 = vmax.f32 %v11584_v21, %v11597_v46  ;;  %v12634_v41 = vmax.f32 %v11588_v19, %v11600_v42 }
 0xa2e   : > { %v8087_v3 = vpop.eup %8086  ;;  %8092 = vpow2.f32 %v11622_v4  ;;  %v4425_v61 = vunpack.c.3.s8 %v11627_v28  ;;  %v4236_v49 = vpack.c.b16 %v4139_v31, %v4138_v59  ;;  %v4237_v35 = vpack.c.b16 %v4141_v58, %v4140_v27 }
 0xa2f   : > { %v11774_v29 = vsel %vm11726_vm9, %v12633_v63, -1e+30  ;;  %v11781_v18 = vsel %vm11744_vm14, %v12634_v41, -1e+30  ;;  %v11787_v21 = vsel %vm11755_vm15, %v3973_v38, -1e+30  ;;  %v12635_v46 = vunpack.c.2.s8 %v11627_v28 }
 0xa30   : > { %5644 = vmatmul.bf16.gmra.mxu0 %v5306_v37  ;;  %v8089_v19 = vpop.eup %8088  ;;  %v4832_v42 = vmax.f32 %v4831_v62, %v11787_v21  ;;  %v5307_v10 = vpack.c.bf16 %v11661_v12, %v8087_v3  ;;  %v4835_v4 = vmax.f32 %v11774_v29, %v11781_v18  ;;  %v4238_v30 = vpack.c.b8 %v4237_v35, %v4236_v49  ;;  %v11835_v3 = vld [vmem:[%s8702_s11] ss:$0 sm:$0xff] }
 0xa31   : > { %vm4552_vm0 = vcmp.ne.s32.totalorder %v12635_v46, 0  ;;  %v8091_v0 = vpop.eup %8090  ;;  %v3977_v34 = vmax.f32 %v11605_v60, %v11644_v6  ;;  %vm11797_vm1 = vcmp.ne.s32.totalorder %v4425_v61, 0  ;;  %v12638_v28 = vmax.f32 %v11594_v40, %v11612_v39  ;;  %v11810_v60 = vpop.xlane.xlu1 %4813  ;;  %v12639_v46 = vld [vmem:[#allocation39_spill] sm:$0xff] }
 0xa32   : > { %4833 = vmax.xlane.f32.xlu2 %v4832_v42  ;;  %5733 = vmatmul.bf16.gmra.mxu1 %v5307_v10  ;;  %vm4272_vm2 = vnez %v4238_v30  ;;  %v5308_v12 = vpack.c.bf16 %v11672_v33, %v8089_v19  ;;  %v12640_v19 = vld [vmem:[#allocation40_spill] sm:$0xff]  ;;  %v12642_v30 = vld [vmem:[#allocation29_spill] sm:$0xff] }
 0xa33   : > { %v3586_v55 = vpop.permute.xlu0 %3585  ;;  %v11804_v16 = vsel %vm4552_vm0, %v12638_v28, -1e+30  ;;  %v4304_v40 = vsel %vm4272_vm2, 16843009, %v12427_v11  ;;  %v5692_v42 = vadd.f32 %v12640_v19, %v12639_v46  ;;  %v12643_v28 = vld [vmem:[#allocation30_spill] sm:$0xff] }
 0xa34   : > { %v3722_v17 = vadd.f32 %v9993_v13, %v3586_v55  ;;  %v3723_v1 = vadd.f32 %v9995_v14, %v3586_v55  ;;  %v3724_v8 = vadd.f32 %v10000_v52, %v3586_v55  ;;  %v8093_v23 = vpop.eup %8092  ;;  %v3725_v6 = vadd.f32 %v10031_v54, %v3586_v55  ;;  %5822 = vmatmul.bf16.gmra.mxu2 %v5308_v12  ;;  %v12655_v46 = vld [vmem:[#allocation34_spill] sm:$0xff] }
 0xa35   : > { %v4836_v56 = vmax.f32 %v4835_v4, %v11804_v16  ;;  %v5309_v39 = vpack.c.bf16 %v8093_v23, %v8091_v0  ;;  %v11817_v13 = vsel %vm11797_vm1, %v3977_v34, -1e+30  ;;  %v4426_v52 = vunpack.c.0.s8 %v4304_v40  ;;  %v12641_v4 = vld [vmem:[#allocation33_spill] sm:$0xff]  ;;  %v12646_v23 = vld [vmem:[#allocation42_spill] sm:$0xff] }
 0xa36   : > { %v3850_v5 = vmul.f32 0.2, %v3722_v17  ;;  %v3851_v24 = vmul.f32 0.2, %v3723_v1  ;;  %v3852_v33 = vmul.f32 0.2, %v3724_v8  ;;  %v4427_v22 = vunpack.c.1.s8 %v4304_v40 }
 0xa37   : > { %v3853_v14 = vmul.f32 0.2, %v3725_v6  ;;  %5911 = vmatmul.bf16.gmra.mxu3 %v5309_v39  ;;  %v4428_v38 = vunpack.c.2.s8 %v4304_v40  ;;  %v4837_v2 = vmax.f32 %v4836_v56, %v11817_v13  ;;  %v4429_v11 = vunpack.c.3.s8 %v4304_v40  ;;  %v12647_v39 = vld [vmem:[#allocation65_spill] sm:$0xff] }
 0xa38   : > { %v3978_v43 = vmax.f32 %v3722_v17, %v3850_v5  ;;  %v3979_v53 = vmax.f32 %v3723_v1, %v3851_v24  ;;  %v3980_v54 = vmax.f32 %v3724_v8, %v3852_v33  ;;  %vm4554_vm3 = vcmp.ne.s32.totalorder %v4426_v52, 0  ;;  %v12644_v17 = vld [vmem:[#allocation31_spill] sm:$0xff]  ;;  %v12645_v1 = vld [vmem:[#allocation41_spill] sm:$0xff]  ;;  %v12649_v52 = vld [vmem:[#allocation66_spill] sm:$0xff] }
 0xa39   : > { %vm4555_vm4 = vcmp.ne.s32.totalorder %v4427_v22, 0  ;;  %v3981_v15 = vmax.f32 %v3725_v6, %v3853_v14  ;;  %vm4556_vm5 = vcmp.ne.s32.totalorder %v4428_v38, 0  ;;  %vm4557_vm6 = vcmp.ne.s32.totalorder %v4429_v11, 0  ;;  %v11828_v62 = vpop.xlane.xlu1 %4848  ;;  %v12648_v33 = vld [vmem:[#allocation43_spill] sm:$0xff] }
 0xa3a   : > { %v11820_v59 = vsel %vm4554_vm3, %v3978_v43, -1e+30  ;;  %v11822_v31 = vsel %vm4555_vm4, %v3979_v53, -1e+30  ;;  %4838 = vmax.xlane.f32.xlu2 %v4837_v2  ;;  %v11826_v58 = vsel %vm4556_vm5, %v3980_v54, -1e+30  ;;  %v5781_v0 = vadd.f32 %v12642_v30, %v5692_v42 }
 0xa3b   : > { %v4840_v27 = vmax.f32 %v11820_v59, %v11822_v31  ;;  %v11831_v63 = vsel %vm4557_vm6, %v3981_v15, -1e+30  ;;  %vm5942_vm7 = vcmp.gt.f32.partialorder %v12641_v4, 0.0  ;;  %v4873_v12 = vmax.f32 %v11748_v20, 0.0  ;;  %v12650_v2 = vld [vmem:[#allocation32_spill] sm:$0xff]  ;;  %v12652_v15 = vld [vmem:[#allocation35_spill] sm:$0xff] }
 0xa3c   : > { %v5974_v32 = vsel %vm5942_vm7, %v12641_v4, 1.0  ;;  %v5697_v8 = vadd.f32 %v12645_v1, %v12644_v17  ;;  %v12656_v30 = vld [vmem:[#allocation46_spill] sm:$0xff] }
 0xa3d   : > { %v4841_v37 = vmax.f32 %v4840_v27, %v11826_v58  ;;  %8094 = vrcp.f32 %v5974_v32  ;;  %v4975_v5 = vsub.f32 %v12647_v39, %v4873_v12  ;;  %v4976_v22 = vsub.f32 %v12649_v52, %v4873_v12  ;;  %v12659_v52 = vld [vmem:[#allocation78_spill] sm:$0xff] }
 0xa3e   : > { %v5786_v6 = vadd.f32 %v12646_v23, %v5697_v8  ;;  %v12657_v8 = vld [vmem:[#allocation36_spill] sm:$0xff] }
 0xa3f   : > { %v4842_v41 = vmax.f32 %v4841_v37, %v11831_v63  ;;  %v12653_v37 = vld [vmem:[#allocation37_spill] sm:$0xff] }
 0xa40   : > { %v11866_v14 = vadd.f32 %v12648_v33, %v5786_v6 }
 0xa42   : > { %4843 = vmax.xlane.f32.xlu2 %v4842_v41  ;;  %vm5947_vm9 = vcmp.gt.f32.partialorder %v11866_v14, 0.0 }
 0xa43   : > { %v8095_v53 = vpop.eup %8094  ;;  %v5979_v1 = vsel %vm5947_vm9, %v11866_v14, 1.0 }
 0xa45   : > { %v6046_v61 = vpop.permute.xlu1 %6045 }
 0xa46   : > { %v6199_v49 = vmul.f32 %v6046_v61, %v11367_v51  ;;  %v11851_v51 = vadd.f32 %v12643_v28, %v5781_v0  ;;  %v12654_v61 = vld [vmem:[#allocation74_spill] sm:$0xff] }
 0xa48   : > { %v11839_v35 = vadd.f32 %v11835_v3, %v6199_v49  ;;  %vm5945_vm8 = vcmp.gt.f32.partialorder %v11851_v51, 0.0 }
 0xa49   : > { %v5977_v20 = vsel %vm5945_vm8, %v11851_v51, 1.0 }
 0xa4a   : > { %8096 = vrcp.f32 %v5977_v20 }
 0xa4d   : > { %v6061_v10 = vpop.permute.xlu1 %6060 }
 0xa4e   : > { %v6202_v55 = vmul.f32 %v6061_v10, %v11397_v48  ;;  %v4974_v48 = vsub.f32 %v11308_v25, %v4873_v12  ;;  %v12651_v25 = vld [vmem:[#allocation44_spill] sm:$0xff]  ;;  %v5198_v10 = vmul.f32 1.442695, %v4976_v22 }
 0xa4f   : > { %v5702_v11 = vadd.f32 %v12651_v25, %v12650_v2 }
 0xa50   : > { %v11847_v34 = vadd.f32 %v11835_v3, %v6202_v55  ;;  %v5194_v38 = vmul.f32 1.442695, %v4974_v48 }
 0xa51   : > { %v5791_v19 = vadd.f32 %v12655_v46, %v5702_v11 }
 0xa52   : > { %8098 = vpow2.f32 %v5194_v38  ;;  %v12660_v38 = vld [vmem:[#allocation80_spill] sm:$0xff] }
 0xa53   : > { %v11882_v23 = vadd.f32 %v12657_v8, %v5791_v19  ;;  %v12664_v19 = vld [vmem:[#allocation84_spill] sm:$0xff] }
 0xa55   : > { %v6071_v56 = vpop.permute.xlu1 %6070  ;;  %vm5949_vm10 = vcmp.gt.f32.partialorder %v11882_v23, 0.0 }
 0xa56   : > { %v6204_v40 = vmul.f32 %v6071_v56, %v11431_v7  ;;  %v5196_v7 = vmul.f32 1.442695, %v4975_v5  ;;  %v8097_v56 = vpop.eup %8096  ;;  %v12658_v5 = vld [vmem:[#allocation67_spill] sm:$0xff] }
 0xa57   : > { %v4977_v20 = vsub.f32 %v12658_v5, %v4873_v12  ;;  %v5981_v12 = vsel %vm5949_vm10, %v11882_v23, 1.0  ;;  %v12667_v5 = vld [vmem:[#allocation72_spill] sm:$0xff] }
 0xa58   : > { %v11862_v24 = vadd.f32 %v11835_v3, %v6204_v40  ;;  %8100 = vpow2.f32 %v5196_v7  ;;  %v11887_v40 = vmax.f32 %v11810_v60, 0.0  ;;  %v8099_v39 = vpop.eup %8098  ;;  %v12661_v60 = vld [vmem:[#allocation57_spill] sm:$0xff]  ;;  %v12662_v7 = vld [vmem:[#allocation82_spill] sm:$0xff] }
 0xa59   : > { %v4804_v43 = vpop.xlane.xlu2 %4803 }
 0xa5a   : > { %v4872_v54 = vmax.f32 %v4804_v43, 0.0  ;;  %6040 = vperm.xlu2 %7892, %v8095_v53   ;;  %v4978_v11 = vsub.f32 %v12661_v60, %v11887_v40  ;;  %v12671_v60 = vld [vmem:[#allocation86_spill] sm:$0xff] }
 0xa5c   : > { %v4970_v27 = vsub.f32 %v12652_v15, %v4872_v54  ;;  %v4971_v41 = vsub.f32 %v12653_v37, %v4872_v54  ;;  %v4972_v49 = vsub.f32 %v12654_v61, %v4872_v54  ;;  %v4973_v22 = vsub.f32 %v12659_v52, %v4872_v54 }
 0xa5d   : > { %v6081_v42 = vpop.permute.xlu1 %6080 }
 0xa5e   : > { %v6206_v0 = vmul.f32 %v6081_v42, %v12656_v30  ;;  %v5186_v55 = vmul.f32 1.442695, %v4970_v27  ;;  %v5188_v32 = vmul.f32 1.442695, %v4971_v41  ;;  %v5190_v28 = vmul.f32 1.442695, %v4972_v49  ;;  %v8101_v33 = vpop.eup %8100  ;;  %v11900_v46 = vpop.xlane.xlu0 %4823 }
 0xa5f   : > { %v12663_v41 = vld [vmem:[#allocation81_spill] sm:$0xff]  ;;  %v5200_v49 = vmul.f32 1.442695, %v4977_v20 }
 0xa60   : > { %v11878_v17 = vadd.f32 %v11835_v3, %v6206_v0  ;;  %8102 = vpow2.f32 %v5186_v55  ;;  %v5192_v0 = vmul.f32 1.442695, %v4973_v22  ;;  %v12668_v20 = vld [vmem:[#allocation73_spill] sm:$0xff] }
 0xa61   : > { %v4819_v6 = vpop.xlane.xlu2 %4818  ;;  %8104 = vpow2.f32 %v5198_v10  ;;  %v5717_v52 = vadd.f32 %v12668_v20, %v12667_v5 }
 0xa62   : > { %v11884_v48 = vmax.f32 %v4819_v6, 0.0  ;;  %8106 = vpow2.f32 %v5188_v32  ;;  %6055 = vperm.xlu2 %7892, %v8097_v56   ;;  %v12665_v32 = vld [vmem:[#allocation58_spill] sm:$0xff]  ;;  %v12666_v6 = vld [vmem:[#allocation59_spill] sm:$0xff] }
 0xa63   : > { %8108 = vpow2.f32 %v5190_v28  ;;  %v4979_v28 = vsub.f32 %v12665_v32, %v11887_v40  ;;  %v4980_v56 = vsub.f32 %v12666_v6, %v11887_v40 }
 0xa64   : > { %8110 = vrcp.f32 %v5979_v1  ;;  %v4982_v2 = vsub.f32 %v12660_v38, %v11884_v48  ;;  %v4983_v61 = vsub.f32 %v12663_v41, %v11884_v48  ;;  %v4984_v42 = vsub.f32 %v12664_v19, %v11884_v48  ;;  %v12670_v38 = vld [vmem:[#allocation75_spill] sm:$0xff] }
 0xa65   : > { %v6096_v43 = vpop.permute.xlu1 %6095  ;;  %8112 = vrcp.f32 %v5981_v12 }
 0xa66   : > { %v8103_v53 = vpop.eup %8102  ;;  %v6209_v15 = vmul.f32 %v6096_v43, %v12662_v7  ;;  %v5210_v1 = vmul.f32 1.442695, %v4982_v2  ;;  %v5212_v43 = vmul.f32 1.442695, %v4983_v61  ;;  %8114 = vpow2.f32 %v5200_v49  ;;  %v12672_v61 = vld [vmem:[#allocation79_spill] sm:$0xff] }
 0xa67   : > { %v8105_v25 = vpop.eup %8104  ;;  %v5310_v27 = vpack.c.bf16 %v8099_v39, %v8103_v53  ;;  %v5202_v39 = vmul.f32 1.442695, %v4978_v11  ;;  %v5214_v22 = vmul.f32 1.442695, %v4984_v42  ;;  %8116 = vpow2.f32 %v5192_v0 }
 0xa68   : > { %v8107_v37 = vpop.eup %8106  ;;  %v11905_v10 = vadd.f32 %v11835_v3, %v6209_v15  ;;  %v5806_v2 = vadd.f32 %v12670_v38, %v5717_v52  ;;  %8118 = vpow2.f32 %v5210_v1  ;;  %v5206_v11 = vmul.f32 1.442695, %v4980_v56 }
 0xa69   : > { %v8109_v54 = vpop.eup %8108  ;;  %5649 = vmatmul.bf16.gmra.mxu0 %v5310_v27  ;;  %v5311_v30 = vpack.c.bf16 %v8101_v33, %v8107_v37  ;;  %v12669_v33 = vld [vmem:[#allocation56_spill] sm:$0xff]  ;;  %8120 = vpow2.f32 %v5202_v39 }
 0xa6a   : > { %v8111_v55 = vpop.eup %8110  ;;  %v5312_v8 = vpack.c.bf16 %v8105_v25, %v8109_v54  ;;  %vm5952_vm11 = vcmp.gt.f32.partialorder %v12669_v33, 0.0  ;;  %v5204_v25 = vmul.f32 1.442695, %v4979_v28  ;;  %8122 = vpow2.f32 %v5212_v43  ;;  %v12673_v54 = vld [vmem:[#allocation38_spill] sm:$0xff] }
 0xa6b   : > { %6065 = vperm.xlu2 %7892, %v8111_v55   ;;  %5738 = vmatmul.bf16.gmra.mxu1 %v5311_v30  ;;  %v8113_v27 = vpop.eup %8112  ;;  %v5984_v37 = vsel %vm5952_vm11, %v12669_v33, 1.0  ;;  %8124 = vpow2.f32 %v5214_v22  ;;  %v11921_v49 = vadd.f32 %v12672_v61, %v5806_v2  ;;  %v12674_v30 = vld [vmem:[#allocation87_spill] sm:$0xff]  ;;  %v12678_v61 = vld [vmem:[#allocation45_spill] sm:$0xff] }
 0xa6c   : > { %5827 = vmatmul.bf16.gmra.mxu2 %v5312_v8  ;;  %v8115_v41 = vpop.eup %8114  ;;  %8126 = vpow2.f32 %v5204_v25  ;;  %v4985_v0 = vsub.f32 %v12674_v30, %v11884_v48  ;;  %v12675_v8 = vld [vmem:[#allocation60_spill] sm:$0xff] }
 0xa6d   : > { %v6111_v53 = vpop.permute.xlu1 %6110  ;;  %v8117_v42 = vpop.eup %8116  ;;  %8128 = vpow2.f32 %v5206_v11  ;;  %v4981_v6 = vsub.f32 %v12675_v8, %v11887_v40  ;;  %vm5955_vm12 = vcmp.gt.f32.partialorder %v11921_v49, 0.0  ;;  %v12676_v25 = vld [vmem:[#allocation48_spill] sm:$0xff]  ;;  %v12677_v11 = vld [vmem:[#allocation61_spill] sm:$0xff] }
 0xa6e   : > { %v6212_v7 = vmul.f32 %v6111_v53, %v12671_v60  ;;  %v8119_v55 = vpop.eup %8118  ;;  %8130 = vrcp.f32 %v5984_v37  ;;  %v5313_v32 = vpack.c.bf16 %v8115_v41, %v8117_v42  ;;  %v5216_v5 = vmul.f32 1.442695, %v4985_v0 }
 0xa6f   : > { %v8121_v1 = vpop.eup %8120  ;;  %v5987_v43 = vsel %vm5955_vm12, %v11921_v49, 1.0  ;;  %v5208_v22 = vmul.f32 1.442695, %v4981_v6  ;;  %vm5958_vm13 = vcmp.gt.f32.partialorder %v12677_v11, 0.0  ;;  %v4876_v6 = vmax.f32 %v11900_v46, 0.0 }
 0xa70   : > { %v11917_v15 = vadd.f32 %v11835_v3, %v6212_v7  ;;  %v8123_v56 = vpop.eup %8122  ;;  %5916 = vmatmul.bf16.gmra.mxu3 %v5313_v32  ;;  %v5314_v20 = vpack.c.bf16 %v8119_v55, %v8121_v1  ;;  %8132 = vpow2.f32 %v5216_v5  ;;  %v5990_v37 = vsel %vm5958_vm13, %v12677_v11, 1.0  ;;  %v12679_v32 = vld [vmem:[#allocation52_spill] sm:$0xff] }
 0xa71   : > { %v6051_v12 = vpop.permute.xlu0 %6050  ;;  %v8125_v39 = vpop.eup %8124  ;;  %8134 = vrcp.f32 %v5987_v43  ;;  %v12682_v43 = vld [vmem:[#allocation83_spill] sm:$0xff] }
 0xa72   : > { %v6200_v19 = vmul.f32 %v6051_v12, %v12673_v54  ;;  %v8127_v52 = vpop.eup %8126  ;;  %8136 = vpow2.f32 %v5208_v22  ;;  %v4988_v22 = vsub.f32 %v12682_v43, %v4876_v6 }
 0xa73   : > { %6075 = vperm.xlu2 %7892, %v8113_v27   ;;  %v8129_v48 = vpop.eup %8128  ;;  %v5315_v38 = vpack.c.bf16 %v8123_v56, %v8127_v52  ;;  %8138 = vrcp.f32 %v5990_v37  ;;  %v12680_v56 = vld [vmem:[#allocation76_spill] sm:$0xff] }
 0xa74   : > { %v11927_v28 = vadd.f32 %v11835_v3, %v6200_v19  ;;  %v8131_v2 = vpop.eup %8130  ;;  %v5316_v7 = vpack.c.bf16 %v8125_v39, %v8129_v48  ;;  %v4986_v39 = vsub.f32 %v12680_v56, %v4876_v6  ;;  %v5222_v37 = vmul.f32 1.442695, %v4988_v22 }
 0xa76   : > { %v8133_v27 = vpop.eup %8132 }
 0xa77   : > { %v8135_v41 = vpop.eup %8134 }
 0xa78   : > { %v8137_v19 = vpop.eup %8136 }
 0xa79   : > { %v6086_v53 = vpop.permute.xlu0 %6085  ;;  %5654 = vmatmul.bf16.gmra.mxu0 %v5314_v20  ;;  %v5317_v42 = vpack.c.bf16 %v8133_v27, %v8137_v19  ;;  %v8139_v55 = vpop.eup %8138  ;;  %v12681_v20 = vld [vmem:[#allocation77_spill] sm:$0xff] }
 0xa7a   : > { %v6207_v60 = vmul.f32 %v6086_v53, %v12676_v25  ;;  %v4987_v52 = vsub.f32 %v12681_v20, %v4876_v6  ;;  %v12683_v53 = vld [vmem:[#allocation85_spill] sm:$0xff] }
 0xa7b   : > { %6090 = vperm.xlu2 %7892, %v8131_v2   ;;  %5743 = vmatmul.bf16.gmra.mxu1 %v5315_v38  ;;  %v4989_v38 = vsub.f32 %v12683_v53, %v4876_v6  ;;  %v5218_v2 = vmul.f32 1.442695, %v4986_v39 }
 0xa7c   : > { %v11935_v40 = vadd.f32 %v11835_v3, %v6207_v60  ;;  %5832 = vmatmul.bf16.gmra.mxu2 %v5316_v7  ;;  %v5220_v60 = vmul.f32 1.442695, %v4987_v52 }
 0xa7d   : > { %8140 = vpow2.f32 %v5218_v2 }
 0xa7e   : > { %8142 = vpow2.f32 %v5220_v60 }
 0xa7f   : > { %8144 = vpow2.f32 %v5222_v37 }
 0xa80   : > { %5921 = vmatmul.bf16.gmra.mxu3 %v5317_v42 }
 0xa81   : > { %v6101_v12 = vpop.permute.xlu0 %6100 }
 0xa82   : > { %v6210_v54 = vmul.f32 %v6101_v12, %v12678_v61  ;;  %v5224_v12 = vmul.f32 1.442695, %v4989_v38 }
 0xa83   : > { %6105 = vperm.xlu2 %7892, %v8135_v41  }
 0xa84   : > { %v11941_v30 = vadd.f32 %v11835_v3, %v6210_v54  ;;  %8146 = vpow2.f32 %v5224_v12 }
 0xa89   : > { %v6116_v0 = vpop.permute.xlu0 %6115 }
 0xa8a   : > { %v6213_v1 = vmul.f32 %v6116_v0, %v12679_v32 }
 0xa8b   : > { %6120 = vperm.xlu2 %7892, %v8139_v55  }
 0xa8c   : > { %v11945_v8 = vadd.f32 %v11835_v3, %v6213_v1  ;;  %v8141_v1 = vpop.eup %8140 }
 0xa99   : > { %v6126_v5 = vpop.permute.xlu1 %6125 }
 0xa9a   : > { %v6215_v48 = vmul.f32 %v6126_v5, %v11686_v50 }
 0xa9c   : > { %v11954_v25 = vadd.f32 %v11835_v3, %v6215_v48 }
 0xa9d   : > { %v4829_v7 = vpop.xlane.xlu2 %4828  ;;  %v5640_v27 = vpop.f32.mrf.mxu0 }
 0xa9e   : > { %v4877_v46 = vmax.f32 %v4829_v7, 0.0  ;;  %v5729_v41 = vpop.f32.mrf.mxu1 }
 0xaa0   : > { %v4990_v61 = vsub.f32 %v11708_v47, %v4877_v46  ;;  %v4991_v50 = vsub.f32 %v11712_v26, %v4877_v46  ;;  %v4992_v54 = vsub.f32 %v11722_v44, %v4877_v46  ;;  %v4993_v19 = vsub.f32 %v11733_v57, %v4877_v46  ;;  %v8143_v47 = vpop.eup %8142 }
 0xaa1   : > { %v5730_v26 = vadd.f32 %v5729_v41, %v5640_v27  ;;  %v8145_v44 = vpop.eup %8144 }
 0xaa2   : > { %v5226_v42 = vmul.f32 1.442695, %v4990_v61  ;;  %v5228_v0 = vmul.f32 1.442695, %v4991_v50  ;;  %v5230_v55 = vmul.f32 1.442695, %v4992_v54  ;;  %v8147_v52 = vpop.eup %8146 }
 0xaa3   : > { %v5232_v32 = vmul.f32 1.442695, %v4993_v19 }
 0xaa4   : > { %8148 = vpow2.f32 %v5226_v42 }
 0xaa5   : > { %8150 = vpow2.f32 %v5228_v0  ;;  %v4834_v6 = vpop.xlane.xlu2 %4833  ;;  %v5642_v39 = vpop.f32.mrf.mxu0 }
 0xaa6   : > { %8152 = vpow2.f32 %v5230_v55  ;;  %v4878_v56 = vmax.f32 %v4834_v6, 0.0  ;;  %v5731_v20 = vpop.f32.mrf.mxu1  ;;  %v11972_v6 = vmax.f32 %v11828_v62, 0.0  ;;  %v12684_v62 = vld [vmem:[#allocation68_spill] sm:$0xff] }
 0xaa7   : > { %8154 = vpow2.f32 %v5232_v32  ;;  %v5818_v5 = vpop.f32.mrf.mxu2  ;;  %v5732_v42 = vadd.f32 %v5731_v20, %v5642_v39 }
 0xaa8   : > { %v4994_v57 = vsub.f32 %v11751_v36, %v4878_v56  ;;  %v4995_v48 = vsub.f32 %v11753_v9, %v4878_v56  ;;  %v5819_v43 = vadd.f32 %v5818_v5, %v5730_v26  ;;  %v4996_v53 = vsub.f32 %v11759_v45, %v4878_v56 }
 0xaa9   : > { %v5907_v38 = vpop.f32.mrf.mxu3  ;;  %v4997_v60 = vsub.f32 %v11787_v21, %v4878_v56 }
 0xaaa   : > { %v8149_v22 = vpop.eup %8148  ;;  %v5234_v7 = vmul.f32 1.442695, %v4994_v57  ;;  %v11964_v37 = vadd.f32 %v5907_v38, %v5819_v43  ;;  %v5236_v41 = vmul.f32 1.442695, %v4995_v48  ;;  %v5238_v50 = vmul.f32 1.442695, %v4996_v53 }
 0xaab   : > { %v8151_v2 = vpop.eup %8150  ;;  %v5318_v27 = vpack.c.bf16 %v8149_v22, %v8141_v1  ;;  %v5240_v21 = vmul.f32 1.442695, %v4997_v60  ;;  %v12685_v60 = vld [vmem:[#allocation69_spill] sm:$0xff] }
 0xaac   : > { %v8153_v46 = vpop.eup %8152  ;;  %v5319_v12 = vpack.c.bf16 %v8151_v2, %v8143_v47  ;;  %vm5960_vm14 = vcmp.gt.f32.partialorder %v11964_v37, 0.0  ;;  %8156 = vpow2.f32 %v5234_v7  ;;  %v5007_v7 = vsub.f32 %v12685_v60, %v11972_v6 }
 0xaad   : > { %v8155_v36 = vpop.eup %8154  ;;  %5659 = vmatmul.bf16.gmra.mxu0 %v5318_v27  ;;  %v5320_v9 = vpack.c.bf16 %v8153_v46, %v8145_v44  ;;  %v4839_v61 = vpop.xlane.xlu2 %4838  ;;  %v5992_v45 = vsel %vm5960_vm14, %v11964_v37, 1.0  ;;  %v12686_v27 = vld [vmem:[#allocation70_spill] sm:$0xff] }
 0xaae   : > { %5748 = vmatmul.bf16.gmra.mxu1 %v5319_v12  ;;  %v5321_v54 = vpack.c.bf16 %v8155_v36, %v8147_v52  ;;  %v4879_v19 = vmax.f32 %v4839_v61, 0.0  ;;  %8158 = vrcp.f32 %v5992_v45  ;;  %v5645_v26 = vpop.f32.mrf.mxu0  ;;  %v5006_v52 = vsub.f32 %v12684_v62, %v11972_v6 }
 0xaaf   : > { %5837 = vmatmul.bf16.gmra.mxu2 %v5320_v9  ;;  %v5820_v1 = vpop.f32.mrf.mxu2  ;;  %8160 = vpow2.f32 %v5236_v41  ;;  %v5734_v20 = vpop.f32.mrf.mxu1  ;;  %v5008_v46 = vsub.f32 %v12686_v27, %v11972_v6 }
 0xab0   : > { %5926 = vmatmul.bf16.gmra.mxu3 %v5321_v54  ;;  %v4998_v0 = vsub.f32 %v11774_v29, %v4879_v19  ;;  %v4999_v55 = vsub.f32 %v11781_v18, %v4879_v19  ;;  %v5000_v32 = vsub.f32 %v11804_v16, %v4879_v19  ;;  %v5001_v56 = vsub.f32 %v11817_v13, %v4879_v19  ;;  %v12687_v19 = vld [vmem:[#allocation71_spill] sm:$0xff] }
 0xab1   : > { %v5821_v47 = vadd.f32 %v5820_v1, %v5732_v42  ;;  %8162 = vpow2.f32 %v5238_v50  ;;  %v5909_v5 = vpop.f32.mrf.mxu3  ;;  %v5735_v38 = vadd.f32 %v5734_v20, %v5645_v26  ;;  %v5258_v41 = vmul.f32 1.442695, %v5006_v52 }
 0xab2   : > { %v5242_v39 = vmul.f32 1.442695, %v4998_v0  ;;  %v5244_v44 = vmul.f32 1.442695, %v4999_v55  ;;  %v5246_v57 = vmul.f32 1.442695, %v5000_v32  ;;  %8164 = vpow2.f32 %v5240_v21  ;;  %v8157_v16 = vpop.eup %8156 }
 0xab3   : > { %v5248_v29 = vmul.f32 1.442695, %v5001_v56  ;;  %v11975_v18 = vadd.f32 %v5909_v5, %v5821_v47  ;;  %v5009_v21 = vsub.f32 %v12687_v19, %v11972_v6  ;;  %v5260_v1 = vmul.f32 1.442695, %v5007_v7 }
 0xab4   : > { %8166 = vpow2.f32 %v5242_v39  ;;  %v8159_v48 = vpop.eup %8158  ;;  %v5262_v56 = vmul.f32 1.442695, %v5008_v46 }
 0xab5   : > { %8168 = vpow2.f32 %v5244_v44  ;;  %vm5961_vm15 = vcmp.gt.f32.partialorder %v11975_v18, 0.0  ;;  %v4844_v13 = vpop.xlane.xlu2 %4843  ;;  %v8161_v53 = vpop.eup %8160  ;;  %6130 = vperm.xlu0 %7894, %v8159_v48  }
 0xab6   : > { %8170 = vpow2.f32 %v5246_v57  ;;  %v5993_v43 = vsel %vm5961_vm15, %v11975_v18, 1.0  ;;  %v4880_v22 = vmax.f32 %v4844_v13, 0.0  ;;  %v5647_v26 = vpop.f32.mrf.mxu0 }
 0xab7   : > { %8172 = vpow2.f32 %v5248_v29  ;;  %v8163_v2 = vpop.eup %8162  ;;  %v5823_v12 = vpop.f32.mrf.mxu2 }
 0xab8   : > { %8174 = vrcp.f32 %v5993_v43  ;;  %v8165_v36 = vpop.eup %8164  ;;  %v5824_v9 = vadd.f32 %v5823_v12, %v5735_v38  ;;  %v5002_v45 = vsub.f32 %v11820_v59, %v4880_v22  ;;  %v5003_v0 = vsub.f32 %v11822_v31, %v4880_v22  ;;  %v5736_v39 = vpop.f32.mrf.mxu1 }
 0xab9   : > { %v5004_v47 = vsub.f32 %v11826_v58, %v4880_v22  ;;  %8176 = vpow2.f32 %v5258_v41  ;;  %v5005_v59 = vsub.f32 %v11831_v63, %v4880_v22  ;;  %v5737_v52 = vadd.f32 %v5736_v39, %v5647_v26 }
 0xaba   : > { %v8167_v61 = vpop.eup %8166  ;;  %v5912_v50 = vpop.f32.mrf.mxu3  ;;  %v5250_v29 = vmul.f32 1.442695, %v5002_v45  ;;  %v5252_v62 = vmul.f32 1.442695, %v5003_v0 }
 0xabb   : > { %v8169_v54 = vpop.eup %8168  ;;  %v11988_v42 = vadd.f32 %v5912_v50, %v5824_v9  ;;  %v5322_v55 = vpack.c.bf16 %v8167_v61, %v8157_v16  ;;  %v5254_v13 = vmul.f32 1.442695, %v5004_v47  ;;  %v5256_v43 = vmul.f32 1.442695, %v5005_v59 }
 0xabc   : > { %v8171_v32 = vpop.eup %8170  ;;  %v5323_v44 = vpack.c.bf16 %v8169_v54, %v8161_v53  ;;  %v5264_v53 = vmul.f32 1.442695, %v5009_v21 }
 0xabd   : > { %v8173_v57 = vpop.eup %8172  ;;  %vm5962_vm0 = vcmp.gt.f32.partialorder %v11988_v42, 0.0  ;;  %5664 = vmatmul.bf16.gmra.mxu0 %v5322_v55  ;;  %v5324_v6 = vpack.c.bf16 %v8171_v32, %v8163_v2  ;;  %v6041_v5 = vpop.permute.xlu2 %6040 }
 0xabe   : > { %v8175_v20 = vpop.eup %8174  ;;  %v5994_v31 = vsel %vm5962_vm0, %v11988_v42, 1.0  ;;  %5753 = vmatmul.bf16.gmra.mxu1 %v5323_v44  ;;  %v5325_v16 = vpack.c.bf16 %v8173_v57, %v8165_v36  ;;  %v6198_v58 = vmul.f32 %v6041_v5, %v12641_v4 }
 0xabf   : > { %8178 = vrcp.f32 %v5994_v31  ;;  %6135 = vperm.xlu2 %7892, %v8175_v20   ;;  %5842 = vmatmul.bf16.gmra.mxu2 %v5324_v6  ;;  %v5825_v63 = vpop.f32.mrf.mxu2  ;;  %v8177_v2 = vpop.eup %8176 }
 0xac0   : > { %8180 = vpow2.f32 %v5260_v1  ;;  %5931 = vmatmul.bf16.gmra.mxu3 %v5325_v16  ;;  %v11997_v48 = vadd.f32 %v11835_v3, %v6198_v58  ;;  %v5826_v22 = vadd.f32 %v5825_v63, %v5737_v52 }
 0xac1   : > { %8182 = vpow2.f32 %v5262_v56 }
 0xac2   : > { %8184 = vpow2.f32 %v5250_v29  ;;  %v5914_v38 = vpop.f32.mrf.mxu3 }
 0xac3   : > { %8186 = vpow2.f32 %v5252_v62  ;;  %v11999_v4 = vadd.f32 %v5914_v38, %v5826_v22 }
 0xac4   : > { %8188 = vpow2.f32 %v5254_v13 }
 0xac5   : > { %v8179_v60 = vpop.eup %8178  ;;  %8190 = vpow2.f32 %v5256_v43  ;;  %vm5963_vm1 = vcmp.gt.f32.partialorder %v11999_v4, 0.0  ;;  %v6056_v7 = vpop.permute.xlu2 %6055 }
 0xac6   : > { %v8181_v27 = vpop.eup %8180  ;;  %8192 = vpow2.f32 %v5264_v53  ;;  %v5995_v46 = vsel %vm5963_vm1, %v11999_v4, 1.0  ;;  %6140 = vperm.xlu1 %7893, %v8179_v60   ;;  %v6201_v12 = vmul.f32 %v6056_v7, %v11851_v51 }
 0xac7   : > { %v8183_v36 = vpop.eup %8182  ;;  %8194 = vrcp.f32 %v5995_v46 }
 0xac8   : > { %v8185_v41 = vpop.eup %8184  ;;  %v12005_v9 = vadd.f32 %v11835_v3, %v6201_v12 }
 0xac9   : > { %v8187_v61 = vpop.eup %8186  ;;  %v5326_v54 = vpack.c.bf16 %v8177_v2, %v8185_v41 }
 0xaca   : > { %v8189_v50 = vpop.eup %8188  ;;  %v5327_v21 = vpack.c.bf16 %v8181_v27, %v8187_v61 }
 0xacb   : > { %v8191_v45 = vpop.eup %8190  ;;  %v5328_v55 = vpack.c.bf16 %v8183_v36, %v8189_v50 }
 0xacc   : > { %v8193_v19 = vpop.eup %8192 }
 0xacd   : > { %v8195_v0 = vpop.eup %8194  ;;  %5669 = vmatmul.bf16.gmra.mxu0 %v5326_v54  ;;  %v6066_v32 = vpop.permute.xlu2 %6065  ;;  %v5329_v1 = vpack.c.bf16 %v8193_v19, %v8191_v45 }
 0xace   : > { %6145 = vperm.xlu0 %7894, %v8195_v0   ;;  %5758 = vmatmul.bf16.gmra.mxu1 %v5327_v21  ;;  %v6203_v51 = vmul.f32 %v6066_v32, %v11866_v14 }
 0xacf   : > { %5847 = vmatmul.bf16.gmra.mxu2 %v5328_v55 }
 0xad0   : > { %5936 = vmatmul.bf16.gmra.mxu3 %v5329_v1  ;;  %v12009_v56 = vadd.f32 %v11835_v3, %v6203_v51 }
 0xad5   : > { %v6076_v47 = vpop.permute.xlu2 %6075 }
 0xad6   : > { %v6205_v26 = vmul.f32 %v6076_v47, %v11882_v23 }
 0xad8   : > { %v12013_v39 = vadd.f32 %v11835_v3, %v6205_v26 }
 0xadd   : > { %v6091_v44 = vpop.permute.xlu2 %6090 }
 0xade   : > { %v6208_v57 = vmul.f32 %v6091_v44, %v12669_v33 }
 0xae0   : > { %v12017_v59 = vadd.f32 %v11835_v3, %v6208_v57 }
 0xae5   : > { %v6106_v6 = vpop.permute.xlu2 %6105 }
 0xae6   : > { %v6211_v14 = vmul.f32 %v6106_v6, %v11921_v49  ;;  %v5650_v20 = vpop.f32.mrf.mxu0 }
 0xae8   : > { %v12021_v5 = vadd.f32 %v11835_v3, %v6211_v14  ;;  %v5739_v31 = vpop.f32.mrf.mxu1 }
 0xae9   : > { %v5740_v62 = vadd.f32 %v5739_v31, %v5650_v20 }
 0xaed   : > { %v6121_v29 = vpop.permute.xlu2 %6120 }
 0xaee   : > { %v6214_v23 = vmul.f32 %v6121_v29, %v12677_v11  ;;  %v5652_v33 = vpop.f32.mrf.mxu0 }
 0xaef   : > { %v5828_v16 = vpop.f32.mrf.mxu2 }
 0xaf0   : > { %v12025_v58 = vadd.f32 %v11835_v3, %v6214_v23  ;;  %v5741_v52 = vpop.f32.mrf.mxu1  ;;  %v5829_v13 = vadd.f32 %v5828_v16, %v5740_v62 }
 0xaf1   : > { %v5742_v49 = vadd.f32 %v5741_v52, %v5652_v33 }
 0xaf3   : > { %v5917_v43 = vpop.f32.mrf.mxu3 }
 0xaf4   : > { %v12027_v22 = vadd.f32 %v5917_v43, %v5829_v13 }
 0xaf6   : > { %vm5964_vm2 = vcmp.gt.f32.partialorder %v12027_v22, 0.0  ;;  %v5655_v2 = vpop.f32.mrf.mxu0 }
 0xaf7   : > { %v5830_v63 = vpop.f32.mrf.mxu2  ;;  %v5996_v53 = vsel %vm5964_vm2, %v12027_v22, 1.0 }
 0xaf8   : > { %8196 = vrcp.f32 %v5996_v53  ;;  %v5831_v38 = vadd.f32 %v5830_v63, %v5742_v49  ;;  %v5744_v11 = vpop.f32.mrf.mxu1 }
 0xaf9   : > { %v5745_v12 = vadd.f32 %v5744_v11, %v5655_v2 }
 0xafb   : > { %v5919_v60 = vpop.f32.mrf.mxu3 }
 0xafc   : > { %v12031_v27 = vadd.f32 %v5919_v60, %v5831_v38 }
 0xafe   : > { %v8197_v46 = vpop.eup %8196  ;;  %vm5965_vm3 = vcmp.gt.f32.partialorder %v12031_v27, 0.0  ;;  %v5657_v61 = vpop.f32.mrf.mxu0 }
 0xaff   : > { %v5833_v7 = vpop.f32.mrf.mxu2  ;;  %v5997_v36 = vsel %vm5965_vm3, %v12031_v27, 1.0  ;;  %6150 = vperm.xlu2 %7892, %v8197_v46  }
 0xb00   : > { %8198 = vrcp.f32 %v5997_v36  ;;  %v5834_v41 = vadd.f32 %v5833_v7, %v5745_v12  ;;  %v5746_v45 = vpop.f32.mrf.mxu1 }
 0xb01   : > { %v5747_v0 = vadd.f32 %v5746_v45, %v5657_v61 }
 0xb03   : > { %v5922_v50 = vpop.f32.mrf.mxu3 }
 0xb04   : > { %v12035_v54 = vadd.f32 %v5922_v50, %v5834_v41 }
 0xb06   : > { %v8199_v21 = vpop.eup %8198  ;;  %vm5966_vm4 = vcmp.gt.f32.partialorder %v12035_v54, 0.0 }
 0xb07   : > { %v5835_v19 = vpop.f32.mrf.mxu2  ;;  %v5998_v55 = vsel %vm5966_vm4, %v12035_v54, 1.0  ;;  %6155 = vperm.xlu1 %7893, %v8199_v21  }
 0xb08   : > { %8200 = vrcp.f32 %v5998_v55  ;;  %v5836_v32 = vadd.f32 %v5835_v19, %v5747_v0 }
 0xb0b   : > { %v5924_v1 = vpop.f32.mrf.mxu3 }
 0xb0c   : > { %v12039_v51 = vadd.f32 %v5924_v1, %v5836_v32 }
 0xb0e   : > { %v8201_v47 = vpop.eup %8200  ;;  %vm5967_vm5 = vcmp.gt.f32.partialorder %v12039_v51, 0.0 }
 0xb0f   : > { %v5999_v26 = vsel %vm5967_vm5, %v12039_v51, 1.0  ;;  %6160 = vperm.xlu0 %7894, %v8201_v47  }
 0xb10   : > { %8202 = vrcp.f32 %v5999_v26 }
 0xb16   : > { %v8203_v6 = vpop.eup %8202 }
 0xb17   : > { %6165 = vperm.xlu2 %7892, %v8203_v6  }
 0xb19   : > { %v6136_v44 = vpop.permute.xlu2 %6135 }
 0xb1a   : > { %v6217_v57 = vmul.f32 %v6136_v44, %v11975_v18 }
 0xb1c   : > { %v12045_v14 = vadd.f32 %v11835_v3, %v6217_v57 }
 0xb27   : > { %v6131_v20 = vpop.permute.xlu0 %6130 }
 0xb28   : > { %v6216_v31 = vmul.f32 %v6131_v20, %v11964_v37 }
 0xb2a   : > { %v5660_v29 = vpop.f32.mrf.mxu0  ;;  %v12049_v23 = vadd.f32 %v11835_v3, %v6216_v31 }
 0xb2b   : > { %v5749_v16 = vpop.f32.mrf.mxu1 }
 0xb2c   : > { %v5750_v62 = vadd.f32 %v5749_v16, %v5660_v29 }
 0xb32   : > { %v5838_v33 = vpop.f32.mrf.mxu2  ;;  %v5662_v52 = vpop.f32.mrf.mxu0 }
 0xb33   : > { %v5839_v13 = vadd.f32 %v5838_v33, %v5750_v62  ;;  %v5927_v63 = vpop.f32.mrf.mxu3  ;;  %v5751_v43 = vpop.f32.mrf.mxu1 }
 0xb34   : > { %v5752_v37 = vadd.f32 %v5751_v43, %v5662_v52 }
 0xb35   : > { %v12051_v18 = vadd.f32 %v5927_v63, %v5839_v13 }
 0xb37   : > { %vm5968_vm6 = vcmp.gt.f32.partialorder %v12051_v18, 0.0 }
 0xb38   : > { %v6000_v49 = vsel %vm5968_vm6, %v12051_v18, 1.0  ;;  %v6141_v53 = vpop.permute.xlu1 %6140 }
 0xb39   : > { %8204 = vrcp.f32 %v6000_v49  ;;  %v6218_v38 = vmul.f32 %v6141_v53, %v11988_v42 }
 0xb3a   : > { %v5840_v2 = vpop.f32.mrf.mxu2  ;;  %v5665_v11 = vpop.f32.mrf.mxu0 }
 0xb3b   : > { %v12057_v60 = vadd.f32 %v11835_v3, %v6218_v38  ;;  %v5841_v7 = vadd.f32 %v5840_v2, %v5752_v37  ;;  %v5929_v46 = vpop.f32.mrf.mxu3  ;;  %v5754_v12 = vpop.f32.mrf.mxu1 }
 0xb3c   : > { %v5755_v45 = vadd.f32 %v5754_v12, %v5665_v11 }
 0xb3d   : > { %v12059_v36 = vadd.f32 %v5929_v46, %v5841_v7 }
 0xb3f   : > { %v8205_v41 = vpop.eup %8204  ;;  %vm5969_vm7 = vcmp.gt.f32.partialorder %v12059_v36, 0.0 }
 0xb40   : > { %v6001_v61 = vsel %vm5969_vm7, %v12059_v36, 1.0  ;;  %6170 = vperm.xlu1 %7893, %v8205_v41   ;;  %v6146_v50 = vpop.permute.xlu0 %6145 }
 0xb41   : > { %8206 = vrcp.f32 %v6001_v61  ;;  %v6219_v42 = vmul.f32 %v6146_v50, %v11999_v4 }
 0xb42   : > { %v5843_v19 = vpop.f32.mrf.mxu2  ;;  %v5667_v21 = vpop.f32.mrf.mxu0 }
 0xb43   : > { %v12065_v0 = vadd.f32 %v11835_v3, %v6219_v42  ;;  %v5844_v55 = vadd.f32 %v5843_v19, %v5755_v45  ;;  %v5932_v32 = vpop.f32.mrf.mxu3  ;;  %v5756_v1 = vpop.f32.mrf.mxu1 }
 0xb44   : > { %v5757_v57 = vadd.f32 %v5756_v1, %v5667_v21 }
 0xb45   : > { %v5933_v47 = vadd.f32 %v5932_v32, %v5844_v55 }
 0xb47   : > { %v8207_v26 = vpop.eup %8206  ;;  %vm5970_vm8 = vcmp.gt.f32.partialorder %v5933_v47, 0.0 }
 0xb48   : > { %v6002_v44 = vsel %vm5970_vm8, %v5933_v47, 1.0  ;;  %6175 = vperm.xlu0 %7894, %v8207_v26  }
 0xb49   : > { %8208 = vrcp.f32 %v6002_v44 }
 0xb4a   : > { %v5845_v6 = vpop.f32.mrf.mxu2  ;;  %v5670_v29 = vpop.f32.mrf.mxu0 }
 0xb4b   : > { %v5846_v20 = vadd.f32 %v5845_v6, %v5757_v57  ;;  %v5934_v31 = vpop.f32.mrf.mxu3  ;;  %v5759_v4 = vpop.f32.mrf.mxu1 }
 0xb4c   : > { %v5760_v52 = vadd.f32 %v5759_v4, %v5670_v29  ;;  %v8216_v4 = vld [vmem:[%s8702_s11] ss:$0 sm:$0xff] }
 0xb4d   : > { %v5935_v16 = vadd.f32 %v5934_v31, %v5846_v20 }
 0xb4f   : > { %v8209_v62 = vpop.eup %8208  ;;  %vm5971_vm9 = vcmp.gt.f32.partialorder %v5935_v16, 0.0 }
 0xb50   : > { %v6003_v33 = vsel %vm5971_vm9, %v5935_v16, 1.0  ;;  %6180 = vperm.xlu2 %7892, %v8209_v62  }
 0xb51   : > { %8210 = vrcp.f32 %v6003_v33 }
 0xb52   : > { %v5848_v13 = vpop.f32.mrf.mxu2  ;;  %v5672_v53 = vpop.f32.mrf.mxu0 }
 0xb53   : > { %v5849_v63 = vadd.f32 %v5848_v13, %v5760_v52  ;;  %v5937_v43 = vpop.f32.mrf.mxu3  ;;  %v5761_v37 = vpop.f32.mrf.mxu1 }
 0xb54   : > { %v5762_v11 = vadd.f32 %v5761_v37, %v5672_v53 }
 0xb55   : > { %v5938_v49 = vadd.f32 %v5937_v43, %v5849_v63 }
 0xb57   : > { %v8211_v38 = vpop.eup %8210  ;;  %vm5972_vm10 = vcmp.gt.f32.partialorder %v5938_v49, 0.0 }
 0xb58   : > { %v6004_v2 = vsel %vm5972_vm10, %v5938_v49, 1.0  ;;  %6185 = vperm.xlu1 %7893, %v8211_v38  }
 0xb59   : > { %8212 = vrcp.f32 %v6004_v2  ;;  %v6151_v61 = vpop.permute.xlu2 %6150 }
 0xb5a   : > { %v5850_v7 = vpop.f32.mrf.mxu2  ;;  %v6220_v45 = vmul.f32 %v6151_v61, %v12027_v22 }
 0xb5b   : > { %v5851_v46 = vadd.f32 %v5850_v7, %v5762_v11  ;;  %v5939_v12 = vpop.f32.mrf.mxu3 }
 0xb5c   : > { %v12069_v19 = vadd.f32 %v11835_v3, %v6220_v45 }
 0xb5d   : > { %v5940_v41 = vadd.f32 %v5939_v12, %v5851_v46 }
 0xb5f   : > { %v8213_v50 = vpop.eup %8212  ;;  %vm5973_vm11 = vcmp.gt.f32.partialorder %v5940_v41, 0.0 }
 0xb60   : > { %v6005_v42 = vsel %vm5973_vm11, %v5940_v41, 1.0  ;;  %6190 = vperm.xlu0 %7894, %v8213_v50  }
 0xb61   : > { %8214 = vrcp.f32 %v6005_v42 }
 0xb67   : > { %v8215_v21 = vpop.eup %8214 }
 0xb68   : > { %6195 = vperm.xlu2 %7892, %v8215_v21  }
 0xb71   : > { %v6166_v55 = vpop.permute.xlu2 %6165 }
 0xb72   : > { %v6223_v32 = vmul.f32 %v6166_v55, %v12039_v51 }
 0xb74   : > { %v12073_v1 = vadd.f32 %v11835_v3, %v6223_v32 }
 0xb79   : > { %v6156_v26 = vpop.permute.xlu1 %6155 }
 0xb7a   : > { %v6221_v44 = vmul.f32 %v6156_v26, %v12031_v27 }
 0xb7c   : > { %v12077_v22 = vadd.f32 %v11835_v3, %v6221_v44 }
 0xb81   : > { %v6161_v57 = vpop.permute.xlu0 %6160 }
 0xb82   : > { %v6222_v6 = vmul.f32 %v6161_v57, %v12035_v54 }
 0xb84   : > { %v12081_v20 = vadd.f32 %v11835_v3, %v6222_v6 }
 0xbaa   : > { %v6181_v31 = vpop.permute.xlu2 %6180 }
 0xbab   : > { %v6226_v29 = vmul.f32 %v6181_v31, %v5933_v47 }
 0xbad   : > { %v12084_v62 = vadd.f32 %v8216_v4, %v6226_v29 }
 0xbb2   : > { %v6171_v51 = vpop.permute.xlu1 %6170 }
 0xbb3   : > { %v6224_v33 = vmul.f32 %v6171_v51, %v12051_v18 }
 0xbb5   : > { %v12087_v52 = vadd.f32 %v8216_v4, %v6224_v33 }
 0xbba   : > { %v6176_v27 = vpop.permute.xlu0 %6175 }
 0xbbb   : > { %v6225_v13 = vmul.f32 %v6176_v27, %v12059_v36 }
 0xbbd   : > { %v12090_v63 = vadd.f32 %v8216_v4, %v6225_v13 }
 0xbc2   : > { %v6196_v43 = vpop.permute.xlu2 %6195 }
 0xbc3   : > { %v6229_v54 = vmul.f32 %v6196_v43, %v5940_v41 }
 0xbc5   : > { %v12092_v53 = vadd.f32 %v8216_v4, %v6229_v54 }
 0xbca   : > { %v6186_v3 = vpop.permute.xlu1 %6185 }
 0xbcb   : > { %v6227_v37 = vmul.f32 %v6186_v3, %v5935_v16 }
 0xbcd   : > { %v12094_v47 = vadd.f32 %v8216_v4, %v6227_v37 }
 0xbd1   : > { %6268 = sbr.rel (%p7093_p5) target bundleno = 3050 (0xbea), region = 68 }
 0xbd2   : > { %v6191_v38 = vpop.permute.xlu0 %6190 }
 0xbd3   : > { %v6228_v2 = vmul.f32 %v6191_v38, %v5938_v49 }
 0xbd5   : > { %v12096_v11 = vadd.f32 %v8216_v4, %v6228_v2 }
 0xbd6   : > { %v6269_v18 = vmax.f32 %v11997_v48, 0.0  ;;  %v6270_v36 = vmax.f32 %v11839_v35, 0.0  ;;  %v6271_v7 = vmax.f32 %v11927_v28, 0.0  ;;  %v6272_v46 = vmax.f32 %v12005_v9, 0.0 }
 0xbd7   : > { %v6273_v16 = vmax.f32 %v11847_v34, 0.0  ;;  %v6274_v49 = vmax.f32 %v12009_v56, 0.0  ;;  %v6275_v12 = vmax.f32 %v11862_v24, 0.0  ;;  %v6276_v41 = vmax.f32 %v12013_v39, 0.0 }
 0xbd8   : > { %v7555_v61 = vpack.c.bf16 %v6270_v36, %v6269_v18  ;;  %v7560_v50 = vpack.c.bf16 %v6272_v46, %v6271_v7  ;;  %v6277_v45 = vmax.f32 %v11878_v17, 0.0  ;;  %v6278_v42 = vmax.f32 %v11935_v40, 0.0 }
 0xbd9   : > { %v7565_v21 = vpack.c.bf16 %v6274_v49, %v6273_v16  ;;  %v7570_v55 = vpack.c.bf16 %v6276_v41, %v6275_v12  ;;  %v6279_v32 = vmax.f32 %v12017_v59, 0.0  ;;  %v6280_v26 = vmax.f32 %v11905_v10, 0.0 }
 0xbda   : > { %7556 = vst [vmem:[%s12112_s13] sm:$0xff] %v7555_v61   ;;  %v7575_v44 = vpack.c.bf16 %v6278_v42, %v6277_v45  ;;  %v6281_v57 = vmax.f32 %v11941_v30, 0.0  ;;  %v6282_v6 = vmax.f32 %v12021_v5, 0.0  ;;  %v6283_v31 = vmax.f32 %v11917_v15, 0.0 }
 0xbdb   : > { %7694 = vst [vmem:[%s12112_s13 + $0x8] sm:$0xff] %v7560_v50   ;;  %v7580_v29 = vpack.c.bf16 %v6280_v26, %v6279_v32  ;;  %v6284_v4 = vmax.f32 %v11945_v8, 0.0  ;;  %v6285_v51 = vmax.f32 %v12025_v58, 0.0  ;;  %v6286_v33 = vmax.f32 %v11954_v25, 0.0 }
 0xbdc   : > { %7695 = vst [vmem:[%s12112_s13 + $0x10] sm:$0xff] %v7565_v21   ;;  %v7585_v27 = vpack.c.bf16 %v6282_v6, %v6281_v57  ;;  %v6287_v13 = vmax.f32 %v12049_v23, 0.0  ;;  %v6288_v43 = vmax.f32 %v12045_v14, 0.0  ;;  %v6289_v54 = vmax.f32 %v12057_v60, 0.0 }
 0xbdd   : > { %7696 = vst [vmem:[%s12112_s13 + $0x18] sm:$0xff] %v7570_v55   ;;  %v7590_v3 = vpack.c.bf16 %v6284_v4, %v6283_v31  ;;  %v6290_v37 = vmax.f32 %v12065_v0, 0.0  ;;  %v6291_v38 = vmax.f32 %v12069_v19, 0.0  ;;  %v7595_v2 = vpack.c.bf16 %v6286_v33, %v6285_v51 }
 0xbde   : > { %7697 = vst [vmem:[%s12112_s13 + $0x20] sm:$0xff] %v7575_v44   ;;  %v6292_v18 = vmax.f32 %v12077_v22, 0.0  ;;  %v6293_v36 = vmax.f32 %v12081_v20, 0.0  ;;  %v6294_v7 = vmax.f32 %v12073_v1, 0.0  ;;  %v7600_v46 = vpack.c.bf16 %v6288_v43, %v6287_v13 }
 0xbdf   : > { %7698 = vst [vmem:[%s12112_s13 + $0x28] sm:$0xff] %v7580_v29   ;;  %v6295_v16 = vmax.f32 %v12087_v52, 0.0  ;;  %v6296_v49 = vmax.f32 %v12090_v63, 0.0  ;;  %v7605_v12 = vpack.c.bf16 %v6290_v37, %v6289_v54  ;;  %v6297_v41 = vmax.f32 %v12084_v62, 0.0 }
 0xbe0   : > { %7699 = vst [vmem:[%s12112_s13 + $0x30] sm:$0xff] %v7585_v27   ;;  %v6298_v61 = vmax.f32 %v12094_v47, 0.0  ;;  %v7610_v50 = vpack.c.bf16 %v6292_v18, %v6291_v38  ;;  %v6299_v45 = vmax.f32 %v12096_v11, 0.0  ;;  %v6300_v42 = vmax.f32 %v12092_v53, 0.0 }
 0xbe1   : > { %7700 = vst [vmem:[%s12112_s13 + $0x38] sm:$0xff] %v7590_v3   ;;  %v7615_v21 = vpack.c.bf16 %v6294_v7, %v6293_v36  ;;  %v7620_v55 = vpack.c.bf16 %v6296_v49, %v6295_v16 }
 0xbe2   : > { %7701 = vst [vmem:[%s12112_s13 + $0x40] sm:$0xff] %v7595_v2   ;;  %v7625_v32 = vpack.c.bf16 %v6298_v61, %v6297_v41  ;;  %v7630_v26 = vpack.c.bf16 %v6300_v42, %v6299_v45 }
 0xbe3   : > { %7702 = vst [vmem:[%s12112_s13 + $0x48] sm:$0xff] %v7600_v46  }
 0xbe4   : > { %7703 = vst [vmem:[%s12112_s13 + $0x50] sm:$0xff] %v7605_v12  }
 0xbe5   : > { %7704 = vst [vmem:[%s12112_s13 + $0x58] sm:$0xff] %v7610_v50  }
 0xbe6   : > { %7705 = vst [vmem:[%s12112_s13 + $0x60] sm:$0xff] %v7615_v21  }
 0xbe7   : > { %7706 = vst [vmem:[%s12112_s13 + $0x68] sm:$0xff] %v7620_v55  }
 0xbe8   : > { %7707 = vst [vmem:[%s12112_s13 + $0x70] sm:$0xff] %v7625_v32  }
 0xbe9   : > { %7708 = vst [vmem:[%s12112_s13 + $0x78] sm:$0xff] %v7630_v26  }
 0xbea PF: > { %s12689_s10 = sld [smem:[#allocation22_spill]] }
 0xbf0   : > { %p7095_p6 = scmp.ne.s32.totalorder %s12689_s10, 1 }
 0xbf2   : > { %6371 = sbr.rel (%p7095_p6) target bundleno = 3095 (0xc17), region = 72 }
 0xbf7   : > { %6372 = vst [vmem:[%s8706_s12] sm:$0xff] %v11997_v48 }
 0xbf8   : > { %6373 = vst [vmem:[%s8706_s12 + $0x8] sm:$0xff] %v11839_v35 }
 0xbf9   : > { %6374 = vst [vmem:[%s8706_s12 + $0x10] sm:$0xff] %v11927_v28 }
 0xbfa   : > { %6375 = vst [vmem:[%s8706_s12 + $0x18] sm:$0xff] %v12005_v9 }
 0xbfb   : > { %6376 = vst [vmem:[%s8706_s12 + $0x20] sm:$0xff] %v11847_v34 }
 0xbfc   : > { %6377 = vst [vmem:[%s8706_s12 + $0x28] sm:$0xff] %v12009_v56 }
 0xbfd   : > { %6378 = vst [vmem:[%s8706_s12 + $0x30] sm:$0xff] %v11862_v24 }
 0xbfe   : > { %6379 = vst [vmem:[%s8706_s12 + $0x38] sm:$0xff] %v12013_v39 }
 0xbff   : > { %6380 = vst [vmem:[%s8706_s12 + $0x40] sm:$0xff] %v11878_v17 }
 0xc00   : > { %6381 = vst [vmem:[%s8706_s12 + $0x48] sm:$0xff] %v11935_v40 }
 0xc01   : > { %6382 = vst [vmem:[%s8706_s12 + $0x50] sm:$0xff] %v12017_v59 }
 0xc02   : > { %6383 = vst [vmem:[%s8706_s12 + $0x58] sm:$0xff] %v11905_v10 }
 0xc03   : > { %6384 = vst [vmem:[%s8706_s12 + $0x60] sm:$0xff] %v11941_v30 }
 0xc04   : > { %6385 = vst [vmem:[%s8706_s12 + $0x68] sm:$0xff] %v12021_v5 }
 0xc05   : > { %6386 = vst [vmem:[%s8706_s12 + $0x70] sm:$0xff] %v11917_v15 }
 0xc06   : > { %6387 = vst [vmem:[%s8706_s12 + $0x78] sm:$0xff] %v11945_v8 }
 0xc07   : > { %6388 = vst [vmem:[%s8706_s12 + $0x80] sm:$0xff] %v12025_v58 }
 0xc08   : > { %6389 = vst [vmem:[%s8706_s12 + $0x88] sm:$0xff] %v11954_v25 }
 0xc09   : > { %6390 = vst [vmem:[%s8706_s12 + $0x90] sm:$0xff] %v12049_v23 }
 0xc0a   : > { %6391 = vst [vmem:[%s8706_s12 + $0x98] sm:$0xff] %v12045_v14 }
 0xc0b   : > { %6392 = vst [vmem:[%s8706_s12 + $0xa0] sm:$0xff] %v12057_v60 }
 0xc0c   : > { %6393 = vst [vmem:[%s8706_s12 + $0xa8] sm:$0xff] %v12065_v0 }
 0xc0d   : > { %6394 = vst [vmem:[%s8706_s12 + $0xb0] sm:$0xff] %v12069_v19 }
 0xc0e   : > { %6395 = vst [vmem:[%s8706_s12 + $0xb8] sm:$0xff] %v12077_v22 }
 0xc0f   : > { %6396 = vst [vmem:[%s8706_s12 + $0xc0] sm:$0xff] %v12081_v20 }
 0xc10   : > { %6397 = vst [vmem:[%s8706_s12 + $0xc8] sm:$0xff] %v12073_v1 }
 0xc11   : > { %6398 = vst [vmem:[%s8706_s12 + $0xd0] sm:$0xff] %v12087_v52 }
 0xc12   : > { %6399 = vst [vmem:[%s8706_s12 + $0xd8] sm:$0xff] %v12090_v63 }
 0xc13   : > { %6400 = vst [vmem:[%s8706_s12 + $0xe0] sm:$0xff] %v12084_v62 }
 0xc14   : > { %6401 = vst [vmem:[%s8706_s12 + $0xe8] sm:$0xff] %v12094_v47 }
 0xc15   : > { %6402 = vst [vmem:[%s8706_s12 + $0xf0] sm:$0xff] %v12096_v11 }
 0xc16   : > { %6403 = vst [vmem:[%s8706_s12 + $0xf8] sm:$0xff] %v12092_v53 }
 0xc17 PF: > { %s12690_s17 = sld [smem:[#allocation22_spill]]  ;;  %s6418_s24 = sshll.u32 %s8706_s12, 4  ;;  %s6419_s24 = int_to_ptr.vmem [resolvable:$true] %s6418_s24 }
 0xc18   : > { %s12691_s26 = sld [smem:[#allocation21_spill]]  ;;  %s6405_s5 = scalar_lea.sflag [#allocation8], %s334_s19 }
 0xc19   : > { %s12694_s14 = sld [smem:[#allocation92_spill]] }
 0xc1e   : > { %s6412_s29 = smul.u32 %s12691_s26, %s12690_s17 }
 0xc1f   : > { %s8357_s12 = scalar_lea.hbm %s12694_s14, 512 }
 0xc20   : > { %s7231_s4 = sshll.u32 %s6412_s29, 8 }
 0xc21   : > { %s6417_s21 = scalar_lea.hbm %s12694_s14, %s7231_s4 }
 0xc22   : > { %s6420_s6 = sshll.u32 %s6417_s21, 4  ;;  %s6421_s6 = int_to_ptr.hbm [resolvable:$true] %s6420_s6 }
 0xc23   : > { %s8351_s15 = sshra.s32 %s6421_s6, 4  ;;  %s8352_s15 = int_to_ptr.hbm [resolvable:$true] %s8351_s15 }
 0xc24   : > { %s8353_s2 = scalar_lea.hbm %s8352_s15, 256  ;;  %p8358_p0 = scmp.lt.s32.totalorder %s8352_s15, %s12694_s14 }
 0xc25   : > { %p8354_p8 = scmp.ne.s32.totalorder %s8352_s15, %s8353_s2  ;;  %p8359_p1 = scmp.lt.s32.totalorder %s8357_s12, %s8353_s2 }
 0xc27   : > { %p8355_p10 = pnand %p8354_p8, %p8584_p7  ;;  %p8360_p11 = por %p8359_p1, %p8358_p0 }
 0xc29   : > { %p8356_p12 = pneg %p8355_p10 }
 0xc2b   : > { %p8361_p13 = pnand %p8360_p11, %p8356_p12 }
 0xc2d   : > { %8364 = shalt.err (!%p8361_p13)
}
 0xc2e   : > { %s8481_s19 = smov 128   ;;  %s8482_s13 = smov 8  }
 0xc2f   : > { %7753 = dma.vmem_to_hbm [thread:$0]  (%p8584_p7), %s6419_s24, 4096, %s6421_s6, %s6405_s5, %s8481_s19, %s8481_s19, %s8482_s13  }
 0xc30 PF: > { %s12695_s10 = sld [smem:[#allocation18_spill]]  ;;  %p7778_p2 = scmp.ge.s32.totalorder %s8467_s28, 2 }
 0xc32   : > { %p7770_p3 = pnand %p7778_p2, %p8589_p9 }
 0xc34   : > { %p7771_p4 = pneg %p7770_p3 }
 0xc36   : > { %s6435_s26 = sand.u32 1, %s12695_s10  }
 0xc37   : > { %s6436_s0 = scalar_lea.sflag [#allocation8], %s6435_s26 }
 0xc38   : > { %8422 = dma.done.wait (%p7771_p4), %s6436_s0, 4096  }
 0xc39   : > { %8424 = vsyncadd (%p7771_p4), %s6436_s0, 4294963200  ;;  %s20_s28 = sadd.s32 1, %s8467_s28   ;;  %s12697_s18 = sld [smem:[#allocation19_spill]] }
 0xc3a   : > { %p17_p5 = scmp.ge.s32.totalorder %s20_s28, 6   ;;  %s12698_s21 = sld [smem:[#allocation20_spill]] }
 0xc3b   : > { %s12699_s24 = sld [smem:[#allocation23_spill]]  ;;  %s12701_s19 = smov %s8435_s20 }
 0xc3c   : > { %s12700_s29 = sld [smem:[#allocation27_spill]]  ;;  %s12702_s20 = smov %s8647_s7 }
 0xc3d   : > { %s12703_s22 = smov %s8447_s23  ;;  %s12704_s23 = smov %s8638_s9 }
 0xc3e   : > { %s12705_s25 = smov %s8463_s27  ;;  %s12706_s26 = smov %s12709_s30 }
 0xc3f   :  { %19 = sbr.rel (!%p17_p5) target bundleno = 15 (0xf), region = 125 }
 0xc42   : > { %s12707_s27 = smov %s12700_s29 }
 0xc44   :  { %6442 = vsyncpa [#allocation7], 1 }
 0xc45   :  { %6444 = vsyncpa [#allocation7 + $0x1], 1 }
 0xc46   :  { %6445 = vsyncpa [#allocation10], 1 }
 0xc47   :  { %6446 = vsyncpa [#allocation8], 1 }
 0xc48   :  { %6448 = vsyncpa [#allocation8 + $0x1], 1 }

</bundles_post_ra>
